<compile_context>
chip_gen: v5e
topology: v5e:2x2
jax: 0.10.0
libtpu: 0.0.40
codegen_flags: <defaults>
</compile_context>

<pallas_src>
import jax
import jax.numpy as jnp
from jax.experimental import pallas as pl
from jax.experimental.pallas import tpu as pltpu


# ----------------------------------------------------------------------------
# In-kernel building blocks (pure functions on VMEM/vreg-resident values).
# ----------------------------------------------------------------------------
def _conv3x3_bias_relu(x, w9, b, *, relu=True):
    """3x3 conv (stride 1, zero pad 1) + folded-BN bias (+ ReLU).

    x  : (H, W, Cin)    f32 activation value (already bf16-rounded)
    w9 : (9, Cin, Cout) bf16 weights with BN scale folded in, tap k = dy*3 + dx
    b  : (1, Cout)      f32 folded BN bias
    returns (H*W, Cout) f32
    """
    H, W, Cin = x.shape

    # Zero padding assembled via explicit concats (no 0*x masking -> Inf/NaN safe).
    zrow = jnp.zeros((1, W, Cin), x.dtype)
    zcol = jnp.zeros((H + 2, 1, Cin), x.dtype)
    xp = jnp.concatenate([zrow, x, zrow], axis=0)          # (H+2, W,   Cin)
    xp = jnp.concatenate([zcol, xp, zcol], axis=1)         # (H+2, W+2, Cin)

    # 9 shifted-tap matmuls: bf16 MXU inputs, f32 accumulation.
    # TODO(synk): fold the 9 taps into one (H*W, 9*Cin) im2col matmul and slice
    # the halo directly in bf16 once unaligned packed-dtype sublane slicing /
    # minor-dim concat lowering is confirmed on all target chips.
    acc = None
    for dy in range(3):
        for dx in range(3):
            lhs = xp[dy:dy + H, dx:dx + W, :].reshape(H * W, Cin)
            d = jnp.dot(lhs.astype(jnp.bfloat16), w9[dy * 3 + dx],
                        preferred_element_type=jnp.float32)
            acc = d if acc is None else acc + d

    out = acc + b                                          # folded BN bias
    if relu:
        out = jnp.maximum(out, 0.0)
    return out


def _maxpool3x3s2(x):
    """MaxPool2d(kernel=3, stride=2, padding=1) on an (H, W, C) f32 value (H, W even)."""
    H, W, C = x.shape
    Ho, Wo = H // 2, W // 2
    neg = jnp.float32(-jnp.inf)

    # pool along H: rows {2p-1, 2p, 2p+1} (-inf at the p=0 boundary)
    xr = x.reshape(Ho, 2, W, C)
    x_even = xr[:, 0]
    x_odd = xr[:, 1]
    x_prev = jnp.concatenate(
        [jnp.full((1, W, C), neg, x.dtype), x_odd[:Ho - 1]], axis=0)
    rowmax = jnp.maximum(jnp.maximum(x_even, x_odd), x_prev)        # (Ho, W, C)

    # pool along W: cols {2q-1, 2q, 2q+1}
    rr = rowmax.reshape(Ho, Wo, 2, C)
    c_even = rr[:, :, 0, :]
    c_odd = rr[:, :, 1, :]
    c_prev = jnp.concatenate(
        [jnp.full((Ho, 1, C), neg, x.dtype), c_odd[:, :Wo - 1, :]], axis=1)
    return jnp.maximum(jnp.maximum(c_even, c_odd), c_prev)          # (Ho, Wo, C)


def _round_bf16(x):
    """Round an f32 value to bf16 precision (inter-layer activation policy)."""
    return x.astype(jnp.bfloat16).astype(jnp.float32)


# ----------------------------------------------------------------------------
# Fused SPS stem kernel: whole stem for one batch image per grid step.
# ----------------------------------------------------------------------------
def _sps_kernel(x_ref, w0, b0, w1, b1, w2, b2, w3, b3, w4, b4, o_ref):
    H, W, _ = x_ref.shape
    H2, W2, H4, W4 = H // 2, W // 2, H // 4, W // 4

    def conv(a, w_ref, b_ref, relu=True):
        return _conv3x3_bias_relu(a, w_ref[...], b_ref[...], relu=relu)

    x = x_ref[...].astype(jnp.float32)                     # (H, W, Cin)

    # proj_conv + proj_bn + (repeat over T commutes with) ReLU; conv1; conv2.
    a = _round_bf16(conv(x, w0, b0)).reshape(H, W, -1)
    a = _round_bf16(conv(a, w1, b1)).reshape(H, W, -1)
    a = _round_bf16(conv(a, w2, b2)).reshape(H, W, -1)
    a = _maxpool3x3s2(a)                                   # (H/2, W/2, C2)
    a = _round_bf16(conv(a, w3, b3)).reshape(H2, W2, -1)
    a = _maxpool3x3s2(a)                                   # (H/4, W/4, E)
    feat = a                                               # x_feat (residual)

    # rpe_conv + rpe_bn + ReLU, THEN residual add (matches PyTorch order).
    y = conv(feat, w4, b4, relu=True)                      # (H4*W4, E) f32
    y = y + feat.reshape(H4 * W4, -1)
    o_ref[...] = y.astype(o_ref.dtype)


def sps_forward(x_nchw, params, T):
    """SPS forward. x_nchw: (B, Cin, H, W) like PyTorch. Returns (T, B, H/4*W/4, E) bf16."""
    x = jnp.transpose(x_nchw, (0, 2, 3, 1)).astype(jnp.bfloat16)   # NHWC, bf16
    N, H, W, Cin = x.shape
    assert H % 4 == 0 and W % 4 == 0, "SPS /4 path needs H, W divisible by 4"
    E = params[4]["w"].shape[-1]
    Hq, Wq = H // 4, W // 4

    args = [x]
    in_specs = [pl.BlockSpec((None, H, W, Cin), lambda n: (n, 0, 0, 0))]
    for p in params:
        args += [p["w"], p["b"]]
        in_specs += [pl.BlockSpec(p["w"].shape, lambda n: (0, 0, 0)),
                     pl.BlockSpec(p["b"].shape, lambda n: (0, 0))]

    out = pl.pallas_call(
        _sps_kernel,
        out_shape=jax.ShapeDtypeStruct((N, Hq * Wq, E), jnp.bfloat16),
        grid=(N,),
        in_specs=in_specs,
        out_specs=pl.BlockSpec((None, Hq * Wq, E), lambda n: (n, 0, 0)),
        compiler_params=pltpu.CompilerParams(
            dimension_semantics=("parallel",)),
    )(*args)

    # flatten(-2).transpose(-1,-2) in NCHW == reshape(B, H*W, C) in NHWC.
    # The T copies are bit-identical -> broadcast instead of materializing writes.
    return jnp.broadcast_to(out[None], (T,) + out.shape)


# ----------------------------------------------------------------------------
# Parameters (deterministic, synthetic) with inference-form BN folded in.
# ----------------------------------------------------------------------------
def make_params(key, in_channels, embed_dims):
    dims = [in_channels, embed_dims // 8, embed_dims // 4,
            embed_dims // 2, embed_dims, embed_dims]
    eps = 1e-5
    params = []
    for li in range(5):
        cin, cout = dims[li], dims[li + 1]
        key, kw, kg, kb, km, kv = jax.random.split(key, 6)
        w = jax.random.normal(kw, (3, 3, cin, cout), jnp.float32) / jnp.sqrt(9.0 * cin)
        gamma = 1.0 + 0.1 * jax.random.normal(kg, (cout,), jnp.float32)
        beta = 0.1 * jax.random.normal(kb, (cout,), jnp.float32)
        mean = 0.1 * jax.random.normal(km, (cout,), jnp.float32)
        var = 1.0 + 0.1 * jax.random.uniform(kv, (cout,), jnp.float32)
        scale = gamma / jnp.sqrt(var + eps)
        bias = beta - mean * scale
        # Fold BN scale into the conv weights (then bf16); keep bias for the epilogue.
        w_folded = (w * scale).reshape(9, cin, cout).astype(jnp.bfloat16)
        params.append({"w": w_folded, "b": bias.reshape(1, cout).astype(jnp.float32)})
    return params


# ----------------------------------------------------------------------------
# Pure-JAX reference with the same precision policy (bf16 MXU, f32 epilogue).
# ----------------------------------------------------------------------------
def ref_forward(x_nchw, params, T):
    x = jnp.transpose(x_nchw, (0, 2, 3, 1)).astype(jnp.bfloat16)

    def conv(x, p, relu=True):
        cin, cout = p["w"].shape[1], p["w"].shape[2]
        w = p["w"].reshape(3, 3, cin, cout)                 # HWIO, bf16, BN-folded
        y = jax.lax.conv_general_dilated(
            x, w, (1, 1), "SAME", dimension_numbers=("NHWC", "HWIO", "NHWC"),
            preferred_element_type=jnp.float32)
        y = y + p["b"].reshape(1, 1, 1, cout)
        if relu:
            y = jnp.maximum(y, 0.0)
        return y                                            # f32

    def pool(x):
        return jax.lax.reduce_window(
            x, jnp.array(-jnp.inf, x.dtype), jax.lax.max,
            (1, 3, 3, 1), (1, 2, 2, 1), ((0, 0), (1, 1), (1, 1), (0, 0)))

    x = conv(x, params[0]).astype(jnp.bfloat16)
    x = conv(x, params[1]).astype(jnp.bfloat16)
    x = conv(x, params[2]).astype(jnp.bfloat16)
    x = pool(x)
    x = conv(x, params[3]).astype(jnp.bfloat16)
    x = pool(x)
    xf = x
    y = conv(x, params[4])                                  # f32, post-ReLU
    y = (y + xf.astype(jnp.float32)).astype(jnp.bfloat16)
    B, Hq, Wq, C = y.shape
    y = y.reshape(B, Hq * Wq, C)
    return jnp.broadcast_to(y[None], (T,) + y.shape)


if __name__ == "__main__":
    T, B, Cin, H, W, E = 2, 2, 3, 16, 16, 32
    key = jax.random.PRNGKey(0)
    kx, kp = jax.random.split(key)
    x = jax.random.normal(kx, (B, Cin, H, W), jnp.float32)   # NCHW like PyTorch
    params = make_params(kp, Cin, E)

    fwd = jax.jit(lambda inp: sps_forward(inp, params, T))
    out = jax.block_until_ready(fwd(x))

    assert out.shape == (T, B, (H // 4) * (W // 4), E), out.shape
    ref = ref_forward(x, params, T)
    o32 = out.astype(jnp.float32)
    r32 = ref.astype(jnp.float32)
    err = float(jnp.max(jnp.abs(o32 - r32)))
    assert jnp.allclose(o32, r32, rtol=2e-2, atol=2e-2), f"max abs err {err}"
    print("KERNEL_OK")
</pallas_src>

<mosaic_0001>
module attributes {stable_mosaic.version = 11 : i64} {
  func.func @_sps_kernel(%arg0: i32, %arg1: memref<1x16x16x3xbf16, #tpu.memory_space<vmem>>, %arg2: memref<9x3x4xbf16, #tpu.memory_space<vmem>>, %arg3: memref<1x4xf32, #tpu.memory_space<vmem>>, %arg4: memref<9x4x8xbf16, #tpu.memory_space<vmem>>, %arg5: memref<1x8xf32, #tpu.memory_space<vmem>>, %arg6: memref<9x8x16xbf16, #tpu.memory_space<vmem>>, %arg7: memref<1x16xf32, #tpu.memory_space<vmem>>, %arg8: memref<9x16x32xbf16, #tpu.memory_space<vmem>>, %arg9: memref<1x32xf32, #tpu.memory_space<vmem>>, %arg10: memref<9x32x32xbf16, #tpu.memory_space<vmem>>, %arg11: memref<1x32xf32, #tpu.memory_space<vmem>>, %arg12: memref<1x16x32xbf16, #tpu.memory_space<vmem>>) attributes {dimension_semantics = [#tpu.dimension_semantics<parallel>], iteration_bounds = array<i64: 2>, scalar_prefetch = 0 : i64, scratch_operands = 0 : i64, tpu.core_type = #tpu.core_type<tc>, window_params = [{transform_indices = @transform_0, window_bounds = array<i64: 1, 16, 16, 3>}, {pipeline_mode = #tpu.pipeline_mode<synchronous>, transform_indices = @transform_1, window_bounds = array<i64: 9, 3, 4>}, {pipeline_mode = #tpu.pipeline_mode<synchronous>, transform_indices = @transform_2, window_bounds = array<i64: 1, 4>}, {pipeline_mode = #tpu.pipeline_mode<synchronous>, transform_indices = @transform_3, window_bounds = array<i64: 9, 4, 8>}, {pipeline_mode = #tpu.pipeline_mode<synchronous>, transform_indices = @transform_4, window_bounds = array<i64: 1, 8>}, {pipeline_mode = #tpu.pipeline_mode<synchronous>, transform_indices = @transform_5, window_bounds = array<i64: 9, 8, 16>}, {pipeline_mode = #tpu.pipeline_mode<synchronous>, transform_indices = @transform_6, window_bounds = array<i64: 1, 16>}, {pipeline_mode = #tpu.pipeline_mode<synchronous>, transform_indices = @transform_7, window_bounds = array<i64: 9, 16, 32>}, {pipeline_mode = #tpu.pipeline_mode<synchronous>, transform_indices = @transform_8, window_bounds = array<i64: 1, 32>}, {pipeline_mode = #tpu.pipeline_mode<synchronous>, transform_indices = @transform_9, window_bounds = array<i64: 9, 32, 32>}, {pipeline_mode = #tpu.pipeline_mode<synchronous>, transform_indices = @transform_10, window_bounds = array<i64: 1, 32>}, {transform_indices = @transform_11, window_bounds = array<i64: 1, 16, 32>}]} {
    %c0 = arith.constant 0 : index
    %c0_0 = arith.constant 0 : index
    %c0_1 = arith.constant 0 : index
    %c0_2 = arith.constant 0 : index
    %0 = vector.load %arg1[%c0, %c0_0, %c0_1, %c0_2] : memref<1x16x16x3xbf16, #tpu.memory_space<vmem>>, vector<1x16x16x3xbf16>
    %1 = vector.shape_cast %0 : vector<1x16x16x3xbf16> to vector<16x16x3xbf16>
    %2 = arith.extf %1 : vector<16x16x3xbf16> to vector<16x16x3xf32>
    %c0_3 = arith.constant 0 : index
    %c0_4 = arith.constant 0 : index
    %c0_5 = arith.constant 0 : index
    %3 = vector.load %arg2[%c0_3, %c0_4, %c0_5] : memref<9x3x4xbf16, #tpu.memory_space<vmem>>, vector<9x3x4xbf16>
    %c0_6 = arith.constant 0 : index
    %c0_7 = arith.constant 0 : index
    %4 = vector.load %arg3[%c0_6, %c0_7] : memref<1x4xf32, #tpu.memory_space<vmem>>, vector<1x4xf32>
    %cst = arith.constant 0.000000e+00 : f32
    %5 = vector.broadcast %cst : f32 to vector<1x16x3xf32>
    %cst_8 = arith.constant 0.000000e+00 : f32
    %6 = vector.broadcast %cst_8 : f32 to vector<18x1x3xf32>
    %7 = tpu.concatenate %5, %2, %5 in 0 : vector<1x16x3xf32>, vector<16x16x3xf32>, vector<1x16x3xf32> -> vector<18x16x3xf32>
    %8 = tpu.concatenate %6, %7, %6 in 1 : vector<18x1x3xf32>, vector<18x16x3xf32>, vector<18x1x3xf32> -> vector<18x18x3xf32>
    %9 = vector.extract_strided_slice %8 {offsets = [0, 0, 0], sizes = [16, 16, 3], strides = [1, 1, 1]} : vector<18x18x3xf32> to vector<16x16x3xf32>
    %10 = vector.shape_cast %9 : vector<16x16x3xf32> to vector<256x3xf32>
    %11 = arith.truncf %10 : vector<256x3xf32> to vector<256x3xbf16>
    %12 = vector.extract_strided_slice %3 {offsets = [0, 0, 0], sizes = [1, 3, 4], strides = [1, 1, 1]} : vector<9x3x4xbf16> to vector<1x3x4xbf16>
    %13 = vector.shape_cast %12 : vector<1x3x4xbf16> to vector<3x4xbf16>
    %cst_9 = arith.constant dense<0.000000e+00> : vector<256x4xf32>
    %14 = tpu.matmul %11, %13, %cst_9 {dimension_numbers = #tpu.dot_dimension_numbers<[1], [0], [0], [1], [0, 0, 1, 1], [], []>} : vector<256x3xbf16>, vector<3x4xbf16>, vector<256x4xf32> -> vector<256x4xf32>
    %15 = vector.extract_strided_slice %8 {offsets = [0, 1, 0], sizes = [16, 16, 3], strides = [1, 1, 1]} : vector<18x18x3xf32> to vector<16x16x3xf32>
    %16 = vector.shape_cast %15 : vector<16x16x3xf32> to vector<256x3xf32>
    %17 = arith.truncf %16 : vector<256x3xf32> to vector<256x3xbf16>
    %18 = vector.extract_strided_slice %3 {offsets = [1, 0, 0], sizes = [1, 3, 4], strides = [1, 1, 1]} : vector<9x3x4xbf16> to vector<1x3x4xbf16>
    %19 = vector.shape_cast %18 : vector<1x3x4xbf16> to vector<3x4xbf16>
    %cst_10 = arith.constant dense<0.000000e+00> : vector<256x4xf32>
    %20 = tpu.matmul %17, %19, %cst_10 {dimension_numbers = #tpu.dot_dimension_numbers<[1], [0], [0], [1], [0, 0, 1, 1], [], []>} : vector<256x3xbf16>, vector<3x4xbf16>, vector<256x4xf32> -> vector<256x4xf32>
    %21 = arith.addf %14, %20 : vector<256x4xf32>
    %22 = vector.extract_strided_slice %8 {offsets = [0, 2, 0], sizes = [16, 16, 3], strides = [1, 1, 1]} : vector<18x18x3xf32> to vector<16x16x3xf32>
    %23 = vector.shape_cast %22 : vector<16x16x3xf32> to vector<256x3xf32>
    %24 = arith.truncf %23 : vector<256x3xf32> to vector<256x3xbf16>
    %25 = vector.extract_strided_slice %3 {offsets = [2, 0, 0], sizes = [1, 3, 4], strides = [1, 1, 1]} : vector<9x3x4xbf16> to vector<1x3x4xbf16>
    %26 = vector.shape_cast %25 : vector<1x3x4xbf16> to vector<3x4xbf16>
    %cst_11 = arith.constant dense<0.000000e+00> : vector<256x4xf32>
    %27 = tpu.matmul %24, %26, %cst_11 {dimension_numbers = #tpu.dot_dimension_numbers<[1], [0], [0], [1], [0, 0, 1, 1], [], []>} : vector<256x3xbf16>, vector<3x4xbf16>, vector<256x4xf32> -> vector<256x4xf32>
    %28 = arith.addf %21, %27 : vector<256x4xf32>
    %29 = vector.extract_strided_slice %8 {offsets = [1, 0, 0], sizes = [16, 16, 3], strides = [1, 1, 1]} : vector<18x18x3xf32> to vector<16x16x3xf32>
    %30 = vector.shape_cast %29 : vector<16x16x3xf32> to vector<256x3xf32>
    %31 = arith.truncf %30 : vector<256x3xf32> to vector<256x3xbf16>
    %32 = vector.extract_strided_slice %3 {offsets = [3, 0, 0], sizes = [1, 3, 4], strides = [1, 1, 1]} : vector<9x3x4xbf16> to vector<1x3x4xbf16>
    %33 = vector.shape_cast %32 : vector<1x3x4xbf16> to vector<3x4xbf16>
    %cst_12 = arith.constant dense<0.000000e+00> : vector<256x4xf32>
    %34 = tpu.matmul %31, %33, %cst_12 {dimension_numbers = #tpu.dot_dimension_numbers<[1], [0], [0], [1], [0, 0, 1, 1], [], []>} : vector<256x3xbf16>, vector<3x4xbf16>, vector<256x4xf32> -> vector<256x4xf32>
    %35 = arith.addf %28, %34 : vector<256x4xf32>
    %36 = vector.extract_strided_slice %8 {offsets = [1, 1, 0], sizes = [16, 16, 3], strides = [1, 1, 1]} : vector<18x18x3xf32> to vector<16x16x3xf32>
    %37 = vector.shape_cast %36 : vector<16x16x3xf32> to vector<256x3xf32>
    %38 = arith.truncf %37 : vector<256x3xf32> to vector<256x3xbf16>
    %39 = vector.extract_strided_slice %3 {offsets = [4, 0, 0], sizes = [1, 3, 4], strides = [1, 1, 1]} : vector<9x3x4xbf16> to vector<1x3x4xbf16>
    %40 = vector.shape_cast %39 : vector<1x3x4xbf16> to vector<3x4xbf16>
    %cst_13 = arith.constant dense<0.000000e+00> : vector<256x4xf32>
    %41 = tpu.matmul %38, %40, %cst_13 {dimension_numbers = #tpu.dot_dimension_numbers<[1], [0], [0], [1], [0, 0, 1, 1], [], []>} : vector<256x3xbf16>, vector<3x4xbf16>, vector<256x4xf32> -> vector<256x4xf32>
    %42 = arith.addf %35, %41 : vector<256x4xf32>
    %43 = vector.extract_strided_slice %8 {offsets = [1, 2, 0], sizes = [16, 16, 3], strides = [1, 1, 1]} : vector<18x18x3xf32> to vector<16x16x3xf32>
    %44 = vector.shape_cast %43 : vector<16x16x3xf32> to vector<256x3xf32>
    %45 = arith.truncf %44 : vector<256x3xf32> to vector<256x3xbf16>
    %46 = vector.extract_strided_slice %3 {offsets = [5, 0, 0], sizes = [1, 3, 4], strides = [1, 1, 1]} : vector<9x3x4xbf16> to vector<1x3x4xbf16>
    %47 = vector.shape_cast %46 : vector<1x3x4xbf16> to vector<3x4xbf16>
    %cst_14 = arith.constant dense<0.000000e+00> : vector<256x4xf32>
    %48 = tpu.matmul %45, %47, %cst_14 {dimension_numbers = #tpu.dot_dimension_numbers<[1], [0], [0], [1], [0, 0, 1, 1], [], []>} : vector<256x3xbf16>, vector<3x4xbf16>, vector<256x4xf32> -> vector<256x4xf32>
    %49 = arith.addf %42, %48 : vector<256x4xf32>
    %50 = vector.extract_strided_slice %8 {offsets = [2, 0, 0], sizes = [16, 16, 3], strides = [1, 1, 1]} : vector<18x18x3xf32> to vector<16x16x3xf32>
    %51 = vector.shape_cast %50 : vector<16x16x3xf32> to vector<256x3xf32>
    %52 = arith.truncf %51 : vector<256x3xf32> to vector<256x3xbf16>
    %53 = vector.extract_strided_slice %3 {offsets = [6, 0, 0], sizes = [1, 3, 4], strides = [1, 1, 1]} : vector<9x3x4xbf16> to vector<1x3x4xbf16>
    %54 = vector.shape_cast %53 : vector<1x3x4xbf16> to vector<3x4xbf16>
    %cst_15 = arith.constant dense<0.000000e+00> : vector<256x4xf32>
    %55 = tpu.matmul %52, %54, %cst_15 {dimension_numbers = #tpu.dot_dimension_numbers<[1], [0], [0], [1], [0, 0, 1, 1], [], []>} : vector<256x3xbf16>, vector<3x4xbf16>, vector<256x4xf32> -> vector<256x4xf32>
    %56 = arith.addf %49, %55 : vector<256x4xf32>
    %57 = vector.extract_strided_slice %8 {offsets = [2, 1, 0], sizes = [16, 16, 3], strides = [1, 1, 1]} : vector<18x18x3xf32> to vector<16x16x3xf32>
    %58 = vector.shape_cast %57 : vector<16x16x3xf32> to vector<256x3xf32>
    %59 = arith.truncf %58 : vector<256x3xf32> to vector<256x3xbf16>
    %60 = vector.extract_strided_slice %3 {offsets = [7, 0, 0], sizes = [1, 3, 4], strides = [1, 1, 1]} : vector<9x3x4xbf16> to vector<1x3x4xbf16>
    %61 = vector.shape_cast %60 : vector<1x3x4xbf16> to vector<3x4xbf16>
    %cst_16 = arith.constant dense<0.000000e+00> : vector<256x4xf32>
    %62 = tpu.matmul %59, %61, %cst_16 {dimension_numbers = #tpu.dot_dimension_numbers<[1], [0], [0], [1], [0, 0, 1, 1], [], []>} : vector<256x3xbf16>, vector<3x4xbf16>, vector<256x4xf32> -> vector<256x4xf32>
    %63 = arith.addf %56, %62 : vector<256x4xf32>
    %64 = vector.extract_strided_slice %8 {offsets = [2, 2, 0], sizes = [16, 16, 3], strides = [1, 1, 1]} : vector<18x18x3xf32> to vector<16x16x3xf32>
    %65 = vector.shape_cast %64 : vector<16x16x3xf32> to vector<256x3xf32>
    %66 = arith.truncf %65 : vector<256x3xf32> to vector<256x3xbf16>
    %67 = vector.extract_strided_slice %3 {offsets = [8, 0, 0], sizes = [1, 3, 4], strides = [1, 1, 1]} : vector<9x3x4xbf16> to vector<1x3x4xbf16>
    %68 = vector.shape_cast %67 : vector<1x3x4xbf16> to vector<3x4xbf16>
    %cst_17 = arith.constant dense<0.000000e+00> : vector<256x4xf32>
    %69 = tpu.matmul %66, %68, %cst_17 {dimension_numbers = #tpu.dot_dimension_numbers<[1], [0], [0], [1], [0, 0, 1, 1], [], []>} : vector<256x3xbf16>, vector<3x4xbf16>, vector<256x4xf32> -> vector<256x4xf32>
    %70 = arith.addf %63, %69 : vector<256x4xf32>
    %71 = vector.broadcast %4 : vector<1x4xf32> to vector<256x4xf32>
    %72 = arith.addf %70, %71 : vector<256x4xf32>
    %cst_18 = arith.constant 0.000000e+00 : f32
    %73 = vector.broadcast %cst_18 : f32 to vector<256x4xf32>
    %74 = arith.maximumf %72, %73 : vector<256x4xf32>
    %75 = arith.truncf %74 : vector<256x4xf32> to vector<256x4xbf16>
    %76 = arith.extf %75 : vector<256x4xbf16> to vector<256x4xf32>
    %77 = vector.shape_cast %76 : vector<256x4xf32> to vector<16x16x4xf32>
    %c0_19 = arith.constant 0 : index
    %c0_20 = arith.constant 0 : index
    %c0_21 = arith.constant 0 : index
    %78 = vector.load %arg4[%c0_19, %c0_20, %c0_21] : memref<9x4x8xbf16, #tpu.memory_space<vmem>>, vector<9x4x8xbf16>
    %c0_22 = arith.constant 0 : index
    %c0_23 = arith.constant 0 : index
    %79 = vector.load %arg5[%c0_22, %c0_23] : memref<1x8xf32, #tpu.memory_space<vmem>>, vector<1x8xf32>
    %cst_24 = arith.constant 0.000000e+00 : f32
    %80 = vector.broadcast %cst_24 : f32 to vector<1x16x4xf32>
    %cst_25 = arith.constant 0.000000e+00 : f32
    %81 = vector.broadcast %cst_25 : f32 to vector<18x1x4xf32>
    %82 = tpu.concatenate %80, %77, %80 in 0 : vector<1x16x4xf32>, vector<16x16x4xf32>, vector<1x16x4xf32> -> vector<18x16x4xf32>
    %83 = tpu.concatenate %81, %82, %81 in 1 : vector<18x1x4xf32>, vector<18x16x4xf32>, vector<18x1x4xf32> -> vector<18x18x4xf32>
    %84 = vector.extract_strided_slice %83 {offsets = [0, 0, 0], sizes = [16, 16, 4], strides = [1, 1, 1]} : vector<18x18x4xf32> to vector<16x16x4xf32>
    %85 = vector.shape_cast %84 : vector<16x16x4xf32> to vector<256x4xf32>
    %86 = arith.truncf %85 : vector<256x4xf32> to vector<256x4xbf16>
    %87 = vector.extract_strided_slice %78 {offsets = [0, 0, 0], sizes = [1, 4, 8], strides = [1, 1, 1]} : vector<9x4x8xbf16> to vector<1x4x8xbf16>
    %88 = vector.shape_cast %87 : vector<1x4x8xbf16> to vector<4x8xbf16>
    %cst_26 = arith.constant dense<0.000000e+00> : vector<256x8xf32>
    %89 = tpu.matmul %86, %88, %cst_26 {dimension_numbers = #tpu.dot_dimension_numbers<[1], [0], [0], [1], [0, 0, 1, 1], [], []>} : vector<256x4xbf16>, vector<4x8xbf16>, vector<256x8xf32> -> vector<256x8xf32>
    %90 = vector.extract_strided_slice %83 {offsets = [0, 1, 0], sizes = [16, 16, 4], strides = [1, 1, 1]} : vector<18x18x4xf32> to vector<16x16x4xf32>
    %91 = vector.shape_cast %90 : vector<16x16x4xf32> to vector<256x4xf32>
    %92 = arith.truncf %91 : vector<256x4xf32> to vector<256x4xbf16>
    %93 = vector.extract_strided_slice %78 {offsets = [1, 0, 0], sizes = [1, 4, 8], strides = [1, 1, 1]} : vector<9x4x8xbf16> to vector<1x4x8xbf16>
    %94 = vector.shape_cast %93 : vector<1x4x8xbf16> to vector<4x8xbf16>
    %cst_27 = arith.constant dense<0.000000e+00> : vector<256x8xf32>
    %95 = tpu.matmul %92, %94, %cst_27 {dimension_numbers = #tpu.dot_dimension_numbers<[1], [0], [0], [1], [0, 0, 1, 1], [], []>} : vector<256x4xbf16>, vector<4x8xbf16>, vector<256x8xf32> -> vector<256x8xf32>
    %96 = arith.addf %89, %95 : vector<256x8xf32>
    %97 = vector.extract_strided_slice %83 {offsets = [0, 2, 0], sizes = [16, 16, 4], strides = [1, 1, 1]} : vector<18x18x4xf32> to vector<16x16x4xf32>
    %98 = vector.shape_cast %97 : vector<16x16x4xf32> to vector<256x4xf32>
    %99 = arith.truncf %98 : vector<256x4xf32> to vector<256x4xbf16>
    %100 = vector.extract_strided_slice %78 {offsets = [2, 0, 0], sizes = [1, 4, 8], strides = [1, 1, 1]} : vector<9x4x8xbf16> to vector<1x4x8xbf16>
    %101 = vector.shape_cast %100 : vector<1x4x8xbf16> to vector<4x8xbf16>
    %cst_28 = arith.constant dense<0.000000e+00> : vector<256x8xf32>
    %102 = tpu.matmul %99, %101, %cst_28 {dimension_numbers = #tpu.dot_dimension_numbers<[1], [0], [0], [1], [0, 0, 1, 1], [], []>} : vector<256x4xbf16>, vector<4x8xbf16>, vector<256x8xf32> -> vector<256x8xf32>
    %103 = arith.addf %96, %102 : vector<256x8xf32>
    %104 = vector.extract_strided_slice %83 {offsets = [1, 0, 0], sizes = [16, 16, 4], strides = [1, 1, 1]} : vector<18x18x4xf32> to vector<16x16x4xf32>
    %105 = vector.shape_cast %104 : vector<16x16x4xf32> to vector<256x4xf32>
    %106 = arith.truncf %105 : vector<256x4xf32> to vector<256x4xbf16>
    %107 = vector.extract_strided_slice %78 {offsets = [3, 0, 0], sizes = [1, 4, 8], strides = [1, 1, 1]} : vector<9x4x8xbf16> to vector<1x4x8xbf16>
    %108 = vector.shape_cast %107 : vector<1x4x8xbf16> to vector<4x8xbf16>
    %cst_29 = arith.constant dense<0.000000e+00> : vector<256x8xf32>
    %109 = tpu.matmul %106, %108, %cst_29 {dimension_numbers = #tpu.dot_dimension_numbers<[1], [0], [0], [1], [0, 0, 1, 1], [], []>} : vector<256x4xbf16>, vector<4x8xbf16>, vector<256x8xf32> -> vector<256x8xf32>
    %110 = arith.addf %103, %109 : vector<256x8xf32>
    %111 = vector.extract_strided_slice %83 {offsets = [1, 1, 0], sizes = [16, 16, 4], strides = [1, 1, 1]} : vector<18x18x4xf32> to vector<16x16x4xf32>
    %112 = vector.shape_cast %111 : vector<16x16x4xf32> to vector<256x4xf32>
    %113 = arith.truncf %112 : vector<256x4xf32> to vector<256x4xbf16>
    %114 = vector.extract_strided_slice %78 {offsets = [4, 0, 0], sizes = [1, 4, 8], strides = [1, 1, 1]} : vector<9x4x8xbf16> to vector<1x4x8xbf16>
    %115 = vector.shape_cast %114 : vector<1x4x8xbf16> to vector<4x8xbf16>
    %cst_30 = arith.constant dense<0.000000e+00> : vector<256x8xf32>
    %116 = tpu.matmul %113, %115, %cst_30 {dimension_numbers = #tpu.dot_dimension_numbers<[1], [0], [0], [1], [0, 0, 1, 1], [], []>} : vector<256x4xbf16>, vector<4x8xbf16>, vector<256x8xf32> -> vector<256x8xf32>
    %117 = arith.addf %110, %116 : vector<256x8xf32>
    %118 = vector.extract_strided_slice %83 {offsets = [1, 2, 0], sizes = [16, 16, 4], strides = [1, 1, 1]} : vector<18x18x4xf32> to vector<16x16x4xf32>
    %119 = vector.shape_cast %118 : vector<16x16x4xf32> to vector<256x4xf32>
    %120 = arith.truncf %119 : vector<256x4xf32> to vector<256x4xbf16>
    %121 = vector.extract_strided_slice %78 {offsets = [5, 0, 0], sizes = [1, 4, 8], strides = [1, 1, 1]} : vector<9x4x8xbf16> to vector<1x4x8xbf16>
    %122 = vector.shape_cast %121 : vector<1x4x8xbf16> to vector<4x8xbf16>
    %cst_31 = arith.constant dense<0.000000e+00> : vector<256x8xf32>
    %123 = tpu.matmul %120, %122, %cst_31 {dimension_numbers = #tpu.dot_dimension_numbers<[1], [0], [0], [1], [0, 0, 1, 1], [], []>} : vector<256x4xbf16>, vector<4x8xbf16>, vector<256x8xf32> -> vector<256x8xf32>
    %124 = arith.addf %117, %123 : vector<256x8xf32>
    %125 = vector.extract_strided_slice %83 {offsets = [2, 0, 0], sizes = [16, 16, 4], strides = [1, 1, 1]} : vector<18x18x4xf32> to vector<16x16x4xf32>
    %126 = vector.shape_cast %125 : vector<16x16x4xf32> to vector<256x4xf32>
    %127 = arith.truncf %126 : vector<256x4xf32> to vector<256x4xbf16>
    %128 = vector.extract_strided_slice %78 {offsets = [6, 0, 0], sizes = [1, 4, 8], strides = [1, 1, 1]} : vector<9x4x8xbf16> to vector<1x4x8xbf16>
    %129 = vector.shape_cast %128 : vector<1x4x8xbf16> to vector<4x8xbf16>
    %cst_32 = arith.constant dense<0.000000e+00> : vector<256x8xf32>
    %130 = tpu.matmul %127, %129, %cst_32 {dimension_numbers = #tpu.dot_dimension_numbers<[1], [0], [0], [1], [0, 0, 1, 1], [], []>} : vector<256x4xbf16>, vector<4x8xbf16>, vector<256x8xf32> -> vector<256x8xf32>
    %131 = arith.addf %124, %130 : vector<256x8xf32>
    %132 = vector.extract_strided_slice %83 {offsets = [2, 1, 0], sizes = [16, 16, 4], strides = [1, 1, 1]} : vector<18x18x4xf32> to vector<16x16x4xf32>
    %133 = vector.shape_cast %132 : vector<16x16x4xf32> to vector<256x4xf32>
    %134 = arith.truncf %133 : vector<256x4xf32> to vector<256x4xbf16>
    %135 = vector.extract_strided_slice %78 {offsets = [7, 0, 0], sizes = [1, 4, 8], strides = [1, 1, 1]} : vector<9x4x8xbf16> to vector<1x4x8xbf16>
    %136 = vector.shape_cast %135 : vector<1x4x8xbf16> to vector<4x8xbf16>
    %cst_33 = arith.constant dense<0.000000e+00> : vector<256x8xf32>
    %137 = tpu.matmul %134, %136, %cst_33 {dimension_numbers = #tpu.dot_dimension_numbers<[1], [0], [0], [1], [0, 0, 1, 1], [], []>} : vector<256x4xbf16>, vector<4x8xbf16>, vector<256x8xf32> -> vector<256x8xf32>
    %138 = arith.addf %131, %137 : vector<256x8xf32>
    %139 = vector.extract_strided_slice %83 {offsets = [2, 2, 0], sizes = [16, 16, 4], strides = [1, 1, 1]} : vector<18x18x4xf32> to vector<16x16x4xf32>
    %140 = vector.shape_cast %139 : vector<16x16x4xf32> to vector<256x4xf32>
    %141 = arith.truncf %140 : vector<256x4xf32> to vector<256x4xbf16>
    %142 = vector.extract_strided_slice %78 {offsets = [8, 0, 0], sizes = [1, 4, 8], strides = [1, 1, 1]} : vector<9x4x8xbf16> to vector<1x4x8xbf16>
    %143 = vector.shape_cast %142 : vector<1x4x8xbf16> to vector<4x8xbf16>
    %cst_34 = arith.constant dense<0.000000e+00> : vector<256x8xf32>
    %144 = tpu.matmul %141, %143, %cst_34 {dimension_numbers = #tpu.dot_dimension_numbers<[1], [0], [0], [1], [0, 0, 1, 1], [], []>} : vector<256x4xbf16>, vector<4x8xbf16>, vector<256x8xf32> -> vector<256x8xf32>
    %145 = arith.addf %138, %144 : vector<256x8xf32>
    %146 = vector.broadcast %79 : vector<1x8xf32> to vector<256x8xf32>
    %147 = arith.addf %145, %146 : vector<256x8xf32>
    %cst_35 = arith.constant 0.000000e+00 : f32
    %148 = vector.broadcast %cst_35 : f32 to vector<256x8xf32>
    %149 = arith.maximumf %147, %148 : vector<256x8xf32>
    %150 = arith.truncf %149 : vector<256x8xf32> to vector<256x8xbf16>
    %151 = arith.extf %150 : vector<256x8xbf16> to vector<256x8xf32>
    %152 = vector.shape_cast %151 : vector<256x8xf32> to vector<16x16x8xf32>
    %c0_36 = arith.constant 0 : index
    %c0_37 = arith.constant 0 : index
    %c0_38 = arith.constant 0 : index
    %153 = vector.load %arg6[%c0_36, %c0_37, %c0_38] : memref<9x8x16xbf16, #tpu.memory_space<vmem>>, vector<9x8x16xbf16>
    %c0_39 = arith.constant 0 : index
    %c0_40 = arith.constant 0 : index
    %154 = vector.load %arg7[%c0_39, %c0_40] : memref<1x16xf32, #tpu.memory_space<vmem>>, vector<1x16xf32>
    %cst_41 = arith.constant 0.000000e+00 : f32
    %155 = vector.broadcast %cst_41 : f32 to vector<1x16x8xf32>
    %cst_42 = arith.constant 0.000000e+00 : f32
    %156 = vector.broadcast %cst_42 : f32 to vector<18x1x8xf32>
    %157 = tpu.concatenate %155, %152, %155 in 0 : vector<1x16x8xf32>, vector<16x16x8xf32>, vector<1x16x8xf32> -> vector<18x16x8xf32>
    %158 = tpu.concatenate %156, %157, %156 in 1 : vector<18x1x8xf32>, vector<18x16x8xf32>, vector<18x1x8xf32> -> vector<18x18x8xf32>
    %159 = vector.extract_strided_slice %158 {offsets = [0, 0, 0], sizes = [16, 16, 8], strides = [1, 1, 1]} : vector<18x18x8xf32> to vector<16x16x8xf32>
    %160 = vector.shape_cast %159 : vector<16x16x8xf32> to vector<256x8xf32>
    %161 = arith.truncf %160 : vector<256x8xf32> to vector<256x8xbf16>
    %162 = vector.extract_strided_slice %153 {offsets = [0, 0, 0], sizes = [1, 8, 16], strides = [1, 1, 1]} : vector<9x8x16xbf16> to vector<1x8x16xbf16>
    %163 = vector.shape_cast %162 : vector<1x8x16xbf16> to vector<8x16xbf16>
    %cst_43 = arith.constant dense<0.000000e+00> : vector<256x16xf32>
    %164 = tpu.matmul %161, %163, %cst_43 {dimension_numbers = #tpu.dot_dimension_numbers<[1], [0], [0], [1], [0, 0, 1, 1], [], []>} : vector<256x8xbf16>, vector<8x16xbf16>, vector<256x16xf32> -> vector<256x16xf32>
    %165 = vector.extract_strided_slice %158 {offsets = [0, 1, 0], sizes = [16, 16, 8], strides = [1, 1, 1]} : vector<18x18x8xf32> to vector<16x16x8xf32>
    %166 = vector.shape_cast %165 : vector<16x16x8xf32> to vector<256x8xf32>
    %167 = arith.truncf %166 : vector<256x8xf32> to vector<256x8xbf16>
    %168 = vector.extract_strided_slice %153 {offsets = [1, 0, 0], sizes = [1, 8, 16], strides = [1, 1, 1]} : vector<9x8x16xbf16> to vector<1x8x16xbf16>
    %169 = vector.shape_cast %168 : vector<1x8x16xbf16> to vector<8x16xbf16>
    %cst_44 = arith.constant dense<0.000000e+00> : vector<256x16xf32>
    %170 = tpu.matmul %167, %169, %cst_44 {dimension_numbers = #tpu.dot_dimension_numbers<[1], [0], [0], [1], [0, 0, 1, 1], [], []>} : vector<256x8xbf16>, vector<8x16xbf16>, vector<256x16xf32> -> vector<256x16xf32>
    %171 = arith.addf %164, %170 : vector<256x16xf32>
    %172 = vector.extract_strided_slice %158 {offsets = [0, 2, 0], sizes = [16, 16, 8], strides = [1, 1, 1]} : vector<18x18x8xf32> to vector<16x16x8xf32>
    %173 = vector.shape_cast %172 : vector<16x16x8xf32> to vector<256x8xf32>
    %174 = arith.truncf %173 : vector<256x8xf32> to vector<256x8xbf16>
    %175 = vector.extract_strided_slice %153 {offsets = [2, 0, 0], sizes = [1, 8, 16], strides = [1, 1, 1]} : vector<9x8x16xbf16> to vector<1x8x16xbf16>
    %176 = vector.shape_cast %175 : vector<1x8x16xbf16> to vector<8x16xbf16>
    %cst_45 = arith.constant dense<0.000000e+00> : vector<256x16xf32>
    %177 = tpu.matmul %174, %176, %cst_45 {dimension_numbers = #tpu.dot_dimension_numbers<[1], [0], [0], [1], [0, 0, 1, 1], [], []>} : vector<256x8xbf16>, vector<8x16xbf16>, vector<256x16xf32> -> vector<256x16xf32>
    %178 = arith.addf %171, %177 : vector<256x16xf32>
    %179 = vector.extract_strided_slice %158 {offsets = [1, 0, 0], sizes = [16, 16, 8], strides = [1, 1, 1]} : vector<18x18x8xf32> to vector<16x16x8xf32>
    %180 = vector.shape_cast %179 : vector<16x16x8xf32> to vector<256x8xf32>
    %181 = arith.truncf %180 : vector<256x8xf32> to vector<256x8xbf16>
    %182 = vector.extract_strided_slice %153 {offsets = [3, 0, 0], sizes = [1, 8, 16], strides = [1, 1, 1]} : vector<9x8x16xbf16> to vector<1x8x16xbf16>
    %183 = vector.shape_cast %182 : vector<1x8x16xbf16> to vector<8x16xbf16>
    %cst_46 = arith.constant dense<0.000000e+00> : vector<256x16xf32>
    %184 = tpu.matmul %181, %183, %cst_46 {dimension_numbers = #tpu.dot_dimension_numbers<[1], [0], [0], [1], [0, 0, 1, 1], [], []>} : vector<256x8xbf16>, vector<8x16xbf16>, vector<256x16xf32> -> vector<256x16xf32>
    %185 = arith.addf %178, %184 : vector<256x16xf32>
    %186 = vector.extract_strided_slice %158 {offsets = [1, 1, 0], sizes = [16, 16, 8], strides = [1, 1, 1]} : vector<18x18x8xf32> to vector<16x16x8xf32>
    %187 = vector.shape_cast %186 : vector<16x16x8xf32> to vector<256x8xf32>
    %188 = arith.truncf %187 : vector<256x8xf32> to vector<256x8xbf16>
    %189 = vector.extract_strided_slice %153 {offsets = [4, 0, 0], sizes = [1, 8, 16], strides = [1, 1, 1]} : vector<9x8x16xbf16> to vector<1x8x16xbf16>
    %190 = vector.shape_cast %189 : vector<1x8x16xbf16> to vector<8x16xbf16>
    %cst_47 = arith.constant dense<0.000000e+00> : vector<256x16xf32>
    %191 = tpu.matmul %188, %190, %cst_47 {dimension_numbers = #tpu.dot_dimension_numbers<[1], [0], [0], [1], [0, 0, 1, 1], [], []>} : vector<256x8xbf16>, vector<8x16xbf16>, vector<256x16xf32> -> vector<256x16xf32>
    %192 = arith.addf %185, %191 : vector<256x16xf32>
    %193 = vector.extract_strided_slice %158 {offsets = [1, 2, 0], sizes = [16, 16, 8], strides = [1, 1, 1]} : vector<18x18x8xf32> to vector<16x16x8xf32>
    %194 = vector.shape_cast %193 : vector<16x16x8xf32> to vector<256x8xf32>
    %195 = arith.truncf %194 : vector<256x8xf32> to vector<256x8xbf16>
    %196 = vector.extract_strided_slice %153 {offsets = [5, 0, 0], sizes = [1, 8, 16], strides = [1, 1, 1]} : vector<9x8x16xbf16> to vector<1x8x16xbf16>
    %197 = vector.shape_cast %196 : vector<1x8x16xbf16> to vector<8x16xbf16>
    %cst_48 = arith.constant dense<0.000000e+00> : vector<256x16xf32>
    %198 = tpu.matmul %195, %197, %cst_48 {dimension_numbers = #tpu.dot_dimension_numbers<[1], [0], [0], [1], [0, 0, 1, 1], [], []>} : vector<256x8xbf16>, vector<8x16xbf16>, vector<256x16xf32> -> vector<256x16xf32>
    %199 = arith.addf %192, %198 : vector<256x16xf32>
    %200 = vector.extract_strided_slice %158 {offsets = [2, 0, 0], sizes = [16, 16, 8], strides = [1, 1, 1]} : vector<18x18x8xf32> to vector<16x16x8xf32>
    %201 = vector.shape_cast %200 : vector<16x16x8xf32> to vector<256x8xf32>
    %202 = arith.truncf %201 : vector<256x8xf32> to vector<256x8xbf16>
    %203 = vector.extract_strided_slice %153 {offsets = [6, 0, 0], sizes = [1, 8, 16], strides = [1, 1, 1]} : vector<9x8x16xbf16> to vector<1x8x16xbf16>
    %204 = vector.shape_cast %203 : vector<1x8x16xbf16> to vector<8x16xbf16>
    %cst_49 = arith.constant dense<0.000000e+00> : vector<256x16xf32>
    %205 = tpu.matmul %202, %204, %cst_49 {dimension_numbers = #tpu.dot_dimension_numbers<[1], [0], [0], [1], [0, 0, 1, 1], [], []>} : vector<256x8xbf16>, vector<8x16xbf16>, vector<256x16xf32> -> vector<256x16xf32>
    %206 = arith.addf %199, %205 : vector<256x16xf32>
    %207 = vector.extract_strided_slice %158 {offsets = [2, 1, 0], sizes = [16, 16, 8], strides = [1, 1, 1]} : vector<18x18x8xf32> to vector<16x16x8xf32>
    %208 = vector.shape_cast %207 : vector<16x16x8xf32> to vector<256x8xf32>
    %209 = arith.truncf %208 : vector<256x8xf32> to vector<256x8xbf16>
    %210 = vector.extract_strided_slice %153 {offsets = [7, 0, 0], sizes = [1, 8, 16], strides = [1, 1, 1]} : vector<9x8x16xbf16> to vector<1x8x16xbf16>
    %211 = vector.shape_cast %210 : vector<1x8x16xbf16> to vector<8x16xbf16>
    %cst_50 = arith.constant dense<0.000000e+00> : vector<256x16xf32>
    %212 = tpu.matmul %209, %211, %cst_50 {dimension_numbers = #tpu.dot_dimension_numbers<[1], [0], [0], [1], [0, 0, 1, 1], [], []>} : vector<256x8xbf16>, vector<8x16xbf16>, vector<256x16xf32> -> vector<256x16xf32>
    %213 = arith.addf %206, %212 : vector<256x16xf32>
    %214 = vector.extract_strided_slice %158 {offsets = [2, 2, 0], sizes = [16, 16, 8], strides = [1, 1, 1]} : vector<18x18x8xf32> to vector<16x16x8xf32>
    %215 = vector.shape_cast %214 : vector<16x16x8xf32> to vector<256x8xf32>
    %216 = arith.truncf %215 : vector<256x8xf32> to vector<256x8xbf16>
    %217 = vector.extract_strided_slice %153 {offsets = [8, 0, 0], sizes = [1, 8, 16], strides = [1, 1, 1]} : vector<9x8x16xbf16> to vector<1x8x16xbf16>
    %218 = vector.shape_cast %217 : vector<1x8x16xbf16> to vector<8x16xbf16>
    %cst_51 = arith.constant dense<0.000000e+00> : vector<256x16xf32>
    %219 = tpu.matmul %216, %218, %cst_51 {dimension_numbers = #tpu.dot_dimension_numbers<[1], [0], [0], [1], [0, 0, 1, 1], [], []>} : vector<256x8xbf16>, vector<8x16xbf16>, vector<256x16xf32> -> vector<256x16xf32>
    %220 = arith.addf %213, %219 : vector<256x16xf32>
    %221 = vector.broadcast %154 : vector<1x16xf32> to vector<256x16xf32>
    %222 = arith.addf %220, %221 : vector<256x16xf32>
    %cst_52 = arith.constant 0.000000e+00 : f32
    %223 = vector.broadcast %cst_52 : f32 to vector<256x16xf32>
    %224 = arith.maximumf %222, %223 : vector<256x16xf32>
    %225 = arith.truncf %224 : vector<256x16xf32> to vector<256x16xbf16>
    %226 = arith.extf %225 : vector<256x16xbf16> to vector<256x16xf32>
    %227 = vector.shape_cast %226 : vector<256x16xf32> to vector<16x16x16xf32>
    %228 = vector.shape_cast %227 : vector<16x16x16xf32> to vector<8x2x16x16xf32>
    %229 = vector.extract_strided_slice %228 {offsets = [0, 0, 0, 0], sizes = [8, 1, 16, 16], strides = [1, 1, 1, 1]} : vector<8x2x16x16xf32> to vector<8x1x16x16xf32>
    %230 = vector.shape_cast %229 : vector<8x1x16x16xf32> to vector<8x16x16xf32>
    %231 = vector.extract_strided_slice %228 {offsets = [0, 1, 0, 0], sizes = [8, 1, 16, 16], strides = [1, 1, 1, 1]} : vector<8x2x16x16xf32> to vector<8x1x16x16xf32>
    %232 = vector.shape_cast %231 : vector<8x1x16x16xf32> to vector<8x16x16xf32>
    %cst_53 = arith.constant 0xFF800000 : f32
    %233 = vector.broadcast %cst_53 : f32 to vector<1x16x16xf32>
    %234 = vector.extract_strided_slice %232 {offsets = [0, 0, 0], sizes = [7, 16, 16], strides = [1, 1, 1]} : vector<8x16x16xf32> to vector<7x16x16xf32>
    %235 = tpu.concatenate %233, %234 in 0 : vector<1x16x16xf32>, vector<7x16x16xf32> -> vector<8x16x16xf32>
    %236 = arith.maximumf %230, %232 : vector<8x16x16xf32>
    %237 = arith.maximumf %236, %235 : vector<8x16x16xf32>
    %238 = vector.shape_cast %237 : vector<8x16x16xf32> to vector<8x8x2x16xf32>
    %239 = vector.extract_strided_slice %238 {offsets = [0, 0, 0, 0], sizes = [8, 8, 1, 16], strides = [1, 1, 1, 1]} : vector<8x8x2x16xf32> to vector<8x8x1x16xf32>
    %240 = vector.shape_cast %239 : vector<8x8x1x16xf32> to vector<8x8x16xf32>
    %241 = vector.extract_strided_slice %238 {offsets = [0, 0, 1, 0], sizes = [8, 8, 1, 16], strides = [1, 1, 1, 1]} : vector<8x8x2x16xf32> to vector<8x8x1x16xf32>
    %242 = vector.shape_cast %241 : vector<8x8x1x16xf32> to vector<8x8x16xf32>
    %cst_54 = arith.constant 0xFF800000 : f32
    %243 = vector.broadcast %cst_54 : f32 to vector<8x1x16xf32>
    %244 = vector.extract_strided_slice %242 {offsets = [0, 0, 0], sizes = [8, 7, 16], strides = [1, 1, 1]} : vector<8x8x16xf32> to vector<8x7x16xf32>
    %245 = tpu.concatenate %243, %244 in 1 : vector<8x1x16xf32>, vector<8x7x16xf32> -> vector<8x8x16xf32>
    %246 = arith.maximumf %240, %242 : vector<8x8x16xf32>
    %247 = arith.maximumf %246, %245 : vector<8x8x16xf32>
    %c0_55 = arith.constant 0 : index
    %c0_56 = arith.constant 0 : index
    %c0_57 = arith.constant 0 : index
    %248 = vector.load %arg8[%c0_55, %c0_56, %c0_57] : memref<9x16x32xbf16, #tpu.memory_space<vmem>>, vector<9x16x32xbf16>
    %c0_58 = arith.constant 0 : index
    %c0_59 = arith.constant 0 : index
    %249 = vector.load %arg9[%c0_58, %c0_59] : memref<1x32xf32, #tpu.memory_space<vmem>>, vector<1x32xf32>
    %cst_60 = arith.constant 0.000000e+00 : f32
    %250 = vector.broadcast %cst_60 : f32 to vector<1x8x16xf32>
    %cst_61 = arith.constant 0.000000e+00 : f32
    %251 = vector.broadcast %cst_61 : f32 to vector<10x1x16xf32>
    %252 = tpu.concatenate %250, %247, %250 in 0 : vector<1x8x16xf32>, vector<8x8x16xf32>, vector<1x8x16xf32> -> vector<10x8x16xf32>
    %253 = tpu.concatenate %251, %252, %251 in 1 : vector<10x1x16xf32>, vector<10x8x16xf32>, vector<10x1x16xf32> -> vector<10x10x16xf32>
    %254 = vector.extract_strided_slice %253 {offsets = [0, 0, 0], sizes = [8, 8, 16], strides = [1, 1, 1]} : vector<10x10x16xf32> to vector<8x8x16xf32>
    %255 = vector.shape_cast %254 : vector<8x8x16xf32> to vector<64x16xf32>
    %256 = arith.truncf %255 : vector<64x16xf32> to vector<64x16xbf16>
    %257 = vector.extract_strided_slice %248 {offsets = [0, 0, 0], sizes = [1, 16, 32], strides = [1, 1, 1]} : vector<9x16x32xbf16> to vector<1x16x32xbf16>
    %258 = vector.shape_cast %257 : vector<1x16x32xbf16> to vector<16x32xbf16>
    %cst_62 = arith.constant dense<0.000000e+00> : vector<64x32xf32>
    %259 = tpu.matmul %256, %258, %cst_62 {dimension_numbers = #tpu.dot_dimension_numbers<[1], [0], [0], [1], [0, 0, 1, 1], [], []>} : vector<64x16xbf16>, vector<16x32xbf16>, vector<64x32xf32> -> vector<64x32xf32>
    %260 = vector.extract_strided_slice %253 {offsets = [0, 1, 0], sizes = [8, 8, 16], strides = [1, 1, 1]} : vector<10x10x16xf32> to vector<8x8x16xf32>
    %261 = vector.shape_cast %260 : vector<8x8x16xf32> to vector<64x16xf32>
    %262 = arith.truncf %261 : vector<64x16xf32> to vector<64x16xbf16>
    %263 = vector.extract_strided_slice %248 {offsets = [1, 0, 0], sizes = [1, 16, 32], strides = [1, 1, 1]} : vector<9x16x32xbf16> to vector<1x16x32xbf16>
    %264 = vector.shape_cast %263 : vector<1x16x32xbf16> to vector<16x32xbf16>
    %cst_63 = arith.constant dense<0.000000e+00> : vector<64x32xf32>
    %265 = tpu.matmul %262, %264, %cst_63 {dimension_numbers = #tpu.dot_dimension_numbers<[1], [0], [0], [1], [0, 0, 1, 1], [], []>} : vector<64x16xbf16>, vector<16x32xbf16>, vector<64x32xf32> -> vector<64x32xf32>
    %266 = arith.addf %259, %265 : vector<64x32xf32>
    %267 = vector.extract_strided_slice %253 {offsets = [0, 2, 0], sizes = [8, 8, 16], strides = [1, 1, 1]} : vector<10x10x16xf32> to vector<8x8x16xf32>
    %268 = vector.shape_cast %267 : vector<8x8x16xf32> to vector<64x16xf32>
    %269 = arith.truncf %268 : vector<64x16xf32> to vector<64x16xbf16>
    %270 = vector.extract_strided_slice %248 {offsets = [2, 0, 0], sizes = [1, 16, 32], strides = [1, 1, 1]} : vector<9x16x32xbf16> to vector<1x16x32xbf16>
    %271 = vector.shape_cast %270 : vector<1x16x32xbf16> to vector<16x32xbf16>
    %cst_64 = arith.constant dense<0.000000e+00> : vector<64x32xf32>
    %272 = tpu.matmul %269, %271, %cst_64 {dimension_numbers = #tpu.dot_dimension_numbers<[1], [0], [0], [1], [0, 0, 1, 1], [], []>} : vector<64x16xbf16>, vector<16x32xbf16>, vector<64x32xf32> -> vector<64x32xf32>
    %273 = arith.addf %266, %272 : vector<64x32xf32>
    %274 = vector.extract_strided_slice %253 {offsets = [1, 0, 0], sizes = [8, 8, 16], strides = [1, 1, 1]} : vector<10x10x16xf32> to vector<8x8x16xf32>
    %275 = vector.shape_cast %274 : vector<8x8x16xf32> to vector<64x16xf32>
    %276 = arith.truncf %275 : vector<64x16xf32> to vector<64x16xbf16>
    %277 = vector.extract_strided_slice %248 {offsets = [3, 0, 0], sizes = [1, 16, 32], strides = [1, 1, 1]} : vector<9x16x32xbf16> to vector<1x16x32xbf16>
    %278 = vector.shape_cast %277 : vector<1x16x32xbf16> to vector<16x32xbf16>
    %cst_65 = arith.constant dense<0.000000e+00> : vector<64x32xf32>
    %279 = tpu.matmul %276, %278, %cst_65 {dimension_numbers = #tpu.dot_dimension_numbers<[1], [0], [0], [1], [0, 0, 1, 1], [], []>} : vector<64x16xbf16>, vector<16x32xbf16>, vector<64x32xf32> -> vector<64x32xf32>
    %280 = arith.addf %273, %279 : vector<64x32xf32>
    %281 = vector.extract_strided_slice %253 {offsets = [1, 1, 0], sizes = [8, 8, 16], strides = [1, 1, 1]} : vector<10x10x16xf32> to vector<8x8x16xf32>
    %282 = vector.shape_cast %281 : vector<8x8x16xf32> to vector<64x16xf32>
    %283 = arith.truncf %282 : vector<64x16xf32> to vector<64x16xbf16>
    %284 = vector.extract_strided_slice %248 {offsets = [4, 0, 0], sizes = [1, 16, 32], strides = [1, 1, 1]} : vector<9x16x32xbf16> to vector<1x16x32xbf16>
    %285 = vector.shape_cast %284 : vector<1x16x32xbf16> to vector<16x32xbf16>
    %cst_66 = arith.constant dense<0.000000e+00> : vector<64x32xf32>
    %286 = tpu.matmul %283, %285, %cst_66 {dimension_numbers = #tpu.dot_dimension_numbers<[1], [0], [0], [1], [0, 0, 1, 1], [], []>} : vector<64x16xbf16>, vector<16x32xbf16>, vector<64x32xf32> -> vector<64x32xf32>
    %287 = arith.addf %280, %286 : vector<64x32xf32>
    %288 = vector.extract_strided_slice %253 {offsets = [1, 2, 0], sizes = [8, 8, 16], strides = [1, 1, 1]} : vector<10x10x16xf32> to vector<8x8x16xf32>
    %289 = vector.shape_cast %288 : vector<8x8x16xf32> to vector<64x16xf32>
    %290 = arith.truncf %289 : vector<64x16xf32> to vector<64x16xbf16>
    %291 = vector.extract_strided_slice %248 {offsets = [5, 0, 0], sizes = [1, 16, 32], strides = [1, 1, 1]} : vector<9x16x32xbf16> to vector<1x16x32xbf16>
    %292 = vector.shape_cast %291 : vector<1x16x32xbf16> to vector<16x32xbf16>
    %cst_67 = arith.constant dense<0.000000e+00> : vector<64x32xf32>
    %293 = tpu.matmul %290, %292, %cst_67 {dimension_numbers = #tpu.dot_dimension_numbers<[1], [0], [0], [1], [0, 0, 1, 1], [], []>} : vector<64x16xbf16>, vector<16x32xbf16>, vector<64x32xf32> -> vector<64x32xf32>
    %294 = arith.addf %287, %293 : vector<64x32xf32>
    %295 = vector.extract_strided_slice %253 {offsets = [2, 0, 0], sizes = [8, 8, 16], strides = [1, 1, 1]} : vector<10x10x16xf32> to vector<8x8x16xf32>
    %296 = vector.shape_cast %295 : vector<8x8x16xf32> to vector<64x16xf32>
    %297 = arith.truncf %296 : vector<64x16xf32> to vector<64x16xbf16>
    %298 = vector.extract_strided_slice %248 {offsets = [6, 0, 0], sizes = [1, 16, 32], strides = [1, 1, 1]} : vector<9x16x32xbf16> to vector<1x16x32xbf16>
    %299 = vector.shape_cast %298 : vector<1x16x32xbf16> to vector<16x32xbf16>
    %cst_68 = arith.constant dense<0.000000e+00> : vector<64x32xf32>
    %300 = tpu.matmul %297, %299, %cst_68 {dimension_numbers = #tpu.dot_dimension_numbers<[1], [0], [0], [1], [0, 0, 1, 1], [], []>} : vector<64x16xbf16>, vector<16x32xbf16>, vector<64x32xf32> -> vector<64x32xf32>
    %301 = arith.addf %294, %300 : vector<64x32xf32>
    %302 = vector.extract_strided_slice %253 {offsets = [2, 1, 0], sizes = [8, 8, 16], strides = [1, 1, 1]} : vector<10x10x16xf32> to vector<8x8x16xf32>
    %303 = vector.shape_cast %302 : vector<8x8x16xf32> to vector<64x16xf32>
    %304 = arith.truncf %303 : vector<64x16xf32> to vector<64x16xbf16>
    %305 = vector.extract_strided_slice %248 {offsets = [7, 0, 0], sizes = [1, 16, 32], strides = [1, 1, 1]} : vector<9x16x32xbf16> to vector<1x16x32xbf16>
    %306 = vector.shape_cast %305 : vector<1x16x32xbf16> to vector<16x32xbf16>
    %cst_69 = arith.constant dense<0.000000e+00> : vector<64x32xf32>
    %307 = tpu.matmul %304, %306, %cst_69 {dimension_numbers = #tpu.dot_dimension_numbers<[1], [0], [0], [1], [0, 0, 1, 1], [], []>} : vector<64x16xbf16>, vector<16x32xbf16>, vector<64x32xf32> -> vector<64x32xf32>
    %308 = arith.addf %301, %307 : vector<64x32xf32>
    %309 = vector.extract_strided_slice %253 {offsets = [2, 2, 0], sizes = [8, 8, 16], strides = [1, 1, 1]} : vector<10x10x16xf32> to vector<8x8x16xf32>
    %310 = vector.shape_cast %309 : vector<8x8x16xf32> to vector<64x16xf32>
    %311 = arith.truncf %310 : vector<64x16xf32> to vector<64x16xbf16>
    %312 = vector.extract_strided_slice %248 {offsets = [8, 0, 0], sizes = [1, 16, 32], strides = [1, 1, 1]} : vector<9x16x32xbf16> to vector<1x16x32xbf16>
    %313 = vector.shape_cast %312 : vector<1x16x32xbf16> to vector<16x32xbf16>
    %cst_70 = arith.constant dense<0.000000e+00> : vector<64x32xf32>
    %314 = tpu.matmul %311, %313, %cst_70 {dimension_numbers = #tpu.dot_dimension_numbers<[1], [0], [0], [1], [0, 0, 1, 1], [], []>} : vector<64x16xbf16>, vector<16x32xbf16>, vector<64x32xf32> -> vector<64x32xf32>
    %315 = arith.addf %308, %314 : vector<64x32xf32>
    %316 = vector.broadcast %249 : vector<1x32xf32> to vector<64x32xf32>
    %317 = arith.addf %315, %316 : vector<64x32xf32>
    %cst_71 = arith.constant 0.000000e+00 : f32
    %318 = vector.broadcast %cst_71 : f32 to vector<64x32xf32>
    %319 = arith.maximumf %317, %318 : vector<64x32xf32>
    %320 = arith.truncf %319 : vector<64x32xf32> to vector<64x32xbf16>
    %321 = arith.extf %320 : vector<64x32xbf16> to vector<64x32xf32>
    %322 = vector.shape_cast %321 : vector<64x32xf32> to vector<8x8x32xf32>
    %323 = vector.shape_cast %322 : vector<8x8x32xf32> to vector<4x2x8x32xf32>
    %324 = vector.extract_strided_slice %323 {offsets = [0, 0, 0, 0], sizes = [4, 1, 8, 32], strides = [1, 1, 1, 1]} : vector<4x2x8x32xf32> to vector<4x1x8x32xf32>
    %325 = vector.shape_cast %324 : vector<4x1x8x32xf32> to vector<4x8x32xf32>
    %326 = vector.extract_strided_slice %323 {offsets = [0, 1, 0, 0], sizes = [4, 1, 8, 32], strides = [1, 1, 1, 1]} : vector<4x2x8x32xf32> to vector<4x1x8x32xf32>
    %327 = vector.shape_cast %326 : vector<4x1x8x32xf32> to vector<4x8x32xf32>
    %cst_72 = arith.constant 0xFF800000 : f32
    %328 = vector.broadcast %cst_72 : f32 to vector<1x8x32xf32>
    %329 = vector.extract_strided_slice %327 {offsets = [0, 0, 0], sizes = [3, 8, 32], strides = [1, 1, 1]} : vector<4x8x32xf32> to vector<3x8x32xf32>
    %330 = tpu.concatenate %328, %329 in 0 : vector<1x8x32xf32>, vector<3x8x32xf32> -> vector<4x8x32xf32>
    %331 = arith.maximumf %325, %327 : vector<4x8x32xf32>
    %332 = arith.maximumf %331, %330 : vector<4x8x32xf32>
    %333 = vector.shape_cast %332 : vector<4x8x32xf32> to vector<4x4x2x32xf32>
    %334 = vector.extract_strided_slice %333 {offsets = [0, 0, 0, 0], sizes = [4, 4, 1, 32], strides = [1, 1, 1, 1]} : vector<4x4x2x32xf32> to vector<4x4x1x32xf32>
    %335 = vector.shape_cast %334 : vector<4x4x1x32xf32> to vector<4x4x32xf32>
    %336 = vector.extract_strided_slice %333 {offsets = [0, 0, 1, 0], sizes = [4, 4, 1, 32], strides = [1, 1, 1, 1]} : vector<4x4x2x32xf32> to vector<4x4x1x32xf32>
    %337 = vector.shape_cast %336 : vector<4x4x1x32xf32> to vector<4x4x32xf32>
    %cst_73 = arith.constant 0xFF800000 : f32
    %338 = vector.broadcast %cst_73 : f32 to vector<4x1x32xf32>
    %339 = vector.extract_strided_slice %337 {offsets = [0, 0, 0], sizes = [4, 3, 32], strides = [1, 1, 1]} : vector<4x4x32xf32> to vector<4x3x32xf32>
    %340 = tpu.concatenate %338, %339 in 1 : vector<4x1x32xf32>, vector<4x3x32xf32> -> vector<4x4x32xf32>
    %341 = arith.maximumf %335, %337 : vector<4x4x32xf32>
    %342 = arith.maximumf %341, %340 : vector<4x4x32xf32>
    %c0_74 = arith.constant 0 : index
    %c0_75 = arith.constant 0 : index
    %c0_76 = arith.constant 0 : index
    %343 = vector.load %arg10[%c0_74, %c0_75, %c0_76] : memref<9x32x32xbf16, #tpu.memory_space<vmem>>, vector<9x32x32xbf16>
    %c0_77 = arith.constant 0 : index
    %c0_78 = arith.constant 0 : index
    %344 = vector.load %arg11[%c0_77, %c0_78] : memref<1x32xf32, #tpu.memory_space<vmem>>, vector<1x32xf32>
    %cst_79 = arith.constant 0.000000e+00 : f32
    %345 = vector.broadcast %cst_79 : f32 to vector<1x4x32xf32>
    %cst_80 = arith.constant 0.000000e+00 : f32
    %346 = vector.broadcast %cst_80 : f32 to vector<6x1x32xf32>
    %347 = tpu.concatenate %345, %342, %345 in 0 : vector<1x4x32xf32>, vector<4x4x32xf32>, vector<1x4x32xf32> -> vector<6x4x32xf32>
    %348 = tpu.concatenate %346, %347, %346 in 1 : vector<6x1x32xf32>, vector<6x4x32xf32>, vector<6x1x32xf32> -> vector<6x6x32xf32>
    %349 = vector.extract_strided_slice %348 {offsets = [0, 0, 0], sizes = [4, 4, 32], strides = [1, 1, 1]} : vector<6x6x32xf32> to vector<4x4x32xf32>
    %350 = vector.shape_cast %349 : vector<4x4x32xf32> to vector<16x32xf32>
    %351 = arith.truncf %350 : vector<16x32xf32> to vector<16x32xbf16>
    %352 = vector.extract_strided_slice %343 {offsets = [0, 0, 0], sizes = [1, 32, 32], strides = [1, 1, 1]} : vector<9x32x32xbf16> to vector<1x32x32xbf16>
    %353 = vector.shape_cast %352 : vector<1x32x32xbf16> to vector<32x32xbf16>
    %cst_81 = arith.constant dense<0.000000e+00> : vector<16x32xf32>
    %354 = tpu.matmul %351, %353, %cst_81 {dimension_numbers = #tpu.dot_dimension_numbers<[1], [0], [0], [1], [0, 0, 1, 1], [], []>} : vector<16x32xbf16>, vector<32x32xbf16>, vector<16x32xf32> -> vector<16x32xf32>
    %355 = vector.extract_strided_slice %348 {offsets = [0, 1, 0], sizes = [4, 4, 32], strides = [1, 1, 1]} : vector<6x6x32xf32> to vector<4x4x32xf32>
    %356 = vector.shape_cast %355 : vector<4x4x32xf32> to vector<16x32xf32>
    %357 = arith.truncf %356 : vector<16x32xf32> to vector<16x32xbf16>
    %358 = vector.extract_strided_slice %343 {offsets = [1, 0, 0], sizes = [1, 32, 32], strides = [1, 1, 1]} : vector<9x32x32xbf16> to vector<1x32x32xbf16>
    %359 = vector.shape_cast %358 : vector<1x32x32xbf16> to vector<32x32xbf16>
    %cst_82 = arith.constant dense<0.000000e+00> : vector<16x32xf32>
    %360 = tpu.matmul %357, %359, %cst_82 {dimension_numbers = #tpu.dot_dimension_numbers<[1], [0], [0], [1], [0, 0, 1, 1], [], []>} : vector<16x32xbf16>, vector<32x32xbf16>, vector<16x32xf32> -> vector<16x32xf32>
    %361 = arith.addf %354, %360 : vector<16x32xf32>
    %362 = vector.extract_strided_slice %348 {offsets = [0, 2, 0], sizes = [4, 4, 32], strides = [1, 1, 1]} : vector<6x6x32xf32> to vector<4x4x32xf32>
    %363 = vector.shape_cast %362 : vector<4x4x32xf32> to vector<16x32xf32>
    %364 = arith.truncf %363 : vector<16x32xf32> to vector<16x32xbf16>
    %365 = vector.extract_strided_slice %343 {offsets = [2, 0, 0], sizes = [1, 32, 32], strides = [1, 1, 1]} : vector<9x32x32xbf16> to vector<1x32x32xbf16>
    %366 = vector.shape_cast %365 : vector<1x32x32xbf16> to vector<32x32xbf16>
    %cst_83 = arith.constant dense<0.000000e+00> : vector<16x32xf32>
    %367 = tpu.matmul %364, %366, %cst_83 {dimension_numbers = #tpu.dot_dimension_numbers<[1], [0], [0], [1], [0, 0, 1, 1], [], []>} : vector<16x32xbf16>, vector<32x32xbf16>, vector<16x32xf32> -> vector<16x32xf32>
    %368 = arith.addf %361, %367 : vector<16x32xf32>
    %369 = vector.extract_strided_slice %348 {offsets = [1, 0, 0], sizes = [4, 4, 32], strides = [1, 1, 1]} : vector<6x6x32xf32> to vector<4x4x32xf32>
    %370 = vector.shape_cast %369 : vector<4x4x32xf32> to vector<16x32xf32>
    %371 = arith.truncf %370 : vector<16x32xf32> to vector<16x32xbf16>
    %372 = vector.extract_strided_slice %343 {offsets = [3, 0, 0], sizes = [1, 32, 32], strides = [1, 1, 1]} : vector<9x32x32xbf16> to vector<1x32x32xbf16>
    %373 = vector.shape_cast %372 : vector<1x32x32xbf16> to vector<32x32xbf16>
    %cst_84 = arith.constant dense<0.000000e+00> : vector<16x32xf32>
    %374 = tpu.matmul %371, %373, %cst_84 {dimension_numbers = #tpu.dot_dimension_numbers<[1], [0], [0], [1], [0, 0, 1, 1], [], []>} : vector<16x32xbf16>, vector<32x32xbf16>, vector<16x32xf32> -> vector<16x32xf32>
    %375 = arith.addf %368, %374 : vector<16x32xf32>
    %376 = vector.extract_strided_slice %348 {offsets = [1, 1, 0], sizes = [4, 4, 32], strides = [1, 1, 1]} : vector<6x6x32xf32> to vector<4x4x32xf32>
    %377 = vector.shape_cast %376 : vector<4x4x32xf32> to vector<16x32xf32>
    %378 = arith.truncf %377 : vector<16x32xf32> to vector<16x32xbf16>
    %379 = vector.extract_strided_slice %343 {offsets = [4, 0, 0], sizes = [1, 32, 32], strides = [1, 1, 1]} : vector<9x32x32xbf16> to vector<1x32x32xbf16>
    %380 = vector.shape_cast %379 : vector<1x32x32xbf16> to vector<32x32xbf16>
    %cst_85 = arith.constant dense<0.000000e+00> : vector<16x32xf32>
    %381 = tpu.matmul %378, %380, %cst_85 {dimension_numbers = #tpu.dot_dimension_numbers<[1], [0], [0], [1], [0, 0, 1, 1], [], []>} : vector<16x32xbf16>, vector<32x32xbf16>, vector<16x32xf32> -> vector<16x32xf32>
    %382 = arith.addf %375, %381 : vector<16x32xf32>
    %383 = vector.extract_strided_slice %348 {offsets = [1, 2, 0], sizes = [4, 4, 32], strides = [1, 1, 1]} : vector<6x6x32xf32> to vector<4x4x32xf32>
    %384 = vector.shape_cast %383 : vector<4x4x32xf32> to vector<16x32xf32>
    %385 = arith.truncf %384 : vector<16x32xf32> to vector<16x32xbf16>
    %386 = vector.extract_strided_slice %343 {offsets = [5, 0, 0], sizes = [1, 32, 32], strides = [1, 1, 1]} : vector<9x32x32xbf16> to vector<1x32x32xbf16>
    %387 = vector.shape_cast %386 : vector<1x32x32xbf16> to vector<32x32xbf16>
    %cst_86 = arith.constant dense<0.000000e+00> : vector<16x32xf32>
    %388 = tpu.matmul %385, %387, %cst_86 {dimension_numbers = #tpu.dot_dimension_numbers<[1], [0], [0], [1], [0, 0, 1, 1], [], []>} : vector<16x32xbf16>, vector<32x32xbf16>, vector<16x32xf32> -> vector<16x32xf32>
    %389 = arith.addf %382, %388 : vector<16x32xf32>
    %390 = vector.extract_strided_slice %348 {offsets = [2, 0, 0], sizes = [4, 4, 32], strides = [1, 1, 1]} : vector<6x6x32xf32> to vector<4x4x32xf32>
    %391 = vector.shape_cast %390 : vector<4x4x32xf32> to vector<16x32xf32>
    %392 = arith.truncf %391 : vector<16x32xf32> to vector<16x32xbf16>
    %393 = vector.extract_strided_slice %343 {offsets = [6, 0, 0], sizes = [1, 32, 32], strides = [1, 1, 1]} : vector<9x32x32xbf16> to vector<1x32x32xbf16>
    %394 = vector.shape_cast %393 : vector<1x32x32xbf16> to vector<32x32xbf16>
    %cst_87 = arith.constant dense<0.000000e+00> : vector<16x32xf32>
    %395 = tpu.matmul %392, %394, %cst_87 {dimension_numbers = #tpu.dot_dimension_numbers<[1], [0], [0], [1], [0, 0, 1, 1], [], []>} : vector<16x32xbf16>, vector<32x32xbf16>, vector<16x32xf32> -> vector<16x32xf32>
    %396 = arith.addf %389, %395 : vector<16x32xf32>
    %397 = vector.extract_strided_slice %348 {offsets = [2, 1, 0], sizes = [4, 4, 32], strides = [1, 1, 1]} : vector<6x6x32xf32> to vector<4x4x32xf32>
    %398 = vector.shape_cast %397 : vector<4x4x32xf32> to vector<16x32xf32>
    %399 = arith.truncf %398 : vector<16x32xf32> to vector<16x32xbf16>
    %400 = vector.extract_strided_slice %343 {offsets = [7, 0, 0], sizes = [1, 32, 32], strides = [1, 1, 1]} : vector<9x32x32xbf16> to vector<1x32x32xbf16>
    %401 = vector.shape_cast %400 : vector<1x32x32xbf16> to vector<32x32xbf16>
    %cst_88 = arith.constant dense<0.000000e+00> : vector<16x32xf32>
    %402 = tpu.matmul %399, %401, %cst_88 {dimension_numbers = #tpu.dot_dimension_numbers<[1], [0], [0], [1], [0, 0, 1, 1], [], []>} : vector<16x32xbf16>, vector<32x32xbf16>, vector<16x32xf32> -> vector<16x32xf32>
    %403 = arith.addf %396, %402 : vector<16x32xf32>
    %404 = vector.extract_strided_slice %348 {offsets = [2, 2, 0], sizes = [4, 4, 32], strides = [1, 1, 1]} : vector<6x6x32xf32> to vector<4x4x32xf32>
    %405 = vector.shape_cast %404 : vector<4x4x32xf32> to vector<16x32xf32>
    %406 = arith.truncf %405 : vector<16x32xf32> to vector<16x32xbf16>
    %407 = vector.extract_strided_slice %343 {offsets = [8, 0, 0], sizes = [1, 32, 32], strides = [1, 1, 1]} : vector<9x32x32xbf16> to vector<1x32x32xbf16>
    %408 = vector.shape_cast %407 : vector<1x32x32xbf16> to vector<32x32xbf16>
    %cst_89 = arith.constant dense<0.000000e+00> : vector<16x32xf32>
    %409 = tpu.matmul %406, %408, %cst_89 {dimension_numbers = #tpu.dot_dimension_numbers<[1], [0], [0], [1], [0, 0, 1, 1], [], []>} : vector<16x32xbf16>, vector<32x32xbf16>, vector<16x32xf32> -> vector<16x32xf32>
    %410 = arith.addf %403, %409 : vector<16x32xf32>
    %411 = vector.broadcast %344 : vector<1x32xf32> to vector<16x32xf32>
    %412 = arith.addf %410, %411 : vector<16x32xf32>
    %cst_90 = arith.constant 0.000000e+00 : f32
    %413 = vector.broadcast %cst_90 : f32 to vector<16x32xf32>
    %414 = arith.maximumf %412, %413 : vector<16x32xf32>
    %415 = vector.shape_cast %342 : vector<4x4x32xf32> to vector<16x32xf32>
    %416 = arith.addf %414, %415 : vector<16x32xf32>
    %417 = arith.truncf %416 : vector<16x32xf32> to vector<16x32xbf16>
    %c0_91 = arith.constant 0 : index
    %c0_92 = arith.constant 0 : index
    %c0_93 = arith.constant 0 : index
    %418 = vector.load %arg12[%c0_91, %c0_92, %c0_93] : memref<1x16x32xbf16, #tpu.memory_space<vmem>>, vector<1x16x32xbf16>
    %419 = vector.shape_cast %418 : vector<1x16x32xbf16> to vector<16x32xbf16>
    %420 = vector.shape_cast %417 : vector<16x32xbf16> to vector<1x16x32xbf16>
    tpu.vector_store %arg12[%c0_91, %c0_92, %c0_93], %420 {strides = array<i32>} : memref<1x16x32xbf16, #tpu.memory_space<vmem>>, vector<1x16x32xbf16>,
    return
  }
  func.func @transform_0(%arg0: i32) -> (i32, i32, i32, i32) {
    %c0_i32 = arith.constant 0 : i32
    %c0_i32_0 = arith.constant 0 : i32
    %c0_i32_1 = arith.constant 0 : i32
    %c0_i32_2 = arith.constant 0 : i32
    return %arg0, %c0_i32, %c0_i32_0, %c0_i32_1 : i32, i32, i32, i32
  }
  func.func @transform_1(%arg0: i32) -> (i32, i32, i32) {
    %c0_i32 = arith.constant 0 : i32
    %c0_i32_0 = arith.constant 0 : i32
    %c0_i32_1 = arith.constant 0 : i32
    %c0_i32_2 = arith.constant 0 : i32
    return %c0_i32, %c0_i32_0, %c0_i32_1 : i32, i32, i32
  }
  func.func @transform_2(%arg0: i32) -> (i32, i32) {
    %c0_i32 = arith.constant 0 : i32
    %c0_i32_0 = arith.constant 0 : i32
    %c0_i32_1 = arith.constant 0 : i32
    return %c0_i32, %c0_i32_0 : i32, i32
  }
  func.func @transform_3(%arg0: i32) -> (i32, i32, i32) {
    %c0_i32 = arith.constant 0 : i32
    %c0_i32_0 = arith.constant 0 : i32
    %c0_i32_1 = arith.constant 0 : i32
    %c0_i32_2 = arith.constant 0 : i32
    return %c0_i32, %c0_i32_0, %c0_i32_1 : i32, i32, i32
  }
  func.func @transform_4(%arg0: i32) -> (i32, i32) {
    %c0_i32 = arith.constant 0 : i32
    %c0_i32_0 = arith.constant 0 : i32
    %c0_i32_1 = arith.constant 0 : i32
    return %c0_i32, %c0_i32_0 : i32, i32
  }
  func.func @transform_5(%arg0: i32) -> (i32, i32, i32) {
    %c0_i32 = arith.constant 0 : i32
    %c0_i32_0 = arith.constant 0 : i32
    %c0_i32_1 = arith.constant 0 : i32
    %c0_i32_2 = arith.constant 0 : i32
    return %c0_i32, %c0_i32_0, %c0_i32_1 : i32, i32, i32
  }
  func.func @transform_6(%arg0: i32) -> (i32, i32) {
    %c0_i32 = arith.constant 0 : i32
    %c0_i32_0 = arith.constant 0 : i32
    %c0_i32_1 = arith.constant 0 : i32
    return %c0_i32, %c0_i32_0 : i32, i32
  }
  func.func @transform_7(%arg0: i32) -> (i32, i32, i32) {
    %c0_i32 = arith.constant 0 : i32
    %c0_i32_0 = arith.constant 0 : i32
    %c0_i32_1 = arith.constant 0 : i32
    %c0_i32_2 = arith.constant 0 : i32
    return %c0_i32, %c0_i32_0, %c0_i32_1 : i32, i32, i32
  }
  func.func @transform_8(%arg0: i32) -> (i32, i32) {
    %c0_i32 = arith.constant 0 : i32
    %c0_i32_0 = arith.constant 0 : i32
    %c0_i32_1 = arith.constant 0 : i32
    return %c0_i32, %c0_i32_0 : i32, i32
  }
  func.func @transform_9(%arg0: i32) -> (i32, i32, i32) {
    %c0_i32 = arith.constant 0 : i32
    %c0_i32_0 = arith.constant 0 : i32
    %c0_i32_1 = arith.constant 0 : i32
    %c0_i32_2 = arith.constant 0 : i32
    return %c0_i32, %c0_i32_0, %c0_i32_1 : i32, i32, i32
  }
  func.func @transform_10(%arg0: i32) -> (i32, i32) {
    %c0_i32 = arith.constant 0 : i32
    %c0_i32_0 = arith.constant 0 : i32
    %c0_i32_1 = arith.constant 0 : i32
    return %c0_i32, %c0_i32_0 : i32, i32
  }
  func.func @transform_11(%arg0: i32) -> (i32, i32, i32) {
    %c0_i32 = arith.constant 0 : i32
    %c0_i32_0 = arith.constant 0 : i32
    %c0_i32_1 = arith.constant 0 : i32
    return %arg0, %c0_i32, %c0_i32_0 : i32, i32, i32
  }
}

</mosaic_0001>

<bundles_post_ra>
// kernel: _lambda_.1
= control target key start
LH: loop header
LB: loop body
LE: loop exit
PB: predicated region body
PF: predicated region fallthrough
CT: control target
= control target key end

     0   :  { %s9137_s17 = smov 0   ;;  %s12994_s0 = inlined_call_operand.vmem [shape: bf16[2,16,16,3], index: 0, kind: input, shape index: {}]   ;;  %s12995_s1 = inlined_call_operand.vmem [shape: bf16[9,3,4], index: 1, kind: input, shape index: {}]   ;;  %s12996_s2 = inlined_call_operand.vmem [shape: f32[1,4], index: 2, kind: input, shape index: {}]   ;;  %s12997_s3 = inlined_call_operand.vmem [shape: bf16[9,4,8], index: 3, kind: input, shape index: {}]   ;;  %s12998_s4 = inlined_call_operand.vmem [shape: f32[1,8], index: 4, kind: input, shape index: {}]   ;;  %s12999_s5 = inlined_call_operand.vmem [shape: bf16[9,8,16], index: 5, kind: input, shape index: {}]   ;;  %s13000_s6 = inlined_call_operand.vmem [shape: f32[1,16], index: 6, kind: input, shape index: {}]   ;;  %s13001_s7 = inlined_call_operand.vmem [shape: bf16[9,16,32], index: 7, kind: input, shape index: {}]   ;;  %s13002_s8 = inlined_call_operand.vmem [shape: f32[1,32], index: 8, kind: input, shape index: {}]   ;;  %s13003_s9 = inlined_call_operand.vmem [shape: bf16[9,32,32], index: 9, kind: input, shape index: {}]   ;;  %s13004_s10 = inlined_call_operand.vmem [shape: f32[1,32], index: 10, kind: input, shape index: {}]   ;;  %s13005_s11 = inlined_call_operand.vmem [shape: bf16[2,16,32], index: 11, kind: output, shape index: {}]  }
   0x1 LB: > { %s8255_s18 = sadd.s32 4294967295, %s9073_s17   ;;  %p8259_p0 = scmp.ge.s32.totalorder %s9073_s17, 1  ;;  %s9073_s17 = sphi %s9137_s17, %s21_s17  }
   0x2   : > { %p337_p1 = scmp.lt.s32.totalorder %s9073_s17, 3 }
   0x4   : > { %p338_p2 = pnand %p8259_p0, %p337_p1 }
   0x6   : > { %341 = sbr.rel (%p338_p2) target bundleno = 2875 (0xb3b), region = 64 }
   0xb   : > { %v453_v0 = vld [vmem:[%s12995_s1 + $0x2] sm:$0x3]  ;;  %vm495_vm0 = vcmask 1040384   ;;  %vm856_vm1 = vcmask 1041408   ;;  %v9075_v1 = vmov 65535   ;;  %v9076_v5 = vmov 0.0  }
   0xc   : > { %v857_v2 = vsel %vm495_vm0, 4294967295, %v9075_v1  ;;  %v452_v3 = vld [vmem:[%s12995_s1] sm:$0x3]  ;;  %v454_v4 = vld [vmem:[%s12995_s1 + $0x4] sm:$0x3]  ;;  %v496_v6 = vrot.slane %v9076_v5, 7 }
   0xd   : > { %v9156_v7 = vsel %vm856_vm1, %v857_v2, 0  ;;  %vm678_vm2 = vcmask 1046528   ;;  %vm7731_vm3 = vcmask 1044480   ;;  %p377_p3 = scmp.lt.s32.totalorder %s8255_s18, 1  ;;  %vm807_vm4 = vcmask 23552  }
   0xe   : > { %v860_v8 = vand.u32 %v9156_v7, %v453_v0  ;;  %v1000_v9 = vand.u32 %v9156_v7, %v452_v3  ;;  %v1269_v10 = vand.u32 %v9156_v7, %v454_v4  ;;  %v9162_v11 = vsel %vm495_vm0, 0.0, %v496_v6  ;;  %v456_v18 = vld [vmem:[%s12995_s1 + $0x8] sm:$0x3]  ;;  %v455_v21 = vld [vmem:[%s12995_s1 + $0x6] sm:$0x3] }
   0xf   : > { %13120 = vst [vmem:[#allocation2_spill] sm:$0xff] %v9162_v11  ;;  %v9167_v12 = vsel %vm495_vm0, %v496_v6, 0.0  ;;  %v13008_v13 = vrot.slane %v9162_v11, 1  ;;  %v680_v14 = vrot.slane %v496_v6, 1  ;;  %v9172_v15 = vsel %vm7731_vm3, %v9162_v11, 0.0  ;;  %s13405_s18 = smov (!%p377_p3, %s8255_s18), 1 }
  0x10   : > { %13121 = vst [vmem:[#allocation3_spill] sm:$0xff] %v9167_v12  ;;  %869 = vmatpush.bf16.msra.mxu0 %v860_v8  ;;  %1009 = vmatpush.bf16.msra.mxu1 %v1000_v9  ;;  %v13009_v16 = vrot.slane %v9167_v12, 1  ;;  %v9190_v20 = vpack.c.bf16 %v496_v6, %v9162_v11  ;;  %vm1091_vm5 = vcmask 1045504   ;;  %v13006_v23 = vrot.slane %v9162_v11, 2  ;;  %s8941_s29 = sshll.u32 %s13405_s18, 7  ;;  %s8942_s28 = sshll.u32 %s13405_s18, 3 }
  0x11   : > { %13122 = vst [vmem:[#allocation4_spill] sm:$0xff] %v9172_v15  ;;  %1278 = vmatpush.bf16.msra.mxu2 %v1269_v10  ;;  %v681_v17 = vsel %vm678_vm2, %v13008_v13, %v680_v14  ;;  %v1093_v24 = vrot.slane %v496_v6, 2  ;;  %v13007_v25 = vrot.slane %v9167_v12, 2  ;;  %v1534_v26 = vand.u32 %v9156_v7, %v456_v18  ;;  %s9206_s13 = scalar_lea.vmem %s12994_s0, %s8941_s29  ;;  %s386_s12 = scalar_lea.vmem %s13005_s11, %s8942_s28 }
  0x12   : > { %7741 = vst [vmem:[#allocation1] ss:$2 sm:$0xff] %v9172_v15  ;;  %v683_v19 = vsel %vm678_vm2, %v680_v14, %v13009_v16  ;;  %v1397_v28 = vand.u32 %v9156_v7, %v455_v21  ;;  %v8971_v29 = vld [vmem:[%s9206_s13] sm:$0xff]   ;;  %v9034_v39 = vld [vmem:[%s9206_s13 + $0x8] sm:$0xff]   ;;  %v9035_v0 = vld [vmem:[%s9206_s13 + $0x10] sm:$0xff]   ;;  %vm2630_vm6 = vcmask 31744  }
  0x13   : > { %13123 = vst [vmem:[#allocation5_spill] sm:$0xff] %v9190_v20  ;;  %v9195_v22 = vpack.c.bf16 %v683_v19, %v681_v17  ;;  %8280 = vmatmul.msk.bf16.vlgmr.msra.gmra.mxu1 %vm807_vm4, %v9190_v20  ;;  %v1094_v27 = vsel %vm1091_vm5, %v13006_v23, %v1093_v24  ;;  %v1096_v30 = vsel %vm1091_vm5, %v1093_v24, %v13007_v25  ;;  %v8972_v31 = vunpack.c.l.bf16 %v8971_v29 }
  0x14   : > { %1543 = vmatpush.bf16.msrb.mxu0 %v1534_v26  ;;  %v8973_v32 = vunpack.c.h.bf16 %v8971_v29  ;;  %v9218_v33 = vpack.c.bf16 %v1096_v30, %v1094_v27  ;;  %1406 = vmatpush.bf16.msra.mxu3 %v1397_v28  ;;  %v8976_v45 = vunpack.c.l.bf16 %v9034_v39  ;;  %v8977_v46 = vunpack.c.h.bf16 %v9034_v39 }
  0x15   : > { %13124 = vst [vmem:[#allocation6_spill] sm:$0xff] %v9195_v22  ;;  %8264 = vmatmul.msk.bf16.vlgmr.msra.gmra.mxu0 %vm807_vm4, %v9195_v22  ;;  %v498_v34 = vrot.slane %v8972_v31, 7  ;;  %v8980_v2 = vunpack.c.l.bf16 %v9035_v0  ;;  %v8981_v3 = vunpack.c.h.bf16 %v9035_v0  ;;  %v9036_v31 = vld [vmem:[%s9206_s13 + $0x18] sm:$0xff]   ;;  %vm4486_vm7 = vcmask 1043456  }
  0x16   : > { %13125 = vst [vmem:[#allocation7_spill] sm:$0xff] %v9218_v33  ;;  %v499_v35 = vrot.slane %v8973_v32, 7  ;;  %8296 = vmatmul.msk.bf16.vlgmr.msra.gmra.mxu2 %vm807_vm4, %v9218_v33  ;;  %v501_v54 = vrot.slane %v8976_v45, 7  ;;  %v502_v55 = vrot.slane %v8977_v46, 7  ;;  %v8985_v39 = vunpack.c.h.bf16 %v9036_v31 }
  0x17   : > { %v597_v37 = vsel %vm495_vm0, 0.0, %v498_v34  ;;  %v504_v17 = vrot.slane %v8980_v2, 7  ;;  %v505_v18 = vrot.slane %v8981_v3, 7  ;;  %vm4438_vm8 = vcmask 64512  }
  0x18   : > { %v500_v36 = vsel %vm495_vm0, %v498_v34, %v499_v35  ;;  %v614_v38 = vsel %vm495_vm0, %v499_v35, 0.0  ;;  %v684_v41 = vrot.slane %v597_v37, 1  ;;  %v1097_v44 = vrot.slane %v597_v37, 2 }
  0x19   : > { %v631_v40 = vpack.c.bf16 %v500_v36, %v597_v37  ;;  %v685_v42 = vrot.slane %v500_v36, 1  ;;  %v687_v43 = vrot.slane %v614_v38, 1  ;;  %v1098_v47 = vrot.slane %v500_v36, 2 }
  0x1a   : > { %v1100_v50 = vrot.slane %v614_v38, 2  ;;  %v503_v57 = vsel %vm495_vm0, %v501_v54, %v502_v55  ;;  %v598_v58 = vsel %vm495_vm0, 0.0, %v501_v54  ;;  %v615_v59 = vsel %vm495_vm0, %v502_v55, 0.0  ;;  %v9037_v54 = vld [vmem:[%s9206_s13 + $0x20] sm:$0xff]  }
  0x1b   : > { %8312 = vmatmul.msk.bf16.vlgmr.msra.gmra.mxu3 %vm807_vm4, %v631_v40  ;;  %v686_v48 = vsel %vm678_vm2, %v684_v41, %v685_v42  ;;  %v688_v49 = vsel %vm678_vm2, %v685_v42, %v687_v43  ;;  %v1099_v52 = vsel %vm1091_vm5, %v1097_v44, %v1098_v47  ;;  %v9243_v60 = vpack.c.bf16 %v503_v57, %v598_v58 }
  0x1c   : > { %v9229_v51 = vpack.c.bf16 %v688_v49, %v686_v48  ;;  %v1101_v53 = vsel %vm1091_vm5, %v1098_v47, %v1100_v50  ;;  %v689_v61 = vrot.slane %v598_v58, 1  ;;  %v690_v62 = vrot.slane %v503_v57, 1 }
  0x1d   : > { %v9236_v56 = vpack.c.bf16 %v1101_v53, %v1099_v52  ;;  %v692_v63 = vrot.slane %v615_v59, 1  ;;  %v1102_v1 = vrot.slane %v598_v58, 2  ;;  %v1103_v4 = vrot.slane %v503_v57, 2 }
  0x1e   : > { %v691_v5 = vsel %vm678_vm2, %v689_v61, %v690_v62  ;;  %v1105_v8 = vrot.slane %v615_v59, 2  ;;  %v506_v21 = vsel %vm495_vm0, %v504_v17, %v505_v18  ;;  %v599_v24 = vsel %vm495_vm0, 0.0, %v504_v17 }
  0x1f   : > { %v693_v6 = vsel %vm678_vm2, %v690_v62, %v692_v63  ;;  %v1104_v10 = vsel %vm1091_vm5, %v1102_v1, %v1103_v4  ;;  %v616_v26 = vsel %vm495_vm0, %v505_v18, 0.0  ;;  %v9265_v27 = vpack.c.bf16 %v506_v21, %v599_v24 }
  0x20   : > { %v9250_v9 = vpack.c.bf16 %v693_v6, %v691_v5  ;;  %v1106_v14 = vsel %vm1091_vm5, %v1103_v4, %v1105_v8  ;;  %v694_v28 = vrot.slane %v599_v24, 1  ;;  %v695_v29 = vrot.slane %v506_v21, 1 }
  0x21   : > { %v9258_v19 = vpack.c.bf16 %v1106_v14, %v1104_v10  ;;  %v697_v30 = vrot.slane %v616_v26, 1  ;;  %v1107_v32 = vrot.slane %v599_v24, 2  ;;  %v1108_v34 = vrot.slane %v506_v21, 2  ;;  %v9038_v24 = vld [vmem:[%s9206_s13 + $0x28] sm:$0xff]  }
  0x22   : > { %v696_v35 = vsel %vm678_vm2, %v694_v28, %v695_v29  ;;  %v1110_v37 = vrot.slane %v616_v26, 2  ;;  %v8984_v38 = vunpack.c.l.bf16 %v9036_v31  ;;  %v508_v44 = vrot.slane %v8985_v39, 7 }
  0x23   : > { %8281 = vmatmul.msk.bf16.gmra.mxu1 %vm807_vm4, %v631_v40  ;;  %v698_v36 = vsel %vm678_vm2, %v695_v29, %v697_v30  ;;  %v1109_v41 = vsel %vm1091_vm5, %v1107_v32, %v1108_v34  ;;  %v8988_v62 = vunpack.c.l.bf16 %v9037_v54  ;;  %v8989_v63 = vunpack.c.h.bf16 %v9037_v54 }
  0x24   : > { %v9272_v40 = vpack.c.bf16 %v698_v36, %v696_v35  ;;  %v1111_v42 = vsel %vm1091_vm5, %v1108_v34, %v1110_v37  ;;  %v507_v43 = vrot.slane %v8984_v38, 7  ;;  %v617_v48 = vsel %vm495_vm0, %v508_v44, 0.0 }
  0x25   : > { %8265 = vmatmul.msk.bf16.gmra.mxu0 %vm807_vm4, %v9229_v51  ;;  %v9280_v45 = vpack.c.bf16 %v1111_v42, %v1109_v41  ;;  %v702_v53 = vrot.slane %v617_v48, 1  ;;  %v1115_v61 = vrot.slane %v617_v48, 2  ;;  %v510_v3 = vrot.slane %v8988_v62, 7 }
  0x26   : > { %8297 = vmatmul.msk.bf16.gmra.mxu2 %vm807_vm4, %v9236_v56  ;;  %v509_v46 = vsel %vm495_vm0, %v507_v43, %v508_v44  ;;  %v600_v47 = vsel %vm495_vm0, 0.0, %v507_v43  ;;  %v511_v4 = vrot.slane %v8989_v63, 7  ;;  %v8992_v32 = vunpack.c.l.bf16 %v9038_v24 }
  0x27   : > { %v9287_v49 = vpack.c.bf16 %v509_v46, %v600_v47  ;;  %v699_v50 = vrot.slane %v600_v47, 1  ;;  %v700_v52 = vrot.slane %v509_v46, 1  ;;  %v1112_v55 = vrot.slane %v600_v47, 2 }
  0x28   : > { %v1113_v57 = vrot.slane %v509_v46, 2  ;;  %v512_v6 = vsel %vm495_vm0, %v510_v3, %v511_v4  ;;  %v601_v8 = vsel %vm495_vm0, 0.0, %v510_v3  ;;  %v618_v10 = vsel %vm495_vm0, %v511_v4, 0.0 }
  0x29   : > { %v701_v58 = vsel %vm678_vm2, %v699_v50, %v700_v52  ;;  %v703_v59 = vsel %vm678_vm2, %v700_v52, %v702_v53  ;;  %v9309_v14 = vpack.c.bf16 %v512_v6, %v601_v8  ;;  %v704_v17 = vrot.slane %v601_v8, 1  ;;  %v9039_v52 = vld [vmem:[%s9206_s13 + $0x30] sm:$0xff]  }
  0x2a   : > { %v9294_v0 = vpack.c.bf16 %v703_v59, %v701_v58  ;;  %v1114_v1 = vsel %vm1091_vm5, %v1112_v55, %v1113_v57  ;;  %v1116_v2 = vsel %vm1091_vm5, %v1113_v57, %v1115_v61  ;;  %v705_v18 = vrot.slane %v512_v6, 1 }
  0x2b   : > { %8313 = vmatmul.msk.bf16.gmra.mxu3 %vm807_vm4, %v9243_v60  ;;  %v9302_v5 = vpack.c.bf16 %v1116_v2, %v1114_v1  ;;  %v707_v21 = vrot.slane %v618_v10, 1  ;;  %v1117_v26 = vrot.slane %v601_v8, 2  ;;  %v1118_v28 = vrot.slane %v512_v6, 2 }
  0x2c   : > { %v706_v29 = vsel %vm678_vm2, %v704_v17, %v705_v18  ;;  %v1120_v31 = vrot.slane %v618_v10, 2  ;;  %v8993_v34 = vunpack.c.h.bf16 %v9038_v24  ;;  %v513_v38 = vrot.slane %v8992_v32, 7 }
  0x2d   : > { %v708_v30 = vsel %vm678_vm2, %v705_v18, %v707_v21  ;;  %v1119_v36 = vsel %vm1091_vm5, %v1117_v26, %v1118_v28  ;;  %v8996_v59 = vunpack.c.l.bf16 %v9039_v52  ;;  %v8997_v61 = vunpack.c.h.bf16 %v9039_v52  ;;  %v9040_v26 = vld [vmem:[%s9206_s13 + $0x38] sm:$0xff]  }
  0x2e   : > { %v9316_v35 = vpack.c.bf16 %v708_v30, %v706_v29  ;;  %v1121_v37 = vsel %vm1091_vm5, %v1118_v28, %v1120_v31  ;;  %v514_v39 = vrot.slane %v8993_v34, 7  ;;  %v602_v43 = vsel %vm495_vm0, 0.0, %v513_v38 }
  0x2f   : > { %v9324_v41 = vpack.c.bf16 %v1121_v37, %v1119_v36  ;;  %v709_v47 = vrot.slane %v602_v43, 1  ;;  %v1122_v53 = vrot.slane %v602_v43, 2  ;;  %v516_v2 = vrot.slane %v8996_v59, 7  ;;  %v9041_v59 = vld [vmem:[%s9206_s13 + $0x40] sm:$0xff]  }
  0x30   : > { %v515_v42 = vsel %vm495_vm0, %v513_v38, %v514_v39  ;;  %v619_v44 = vsel %vm495_vm0, %v514_v39, 0.0  ;;  %v517_v3 = vrot.slane %v8997_v61, 7  ;;  %v9000_v34 = vunpack.c.l.bf16 %v9040_v26  ;;  %v457_v39 = vld [vmem:[%s12995_s1 + $0xa] sm:$0x3] }
  0x31   : > { %v9331_v46 = vpack.c.bf16 %v515_v42, %v602_v43  ;;  %v710_v48 = vrot.slane %v515_v42, 1  ;;  %v712_v50 = vrot.slane %v619_v44, 1  ;;  %v1123_v54 = vrot.slane %v515_v42, 2 }
  0x32   : > { %v1125_v58 = vrot.slane %v619_v44, 2  ;;  %v518_v6 = vsel %vm495_vm0, %v516_v2, %v517_v3  ;;  %v603_v8 = vsel %vm495_vm0, 0.0, %v516_v2  ;;  %v620_v10 = vsel %vm495_vm0, %v517_v3, 0.0 }
  0x33   : > { %8282 = vmatmul.msk.bf16.gmra.mxu1 %vm807_vm4, %v9243_v60  ;;  %v711_v55 = vsel %vm678_vm2, %v709_v47, %v710_v48  ;;  %v713_v57 = vsel %vm678_vm2, %v710_v48, %v712_v50  ;;  %v1124_v63 = vsel %vm1091_vm5, %v1122_v53, %v1123_v54  ;;  %v9353_v17 = vpack.c.bf16 %v518_v6, %v603_v8 }
  0x34   : > { %v9338_v62 = vpack.c.bf16 %v713_v57, %v711_v55  ;;  %v1126_v1 = vsel %vm1091_vm5, %v1123_v54, %v1125_v58  ;;  %v714_v18 = vrot.slane %v603_v8, 1  ;;  %v715_v21 = vrot.slane %v518_v6, 1 }
  0x35   : > { %8266 = vmatmul.msk.bf16.gmra.mxu0 %vm807_vm4, %v9250_v9  ;;  %v9346_v4 = vpack.c.bf16 %v1126_v1, %v1124_v63  ;;  %v717_v24 = vrot.slane %v620_v10, 1  ;;  %v1127_v28 = vrot.slane %v603_v8, 2  ;;  %v1128_v29 = vrot.slane %v518_v6, 2 }
  0x36   : > { %8298 = vmatmul.msk.bf16.gmra.mxu2 %vm807_vm4, %v9258_v19  ;;  %v716_v30 = vsel %vm678_vm2, %v714_v18, %v715_v21  ;;  %v1130_v32 = vrot.slane %v620_v10, 2  ;;  %v9001_v36 = vunpack.c.h.bf16 %v9040_v26  ;;  %v519_v43 = vrot.slane %v9000_v34, 7 }
  0x37   : > { %v718_v31 = vsel %vm678_vm2, %v715_v21, %v717_v24  ;;  %v1129_v38 = vsel %vm1091_vm5, %v1127_v28, %v1128_v29  ;;  %v1669_v47 = vand.u32 %v9156_v7, %v457_v39  ;;  %v9004_v6 = vunpack.c.l.bf16 %v9041_v59 }
  0x38   : > { %v9360_v37 = vpack.c.bf16 %v718_v31, %v716_v30  ;;  %v1131_v42 = vsel %vm1091_vm5, %v1128_v29, %v1130_v32  ;;  %v520_v44 = vrot.slane %v9001_v36, 7  ;;  %v604_v52 = vsel %vm495_vm0, 0.0, %v519_v43 }
  0x39   : > { %v9372_v48 = vpack.c.bf16 %v1131_v42, %v1129_v38  ;;  %1678 = vmatpush.bf16.msrb.mxu1 %v1669_v47  ;;  %v719_v55 = vrot.slane %v604_v52, 1  ;;  %v1132_v61 = vrot.slane %v604_v52, 2  ;;  %v9005_v8 = vunpack.c.h.bf16 %v9041_v59 }
  0x3a   : > { %v521_v50 = vsel %vm495_vm0, %v519_v43, %v520_v44  ;;  %v621_v53 = vsel %vm495_vm0, %v520_v44, 0.0  ;;  %v522_v28 = vrot.slane %v9004_v6, 7  ;;  %vm6110_vm9 = vcmask 1042434  }
  0x3b   : > { %8314 = vmatmul.msk.bf16.gmra.mxu3 %vm807_vm4, %v9265_v27  ;;  %v9379_v54 = vpack.c.bf16 %v521_v50, %v604_v52  ;;  %v720_v57 = vrot.slane %v521_v50, 1  ;;  %v722_v58 = vrot.slane %v621_v53, 1  ;;  %v1133_v63 = vrot.slane %v521_v50, 2  ;;  %v9042_v52 = vld [vmem:[%s9206_s13 + $0x48] sm:$0xff]  }
  0x3c   : > { %v1135_v3 = vrot.slane %v621_v53, 2  ;;  %v523_v29 = vrot.slane %v9005_v8, 7  ;;  %v605_v34 = vsel %vm495_vm0, 0.0, %v522_v28  ;;  %vm6112_vm10 = vcmask 1043459  }
  0x3d   : > { %v721_v1 = vsel %vm678_vm2, %v719_v55, %v720_v57  ;;  %v723_v2 = vsel %vm678_vm2, %v720_v57, %v722_v58  ;;  %v1134_v24 = vsel %vm1091_vm5, %v1132_v61, %v1133_v63  ;;  %v724_v43 = vrot.slane %v605_v34, 1 }
  0x3e   : > { %v9386_v18 = vpack.c.bf16 %v723_v2, %v721_v1  ;;  %v1136_v26 = vsel %vm1091_vm5, %v1133_v63, %v1135_v3  ;;  %v524_v32 = vsel %vm495_vm0, %v522_v28, %v523_v29  ;;  %v622_v36 = vsel %vm495_vm0, %v523_v29, 0.0 }
  0x3f   : > { %v9394_v31 = vpack.c.bf16 %v1136_v26, %v1134_v24  ;;  %v9401_v39 = vpack.c.bf16 %v524_v32, %v605_v34  ;;  %v725_v44 = vrot.slane %v524_v32, 1  ;;  %v727_v47 = vrot.slane %v622_v36, 1 }
  0x40   : > { %v1137_v57 = vrot.slane %v605_v34, 2  ;;  %v1138_v58 = vrot.slane %v524_v32, 2  ;;  %v1140_v59 = vrot.slane %v622_v36, 2  ;;  %v9008_v1 = vunpack.c.l.bf16 %v9042_v52 }
  0x41   : > { %v726_v61 = vsel %vm678_vm2, %v724_v43, %v725_v44  ;;  %v728_v63 = vsel %vm678_vm2, %v725_v44, %v727_v47  ;;  %v9009_v2 = vunpack.c.h.bf16 %v9042_v52  ;;  %vm6114_vm11 = vcmask 1044484  }
  0x42   : > { %v1139_v24 = vsel %vm1091_vm5, %v1137_v57, %v1138_v58  ;;  %v1141_v26 = vsel %vm1091_vm5, %v1138_v58, %v1140_v59  ;;  %v525_v28 = vrot.slane %v9008_v1, 7  ;;  %vm6116_vm12 = vcmask 1045509  }
  0x43   : > { %8283 = vmatmul.msk.bf16.gmra.mxu1 %vm807_vm4, %v9265_v27  ;;  %v526_v29 = vrot.slane %v9009_v2, 7  ;;  %v9418_v36 = vpack.c.bf16 %v1141_v26, %v1139_v24  ;;  %vm6118_vm13 = vcmask 1046534   ;;  %vm6120_vm14 = vcmask 1047559  }
  0x44   : > { %vm6775_vm15 = vcmask 1041409  }
  0x45   : > { %8267 = vmatmul.msk.bf16.gmra.mxu0 %vm807_vm4, %v9272_v40  ;;  %v623_v43 = vsel %vm495_vm0, %v526_v29, 0.0 }
  0x46   : > { %8299 = vmatmul.msk.bf16.gmra.mxu2 %vm807_vm4, %v9280_v45  ;;  %v732_v58 = vrot.slane %v623_v43, 1 }
  0x4b   : > { %8315 = vmatmul.msk.bf16.gmra.mxu3 %vm807_vm4, %v9287_v49 }
  0x53   : > { %8284 = vmatmul.msk.bf16.gmra.mxu1 %vm807_vm4, %v9287_v49 }
  0x55   : > { %8268 = vmatmul.msk.bf16.gmra.mxu0 %vm807_vm4, %v9294_v0 }
  0x56   : > { %8300 = vmatmul.msk.bf16.gmra.mxu2 %vm807_vm4, %v9302_v5 }
  0x5b   : > { %8316 = vmatmul.msk.bf16.gmra.mxu3 %vm807_vm4, %v9309_v14 }
  0x63   : > { %8285 = vmatmul.msk.bf16.gmra.mxu1 %vm807_vm4, %v9309_v14 }
  0x65   : > { %8269 = vmatmul.msk.bf16.gmra.mxu0 %vm807_vm4, %v9316_v35 }
  0x66   : > { %8301 = vmatmul.msk.bf16.gmra.mxu2 %vm807_vm4, %v9324_v41 }
  0x6b   : > { %8317 = vmatmul.msk.bf16.gmra.mxu3 %vm807_vm4, %v9331_v46 }
  0x73   : > { %8286 = vmatmul.msk.bf16.gmra.mxu1 %vm807_vm4, %v9331_v46 }
  0x75   : > { %8270 = vmatmul.msk.bf16.gmra.mxu0 %vm807_vm4, %v9338_v62 }
  0x76   : > { %8302 = vmatmul.msk.bf16.gmra.mxu2 %vm807_vm4, %v9346_v4 }
  0x7b   : > { %8318 = vmatmul.msk.bf16.gmra.mxu3 %vm807_vm4, %v9353_v17 }
  0x83   : > { %8287 = vmatmul.msk.bf16.gmra.mxu1 %vm807_vm4, %v9353_v17 }
  0x85   : > { %8271 = vmatmul.msk.bf16.gmra.mxu0 %vm807_vm4, %v9360_v37 }
  0x86   : > { %8303 = vmatmul.msk.bf16.gmra.mxu2 %vm807_vm4, %v9372_v48 }
  0x8b   : > { %8319 = vmatmul.msk.bf16.gmra.mxu3 %vm807_vm4, %v9379_v54 }
  0x90   : > { %v1011_v10 = vpop.f32.mrf.mxu1 }
  0x92   : > { %v871_v21 = vpop.f32.mrf.mxu0 }
  0x93   : > { %v1012_v30 = vadd.f32 %v1011_v10, %v871_v21  ;;  %8288 = vmatmul.msk.bf16.gmra.mxu1 %vm807_vm4, %v9379_v54  ;;  %v9410_v10 = vpack.c.bf16 %v728_v63, %v726_v61  ;;  %v9043_v61 = vld [vmem:[%s9206_s13 + $0x50] sm:$0xff]  }
  0x94   : > { %v9012_v26 = vunpack.c.l.bf16 %v9043_v61 }
  0x95   : > { %8272 = vmatmul.msk.bf16.gmra.mxu0 %vm807_vm4, %v9386_v18 }
  0x96   : > { %8304 = vmatmul.msk.bf16.gmra.mxu2 %vm807_vm4, %v9394_v31 }
  0x98   : > { %v1013_v38 = vpop.f32.mrf.mxu1 }
  0x99   : > { %v1280_v53 = vpop.f32.mrf.mxu2 }
  0x9a   : > { %v873_v42 = vpop.f32.mrf.mxu0  ;;  %v1360_v55 = vadd.f32 %v1280_v53, %v1012_v30 }
  0x9b   : > { %v1014_v50 = vadd.f32 %v1013_v38, %v873_v42  ;;  %8320 = vmatmul.msk.bf16.gmra.mxu3 %vm807_vm4, %v9401_v39  ;;  %v527_v38 = vsel %vm495_vm0, %v525_v28, %v526_v29  ;;  %v606_v42 = vsel %vm495_vm0, 0.0, %v525_v28  ;;  %v9013_v28 = vunpack.c.h.bf16 %v9043_v61 }
  0x9c   : > { %v730_v57 = vrot.slane %v527_v38, 1  ;;  %v1142_v2 = vrot.slane %v606_v42, 2 }
  0x9e   : > { %v1408_v3 = vpop.f32.mrf.mxu3  ;;  %v733_v24 = vsel %vm678_vm2, %v730_v57, %v732_v58 }
  0x9f   : > { %v9408_v6 = vadd.f32 %v1408_v3, %v1360_v55  ;;  %v729_v55 = vrot.slane %v606_v42, 1  ;;  %v1143_v3 = vrot.slane %v527_v38, 2 }
  0xa0   : > { %v1016_v8 = vpop.f32.mrf.mxu1 }
  0xa1   : > { %v1282_v32 = vpop.f32.mrf.mxu2 }
  0xa2   : > { %v876_v21 = vpop.f32.mrf.mxu0  ;;  %v1361_v34 = vadd.f32 %v1282_v32, %v1014_v50  ;;  %v9427_v50 = vpack.c.bf16 %v527_v38, %v606_v42  ;;  %v528_v42 = vrot.slane %v9012_v26, 7 }
  0xa3   : > { %v1017_v30 = vadd.f32 %v1016_v8, %v876_v21  ;;  %8289 = vmatmul.msk.bf16.gmra.mxu1 %vm807_vm4, %v9401_v39  ;;  %v1145_v8 = vrot.slane %v623_v43, 2  ;;  %v731_v21 = vsel %vm678_vm2, %v729_v55, %v730_v57 }
  0xa4   : > { %v607_v61 = vsel %vm495_vm0, 0.0, %v528_v42 }
  0xa5   : > { %8273 = vmatmul.msk.bf16.gmra.mxu0 %vm807_vm4, %v9410_v10  ;;  %v1146_v38 = vsel %vm1091_vm5, %v1143_v3, %v1145_v8 }
  0xa6   : > { %v1410_v44 = vpop.f32.mrf.mxu3  ;;  %8305 = vmatmul.msk.bf16.gmra.mxu2 %vm807_vm4, %v9418_v36 }
  0xa7   : > { %v9425_v47 = vadd.f32 %v1410_v44, %v1361_v34  ;;  %v9436_v44 = vpack.c.bf16 %v733_v24, %v731_v21  ;;  %v734_v24 = vrot.slane %v607_v61, 1 }
  0xa8   : > { %v1018_v52 = vpop.f32.mrf.mxu1 }
  0xa9   : > { %v1285_v63 = vpop.f32.mrf.mxu2 }
  0xaa   : > { %v878_v53 = vpop.f32.mrf.mxu0  ;;  %v1362_v1 = vadd.f32 %v1285_v63, %v1017_v30  ;;  %v1144_v30 = vsel %vm1091_vm5, %v1142_v2, %v1143_v3 }
  0xab   : > { %v1019_v59 = vadd.f32 %v1018_v52, %v878_v53  ;;  %8321 = vmatmul.msk.bf16.gmra.mxu3 %vm807_vm4, %v9427_v50  ;;  %v529_v53 = vrot.slane %v9013_v28, 7  ;;  %v9444_v57 = vpack.c.bf16 %v1146_v38, %v1144_v30  ;;  %v1147_v38 = vrot.slane %v607_v61, 2 }
  0xad   : > { %v530_v58 = vsel %vm495_vm0, %v528_v42, %v529_v53 }
  0xae   : > { %v1413_v29 = vpop.f32.mrf.mxu3  ;;  %v735_v26 = vrot.slane %v530_v58, 1  ;;  %v1148_v42 = vrot.slane %v530_v58, 2 }
  0xaf   : > { %v9434_v32 = vadd.f32 %v1413_v29, %v1362_v1  ;;  %v624_v1 = vsel %vm495_vm0, %v529_v53, 0.0 }
  0xb0   : > { %v1021_v34 = vpop.f32.mrf.mxu1  ;;  %v737_v28 = vrot.slane %v624_v1, 1  ;;  %v1150_v53 = vrot.slane %v624_v1, 2 }
  0xb1   : > { %v1287_v63 = vpop.f32.mrf.mxu2 }
  0xb2   : > { %v881_v52 = vpop.f32.mrf.mxu0  ;;  %v1363_v55 = vadd.f32 %v1287_v63, %v1019_v59  ;;  %v9453_v59 = vpack.c.bf16 %v530_v58, %v607_v61  ;;  %v736_v63 = vsel %vm678_vm2, %v734_v24, %v735_v26  ;;  %v1151_v58 = vsel %vm1091_vm5, %v1148_v42, %v1150_v53 }
  0xb3   : > { %v1022_v43 = vadd.f32 %v1021_v34, %v881_v52  ;;  %8290 = vmatmul.msk.bf16.gmra.mxu1 %vm807_vm4, %v9427_v50  ;;  %v9044_v34 = vld [vmem:[%s9206_s13 + $0x58] sm:$0xff]  }
  0xb4   : > { %v9017_v23 = vunpack.c.h.bf16 %v9044_v34 }
  0xb5   : > { %8274 = vmatmul.msk.bf16.gmra.mxu0 %vm807_vm4, %v9436_v44 }
  0xb6   : > { %v1415_v2 = vpop.f32.mrf.mxu3  ;;  %8306 = vmatmul.msk.bf16.gmra.mxu2 %vm807_vm4, %v9444_v57 }
  0xb7   : > { %v9451_v3 = vadd.f32 %v1415_v2, %v1363_v55  ;;  %v738_v55 = vsel %vm678_vm2, %v735_v26, %v737_v28  ;;  %v9016_v2 = vunpack.c.l.bf16 %v9044_v34 }
  0xb8   : > { %v1023_v8 = vpop.f32.mrf.mxu1 }
  0xb9   : > { %v1290_v52 = vpop.f32.mrf.mxu2  ;;  %v531_v61 = vrot.slane %v9016_v2, 7 }
  0xba   : > { %v883_v21 = vpop.f32.mrf.mxu0  ;;  %v1364_v30 = vadd.f32 %v1290_v52, %v1022_v43  ;;  %v1149_v43 = vsel %vm1091_vm5, %v1147_v38, %v1148_v42  ;;  %v532_v52 = vrot.slane %v9017_v23, 7 }
  0xbb   : > { %v1024_v29 = vadd.f32 %v1023_v8, %v883_v21  ;;  %8322 = vmatmul.msk.bf16.gmra.mxu3 %vm807_vm4, %v9453_v59  ;;  %v9462_v8 = vpack.c.bf16 %v738_v55, %v736_v63  ;;  %v608_v28 = vsel %vm495_vm0, 0.0, %v531_v61  ;;  %v9045_v55 = vld [vmem:[%s9206_s13 + $0x60] sm:$0xff]  }
  0xbc   : > { %v533_v26 = vsel %vm495_vm0, %v531_v61, %v532_v52  ;;  %v625_v34 = vsel %vm495_vm0, %v532_v52, 0.0  ;;  %v739_v38 = vrot.slane %v608_v28, 1  ;;  %v9021_v11 = vunpack.c.h.bf16 %v9045_v55 }
  0xbd   : > { %v740_v42 = vrot.slane %v533_v26, 1  ;;  %v742_v53 = vrot.slane %v625_v34, 1  ;;  %v1155_v61 = vrot.slane %v625_v34, 2 }
  0xbe   : > { %v1418_v25 = vpop.f32.mrf.mxu3 }
  0xbf   : > { %v9460_v13 = vadd.f32 %v1418_v25, %v1364_v30  ;;  %v9470_v25 = vpack.c.bf16 %v1151_v58, %v1149_v43  ;;  %v1152_v43 = vrot.slane %v608_v28, 2  ;;  %v1153_v58 = vrot.slane %v533_v26, 2 }
  0xc0   : > { %v1026_v16 = vpop.f32.mrf.mxu1  ;;  %v741_v52 = vsel %vm678_vm2, %v739_v38, %v740_v42 }
  0xc1   : > { %v1292_v15 = vpop.f32.mrf.mxu2 }
  0xc2   : > { %v886_v21 = vpop.f32.mrf.mxu0  ;;  %v1365_v24 = vadd.f32 %v1292_v15, %v1024_v29  ;;  %v9479_v15 = vpack.c.bf16 %v533_v26, %v608_v28  ;;  %v1156_v26 = vsel %vm1091_vm5, %v1153_v58, %v1155_v61 }
  0xc3   : > { %v1027_v1 = vadd.f32 %v1026_v16, %v886_v21  ;;  %8291 = vmatmul.msk.bf16.gmra.mxu1 %vm807_vm4, %v9453_v59 }
  0xc5   : > { %8275 = vmatmul.msk.bf16.gmra.mxu0 %vm807_vm4, %v9462_v8 }
  0xc6   : > { %v1420_v30 = vpop.f32.mrf.mxu3  ;;  %8307 = vmatmul.msk.bf16.gmra.mxu2 %vm807_vm4, %v9470_v25 }
  0xc7   : > { %v9477_v16 = vadd.f32 %v1420_v30, %v1365_v24  ;;  %v743_v24 = vsel %vm678_vm2, %v740_v42, %v742_v53  ;;  %v9020_v30 = vunpack.c.l.bf16 %v9045_v55 }
  0xc8   : > { %v1028_v23 = vpop.f32.mrf.mxu1 }
  0xc9   : > { %13126 = vst [vmem:[#allocation8_spill] sm:$0xff] %v9477_v16  ;;  %v1295_v2 = vpop.f32.mrf.mxu2  ;;  %v534_v28 = vrot.slane %v9020_v30, 7 }
  0xca   : > { %v888_v29 = vpop.f32.mrf.mxu0  ;;  %v1366_v21 = vadd.f32 %v1295_v2, %v1027_v1  ;;  %v1154_v1 = vsel %vm1091_vm5, %v1152_v43, %v1153_v58  ;;  %v535_v2 = vrot.slane %v9021_v11, 7 }
  0xcb   : > { %v1029_v63 = vadd.f32 %v1028_v23, %v888_v29  ;;  %8323 = vmatmul.msk.bf16.gmra.mxu3 %vm807_vm4, %v9479_v15  ;;  %v9488_v23 = vpack.c.bf16 %v743_v24, %v741_v52  ;;  %v609_v53 = vsel %vm495_vm0, 0.0, %v534_v28  ;;  %v9046_v24 = vld [vmem:[%s9206_s13 + $0x68] sm:$0xff]  }
  0xcc   : > { %v536_v42 = vsel %vm495_vm0, %v534_v28, %v535_v2  ;;  %v626_v55 = vsel %vm495_vm0, %v535_v2, 0.0  ;;  %v744_v43 = vrot.slane %v609_v53, 1 }
  0xcd   : > { %13128 = vst [vmem:[#allocation10_spill] sm:$0xff] %v9488_v23  ;;  %v745_v58 = vrot.slane %v536_v42, 1  ;;  %v747_v61 = vrot.slane %v626_v55, 1  ;;  %v1160_v28 = vrot.slane %v626_v55, 2 }
  0xce   : > { %v1423_v12 = vpop.f32.mrf.mxu3 }
  0xcf   : > { %v9486_v33 = vadd.f32 %v1423_v12, %v1366_v21  ;;  %v9496_v12 = vpack.c.bf16 %v1156_v26, %v1154_v1  ;;  %v1157_v1 = vrot.slane %v609_v53, 2  ;;  %v1158_v26 = vrot.slane %v536_v42, 2 }
  0xd0   : > { %v1031_v22 = vpop.f32.mrf.mxu1  ;;  %v746_v2 = vsel %vm678_vm2, %v744_v43, %v745_v58 }
  0xd1   : > { %13127 = vst [vmem:[#allocation9_spill] sm:$0xff] %v9486_v33  ;;  %v1297_v20 = vpop.f32.mrf.mxu2 }
  0xd2   : > { %v891_v29 = vpop.f32.mrf.mxu0  ;;  %v1367_v38 = vadd.f32 %v1297_v20, %v1029_v63  ;;  %13129 = vst [vmem:[#allocation11_spill] sm:$0xff] %v9496_v12  ;;  %v9505_v20 = vpack.c.bf16 %v536_v42, %v609_v53  ;;  %v1161_v42 = vsel %vm1091_vm5, %v1158_v26, %v1160_v28 }
  0xd3   : > { %v1032_v34 = vadd.f32 %v1031_v22, %v891_v29  ;;  %8292 = vmatmul.msk.bf16.gmra.mxu1 %vm807_vm4, %v9479_v15 }
  0xd4   : > { %13131 = vst [vmem:[#allocation13_spill] sm:$0xff] %v9505_v20 }
  0xd5   : > { %8276 = vmatmul.msk.bf16.gmra.mxu0 %vm807_vm4, %v9488_v23 }
  0xd6   : > { %v1425_v21 = vpop.f32.mrf.mxu3  ;;  %8308 = vmatmul.msk.bf16.gmra.mxu2 %vm807_vm4, %v9496_v12 }
  0xd7   : > { %v9503_v11 = vadd.f32 %v1425_v21, %v1367_v38  ;;  %v748_v38 = vsel %vm678_vm2, %v745_v58, %v747_v61  ;;  %v9024_v21 = vunpack.c.l.bf16 %v9046_v24 }
  0xd8   : > { %v1033_v22 = vpop.f32.mrf.mxu1 }
  0xd9   : > { %13130 = vst [vmem:[#allocation12_spill] sm:$0xff] %v9503_v11  ;;  %v1300_v30 = vpop.f32.mrf.mxu2  ;;  %v9025_v11 = vunpack.c.h.bf16 %v9046_v24  ;;  %v537_v53 = vrot.slane %v9024_v21, 7 }
  0xda   : > { %v893_v63 = vpop.f32.mrf.mxu0  ;;  %v1368_v29 = vadd.f32 %v1300_v30, %v1032_v34  ;;  %v1159_v34 = vsel %vm1091_vm5, %v1157_v1, %v1158_v26 }
  0xdb   : > { %v1034_v52 = vadd.f32 %v1033_v22, %v893_v63  ;;  %8324 = vmatmul.msk.bf16.gmra.mxu3 %vm807_vm4, %v9505_v20  ;;  %v9514_v22 = vpack.c.bf16 %v748_v38, %v746_v2  ;;  %v538_v30 = vrot.slane %v9025_v11, 7  ;;  %v610_v61 = vsel %vm495_vm0, 0.0, %v537_v53  ;;  %v9047_v38 = vld [vmem:[%s9206_s13 + $0x70] sm:$0xff]  }
  0xdd   : > { %13133 = vst [vmem:[#allocation15_spill] sm:$0xff] %v9514_v22  ;;  %v539_v58 = vsel %vm495_vm0, %v537_v53, %v538_v30  ;;  %v627_v24 = vsel %vm495_vm0, %v538_v30, 0.0 }
  0xde   : > { %v1428_v12 = vpop.f32.mrf.mxu3  ;;  %v750_v1 = vrot.slane %v539_v58, 1  ;;  %v752_v28 = vrot.slane %v627_v24, 1  ;;  %v1165_v30 = vrot.slane %v627_v24, 2  ;;  %v459_v24 = vld [vmem:[%s12995_s1 + $0xe] sm:$0x3] }
  0xdf   : > { %v9512_v33 = vadd.f32 %v1428_v12, %v1368_v29  ;;  %v9522_v12 = vpack.c.bf16 %v1161_v42, %v1159_v34  ;;  %v1163_v42 = vrot.slane %v539_v58, 2 }
  0xe0   : > { %v1036_v23 = vpop.f32.mrf.mxu1 }
  0xe1   : > { %13132 = vst [vmem:[#allocation14_spill] sm:$0xff] %v9512_v33  ;;  %v1302_v16 = vpop.f32.mrf.mxu2 }
  0xe2   : > { %v896_v63 = vpop.f32.mrf.mxu0  ;;  %v1369_v43 = vadd.f32 %v1302_v16, %v1034_v52  ;;  %13134 = vst [vmem:[#allocation16_spill] sm:$0xff] %v9522_v12  ;;  %v9531_v16 = vpack.c.bf16 %v539_v58, %v610_v61  ;;  %v749_v52 = vrot.slane %v610_v61, 1 }
  0xe3   : > { %v1037_v55 = vadd.f32 %v1036_v23, %v896_v63  ;;  %8293 = vmatmul.msk.bf16.gmra.mxu1 %vm807_vm4, %v9505_v20  ;;  %v1162_v63 = vrot.slane %v610_v61, 2 }
  0xe4   : > { %13136 = vst [vmem:[#allocation18_spill] sm:$0xff] %v9531_v16  ;;  %v751_v53 = vsel %vm678_vm2, %v749_v52, %v750_v1 }
  0xe5   : > { %8277 = vmatmul.msk.bf16.gmra.mxu0 %vm807_vm4, %v9514_v22  ;;  %v1164_v52 = vsel %vm1091_vm5, %v1162_v63, %v1163_v42 }
  0xe6   : > { %v1430_v29 = vpop.f32.mrf.mxu3  ;;  %8309 = vmatmul.msk.bf16.gmra.mxu2 %vm807_vm4, %v9522_v12  ;;  %v9029_v12 = vunpack.c.h.bf16 %v9047_v38 }
  0xe7   : > { %v9529_v23 = vadd.f32 %v1430_v29, %v1369_v43  ;;  %v458_v43 = vld [vmem:[%s12995_s1 + $0xc] sm:$0x3]  ;;  %v753_v29 = vsel %vm678_vm2, %v750_v1, %v752_v28  ;;  %v1166_v1 = vsel %vm1091_vm5, %v1163_v42, %v1165_v30 }
  0xe8   : > { %v1038_v11 = vpop.f32.mrf.mxu1  ;;  %v9544_v61 = vpack.c.bf16 %v753_v29, %v751_v53  ;;  %v9556_v63 = vpack.c.bf16 %v1166_v1, %v1164_v52 }
  0xe9   : > { %13135 = vst [vmem:[#allocation17_spill] sm:$0xff] %v9529_v23  ;;  %v1305_v21 = vpop.f32.mrf.mxu2  ;;  %v9028_v23 = vunpack.c.l.bf16 %v9047_v38  ;;  %v541_v38 = vrot.slane %v9029_v12, 7 }
  0xea   : > { %v898_v26 = vpop.f32.mrf.mxu0  ;;  %v1370_v34 = vadd.f32 %v1305_v21, %v1037_v55  ;;  %13138 = vst [vmem:[#allocation20_spill] sm:$0xff] %v9544_v61 }
  0xeb   : > { %v1039_v2 = vadd.f32 %v1038_v11, %v898_v26  ;;  %8325 = vmatmul.msk.bf16.gmra.mxu3 %vm807_vm4, %v9531_v16  ;;  %v1793_v11 = vand.u32 %v9156_v7, %v458_v43  ;;  %v540_v28 = vrot.slane %v9028_v23, 7  ;;  %v1917_v43 = vand.u32 %v9156_v7, %v459_v24  ;;  %13139 = vst [vmem:[#allocation21_spill] sm:$0xff] %v9556_v63 }
  0xec   : > { %v628_v12 = vsel %vm495_vm0, %v541_v38, 0.0 }
  0xed   : > { %1802 = vmatpush.bf16.msrb.mxu2 %v1793_v11  ;;  %1926 = vmatpush.bf16.msrb.mxu3 %v1917_v43  ;;  %v542_v53 = vsel %vm495_vm0, %v540_v28, %v541_v38  ;;  %v611_v23 = vsel %vm495_vm0, 0.0, %v540_v28  ;;  %v9048_v38 = vld [vmem:[%s9206_s13 + $0x78] sm:$0xff]  }
  0xee   : > { %v1433_v26 = vpop.f32.mrf.mxu3  ;;  %v754_v52 = vrot.slane %v611_v23, 1  ;;  %v755_v24 = vrot.slane %v542_v53, 1 }
  0xef   : > { %v9542_v55 = vadd.f32 %v1433_v26, %v1370_v34  ;;  %v460_v26 = vld [vmem:[%s12995_s1 + $0x10] sm:$0x3] }
  0xf0   : > { %v1041_v58 = vpop.f32.mrf.mxu1  ;;  %v2041_v1 = vand.u32 %v9156_v7, %v460_v26 }
  0xf1   : > { %13137 = vst [vmem:[#allocation19_spill] sm:$0xff] %v9542_v55  ;;  %v1307_v11 = vpop.f32.mrf.mxu2 }
  0xf2   : > { %v901_v21 = vpop.f32.mrf.mxu0  ;;  %v1371_v34 = vadd.f32 %v1307_v11, %v1039_v2  ;;  %v9565_v2 = vpack.c.bf16 %v542_v53, %v611_v23  ;;  %2050 = vmatpush.bf16.msra.mxu0 %v2041_v1 }
  0xf3   : > { %v1042_v33 = vadd.f32 %v1041_v58, %v901_v21  ;;  %8294 = vmatmul.msk.bf16.gmra.mxu1 %vm807_vm4, %v9531_v16  ;;  %v757_v21 = vrot.slane %v628_v12, 1  ;;  %v9033_v16 = vunpack.c.h.bf16 %v9048_v38 }
  0xf5   : > { %8278 = vmatmul.msk.bf16.gmra.mxu0 %vm807_vm4, %v9544_v61  ;;  %v758_v55 = vsel %vm678_vm2, %v755_v24, %v757_v21  ;;  %v9032_v61 = vunpack.c.l.bf16 %v9048_v38 }
  0xf6   : > { %v1435_v42 = vpop.f32.mrf.mxu3  ;;  %8310 = vmatmul.msk.bf16.gmra.mxu2 %vm807_vm4, %v9556_v63  ;;  %v756_v63 = vsel %vm678_vm2, %v754_v52, %v755_v24 }
  0xf7   : > { %v9563_v30 = vadd.f32 %v1435_v42, %v1371_v34  ;;  %v1167_v34 = vrot.slane %v611_v23, 2  ;;  %v1168_v42 = vrot.slane %v542_v53, 2  ;;  %v543_v23 = vrot.slane %v9032_v61, 7 }
  0xf8   : > { %v1043_v29 = vpop.f32.mrf.mxu1 }
  0xf9   : > { %13140 = vst [vmem:[#allocation22_spill] sm:$0xff] %v9563_v30  ;;  %v1310_v43 = vpop.f32.mrf.mxu2  ;;  %v1170_v30 = vrot.slane %v628_v12, 2 }
  0xfa   : > { %v903_v58 = vpop.f32.mrf.mxu0  ;;  %v1372_v11 = vadd.f32 %v1310_v43, %v1042_v33  ;;  %v1169_v33 = vsel %vm1091_vm5, %v1167_v34, %v1168_v42 }
  0xfb   : > { %v1044_v28 = vadd.f32 %v1043_v29, %v903_v58  ;;  %8326 = vmatmul.msk.bf16.gmra.mxu3 %vm807_vm4, %v9565_v2  ;;  %v9578_v29 = vpack.c.bf16 %v758_v55, %v756_v63  ;;  %v1171_v53 = vsel %vm1091_vm5, %v1168_v42, %v1170_v30  ;;  %v9582_v58 = vrot.slane %v9033_v16, 7 }
  0xfc   : > { %v9595_v63 = vsel %vm495_vm0, 0.0, %v543_v23 }
  0xfd   : > { %v9592_v55 = vsel %vm495_vm0, %v543_v23, %v9582_v58 }
  0xfe   : > { %v1438_v22 = vpop.f32.mrf.mxu3  ;;  %v9603_v21 = vpack.c.bf16 %v9592_v55, %v9595_v63 }
  0xff   : > { %v9576_v20 = vadd.f32 %v1438_v22, %v1372_v11  ;;  %v9588_v22 = vpack.c.bf16 %v1171_v53, %v1169_v33 }
 0x100   : > { %v1046_v7 = vpop.f32.mrf.mxu1 }
 0x101   : > { %v1312_v52 = vpop.f32.mrf.mxu2 }
 0x102   : > { %v906_v26 = vpop.f32.mrf.mxu0  ;;  %v1373_v24 = vadd.f32 %v1312_v52, %v1044_v28 }
 0x103   : > { %v1047_v12 = vadd.f32 %v1046_v7, %v906_v26  ;;  %8295 = vmatmul.msk.bf16.gmra.mxu1 %vm807_vm4, %v9565_v2 }
 0x105   : > { %8279 = vmatmul.msk.bf16.gmra.mxu0 %vm807_vm4, %v9578_v29 }
 0x106   : > { %v1440_v16 = vpop.f32.mrf.mxu3  ;;  %8311 = vmatmul.msk.bf16.gmra.mxu2 %vm807_vm4, %v9588_v22 }
 0x107   : > { %v9599_v61 = vadd.f32 %v1440_v16, %v1373_v24 }
 0x108   : > { %v1048_v30 = vpop.f32.mrf.mxu1 }
 0x109   : > { %v1315_v38 = vpop.f32.mrf.mxu2 }
 0x10a   : > { %v908_v1 = vpop.f32.mrf.mxu0  ;;  %v1374_v43 = vadd.f32 %v1315_v38, %v1047_v12 }
 0x10b   : > { %v1049_v28 = vadd.f32 %v1048_v30, %v908_v1  ;;  %8327 = vmatmul.msk.bf16.gmra.mxu3 %vm807_vm4, %v9603_v21 }
 0x10e   : > { %v1443_v11 = vpop.f32.mrf.mxu3 }
 0x10f   : > { %v9607_v34 = vadd.f32 %v1443_v11, %v1374_v43 }
 0x110   : > { %v1051_v42 = vpop.f32.mrf.mxu1 }
 0x111   : > { %v1317_v33 = vpop.f32.mrf.mxu2 }
 0x112   : > { %v911_v7 = vpop.f32.mrf.mxu0  ;;  %v1375_v53 = vadd.f32 %v1317_v33, %v1049_v28 }
 0x113   : > { %v1052_v26 = vadd.f32 %v1051_v42, %v911_v7  ;;  %8344 = vmatmul.msk.bf16.vlgmr.msrb.gmra.mxu1 %vm807_vm4, %v9236_v56 }
 0x115   : > { %8328 = vmatmul.msk.bf16.vlgmr.msrb.gmra.mxu0 %vm807_vm4, %v9229_v51 }
 0x116   : > { %v1445_v23 = vpop.f32.mrf.mxu3  ;;  %8360 = vmatmul.msk.bf16.vlgmr.msrb.gmra.mxu2 %vm807_vm4, %v9243_v60 }
 0x117   : > { %v9613_v52 = vadd.f32 %v1445_v23, %v1375_v53 }
 0x118   : > { %v1053_v12 = vpop.f32.mrf.mxu1 }
 0x119   : > { %v1320_v30 = vpop.f32.mrf.mxu2 }
 0x11a   : > { %v913_v24 = vpop.f32.mrf.mxu0  ;;  %v1376_v1 = vadd.f32 %v1320_v30, %v1052_v26 }
 0x11b   : > { %v1054_v16 = vadd.f32 %v1053_v12, %v913_v24  ;;  %8376 = vmatmul.msk.bf16.vlgmr.msrb.gmra.mxu3 %vm807_vm4, %v9250_v9 }
 0x11e   : > { %v1448_v38 = vpop.f32.mrf.mxu3 }
 0x11f   : > { %v9619_v56 = vadd.f32 %v1448_v38, %v1376_v1 }
 0x120   : > { %v1056_v28 = vpop.f32.mrf.mxu1 }
 0x121   : > { %v1322_v11 = vpop.f32.mrf.mxu2 }
 0x122   : > { %v916_v43 = vpop.f32.mrf.mxu0  ;;  %v1377_v42 = vadd.f32 %v1322_v11, %v1054_v16 }
 0x123   : > { %v1057_v51 = vadd.f32 %v1056_v28, %v916_v43  ;;  %8345 = vmatmul.msk.bf16.gmra.mxu1 %vm807_vm4, %v9258_v19 }
 0x125   : > { %8329 = vmatmul.msk.bf16.gmra.mxu0 %vm807_vm4, %v9250_v9 }
 0x126   : > { %v1450_v60 = vpop.f32.mrf.mxu3  ;;  %8361 = vmatmul.msk.bf16.gmra.mxu2 %vm807_vm4, %v9265_v27 }
 0x127   : > { %v9625_v7 = vadd.f32 %v1450_v60, %v1377_v42 }
 0x128   : > { %v1058_v26 = vpop.f32.mrf.mxu1 }
 0x129   : > { %v1325_v23 = vpop.f32.mrf.mxu2 }
 0x12a   : > { %v918_v33 = vpop.f32.mrf.mxu0  ;;  %v1378_v12 = vadd.f32 %v1325_v23, %v1057_v51 }
 0x12b   : > { %v1059_v53 = vadd.f32 %v1058_v26, %v918_v33  ;;  %8377 = vmatmul.msk.bf16.gmra.mxu3 %vm807_vm4, %v9272_v40 }
 0x12e   : > { %v1453_v24 = vpop.f32.mrf.mxu3 }
 0x12f   : > { %v9631_v30 = vadd.f32 %v1453_v24, %v1378_v12 }
 0x130   : > { %v1061_v16 = vpop.f32.mrf.mxu1 }
 0x131   : > { %v1327_v38 = vpop.f32.mrf.mxu2 }
 0x132   : > { %v921_v1 = vpop.f32.mrf.mxu0  ;;  %v1379_v28 = vadd.f32 %v1327_v38, %v1059_v53 }
 0x133   : > { %v1062_v9 = vadd.f32 %v1061_v16, %v921_v1  ;;  %8346 = vmatmul.msk.bf16.gmra.mxu1 %vm807_vm4, %v9280_v45 }
 0x135   : > { %8330 = vmatmul.msk.bf16.gmra.mxu0 %vm807_vm4, %v9272_v40 }
 0x136   : > { %v1455_v27 = vpop.f32.mrf.mxu3  ;;  %8362 = vmatmul.msk.bf16.gmra.mxu2 %vm807_vm4, %v9287_v49 }
 0x137   : > { %v9637_v43 = vadd.f32 %v1455_v27, %v1379_v28 }
 0x138   : > { %v1063_v51 = vpop.f32.mrf.mxu1 }
 0x139   : > { %v1330_v60 = vpop.f32.mrf.mxu2 }
 0x13a   : > { %v923_v11 = vpop.f32.mrf.mxu0  ;;  %v1380_v26 = vadd.f32 %v1330_v60, %v1062_v9 }
 0x13b   : > { %v1064_v42 = vadd.f32 %v1063_v51, %v923_v11  ;;  %8378 = vmatmul.msk.bf16.gmra.mxu3 %vm807_vm4, %v9294_v0 }
 0x13e   : > { %v1458_v33 = vpop.f32.mrf.mxu3 }
 0x13f   : > { %v9643_v23 = vadd.f32 %v1458_v33, %v1380_v26 }
 0x140   : > { %v1066_v53 = vpop.f32.mrf.mxu1 }
 0x141   : > { %v1332_v24 = vpop.f32.mrf.mxu2 }
 0x142   : > { %v926_v12 = vpop.f32.mrf.mxu0  ;;  %v1381_v16 = vadd.f32 %v1332_v24, %v1064_v42 }
 0x143   : > { %v1067_v40 = vadd.f32 %v1066_v53, %v926_v12  ;;  %8347 = vmatmul.msk.bf16.gmra.mxu1 %vm807_vm4, %v9302_v5 }
 0x145   : > { %8331 = vmatmul.msk.bf16.gmra.mxu0 %vm807_vm4, %v9294_v0 }
 0x146   : > { %v1460_v49 = vpop.f32.mrf.mxu3  ;;  %8363 = vmatmul.msk.bf16.gmra.mxu2 %vm807_vm4, %v9309_v14 }
 0x147   : > { %v9649_v1 = vadd.f32 %v1460_v49, %v1381_v16 }
 0x148   : > { %v1068_v9 = vpop.f32.mrf.mxu1 }
 0x149   : > { %v1335_v27 = vpop.f32.mrf.mxu2 }
 0x14a   : > { %v928_v38 = vpop.f32.mrf.mxu0  ;;  %v1382_v51 = vadd.f32 %v1335_v27, %v1067_v40 }
 0x14b   : > { %v1069_v28 = vadd.f32 %v1068_v9, %v928_v38  ;;  %8379 = vmatmul.msk.bf16.gmra.mxu3 %vm807_vm4, %v9316_v35 }
 0x14e   : > { %v1463_v11 = vpop.f32.mrf.mxu3 }
 0x14f   : > { %v9655_v60 = vadd.f32 %v1463_v11, %v1382_v51 }
 0x150   : > { %v1071_v42 = vpop.f32.mrf.mxu1 }
 0x151   : > { %v1337_v33 = vpop.f32.mrf.mxu2 }
 0x152   : > { %v931_v26 = vpop.f32.mrf.mxu0  ;;  %v1383_v53 = vadd.f32 %v1337_v33, %v1069_v28 }
 0x153   : > { %v1072_v0 = vadd.f32 %v1071_v42, %v931_v26  ;;  %8348 = vmatmul.msk.bf16.gmra.mxu1 %vm807_vm4, %v9324_v41 }
 0x155   : > { %8332 = vmatmul.msk.bf16.gmra.mxu0 %vm807_vm4, %v9316_v35 }
 0x156   : > { %v1465_v14 = vpop.f32.mrf.mxu3  ;;  %8364 = vmatmul.msk.bf16.gmra.mxu2 %vm807_vm4, %v9331_v46 }
 0x157   : > { %v9661_v12 = vadd.f32 %v1465_v14, %v1383_v53 }
 0x158   : > { %v1073_v40 = vpop.f32.mrf.mxu1 }
 0x159   : > { %v1340_v49 = vpop.f32.mrf.mxu2 }
 0x15a   : > { %v933_v24 = vpop.f32.mrf.mxu0  ;;  %v1384_v9 = vadd.f32 %v1340_v49, %v1072_v0 }
 0x15b   : > { %v1074_v16 = vadd.f32 %v1073_v40, %v933_v24  ;;  %8380 = vmatmul.msk.bf16.gmra.mxu3 %vm807_vm4, %v9338_v62 }
 0x15e   : > { %v1468_v38 = vpop.f32.mrf.mxu3 }
 0x15f   : > { %v9667_v27 = vadd.f32 %v1468_v38, %v1384_v9 }
 0x160   : > { %v1076_v28 = vpop.f32.mrf.mxu1 }
 0x161   : > { %v1342_v11 = vpop.f32.mrf.mxu2 }
 0x162   : > { %v936_v51 = vpop.f32.mrf.mxu0  ;;  %v1385_v42 = vadd.f32 %v1342_v11, %v1074_v16 }
 0x163   : > { %v1077_v35 = vadd.f32 %v1076_v28, %v936_v51  ;;  %8349 = vmatmul.msk.bf16.gmra.mxu1 %vm807_vm4, %v9346_v4 }
 0x165   : > { %8333 = vmatmul.msk.bf16.gmra.mxu0 %vm807_vm4, %v9338_v62 }
 0x166   : > { %v1470_v46 = vpop.f32.mrf.mxu3  ;;  %8365 = vmatmul.msk.bf16.gmra.mxu2 %vm807_vm4, %v9353_v17 }
 0x167   : > { %v9673_v26 = vadd.f32 %v1470_v46, %v1385_v42 }
 0x168   : > { %v1078_v0 = vpop.f32.mrf.mxu1 }
 0x169   : > { %v1345_v14 = vpop.f32.mrf.mxu2 }
 0x16a   : > { %v938_v33 = vpop.f32.mrf.mxu0  ;;  %v1386_v40 = vadd.f32 %v1345_v14, %v1077_v35 }
 0x16b   : > { %v1079_v53 = vadd.f32 %v1078_v0, %v938_v33  ;;  %8381 = vmatmul.msk.bf16.gmra.mxu3 %vm807_vm4, %v9360_v37 }
 0x16e   : > { %v1473_v24 = vpop.f32.mrf.mxu3 }
 0x16f   : > { %v9679_v49 = vadd.f32 %v1473_v24, %v1386_v40 }
 0x170   : > { %v1081_v16 = vpop.f32.mrf.mxu1 }
 0x171   : > { %v1347_v38 = vpop.f32.mrf.mxu2 }
 0x172   : > { %v941_v9 = vpop.f32.mrf.mxu0  ;;  %v1387_v28 = vadd.f32 %v1347_v38, %v1079_v53 }
 0x173   : > { %v1082_v62 = vadd.f32 %v1081_v16, %v941_v9  ;;  %8350 = vmatmul.msk.bf16.gmra.mxu1 %vm807_vm4, %v9372_v48 }
 0x175   : > { %8334 = vmatmul.msk.bf16.gmra.mxu0 %vm807_vm4, %v9360_v37  ;;  %v2296_v37 = vld [vmem:[%s12997_s3 + $0x2] sm:$0x3] }
 0x176   : > { %v1475_v17 = vpop.f32.mrf.mxu3  ;;  %8366 = vmatmul.msk.bf16.gmra.mxu2 %vm807_vm4, %v9379_v54  ;;  %v2679_v24 = vsel %vm856_vm1, %v2296_v37, 0 }
 0x177   : > { %v9685_v51 = vadd.f32 %v1475_v17, %v1387_v28  ;;  %2688 = vmatpush.bf16.msra.mxu1 %v2679_v24 }
 0x178   : > { %v1083_v35 = vpop.f32.mrf.mxu1 }
 0x179   : > { %v1350_v46 = vpop.f32.mrf.mxu2 }
 0x17a   : > { %v943_v11 = vpop.f32.mrf.mxu0  ;;  %v1388_v0 = vadd.f32 %v1350_v46, %v1082_v62 }
 0x17b   : > { %v1084_v42 = vadd.f32 %v1083_v35, %v943_v11  ;;  %8382 = vmatmul.msk.bf16.gmra.mxu3 %vm807_vm4, %v9386_v18 }
 0x17e   : > { %v1478_v33 = vpop.f32.mrf.mxu3 }
 0x17f   : > { %v9691_v14 = vadd.f32 %v1478_v33, %v1388_v0 }
 0x180   : > { %v1086_v53 = vpop.f32.mrf.mxu1 }
 0x181   : > { %v1352_v16 = vpop.f32.mrf.mxu2 }
 0x182   : > { %v946_v40 = vpop.f32.mrf.mxu0  ;;  %v1389_v9 = vadd.f32 %v1352_v16, %v1084_v42 }
 0x183   : > { %v1087_v54 = vadd.f32 %v1086_v53, %v946_v40  ;;  %8351 = vmatmul.msk.bf16.gmra.mxu1 %vm807_vm4, %v9394_v31 }
 0x185   : > { %8335 = vmatmul.msk.bf16.gmra.mxu0 %vm807_vm4, %v9386_v18 }
 0x186   : > { %v1480_v62 = vpop.f32.mrf.mxu3  ;;  %8367 = vmatmul.msk.bf16.gmra.mxu2 %vm807_vm4, %v9401_v39 }
 0x187   : > { %v9701_v38 = vadd.f32 %v1480_v62, %v1389_v9 }
 0x188   : > { %v1088_v28 = vpop.f32.mrf.mxu1 }
 0x189   : > { %v1355_v11 = vpop.f32.mrf.mxu2 }
 0x18a   : > { %v948_v17 = vpop.f32.mrf.mxu0  ;;  %v1390_v46 = vadd.f32 %v1355_v11, %v1087_v54 }
 0x18b   : > { %v1089_v35 = vadd.f32 %v1088_v28, %v948_v17  ;;  %8383 = vmatmul.msk.bf16.gmra.mxu3 %vm807_vm4, %v9410_v10 }
 0x18e   : > { %v1483_v0 = vpop.f32.mrf.mxu3 }
 0x18f   : > { %v9707_v33 = vadd.f32 %v1483_v0, %v1390_v46 }
 0x190   : > { %v1680_v42 = vpop.f32.mrf.mxu1 }
 0x191   : > { %v1357_v37 = vpop.f32.mrf.mxu2 }
 0x192   : > { %v1545_v53 = vpop.f32.mrf.mxu0  ;;  %v1391_v39 = vadd.f32 %v1357_v37, %v1089_v35 }
 0x193   : > { %v1625_v18 = vadd.f32 %v1545_v53, %v9408_v6  ;;  %8352 = vmatmul.msk.bf16.gmra.mxu1 %vm807_vm4, %v9418_v36 }
 0x195   : > { %v1760_v40 = vadd.f32 %v1680_v42, %v1625_v18  ;;  %8336 = vmatmul.msk.bf16.gmra.mxu0 %vm807_vm4, %v9410_v10 }
 0x196   : > { %v1485_v24 = vpop.f32.mrf.mxu3  ;;  %8368 = vmatmul.msk.bf16.gmra.mxu2 %vm807_vm4, %v9427_v50 }
 0x197   : > { %v9714_v54 = vadd.f32 %v1485_v24, %v1391_v39 }
 0x198   : > { %v1682_v16 = vpop.f32.mrf.mxu1 }
 0x199   : > { %v1804_v6 = vpop.f32.mrf.mxu2 }
 0x19a   : > { %v1547_v9 = vpop.f32.mrf.mxu0  ;;  %v1884_v28 = vadd.f32 %v1804_v6, %v1760_v40 }
 0x19b   : > { %v1626_v62 = vadd.f32 %v1547_v9, %v9425_v47  ;;  %8384 = vmatmul.msk.bf16.gmra.mxu3 %vm807_vm4, %v9436_v44 }
 0x19d   : > { %v1761_v17 = vadd.f32 %v1682_v16, %v1626_v62 }
 0x19e   : > { %v1928_v35 = vpop.f32.mrf.mxu3 }
 0x19f   : > { %v9721_v11 = vadd.f32 %v1928_v35, %v1884_v28 }
 0x1a0   : > { %v1685_v10 = vpop.f32.mrf.mxu1 }
 0x1a1   : > { %v1806_v42 = vpop.f32.mrf.mxu2 }
 0x1a2   : > { %v1550_v46 = vpop.f32.mrf.mxu0  ;;  %v1885_v50 = vadd.f32 %v1806_v42, %v1761_v17  ;;  %v13141_v42 = vld [vmem:[#allocation8_spill] sm:$0xff] }
 0x1a3   : > { %v1627_v0 = vadd.f32 %v1550_v46, %v9434_v32  ;;  %8353 = vmatmul.msk.bf16.gmra.mxu1 %vm807_vm4, %v9444_v57 }
 0x1a5   : > { %v1762_v53 = vadd.f32 %v1685_v10, %v1627_v0  ;;  %8337 = vmatmul.msk.bf16.gmra.mxu0 %vm807_vm4, %v9436_v44 }
 0x1a6   : > { %v1930_v47 = vpop.f32.mrf.mxu3  ;;  %8369 = vmatmul.msk.bf16.gmra.mxu2 %vm807_vm4, %v9453_v59 }
 0x1a7   : > { %v9730_v18 = vadd.f32 %v1930_v47, %v1885_v50  ;;  %v13142_v47 = vld [vmem:[#allocation10_spill] sm:$0xff] }
 0x1a8   : > { %v1687_v37 = vpop.f32.mrf.mxu1 }
 0x1a9   : > { %v1809_v32 = vpop.f32.mrf.mxu2 }
 0x1aa   : > { %v1552_v39 = vpop.f32.mrf.mxu0  ;;  %v1886_v24 = vadd.f32 %v1809_v32, %v1762_v53 }
 0x1ab   : > { %v1628_v40 = vadd.f32 %v1552_v39, %v9451_v3  ;;  %8385 = vmatmul.msk.bf16.gmra.mxu3 %vm807_vm4, %v9462_v8 }
 0x1ad   : > { %v1763_v16 = vadd.f32 %v1687_v37, %v1628_v40 }
 0x1ae   : > { %v1933_v9 = vpop.f32.mrf.mxu3 }
 0x1af   : > { %v9735_v62 = vadd.f32 %v1933_v9, %v1886_v24  ;;  %v13143_v24 = vld [vmem:[#allocation9_spill] sm:$0xff]  ;;  %v13144_v9 = vld [vmem:[#allocation11_spill] sm:$0xff] }
 0x1b0   : > { %v1690_v44 = vpop.f32.mrf.mxu1 }
 0x1b1   : > { %v1811_v59 = vpop.f32.mrf.mxu2 }
 0x1b2   : > { %v1555_v6 = vpop.f32.mrf.mxu0  ;;  %v1887_v17 = vadd.f32 %v1811_v59, %v1763_v16  ;;  %v13145_v59 = vld [vmem:[#allocation13_spill] sm:$0xff] }
 0x1b3   : > { %v1629_v28 = vadd.f32 %v1555_v6, %v9460_v13  ;;  %8354 = vmatmul.msk.bf16.gmra.mxu1 %vm807_vm4, %v9470_v25 }
 0x1b5   : > { %v1764_v35 = vadd.f32 %v1690_v44, %v1629_v28  ;;  %8338 = vmatmul.msk.bf16.gmra.mxu0 %vm807_vm4, %v9462_v8 }
 0x1b6   : > { %v1935_v3 = vpop.f32.mrf.mxu3  ;;  %8370 = vmatmul.msk.bf16.gmra.mxu2 %vm807_vm4, %v9479_v15 }
 0x1b7   : > { %v9744_v10 = vadd.f32 %v1935_v3, %v1887_v17 }
 0x1b8   : > { %v1692_v46 = vpop.f32.mrf.mxu1 }
 0x1b9   : > { %v1814_v13 = vpop.f32.mrf.mxu2 }
 0x1ba   : > { %v1557_v0 = vpop.f32.mrf.mxu0  ;;  %v1888_v53 = vadd.f32 %v1814_v13, %v1764_v35  ;;  %v13147_v13 = vld [vmem:[#allocation15_spill] sm:$0xff] }
 0x1bb   : > { %v1630_v50 = vadd.f32 %v1557_v0, %v13141_v42  ;;  %8386 = vmatmul.msk.bf16.gmra.mxu3 %vm807_vm4, %v13142_v47 }
 0x1bd   : > { %v1765_v37 = vadd.f32 %v1692_v46, %v1630_v50  ;;  %v13146_v46 = vld [vmem:[#allocation12_spill] sm:$0xff] }
 0x1be   : > { %v1938_v39 = vpop.f32.mrf.mxu3 }
 0x1bf   : > { %v9749_v40 = vadd.f32 %v1938_v39, %v1888_v53 }
 0x1c0   : > { %v1695_v8 = vpop.f32.mrf.mxu1 }
 0x1c1   : > { %v1816_v15 = vpop.f32.mrf.mxu2 }
 0x1c2   : > { %v1560_v32 = vpop.f32.mrf.mxu0  ;;  %v1889_v44 = vadd.f32 %v1816_v15, %v1765_v37  ;;  %v13149_v15 = vld [vmem:[#allocation16_spill] sm:$0xff] }
 0x1c3   : > { %v1631_v16 = vadd.f32 %v1560_v32, %v13143_v24  ;;  %8355 = vmatmul.msk.bf16.gmra.mxu1 %vm807_vm4, %v13144_v9  ;;  %v13148_v32 = vld [vmem:[#allocation14_spill] sm:$0xff] }
 0x1c5   : > { %v1766_v6 = vadd.f32 %v1695_v8, %v1631_v16  ;;  %8339 = vmatmul.msk.bf16.gmra.mxu0 %vm807_vm4, %v13142_v47 }
 0x1c6   : > { %v1940_v28 = vpop.f32.mrf.mxu3  ;;  %8371 = vmatmul.msk.bf16.gmra.mxu2 %vm807_vm4, %v13145_v59  ;;  %v1523_v59 = vrot.slane %v9592_v55, 1 }
 0x1c7   : > { %v9758_v17 = vadd.f32 %v1940_v28, %v1889_v44 }
 0x1c8   : > { %v1697_v35 = vpop.f32.mrf.mxu1 }
 0x1c9   : > { %v1819_v42 = vpop.f32.mrf.mxu2 }
 0x1ca   : > { %v1562_v3 = vpop.f32.mrf.mxu0  ;;  %v1890_v50 = vadd.f32 %v1819_v42, %v1766_v6  ;;  %v1522_v6 = vrot.slane %v9595_v63, 1 }
 0x1cb   : > { %v1632_v0 = vadd.f32 %v1562_v3, %v13146_v46  ;;  %8387 = vmatmul.msk.bf16.gmra.mxu3 %vm807_vm4, %v13147_v13  ;;  %v629_v3 = vsel %vm495_vm0, %v9582_v58, 0.0  ;;  %v13150_v46 = vld [vmem:[#allocation18_spill] sm:$0xff]  ;;  %v13154_v58 = vld [vmem:[#allocation20_spill] sm:$0xff] }
 0x1cd   : > { %v1767_v53 = vadd.f32 %v1697_v35, %v1632_v0 }
 0x1ce   : > { %v1943_v37 = vpop.f32.mrf.mxu3 }
 0x1cf   : > { %v9763_v39 = vadd.f32 %v1943_v37, %v1890_v50  ;;  %v1525_v50 = vrot.slane %v629_v3, 1  ;;  %v13153_v37 = vld [vmem:[#allocation17_spill] sm:$0xff] }
 0x1d0   : > { %v1700_v47 = vpop.f32.mrf.mxu1 }
 0x1d1   : > { %v1821_v16 = vpop.f32.mrf.mxu2 }
 0x1d2   : > { %v1565_v8 = vpop.f32.mrf.mxu0  ;;  %v1891_v44 = vadd.f32 %v1821_v16, %v1767_v53 }
 0x1d3   : > { %v1633_v24 = vadd.f32 %v1565_v8, %v13148_v32  ;;  %8356 = vmatmul.msk.bf16.gmra.mxu1 %vm807_vm4, %v13149_v15  ;;  %v1526_v8 = vsel %vm678_vm2, %v1523_v59, %v1525_v50  ;;  %v1660_v50 = vrot.slane %v629_v3, 2 }
 0x1d5   : > { %v1768_v28 = vadd.f32 %v1700_v47, %v1633_v24  ;;  %8340 = vmatmul.msk.bf16.gmra.mxu0 %vm807_vm4, %v13147_v13  ;;  %v1524_v13 = vsel %vm678_vm2, %v1522_v6, %v1523_v59  ;;  %v13156_v59 = vld [vmem:[#allocation21_spill] sm:$0xff] }
 0x1d6   : > { %v1945_v35 = vpop.f32.mrf.mxu3  ;;  %8372 = vmatmul.msk.bf16.gmra.mxu2 %vm807_vm4, %v13150_v46  ;;  %v1529_v24 = vpack.c.bf16 %v1526_v8, %v1524_v13 }
 0x1d7   : > { %v9776_v0 = vadd.f32 %v1945_v35, %v1891_v44 }
 0x1d8   : > { %v9778_v42 = vpop.f32.mrf.mxu1 }
 0x1d9   : > { %13151 = vst [vmem:[#allocation8_spill] sm:$0xff] %v9776_v0  ;;  %v1824_v32 = vpop.f32.mrf.mxu2  ;;  %v13155_v0 = vld [vmem:[#allocation19_spill] sm:$0xff] }
 0x1da   : > { %13152 = vst [vmem:[#allocation10_spill] sm:$0xff] %v9778_v42  ;;  %v1567_v53 = vpop.f32.mrf.mxu0  ;;  %v1892_v16 = vadd.f32 %v1824_v32, %v1768_v28  ;;  %v13158_v32 = vld [vmem:[#allocation22_spill] sm:$0xff] }
 0x1db   : > { %v9781_v47 = vadd.f32 %v1567_v53, %v13153_v37  ;;  %8388 = vmatmul.msk.bf16.gmra.mxu3 %vm807_vm4, %v13154_v58  ;;  %v1657_v53 = vrot.slane %v9595_v63, 2  ;;  %v1658_v37 = vrot.slane %v9592_v55, 2 }
 0x1dd   : > { %v1659_v8 = vsel %vm1091_vm5, %v1657_v53, %v1658_v37 }
 0x1de   : > { %v1948_v46 = vpop.f32.mrf.mxu3 }
 0x1df   : > { %v9787_v44 = vadd.f32 %v1948_v46, %v1892_v16 }
 0x1e0   : > { %v1705_v35 = vpop.f32.mrf.mxu1 }
 0x1e1   : > { %v9792_v6 = vpop.f32.mrf.mxu2 }
 0x1e2   : > { %v1570_v42 = vpop.f32.mrf.mxu0 }
 0x1e3   : > { %v1635_v15 = vadd.f32 %v1570_v42, %v13155_v0  ;;  %8357 = vmatmul.msk.bf16.gmra.mxu1 %vm807_vm4, %v13156_v59  ;;  %v1661_v0 = vsel %vm1091_vm5, %v1658_v37, %v1660_v50 }
 0x1e4   : > { %v9806_v63 = vpack.c.bf16 %v1661_v0, %v1659_v8 }
 0x1e5   : > { %v1770_v28 = vadd.f32 %v1705_v35, %v1635_v15  ;;  %8341 = vmatmul.msk.bf16.gmra.mxu0 %vm807_vm4, %v13154_v58 }
 0x1e6   : > { %v9798_v13 = vpop.f32.mrf.mxu3  ;;  %8373 = vmatmul.msk.bf16.gmra.mxu2 %vm807_vm4, %v9565_v2  ;;  %13157 = vst [vmem:[#allocation9_spill] sm:$0xff] %v9806_v63 }
 0x1e8   : > { %v9804_v55 = vpop.f32.mrf.mxu1 }
 0x1e9   : > { %v1829_v16 = vpop.f32.mrf.mxu2 }
 0x1ea   : > { %v1572_v42 = vpop.f32.mrf.mxu0  ;;  %v1894_v58 = vadd.f32 %v1829_v16, %v1770_v28 }
 0x1eb   : > { %v9809_v15 = vadd.f32 %v1572_v42, %v13158_v32  ;;  %8389 = vmatmul.msk.bf16.gmra.mxu3 %vm807_vm4, %v9578_v29 }
 0x1ee   : > { %v1953_v3 = vpop.f32.mrf.mxu3 }
 0x1ef   : > { %v9813_v46 = vadd.f32 %v1953_v3, %v1894_v58 }
 0x1f0   : > { %v1710_v35 = vpop.f32.mrf.mxu1 }
 0x1f1   : > { %v9816_v37 = vpop.f32.mrf.mxu2 }
 0x1f2   : > { %v1575_v53 = vpop.f32.mrf.mxu0 }
 0x1f3   : > { %v1637_v2 = vadd.f32 %v1575_v53, %v9576_v20  ;;  %8358 = vmatmul.msk.bf16.gmra.mxu1 %vm807_vm4, %v9588_v22 }
 0x1f5   : > { %v1772_v50 = vadd.f32 %v1710_v35, %v1637_v2  ;;  %8342 = vmatmul.msk.bf16.gmra.mxu0 %vm807_vm4, %v9578_v29  ;;  %v13162_v2 = vld [vmem:[#allocation5_spill] sm:$0xff] }
 0x1f6   : > { %v9822_v28 = vpop.f32.mrf.mxu3  ;;  %8374 = vmatmul.msk.bf16.gmra.mxu2 %vm807_vm4, %v9603_v21 }
 0x1f8   : > { %v9826_v8 = vpop.f32.mrf.mxu1 }
 0x1f9   : > { %13159 = vst [vmem:[#allocation11_spill] sm:$0xff] %v9826_v8  ;;  %v1834_v20 = vpop.f32.mrf.mxu2 }
 0x1fa   : > { %v1577_v0 = vpop.f32.mrf.mxu0  ;;  %v1896_v32 = vadd.f32 %v1834_v20, %v1772_v50 }
 0x1fb   : > { %v9829_v42 = vadd.f32 %v1577_v0, %v9599_v61  ;;  %8390 = vmatmul.msk.bf16.gmra.mxu3 %vm807_vm4, %v1529_v24  ;;  %v2295_v0 = vld [vmem:[%s12997_s3] sm:$0x3] }
 0x1fc   : > { %v2818_v20 = vsel %vm856_vm1, %v2295_v0, 0 }
 0x1fd   : > { %2827 = vmatpush.bf16.msra.mxu2 %v2818_v20 }
 0x1fe   : > { %v1958_v16 = vpop.f32.mrf.mxu3 }
 0x1ff   : > { %v9832_v58 = vadd.f32 %v1958_v16, %v1896_v32 }
 0x200   : > { %v1715_v3 = vpop.f32.mrf.mxu1 }
 0x201   : > { %v9835_v53 = vpop.f32.mrf.mxu2 }
 0x202   : > { %v1580_v29 = vpop.f32.mrf.mxu0  ;;  %13160 = vst [vmem:[#allocation13_spill] sm:$0xff] %v9835_v53 }
 0x203   : > { %v1639_v35 = vadd.f32 %v1580_v29, %v9607_v34  ;;  %8359 = vmatmul.msk.bf16.gmra.mxu1 %vm807_vm4, %v9806_v63 }
 0x205   : > { %v1774_v21 = vadd.f32 %v1715_v3, %v1639_v35  ;;  %8343 = vmatmul.msk.bf16.gmra.mxu0 %vm807_vm4, %v1529_v24  ;;  %v13164_v3 = vld [vmem:[#allocation6_spill] sm:$0xff] }
 0x206   : > { %v9840_v61 = vpop.f32.mrf.mxu3  ;;  %8375 = vmatmul.msk.bf16.gmra.mxu2 %vm807_vm4, %v13162_v2 }
 0x207   : > { %13161 = vst [vmem:[#allocation12_spill] sm:$0xff] %v9840_v61 }
 0x208   : > { %v9844_v50 = vpop.f32.mrf.mxu1 }
 0x209   : > { %13163 = vst [vmem:[#allocation15_spill] sm:$0xff] %v9844_v50  ;;  %v1839_v16 = vpop.f32.mrf.mxu2 }
 0x20a   : > { %v1582_v34 = vpop.f32.mrf.mxu0  ;;  %v1898_v24 = vadd.f32 %v1839_v16, %v1774_v21 }
 0x20b   : > { %v9851_v32 = vadd.f32 %v1582_v34, %v9613_v52  ;;  %8391 = vmatmul.msk.bf16.gmra.mxu3 %vm807_vm4, %v13164_v3 }
 0x20e   : > { %v1963_v29 = vpop.f32.mrf.mxu3 }
 0x20f   : > { %v9855_v35 = vadd.f32 %v1963_v29, %v1898_v24 }
 0x210   : > { %v1720_v50 = vpop.f32.mrf.mxu1 }
 0x211   : > { %v9858_v63 = vpop.f32.mrf.mxu2 }
 0x212   : > { %v1585_v61 = vpop.f32.mrf.mxu0 }
 0x213   : > { %v1641_v53 = vadd.f32 %v1585_v61, %v9619_v56  ;;  %8408 = vmatmul.msk.bf16.vlgmr.msra.gmra.mxu1 %vm2630_vm6, %v13164_v3 }
 0x215   : > { %v1776_v8 = vadd.f32 %v1720_v50, %v1641_v53  ;;  %8392 = vmatmul.msk.bf16.vlgmr.msra.gmra.mxu0 %vm807_vm4, %v9258_v19 }
 0x216   : > { %v9862_v52 = vpop.f32.mrf.mxu3  ;;  %8424 = vmatmul.msk.bf16.vlgmr.msra.gmra.mxu2 %vm2630_vm6, %v13162_v2 }
 0x217   : > { %13165 = vst [vmem:[#allocation14_spill] sm:$0xff] %v9862_v52 }
 0x218   : > { %v9864_v0 = vpop.f32.mrf.mxu1 }
 0x219   : > { %13166 = vst [vmem:[#allocation18_spill] sm:$0xff] %v9864_v0  ;;  %v1844_v20 = vpop.f32.mrf.mxu2 }
 0x21a   : > { %v1587_v21 = vpop.f32.mrf.mxu0  ;;  %v1900_v16 = vadd.f32 %v1844_v20, %v1776_v8 }
 0x21b   : > { %v9867_v34 = vadd.f32 %v1587_v21, %v9625_v7 }
 0x21e   : > { %v1968_v24 = vpop.f32.mrf.mxu3 }
 0x21f   : > { %v9869_v29 = vadd.f32 %v1968_v24, %v1900_v16 }
 0x220   : > { %v1725_v56 = vpop.f32.mrf.mxu1 }
 0x221   : > { %v9872_v50 = vpop.f32.mrf.mxu2 }
 0x222   : > { %v1590_v61 = vpop.f32.mrf.mxu0 }
 0x223   : > { %v1643_v53 = vadd.f32 %v1590_v61, %v9631_v30 }
 0x225   : > { %v1778_v19 = vadd.f32 %v1725_v56, %v1643_v53  ;;  %8393 = vmatmul.msk.bf16.gmra.mxu0 %vm807_vm4, %v9280_v45 }
 0x226   : > { %v9876_v0 = vpop.f32.mrf.mxu3 }
 0x227   : > { %13167 = vst [vmem:[#allocation17_spill] sm:$0xff] %v9876_v0 }
 0x228   : > { %v9878_v52 = vpop.f32.mrf.mxu1 }
 0x229   : > { %13168 = vst [vmem:[#allocation20_spill] sm:$0xff] %v9878_v52  ;;  %v1849_v21 = vpop.f32.mrf.mxu2 }
 0x22a   : > { %v1592_v7 = vpop.f32.mrf.mxu0  ;;  %v1902_v20 = vadd.f32 %v1849_v21, %v1778_v19 }
 0x22b   : > { %v9881_v8 = vadd.f32 %v1592_v7, %v9637_v43 }
 0x22e   : > { %v1973_v16 = vpop.f32.mrf.mxu3 }
 0x22f   : > { %v9883_v24 = vadd.f32 %v1973_v16, %v1902_v20 }
 0x230   : > { %v1730_v30 = vpop.f32.mrf.mxu1 }
 0x231   : > { %v9886_v53 = vpop.f32.mrf.mxu2 }
 0x232   : > { %v1595_v61 = vpop.f32.mrf.mxu0 }
 0x233   : > { %v1645_v56 = vadd.f32 %v1595_v61, %v9643_v23 }
 0x235   : > { %v1780_v45 = vadd.f32 %v1730_v30, %v1645_v56  ;;  %8394 = vmatmul.msk.bf16.gmra.mxu0 %vm807_vm4, %v9302_v5 }
 0x236   : > { %v9890_v52 = vpop.f32.mrf.mxu3 }
 0x237   : > { %13169 = vst [vmem:[#allocation19_spill] sm:$0xff] %v9890_v52 }
 0x238   : > { %v9892_v0 = vpop.f32.mrf.mxu1 }
 0x239   : > { %13170 = vst [vmem:[#allocation21_spill] sm:$0xff] %v9892_v0  ;;  %v1854_v7 = vpop.f32.mrf.mxu2 }
 0x23a   : > { %v1597_v43 = vpop.f32.mrf.mxu0  ;;  %v1904_v21 = vadd.f32 %v1854_v7, %v1780_v45 }
 0x23b   : > { %v9895_v19 = vadd.f32 %v1597_v43, %v9649_v1 }
 0x23e   : > { %v1978_v20 = vpop.f32.mrf.mxu3 }
 0x23f   : > { %v9897_v16 = vadd.f32 %v1978_v20, %v1904_v21 }
 0x240   : > { %v1735_v23 = vpop.f32.mrf.mxu1 }
 0x241   : > { %v9900_v56 = vpop.f32.mrf.mxu2 }
 0x242   : > { %v1600_v61 = vpop.f32.mrf.mxu0 }
 0x243   : > { %v1647_v30 = vadd.f32 %v1600_v61, %v9655_v60 }
 0x245   : > { %v1782_v5 = vadd.f32 %v1735_v23, %v1647_v30  ;;  %8395 = vmatmul.msk.bf16.gmra.mxu0 %vm807_vm4, %v9324_v41 }
 0x246   : > { %v9904_v0 = vpop.f32.mrf.mxu3 }
 0x247   : > { %13171 = vst [vmem:[#allocation22_spill] sm:$0xff] %v9904_v0 }
 0x248   : > { %v9906_v52 = vpop.f32.mrf.mxu1 }
 0x249   : > { %13172 = vst [vmem:[#allocation23_spill] sm:$0xff] %v9906_v52  ;;  %v1859_v43 = vpop.f32.mrf.mxu2 }
 0x24a   : > { %v1602_v1 = vpop.f32.mrf.mxu0  ;;  %v1906_v7 = vadd.f32 %v1859_v43, %v1782_v5 }
 0x24b   : > { %v9909_v45 = vadd.f32 %v1602_v1, %v9661_v12 }
 0x24e   : > { %v1983_v21 = vpop.f32.mrf.mxu3 }
 0x24f   : > { %v9911_v20 = vadd.f32 %v1983_v21, %v1906_v7 }
 0x250   : > { %v1740_v60 = vpop.f32.mrf.mxu1 }
 0x251   : > { %v9914_v30 = vpop.f32.mrf.mxu2 }
 0x252   : > { %v1605_v61 = vpop.f32.mrf.mxu0 }
 0x253   : > { %v1649_v23 = vadd.f32 %v1605_v61, %v9667_v27 }
 0x255   : > { %v1784_v41 = vadd.f32 %v1740_v60, %v1649_v23  ;;  %8396 = vmatmul.msk.bf16.gmra.mxu0 %vm807_vm4, %v9346_v4 }
 0x256   : > { %v9918_v52 = vpop.f32.mrf.mxu3 }
 0x257   : > { %13173 = vst [vmem:[#allocation24_spill] sm:$0xff] %v9918_v52 }
 0x258   : > { %v9920_v0 = vpop.f32.mrf.mxu1 }
 0x259   : > { %13174 = vst [vmem:[#allocation25_spill] sm:$0xff] %v9920_v0  ;;  %v1864_v1 = vpop.f32.mrf.mxu2 }
 0x25a   : > { %v1607_v12 = vpop.f32.mrf.mxu0  ;;  %v1908_v43 = vadd.f32 %v1864_v1, %v1784_v41 }
 0x25b   : > { %v9923_v5 = vadd.f32 %v1607_v12, %v9673_v26 }
 0x25e   : > { %v1988_v7 = vpop.f32.mrf.mxu3 }
 0x25f   : > { %v9925_v21 = vadd.f32 %v1988_v7, %v1908_v43 }
 0x260   : > { %v1745_v27 = vpop.f32.mrf.mxu1 }
 0x261   : > { %v9928_v23 = vpop.f32.mrf.mxu2 }
 0x262   : > { %v1610_v61 = vpop.f32.mrf.mxu0 }
 0x263   : > { %v1651_v60 = vadd.f32 %v1610_v61, %v9679_v49  ;;  %v2297_v49 = vld [vmem:[%s12997_s3 + $0x4] sm:$0x3] }
 0x265   : > { %v1786_v4 = vadd.f32 %v1745_v27, %v1651_v60  ;;  %8397 = vmatmul.msk.bf16.gmra.mxu0 %vm807_vm4, %v9372_v48  ;;  %v3077_v48 = vsel %vm856_vm1, %v2297_v49, 0 }
 0x266   : > { %v9932_v0 = vpop.f32.mrf.mxu3  ;;  %3086 = vmatpush.bf16.msra.mxu3 %v3077_v48 }
 0x268   : > { %v9934_v52 = vpop.f32.mrf.mxu1 }
 0x269   : > { %v1869_v12 = vpop.f32.mrf.mxu2 }
 0x26a   : > { %v1612_v26 = vpop.f32.mrf.mxu0  ;;  %v1910_v1 = vadd.f32 %v1869_v12, %v1786_v4 }
 0x26b   : > { %v9937_v41 = vadd.f32 %v1612_v26, %v9685_v51  ;;  %v13176_v26 = vld [vmem:[#allocation7_spill] sm:$0xff] }
 0x26c   : > { %8440 = vmatmul.msk.bf16.vlgmr.msra.gmra.mxu3 %vm2630_vm6, %v13176_v26 }
 0x26e   : > { %v1993_v43 = vpop.f32.mrf.mxu3 }
 0x26f   : > { %v9942_v7 = vadd.f32 %v1993_v43, %v1910_v1 }
 0x270   : > { %v1750_v27 = vpop.f32.mrf.mxu1 }
 0x271   : > { %v9950_v60 = vpop.f32.mrf.mxu2 }
 0x272   : > { %v1615_v61 = vpop.f32.mrf.mxu0  ;;  %13175 = vst [vmem:[#allocation26_spill] sm:$0xff] %v9950_v60 }
 0x273   : > { %v1653_v51 = vadd.f32 %v1615_v61, %v9691_v14 }
 0x275   : > { %v1788_v4 = vadd.f32 %v1750_v27, %v1653_v51  ;;  %8398 = vmatmul.msk.bf16.gmra.mxu0 %vm807_vm4, %v9394_v31 }
 0x276   : > { %v9956_v12 = vpop.f32.mrf.mxu3 }
 0x278   : > { %v9958_v1 = vpop.f32.mrf.mxu1 }
 0x279   : > { %13177 = vst [vmem:[#allocation27_spill] sm:$0xff] %v9958_v1  ;;  %v1874_v14 = vpop.f32.mrf.mxu2 }
 0x27a   : > { %v1617_v43 = vpop.f32.mrf.mxu0  ;;  %v1912_v48 = vadd.f32 %v1874_v14, %v1788_v4  ;;  %v2299_v4 = vld [vmem:[%s12997_s3 + $0x8] sm:$0x3] }
 0x27b   : > { %v9961_v49 = vadd.f32 %v1617_v43, %v9701_v38  ;;  %v2298_v38 = vld [vmem:[%s12997_s3 + $0x6] sm:$0x3] }
 0x27c   : > { %v3205_v43 = vsel %vm856_vm1, %v2298_v38, 0 }
 0x27d   : > { %3214 = vmatpush.bf16.msrb.mxu0 %v3205_v43 }
 0x27e   : > { %v1998_v61 = vpop.f32.mrf.mxu3 }
 0x27f   : > { %v9963_v3 = vadd.f32 %v1998_v61, %v1912_v48 }
 0x280   : > { %v1755_v51 = vpop.f32.mrf.mxu1 }
 0x281   : > { %v9966_v2 = vpop.f32.mrf.mxu2 }
 0x282   : > { %v1620_v27 = vpop.f32.mrf.mxu0  ;;  %13178 = vst [vmem:[#allocation28_spill] sm:$0xff] %v9966_v2 }
 0x283   : > { %v1655_v31 = vadd.f32 %v1620_v27, %v9707_v33  ;;  %v3342_v33 = vsel %vm856_vm1, %v2299_v4, 0 }
 0x284   : > { %3351 = vmatpush.bf16.msrb.mxu1 %v3342_v33 }
 0x285   : > { %v1790_v60 = vadd.f32 %v1755_v51, %v1655_v31  ;;  %8399 = vmatmul.msk.bf16.gmra.mxu0 %vm807_vm4, %v9418_v36  ;;  %v9988_v31 = vld [vmem:[%s12996_s2] ss:$0 sm:$0xff] }
 0x286   : > { %v9970_v1 = vpop.f32.mrf.mxu3 }
 0x287   : > { %13179 = vst [vmem:[#allocation29_spill] sm:$0xff] %v9970_v1 }
 0x289   : > { %v1879_v36 = vpop.f32.mrf.mxu2 }
 0x28a   : > { %v1622_v14 = vpop.f32.mrf.mxu0  ;;  %v1914_v61 = vadd.f32 %v1879_v36, %v1790_v60 }
 0x28b   : > { %v9981_v48 = vadd.f32 %v1622_v14, %v9714_v54 }
 0x28d   : > { %13180 = vst [vmem:[#allocation30_spill] sm:$0xff] %v9981_v48 }
 0x28e   : > { %v2003_v27 = vpop.f32.mrf.mxu3 }
 0x28f   : > { %v9983_v51 = vadd.f32 %v2003_v27, %v1914_v61 }
 0x291   : > { %13181 = vst [vmem:[#allocation31_spill] sm:$0xff] %v9983_v51 }
 0x292   : > { %v2052_v1 = vpop.f32.mrf.mxu0 }
 0x293   : > { %v2132_v38 = vadd.f32 %v2052_v1, %v9721_v11 }
 0x295   : > { %v2167_v4 = vadd.f32 %v9988_v31, %v2132_v38  ;;  %8400 = vmatmul.msk.bf16.gmra.mxu0 %vm807_vm4, %v9444_v57 }
 0x297   : > { %v2199_v54 = vmax.f32 %v2167_v4, 0.0 }
 0x299   : > { %v2231_v43 = vpack.c.bf16 %v2199_v54, %v2199_v54 }
 0x29a   : > { %v2054_v33 = vpop.f32.mrf.mxu0 }
 0x29b   : > { %v2133_v60 = vadd.f32 %v2054_v33, %v9730_v18  ;;  %v2263_v14 = vunpack.c.l.bf16 %v2231_v43 }
 0x29d   : > { %v2168_v36 = vadd.f32 %v9988_v31, %v2133_v60  ;;  %v2337_v27 = vrot.slane %v2263_v14, 7 }
 0x29f   : > { %v2200_v61 = vmax.f32 %v2168_v36, 0.0  ;;  %v2433_v1 = vsel %vm495_vm0, 0.0, %v2337_v27 }
 0x2a0   : > { %v2510_v4 = vrot.slane %v2433_v1, 1 }
 0x2a1   : > { %v2232_v48 = vpack.c.bf16 %v2200_v61, %v2200_v61 }
 0x2a2   : > { %v2057_v51 = vpop.f32.mrf.mxu0 }
 0x2a3   : > { %v2264_v2 = vunpack.c.l.bf16 %v2232_v48  ;;  %v2134_v11 = vadd.f32 %v2057_v51, %v9735_v62  ;;  %v2909_v62 = vrot.slane %v2433_v1, 2 }
 0x2a5   : > { %v2338_v38 = vrot.slane %v2264_v2, 7  ;;  %v2169_v57 = vadd.f32 %v9988_v31, %v2134_v11  ;;  %8401 = vmatmul.msk.bf16.gmra.mxu0 %vm807_vm4, %v9470_v25 }
 0x2a7   : > { %v2449_v18 = vsel %vm495_vm0, %v2338_v38, 0.0  ;;  %v2201_v54 = vmax.f32 %v2169_v57, 0.0  ;;  %v2339_v43 = vsel %vm495_vm0, %v2337_v27, %v2338_v38 }
 0x2a8   : > { %v2513_v33 = vrot.slane %v2449_v18, 1  ;;  %v2912_v60 = vrot.slane %v2449_v18, 2  ;;  %v10003_v14 = vpack.c.bf16 %v2339_v43, %v2433_v1  ;;  %v2511_v48 = vrot.slane %v2339_v43, 1 }
 0x2a9   : > { %v2233_v51 = vpack.c.bf16 %v2201_v54, %v2201_v54  ;;  %v2910_v36 = vrot.slane %v2339_v43, 2 }
 0x2aa   : > { %v2059_v2 = vpop.f32.mrf.mxu0  ;;  %8425 = vmatmul.msk.bf16.gmra.mxu2 %vm2630_vm6, %v10003_v14  ;;  %v2512_v25 = vsel %vm678_vm2, %v2510_v4, %v2511_v48  ;;  %v2514_v61 = vsel %vm678_vm2, %v2511_v48, %v2513_v33 }
 0x2ab   : > { %v2135_v11 = vadd.f32 %v2059_v2, %v9744_v10  ;;  %v10010_v57 = vpack.c.bf16 %v2514_v61, %v2512_v25  ;;  %v2911_v27 = vsel %vm1091_vm5, %v2909_v62, %v2910_v36  ;;  %v2265_v38 = vunpack.c.l.bf16 %v2233_v51 }
 0x2ac   : > { %v2913_v18 = vsel %vm1091_vm5, %v2910_v36, %v2912_v60 }
 0x2ad   : > { %v2170_v1 = vadd.f32 %v9988_v31, %v2135_v11  ;;  %8409 = vmatmul.msk.bf16.gmra.mxu1 %vm2630_vm6, %v10010_v57  ;;  %v10017_v54 = vpack.c.bf16 %v2913_v18, %v2911_v27  ;;  %v2340_v4 = vrot.slane %v2265_v38, 7 }
 0x2af   : > { %v2202_v43 = vmax.f32 %v2170_v1, 0.0  ;;  %8441 = vmatmul.msk.bf16.gmra.mxu3 %vm2630_vm6, %v10017_v54  ;;  %v2434_v51 = vsel %vm495_vm0, 0.0, %v2340_v4 }
 0x2b0   : > { %v2515_v2 = vrot.slane %v2434_v51, 1 }
 0x2b1   : > { %v2234_v10 = vpack.c.bf16 %v2202_v43, %v2202_v43 }
 0x2b2   : > { %v2062_v33 = vpop.f32.mrf.mxu0 }
 0x2b3   : > { %v2266_v48 = vunpack.c.l.bf16 %v2234_v10  ;;  %v2136_v62 = vadd.f32 %v2062_v33, %v9749_v40  ;;  %v2914_v40 = vrot.slane %v2434_v51, 2 }
 0x2b5   : > { %v2341_v60 = vrot.slane %v2266_v48, 7  ;;  %v2171_v36 = vadd.f32 %v9988_v31, %v2136_v62  ;;  %8402 = vmatmul.msk.bf16.gmra.mxu0 %vm807_vm4, %v13144_v9 }
 0x2b7   : > { %v2450_v25 = vsel %vm495_vm0, %v2341_v60, 0.0  ;;  %v2203_v61 = vmax.f32 %v2171_v36, 0.0  ;;  %v2342_v11 = vsel %vm495_vm0, %v2340_v4, %v2341_v60 }
 0x2b8   : > { %v2518_v27 = vrot.slane %v2450_v25, 1  ;;  %v2917_v38 = vrot.slane %v2450_v25, 2  ;;  %v10028_v18 = vpack.c.bf16 %v2342_v11, %v2434_v51  ;;  %v2516_v1 = vrot.slane %v2342_v11, 1 }
 0x2b9   : > { %v2235_v43 = vpack.c.bf16 %v2203_v61, %v2203_v61  ;;  %v2915_v10 = vrot.slane %v2342_v11, 2 }
 0x2ba   : > { %v2064_v33 = vpop.f32.mrf.mxu0  ;;  %8426 = vmatmul.msk.bf16.gmra.mxu2 %vm2630_vm6, %v10028_v18  ;;  %v2517_v9 = vsel %vm678_vm2, %v2515_v2, %v2516_v1  ;;  %v2519_v48 = vsel %vm678_vm2, %v2516_v1, %v2518_v27 }
 0x2bb   : > { %v2137_v62 = vadd.f32 %v2064_v33, %v9758_v17  ;;  %v10035_v36 = vpack.c.bf16 %v2519_v48, %v2517_v9  ;;  %v2916_v4 = vsel %vm1091_vm5, %v2914_v40, %v2915_v10  ;;  %v2267_v60 = vunpack.c.l.bf16 %v2235_v43  ;;  %v13184_v33 = vld [vmem:[#allocation16_spill] sm:$0xff] }
 0x2bc   : > { %v2918_v25 = vsel %vm1091_vm5, %v2915_v10, %v2917_v38 }
 0x2bd   : > { %13182 = vst [vmem:[#allocation32_spill] sm:$0xff] %v10035_v36  ;;  %v2172_v51 = vadd.f32 %v9988_v31, %v2137_v62  ;;  %8410 = vmatmul.msk.bf16.gmra.mxu1 %vm2630_vm6, %v10035_v36  ;;  %v10042_v61 = vpack.c.bf16 %v2918_v25, %v2916_v4  ;;  %v2343_v2 = vrot.slane %v2267_v60, 7  ;;  %v13185_v36 = vld [vmem:[#allocation8_spill] sm:$0xff] }
 0x2bf   : > { %13183 = vst [vmem:[#allocation33_spill] sm:$0xff] %v10042_v61  ;;  %v2204_v11 = vmax.f32 %v2172_v51, 0.0  ;;  %8442 = vmatmul.msk.bf16.gmra.mxu3 %vm2630_vm6, %v10042_v61  ;;  %v2435_v43 = vsel %vm495_vm0, 0.0, %v2343_v2 }
 0x2c0   : > { %v2520_v9 = vrot.slane %v2435_v43, 1 }
 0x2c1   : > { %v2236_v17 = vpack.c.bf16 %v2204_v11, %v2204_v11 }
 0x2c2   : > { %v2067_v27 = vpop.f32.mrf.mxu0 }
 0x2c3   : > { %v2268_v1 = vunpack.c.l.bf16 %v2236_v17  ;;  %v2138_v40 = vadd.f32 %v2067_v27, %v9763_v39  ;;  %v2919_v39 = vrot.slane %v2435_v43, 2 }
 0x2c5   : > { %v2344_v38 = vrot.slane %v2268_v1, 7  ;;  %v2173_v10 = vadd.f32 %v9988_v31, %v2138_v40  ;;  %8403 = vmatmul.msk.bf16.gmra.mxu0 %vm807_vm4, %v13184_v33 }
 0x2c7   : > { %v2451_v48 = vsel %vm495_vm0, %v2344_v38, 0.0  ;;  %v2205_v62 = vmax.f32 %v2173_v10, 0.0  ;;  %v2345_v4 = vsel %vm495_vm0, %v2343_v2, %v2344_v38 }
 0x2c8   : > { %v2523_v60 = vrot.slane %v2451_v48, 1  ;;  %v2922_v25 = vrot.slane %v2451_v48, 2  ;;  %v10053_v51 = vpack.c.bf16 %v2345_v4, %v2435_v43  ;;  %v2521_v11 = vrot.slane %v2345_v4, 1 }
 0x2c9   : > { %v2237_v17 = vpack.c.bf16 %v2205_v62, %v2205_v62  ;;  %v2920_v27 = vrot.slane %v2345_v4, 2 }
 0x2ca   : > { %v2069_v1 = vpop.f32.mrf.mxu0  ;;  %8427 = vmatmul.msk.bf16.gmra.mxu2 %vm2630_vm6, %v10053_v51  ;;  %v2522_v40 = vsel %vm678_vm2, %v2520_v9, %v2521_v11  ;;  %v2524_v33 = vsel %vm678_vm2, %v2521_v11, %v2523_v60 }
 0x2cb   : > { %v2139_v10 = vadd.f32 %v2069_v1, %v13185_v36  ;;  %v10060_v61 = vpack.c.bf16 %v2524_v33, %v2522_v40  ;;  %v2921_v2 = vsel %vm1091_vm5, %v2919_v39, %v2920_v27  ;;  %v2269_v38 = vunpack.c.l.bf16 %v2237_v17  ;;  %v13187_v17 = vld [vmem:[#allocation10_spill] sm:$0xff] }
 0x2cc   : > { %v2923_v48 = vsel %vm1091_vm5, %v2920_v27, %v2922_v25  ;;  %v1769_v25 = vadd.f32 %v13187_v17, %v9781_v47 }
 0x2cd   : > { %v2174_v43 = vadd.f32 %v9988_v31, %v2139_v10  ;;  %8411 = vmatmul.msk.bf16.gmra.mxu1 %vm2630_vm6, %v10060_v61  ;;  %v10067_v62 = vpack.c.bf16 %v2923_v48, %v2921_v2  ;;  %v2346_v9 = vrot.slane %v2269_v38, 7 }
 0x2ce   : > { %v1893_v33 = vadd.f32 %v9792_v6, %v1769_v25 }
 0x2cf   : > { %13186 = vst [vmem:[#allocation16_spill] sm:$0xff] %v10067_v62  ;;  %v2206_v4 = vmax.f32 %v2174_v43, 0.0  ;;  %8443 = vmatmul.msk.bf16.gmra.mxu3 %vm2630_vm6, %v10067_v62  ;;  %v2436_v27 = vsel %vm495_vm0, 0.0, %v2346_v9 }
 0x2d0   : > { %v2525_v10 = vrot.slane %v2436_v27, 1 }
 0x2d1   : > { %v2238_v36 = vpack.c.bf16 %v2206_v4, %v2206_v4 }
 0x2d2   : > { %v2072_v60 = vpop.f32.mrf.mxu0 }
 0x2d3   : > { %v2270_v11 = vunpack.c.l.bf16 %v2238_v36  ;;  %v2140_v39 = vadd.f32 %v2072_v60, %v9787_v44  ;;  %v2017_v36 = vadd.f32 %v9798_v13, %v1893_v33  ;;  %v2924_v60 = vrot.slane %v2436_v27, 2 }
 0x2d5   : > { %v2347_v1 = vrot.slane %v2270_v11, 7  ;;  %v2175_v40 = vadd.f32 %v9988_v31, %v2140_v39  ;;  %8404 = vmatmul.msk.bf16.gmra.mxu0 %vm807_vm4, %v13156_v59 }
 0x2d7   : > { %v2452_v2 = vsel %vm495_vm0, %v2347_v1, 0.0  ;;  %v2207_v38 = vmax.f32 %v2175_v40, 0.0  ;;  %v2348_v48 = vsel %vm495_vm0, %v2346_v9, %v2347_v1 }
 0x2d8   : > { %v2528_v44 = vrot.slane %v2452_v2, 1  ;;  %v2927_v43 = vrot.slane %v2452_v2, 2  ;;  %v10081_v4 = vpack.c.bf16 %v2348_v48, %v2436_v27  ;;  %v2526_v47 = vrot.slane %v2348_v48, 1 }
 0x2d9   : > { %v2239_v11 = vpack.c.bf16 %v2207_v38, %v2207_v38  ;;  %v2925_v39 = vrot.slane %v2348_v48, 2 }
 0x2da   : > { %v2074_v17 = vpop.f32.mrf.mxu0  ;;  %8428 = vmatmul.msk.bf16.gmra.mxu2 %vm2630_vm6, %v10081_v4  ;;  %v2527_v6 = vsel %vm678_vm2, %v2525_v10, %v2526_v47  ;;  %v2529_v59 = vsel %vm678_vm2, %v2526_v47, %v2528_v44 }
 0x2db   : > { %v2141_v25 = vadd.f32 %v2074_v17, %v2017_v36  ;;  %v10088_v9 = vpack.c.bf16 %v2529_v59, %v2527_v6  ;;  %v2926_v1 = vsel %vm1091_vm5, %v2924_v60, %v2925_v39  ;;  %v2271_v40 = vunpack.c.l.bf16 %v2239_v11 }
 0x2dc   : > { %v2928_v2 = vsel %vm1091_vm5, %v2925_v39, %v2927_v43  ;;  %v1771_v43 = vadd.f32 %v9804_v55, %v9809_v15 }
 0x2dd   : > { %v2176_v13 = vadd.f32 %v9988_v31, %v2141_v25  ;;  %8412 = vmatmul.msk.bf16.gmra.mxu1 %vm2630_vm6, %v10088_v9  ;;  %v10095_v27 = vpack.c.bf16 %v2928_v2, %v2926_v1  ;;  %v2349_v10 = vrot.slane %v2271_v40, 7 }
 0x2de   : > { %v1895_v39 = vadd.f32 %v9816_v37, %v1771_v43 }
 0x2df   : > { %13188 = vst [vmem:[#allocation8_spill] sm:$0xff] %v10095_v27  ;;  %v2208_v33 = vmax.f32 %v2176_v13, 0.0  ;;  %8444 = vmatmul.msk.bf16.gmra.mxu3 %vm2630_vm6, %v10095_v27  ;;  %v2437_v36 = vsel %vm495_vm0, 0.0, %v2349_v10 }
 0x2e0   : > { %v2530_v17 = vrot.slane %v2437_v36, 1  ;;  %v2019_v15 = vadd.f32 %v9822_v28, %v1895_v39  ;;  %v2929_v2 = vrot.slane %v2437_v36, 2 }
 0x2e1   : > { %v2240_v38 = vpack.c.bf16 %v2208_v33, %v2208_v33 }
 0x2e2   : > { %v2077_v48 = vpop.f32.mrf.mxu0 }
 0x2e3   : > { %v2272_v44 = vunpack.c.l.bf16 %v2240_v38  ;;  %v2142_v47 = vadd.f32 %v2077_v48, %v9813_v46 }
 0x2e5   : > { %v2350_v60 = vrot.slane %v2272_v44, 7  ;;  %v2177_v11 = vadd.f32 %v9988_v31, %v2142_v47  ;;  %8405 = vmatmul.msk.bf16.gmra.mxu0 %vm807_vm4, %v9588_v22 }
 0x2e7   : > { %v2453_v6 = vsel %vm495_vm0, %v2350_v60, 0.0  ;;  %v2209_v59 = vmax.f32 %v2177_v11, 0.0  ;;  %v2351_v25 = vsel %vm495_vm0, %v2349_v10, %v2350_v60 }
 0x2e8   : > { %v2533_v46 = vrot.slane %v2453_v6, 1  ;;  %v2932_v1 = vrot.slane %v2453_v6, 2  ;;  %v10109_v40 = vpack.c.bf16 %v2351_v25, %v2437_v36  ;;  %v2531_v55 = vrot.slane %v2351_v25, 1 }
 0x2e9   : > { %v2241_v13 = vpack.c.bf16 %v2209_v59, %v2209_v59  ;;  %v2930_v33 = vrot.slane %v2351_v25, 2  ;;  %v13191_v25 = vld [vmem:[#allocation11_spill] sm:$0xff] }
 0x2ea   : > { %v2079_v38 = vpop.f32.mrf.mxu0  ;;  %8429 = vmatmul.msk.bf16.gmra.mxu2 %vm2630_vm6, %v10109_v40  ;;  %v2532_v22 = vsel %vm678_vm2, %v2530_v17, %v2531_v55  ;;  %v2534_v37 = vsel %vm678_vm2, %v2531_v55, %v2533_v46  ;;  %v1773_v46 = vadd.f32 %v13191_v25, %v9829_v42 }
 0x2eb   : > { %v2143_v48 = vadd.f32 %v2079_v38, %v2019_v15  ;;  %v10116_v10 = vpack.c.bf16 %v2534_v37, %v2532_v22  ;;  %v2931_v44 = vsel %vm1091_vm5, %v2929_v2, %v2930_v33  ;;  %v2273_v47 = vunpack.c.l.bf16 %v2241_v13  ;;  %v13192_v2 = vld [vmem:[#allocation9_spill] sm:$0xff]  ;;  %v10135_v38 = vpop.f32.mrf.mxu1  ;;  %v10137_v22 = vpop.f32.mrf.mxu2 }
 0x2ec   : > { %v2933_v43 = vsel %vm1091_vm5, %v2930_v33, %v2932_v1  ;;  %v13193_v13 = vld [vmem:[#allocation13_spill] sm:$0xff] }
 0x2ed   : > { %13189 = vst [vmem:[#allocation10_spill] sm:$0xff] %v10116_v10  ;;  %v2178_v28 = vadd.f32 %v9988_v31, %v2143_v48  ;;  %8413 = vmatmul.msk.bf16.gmra.mxu1 %vm2630_vm6, %v10116_v10  ;;  %v10123_v36 = vpack.c.bf16 %v2933_v43, %v2931_v44  ;;  %v2352_v11 = vrot.slane %v2273_v47, 7  ;;  %v1897_v33 = vadd.f32 %v13193_v13, %v1773_v46  ;;  %v10141_v44 = vpop.f32.mrf.mxu3 }
 0x2ef   : > { %13190 = vst [vmem:[#allocation34_spill] sm:$0xff] %v10123_v36  ;;  %v2210_v60 = vmax.f32 %v2178_v28, 0.0  ;;  %8445 = vmatmul.msk.bf16.gmra.mxu3 %vm2630_vm6, %v10123_v36  ;;  %v2438_v1 = vsel %vm495_vm0, 0.0, %v2352_v11 }
 0x2f0   : > { %v2535_v37 = vrot.slane %v2438_v1, 1 }
 0x2f1   : > { %v2242_v39 = vpack.c.bf16 %v2210_v60, %v2210_v60 }
 0x2f2   : > { %v2082_v17 = vpop.f32.mrf.mxu0 }
 0x2f3   : > { %v2274_v6 = vunpack.c.l.bf16 %v2242_v39  ;;  %v2144_v59 = vadd.f32 %v2082_v17, %v9832_v58  ;;  %v13194_v39 = vld [vmem:[#allocation12_spill] sm:$0xff] }
 0x2f4   : > { %v2021_v17 = vadd.f32 %v13194_v39, %v1897_v33 }
 0x2f5   : > { %v2353_v55 = vrot.slane %v2274_v6, 7  ;;  %v2179_v15 = vadd.f32 %v9988_v31, %v2144_v59  ;;  %8406 = vmatmul.msk.bf16.gmra.mxu0 %vm807_vm4, %v13192_v2  ;;  %v2934_v6 = vrot.slane %v2438_v1, 2  ;;  %v3088_v39 = vpop.f32.mrf.mxu3 }
 0x2f7   : > { %v2454_v58 = vsel %vm495_vm0, %v2353_v55, 0.0  ;;  %v2211_v48 = vmax.f32 %v2179_v15, 0.0  ;;  %v2354_v42 = vsel %vm495_vm0, %v2352_v11, %v2353_v55 }
 0x2f8   : > { %v2538_v47 = vrot.slane %v2454_v58, 1  ;;  %v2937_v43 = vrot.slane %v2454_v58, 2  ;;  %v10143_v28 = vpack.c.bf16 %v2354_v42, %v2438_v1  ;;  %v2536_v60 = vrot.slane %v2354_v42, 1 }
 0x2f9   : > { %v2243_v59 = vpack.c.bf16 %v2211_v48, %v2211_v48  ;;  %v2935_v25 = vrot.slane %v2354_v42, 2  ;;  %v2690_v48 = vpop.f32.mrf.mxu1  ;;  %v2829_v42 = vpop.f32.mrf.mxu2 }
 0x2fa   : > { %v2084_v46 = vpop.f32.mrf.mxu0  ;;  %8430 = vmatmul.msk.bf16.gmra.mxu2 %vm2630_vm6, %v10143_v28  ;;  %v2537_v15 = vsel %vm678_vm2, %v2535_v37, %v2536_v60  ;;  %v2539_v11 = vsel %vm678_vm2, %v2536_v60, %v2538_v47  ;;  %v2830_v47 = vadd.f32 %v2829_v42, %v2690_v48 }
 0x2fb   : > { %v2145_v55 = vadd.f32 %v2084_v46, %v2021_v17  ;;  %v10150_v2 = vpack.c.bf16 %v2539_v11, %v2537_v15  ;;  %v2936_v13 = vsel %vm1091_vm5, %v2934_v6, %v2935_v25  ;;  %v2275_v58 = vunpack.c.l.bf16 %v2243_v59  ;;  %v13196_v46 = vld [vmem:[#allocation15_spill] sm:$0xff] }
 0x2fc   : > { %v2938_v10 = vsel %vm1091_vm5, %v2935_v25, %v2937_v43  ;;  %v10161_v6 = vadd.f32 %v3088_v39, %v2830_v47  ;;  %v13197_v39 = vld [vmem:[#allocation14_spill] sm:$0xff] }
 0x2fd   : > { %v2180_v1 = vadd.f32 %v9988_v31, %v2145_v55  ;;  %8414 = vmatmul.msk.bf16.gmra.mxu1 %vm2630_vm6, %v10150_v2  ;;  %v10157_v33 = vpack.c.bf16 %v2938_v10, %v2936_v13  ;;  %v2355_v60 = vrot.slane %v2275_v58, 7  ;;  %v1775_v10 = vadd.f32 %v13196_v46, %v9851_v32 }
 0x2ff   : > { %13195 = vst [vmem:[#allocation11_spill] sm:$0xff] %v10157_v33  ;;  %v2212_v37 = vmax.f32 %v2180_v1, 0.0  ;;  %8446 = vmatmul.msk.bf16.gmra.mxu3 %vm2630_vm6, %v10157_v33  ;;  %v2439_v15 = vsel %vm495_vm0, 0.0, %v2355_v60  ;;  %v1899_v13 = vadd.f32 %v9858_v63, %v1775_v10 }
 0x300   : > { %v2540_v58 = vrot.slane %v2439_v15, 1 }
 0x301   : > { %v2244_v17 = vpack.c.bf16 %v2212_v37, %v2212_v37 }
 0x302   : > { %v2087_v43 = vpop.f32.mrf.mxu0 }
 0x303   : > { %v2276_v59 = vunpack.c.l.bf16 %v2244_v17  ;;  %v2146_v25 = vadd.f32 %v2087_v43, %v9855_v35  ;;  %v2023_v17 = vadd.f32 %v13197_v39, %v1899_v13  ;;  %v2939_v43 = vrot.slane %v2439_v15, 2 }
 0x305   : > { %v2356_v11 = vrot.slane %v2276_v59, 7  ;;  %v2181_v55 = vadd.f32 %v9988_v31, %v2146_v25  ;;  %8407 = vmatmul.msk.bf16.gmra.mxu0 %vm807_vm4, %v13176_v26  ;;  %vm6922_vm4 = vcmask 130048  }
 0x307   : > { %v2455_v1 = vsel %vm495_vm0, %v2356_v11, 0.0  ;;  %v2213_v48 = vmax.f32 %v2181_v55, 0.0  ;;  %v2357_v42 = vsel %vm495_vm0, %v2355_v60, %v2356_v11 }
 0x308   : > { %v2543_v35 = vrot.slane %v2455_v1, 1  ;;  %v2942_v37 = vrot.slane %v2455_v1, 2  ;;  %v10173_v47 = vpack.c.bf16 %v2357_v42, %v2439_v15  ;;  %v2541_v32 = vrot.slane %v2357_v42, 1 }
 0x309   : > { %v2245_v59 = vpack.c.bf16 %v2213_v48, %v2213_v48  ;;  %v2940_v25 = vrot.slane %v2357_v42, 2  ;;  %v2300_v42 = vld [vmem:[%s12997_s3 + $0xa] sm:$0x3] }
 0x30a   : > { %v2089_v46 = vpop.f32.mrf.mxu0  ;;  %8431 = vmatmul.msk.bf16.gmra.mxu2 %vm2630_vm6, %v10173_v47  ;;  %v2542_v63 = vsel %vm678_vm2, %v2540_v58, %v2541_v32  ;;  %v2544_v10 = vsel %vm678_vm2, %v2541_v32, %v2543_v35  ;;  %v3477_v32 = vsel %vm856_vm1, %v2300_v42, 0  ;;  %v13200_v42 = vld [vmem:[#allocation17_spill] sm:$0xff] }
 0x30b   : > { %v2147_v55 = vadd.f32 %v2089_v46, %v2023_v17  ;;  %v10180_v60 = vpack.c.bf16 %v2544_v10, %v2542_v63  ;;  %v2941_v11 = vsel %vm1091_vm5, %v2939_v43, %v2940_v25  ;;  %v2277_v1 = vunpack.c.l.bf16 %v2245_v59  ;;  %3486 = vmatpush.bf16.msrb.mxu2 %v3477_v32 }
 0x30c   : > { %v2943_v26 = vsel %vm1091_vm5, %v2940_v25, %v2942_v37 }
 0x30d   : > { %v2182_v15 = vadd.f32 %v9988_v31, %v2147_v55  ;;  %8415 = vmatmul.msk.bf16.gmra.mxu1 %vm2630_vm6, %v10180_v60  ;;  %v10187_v13 = vpack.c.bf16 %v2943_v26, %v2941_v11  ;;  %v2358_v58 = vrot.slane %v2277_v1, 7  ;;  %v13199_v26 = vld [vmem:[#allocation18_spill] sm:$0xff] }
 0x30e   : > { %v1777_v43 = vadd.f32 %v13199_v26, %v9867_v34 }
 0x30f   : > { %13198 = vst [vmem:[#allocation9_spill] sm:$0xff] %v10187_v13  ;;  %v2214_v48 = vmax.f32 %v2182_v15, 0.0  ;;  %8447 = vmatmul.msk.bf16.gmra.mxu3 %vm2630_vm6, %v10187_v13  ;;  %v2440_v59 = vsel %vm495_vm0, 0.0, %v2358_v58 }
 0x310   : > { %v1901_v63 = vadd.f32 %v9872_v50, %v1777_v43  ;;  %v2545_v10 = vrot.slane %v2440_v59, 1  ;;  %v2944_v32 = vrot.slane %v2440_v59, 2 }
 0x311   : > { %v2246_v35 = vpack.c.bf16 %v2214_v48, %v2214_v48 }
 0x312   : > { %v2092_v37 = vpop.f32.mrf.mxu0 }
 0x313   : > { %v2278_v39 = vunpack.c.l.bf16 %v2246_v35  ;;  %v2148_v17 = vadd.f32 %v2092_v37, %v9869_v29  ;;  %v2025_v35 = vadd.f32 %v13200_v42, %v1901_v63 }
 0x315   : > { %v2359_v25 = vrot.slane %v2278_v39, 7  ;;  %v2183_v46 = vadd.f32 %v9988_v31, %v2148_v17  ;;  %8456 = vmatmul.msk.bf16.vlgmr.msrb.gmra.mxu0 %vm2630_vm6, %v10003_v14 }
 0x317   : > { %v2456_v55 = vsel %vm495_vm0, %v2359_v25, 0.0  ;;  %v2215_v11 = vmax.f32 %v2183_v46, 0.0  ;;  %v2360_v1 = vsel %vm495_vm0, %v2358_v58, %v2359_v25 }
 0x318   : > { %v2548_v29 = vrot.slane %v2456_v55, 1  ;;  %v2947_v15 = vrot.slane %v2456_v55, 2  ;;  %v10205_v48 = vpack.c.bf16 %v2360_v1, %v2440_v59  ;;  %v2546_v34 = vrot.slane %v2360_v1, 1 }
 0x319   : > { %v2247_v37 = vpack.c.bf16 %v2215_v11, %v2215_v11  ;;  %v2945_v39 = vrot.slane %v2360_v1, 2  ;;  %v10223_v1 = vpop.f32.mrf.mxu1 }
 0x31a   : > { %v2094_v17 = vpop.f32.mrf.mxu0  ;;  %8432 = vmatmul.msk.bf16.gmra.mxu2 %vm2630_vm6, %v10205_v48  ;;  %v2547_v50 = vsel %vm678_vm2, %v2545_v10, %v2546_v34  ;;  %v2549_v14 = vsel %vm678_vm2, %v2546_v34, %v2548_v29  ;;  %13203 = vst [vmem:[#allocation15_spill] sm:$0xff] %v10223_v1 }
 0x31b   : > { %v2149_v26 = vadd.f32 %v2094_v17, %v2025_v35  ;;  %v10212_v58 = vpack.c.bf16 %v2549_v14, %v2547_v50  ;;  %v2946_v43 = vsel %vm1091_vm5, %v2944_v32, %v2945_v39  ;;  %v2279_v25 = vunpack.c.l.bf16 %v2247_v37 }
 0x31c   : > { %v2948_v46 = vsel %vm1091_vm5, %v2945_v39, %v2947_v15  ;;  %v13204_v15 = vld [vmem:[#allocation20_spill] sm:$0xff]  ;;  %v10229_v39 = vpop.f32.mrf.mxu2 }
 0x31d   : > { %13201 = vst [vmem:[#allocation13_spill] sm:$0xff] %v10212_v58  ;;  %v2184_v59 = vadd.f32 %v9988_v31, %v2149_v26  ;;  %8416 = vmatmul.msk.bf16.gmra.mxu1 %vm2630_vm6, %v10212_v58  ;;  %v10219_v63 = vpack.c.bf16 %v2948_v46, %v2946_v43  ;;  %v2361_v10 = vrot.slane %v2279_v25, 7  ;;  %v1779_v35 = vadd.f32 %v13204_v15, %v9881_v8 }
 0x31e   : > { %13205 = vst [vmem:[#allocation14_spill] sm:$0xff] %v10229_v39 }
 0x31f   : > { %13202 = vst [vmem:[#allocation12_spill] sm:$0xff] %v10219_v63  ;;  %v2216_v55 = vmax.f32 %v2184_v59, 0.0  ;;  %8448 = vmatmul.msk.bf16.gmra.mxu3 %vm2630_vm6, %v10219_v63  ;;  %v2441_v32 = vsel %vm495_vm0, 0.0, %v2361_v10  ;;  %v1903_v50 = vadd.f32 %v9886_v53, %v1779_v35 }
 0x320   : > { %v2550_v14 = vrot.slane %v2441_v32, 1 }
 0x321   : > { %v2248_v11 = vpack.c.bf16 %v2216_v55, %v2216_v55  ;;  %v13206_v55 = vld [vmem:[#allocation19_spill] sm:$0xff] }
 0x322   : > { %v2097_v29 = vpop.f32.mrf.mxu0 }
 0x323   : > { %v2280_v34 = vunpack.c.l.bf16 %v2248_v11  ;;  %v2150_v42 = vadd.f32 %v2097_v29, %v9883_v24  ;;  %v2027_v11 = vadd.f32 %v13206_v55, %v1903_v50  ;;  %v2949_v29 = vrot.slane %v2441_v32, 2 }
 0x325   : > { %v2362_v37 = vrot.slane %v2280_v34, 7  ;;  %v2185_v17 = vadd.f32 %v9988_v31, %v2150_v42  ;;  %8457 = vmatmul.msk.bf16.gmra.mxu0 %vm2630_vm6, %v10028_v18  ;;  %v10240_v34 = vpop.f32.mrf.mxu3 }
 0x326   : > { %13207 = vst [vmem:[#allocation18_spill] sm:$0xff] %v10240_v34 }
 0x327   : > { %v2457_v26 = vsel %vm495_vm0, %v2362_v37, 0.0  ;;  %v2217_v43 = vmax.f32 %v2185_v17, 0.0  ;;  %v2363_v24 = vsel %vm495_vm0, %v2361_v10, %v2362_v37 }
 0x328   : > { %v2553_v25 = vrot.slane %v2457_v26, 1  ;;  %v2952_v8 = vrot.slane %v2457_v26, 2  ;;  %v10237_v46 = vpack.c.bf16 %v2363_v24, %v2441_v32  ;;  %v2551_v59 = vrot.slane %v2363_v24, 1 }
 0x329   : > { %v2249_v42 = vpack.c.bf16 %v2217_v43, %v2217_v43  ;;  %v2950_v15 = vrot.slane %v2363_v24, 2 }
 0x32a   : > { %v2099_v39 = vpop.f32.mrf.mxu0  ;;  %v2695_v53 = vpop.f32.mrf.mxu1  ;;  %8433 = vmatmul.msk.bf16.gmra.mxu2 %vm2630_vm6, %v10237_v46  ;;  %v2552_v35 = vsel %vm678_vm2, %v2550_v14, %v2551_v59  ;;  %v2554_v10 = vsel %vm678_vm2, %v2551_v59, %v2553_v25 }
 0x32b   : > { %v2151_v37 = vadd.f32 %v2099_v39, %v2027_v11  ;;  %v10246_v17 = vpack.c.bf16 %v2554_v10, %v2552_v35  ;;  %v2951_v26 = vsel %vm1091_vm5, %v2949_v29, %v2950_v15  ;;  %v2281_v50 = vunpack.c.l.bf16 %v2249_v42  ;;  %v13210_v35 = vld [vmem:[#allocation21_spill] sm:$0xff] }
 0x32c   : > { %v2953_v32 = vsel %vm1091_vm5, %v2950_v15, %v2952_v8  ;;  %v1781_v10 = vadd.f32 %v13210_v35, %v9895_v19 }
 0x32d   : > { %13208 = vst [vmem:[#allocation17_spill] sm:$0xff] %v10246_v17  ;;  %v2186_v43 = vadd.f32 %v9988_v31, %v2151_v37  ;;  %8417 = vmatmul.msk.bf16.gmra.mxu1 %vm2630_vm6, %v10246_v17  ;;  %v2834_v24 = vpop.f32.mrf.mxu2  ;;  %v10253_v55 = vpack.c.bf16 %v2953_v32, %v2951_v26  ;;  %v2364_v39 = vrot.slane %v2281_v50, 7 }
 0x32e   : > { %v2835_v34 = vadd.f32 %v2834_v24, %v2695_v53  ;;  %v1905_v50 = vadd.f32 %v9900_v56, %v1781_v10 }
 0x32f   : > { %13209 = vst [vmem:[#allocation20_spill] sm:$0xff] %v10253_v55  ;;  %v2218_v14 = vmax.f32 %v2186_v43, 0.0  ;;  %8449 = vmatmul.msk.bf16.gmra.mxu3 %vm2630_vm6, %v10253_v55  ;;  %v2442_v37 = vsel %vm495_vm0, 0.0, %v2364_v39 }
 0x330   : > { %v2954_v1 = vrot.slane %v2442_v37, 2 }
 0x331   : > { %v2250_v25 = vpack.c.bf16 %v2218_v14, %v2218_v14 }
 0x332   : > { %v3093_v59 = vpop.f32.mrf.mxu3  ;;  %v2102_v11 = vpop.f32.mrf.mxu0 }
 0x333   : > { %v2282_v29 = vunpack.c.l.bf16 %v2250_v25  ;;  %v10257_v42 = vadd.f32 %v3093_v59, %v2835_v34  ;;  %v2152_v8 = vadd.f32 %v2102_v11, %v9897_v16  ;;  %v2697_v15 = vpop.f32.mrf.mxu1  ;;  %v2555_v34 = vrot.slane %v2442_v37, 1 }
 0x335   : > { %v2365_v53 = vrot.slane %v2282_v29, 7  ;;  %v2187_v26 = vadd.f32 %v9988_v31, %v2152_v8  ;;  %v2836_v32 = vpop.f32.mrf.mxu2  ;;  %8458 = vmatmul.msk.bf16.gmra.mxu0 %vm2630_vm6, %v10053_v51  ;;  %v13211_v29 = vld [vmem:[#allocation22_spill] sm:$0xff] }
 0x336   : > { %v2837_v43 = vadd.f32 %v2836_v32, %v2697_v15  ;;  %v2029_v8 = vadd.f32 %v13211_v29, %v1905_v50 }
 0x337   : > { %v2458_v24 = vsel %vm495_vm0, %v2365_v53, 0.0  ;;  %v2219_v16 = vmax.f32 %v2187_v26, 0.0  ;;  %v2366_v14 = vsel %vm495_vm0, %v2364_v39, %v2365_v53 }
 0x338   : > { %v2558_v25 = vrot.slane %v2458_v24, 1  ;;  %v2957_v19 = vrot.slane %v2458_v24, 2  ;;  %v10269_v59 = vpack.c.bf16 %v2366_v14, %v2442_v37  ;;  %v2556_v11 = vrot.slane %v2366_v14, 1 }
 0x339   : > { %v2251_v35 = vpack.c.bf16 %v2219_v16, %v2219_v16  ;;  %v2955_v17 = vrot.slane %v2366_v14, 2 }
 0x33a   : > { %v3095_v55 = vpop.f32.mrf.mxu3  ;;  %v2104_v58 = vpop.f32.mrf.mxu0  ;;  %8434 = vmatmul.msk.bf16.gmra.mxu2 %vm2630_vm6, %v10269_v59  ;;  %v2557_v56 = vsel %vm678_vm2, %v2555_v34, %v2556_v11  ;;  %v2559_v15 = vsel %vm678_vm2, %v2556_v11, %v2558_v25 }
 0x33b   : > { %v10276_v39 = vadd.f32 %v3095_v55, %v2837_v43  ;;  %v2153_v10 = vadd.f32 %v2104_v58, %v2029_v8  ;;  %v2700_v53 = vpop.f32.mrf.mxu1  ;;  %v10278_v26 = vpack.c.bf16 %v2559_v15, %v2557_v56  ;;  %v2283_v32 = vunpack.c.l.bf16 %v2251_v35  ;;  %v13214_v8 = vld [vmem:[#allocation23_spill] sm:$0xff] }
 0x33c   : > { %v2956_v50 = vsel %vm1091_vm5, %v2954_v1, %v2955_v17  ;;  %v2958_v37 = vsel %vm1091_vm5, %v2955_v17, %v2957_v19  ;;  %v1783_v35 = vadd.f32 %v13214_v8, %v9909_v45 }
 0x33d   : > { %13212 = vst [vmem:[#allocation19_spill] sm:$0xff] %v10278_v26  ;;  %v2188_v24 = vadd.f32 %v9988_v31, %v2153_v10  ;;  %8418 = vmatmul.msk.bf16.gmra.mxu1 %vm2630_vm6, %v10278_v26  ;;  %v2839_v16 = vpop.f32.mrf.mxu2  ;;  %v10285_v34 = vpack.c.bf16 %v2958_v37, %v2956_v50  ;;  %v2367_v58 = vrot.slane %v2283_v32, 7 }
 0x33e   : > { %v2840_v14 = vadd.f32 %v2839_v16, %v2700_v53  ;;  %v1907_v32 = vadd.f32 %v9914_v30, %v1783_v35 }
 0x33f   : > { %13213 = vst [vmem:[#allocation21_spill] sm:$0xff] %v10285_v34  ;;  %v2220_v55 = vmax.f32 %v2188_v24, 0.0  ;;  %8450 = vmatmul.msk.bf16.gmra.mxu3 %vm2630_vm6, %v10285_v34  ;;  %v2443_v56 = vsel %vm495_vm0, 0.0, %v2367_v58 }
 0x340   : > { %v2560_v37 = vrot.slane %v2443_v56, 1  ;;  %v2959_v8 = vrot.slane %v2443_v56, 2 }
 0x341   : > { %v2252_v43 = vpack.c.bf16 %v2220_v55, %v2220_v55 }
 0x342   : > { %v3098_v25 = vpop.f32.mrf.mxu3  ;;  %v2107_v11 = vpop.f32.mrf.mxu0 }
 0x343   : > { %v2284_v1 = vunpack.c.l.bf16 %v2252_v43  ;;  %v10289_v29 = vadd.f32 %v3098_v25, %v2840_v14  ;;  %v2154_v17 = vadd.f32 %v2107_v11, %v9911_v20  ;;  %v2702_v19 = vpop.f32.mrf.mxu1  ;;  %v13215_v25 = vld [vmem:[#allocation24_spill] sm:$0xff] }
 0x344   : > { %v2031_v11 = vadd.f32 %v13215_v25, %v1907_v32 }
 0x345   : > { %v2368_v15 = vrot.slane %v2284_v1, 7  ;;  %v2189_v10 = vadd.f32 %v9988_v31, %v2154_v17  ;;  %v2841_v53 = vpop.f32.mrf.mxu2  ;;  %8459 = vmatmul.msk.bf16.gmra.mxu0 %vm2630_vm6, %v10081_v4 }
 0x346   : > { %v2842_v50 = vadd.f32 %v2841_v53, %v2702_v19 }
 0x347   : > { %v2459_v24 = vsel %vm495_vm0, %v2368_v15, 0.0  ;;  %v2221_v20 = vmax.f32 %v2189_v10, 0.0  ;;  %v2369_v16 = vsel %vm495_vm0, %v2367_v58, %v2368_v15 }
 0x348   : > { %v2563_v14 = vrot.slane %v2459_v24, 1  ;;  %v2962_v45 = vrot.slane %v2459_v24, 2  ;;  %v10301_v55 = vpack.c.bf16 %v2369_v16, %v2443_v56  ;;  %v2561_v43 = vrot.slane %v2369_v16, 1 }
 0x349   : > { %v2253_v1 = vpack.c.bf16 %v2221_v20, %v2221_v20  ;;  %v2960_v17 = vrot.slane %v2369_v16, 2 }
 0x34a   : > { %v3100_v26 = vpop.f32.mrf.mxu3  ;;  %v2109_v34 = vpop.f32.mrf.mxu0  ;;  %8435 = vmatmul.msk.bf16.gmra.mxu2 %vm2630_vm6, %v10301_v55  ;;  %v2562_v30 = vsel %vm678_vm2, %v2560_v37, %v2561_v43  ;;  %v2564_v19 = vsel %vm678_vm2, %v2561_v43, %v2563_v14 }
 0x34b   : > { %v10308_v58 = vadd.f32 %v3100_v26, %v2842_v50  ;;  %v2155_v35 = vadd.f32 %v2109_v34, %v2031_v11  ;;  %v2705_v15 = vpop.f32.mrf.mxu1  ;;  %v10310_v10 = vpack.c.bf16 %v2564_v19, %v2562_v30  ;;  %v2285_v53 = vunpack.c.l.bf16 %v2253_v1 }
 0x34c   : > { %v2961_v32 = vsel %vm1091_vm5, %v2959_v8, %v2960_v17  ;;  %v2963_v56 = vsel %vm1091_vm5, %v2960_v17, %v2962_v45  ;;  %v13217_v17 = vld [vmem:[#allocation25_spill] sm:$0xff] }
 0x34d   : > { %13216 = vst [vmem:[#allocation22_spill] sm:$0xff] %v10310_v10  ;;  %v2190_v24 = vadd.f32 %v9988_v31, %v2155_v35  ;;  %8419 = vmatmul.msk.bf16.gmra.mxu1 %vm2630_vm6, %v10310_v10  ;;  %v2844_v20 = vpop.f32.mrf.mxu2  ;;  %v10317_v37 = vpack.c.bf16 %v2963_v56, %v2961_v32  ;;  %v2370_v34 = vrot.slane %v2285_v53, 7  ;;  %v1785_v8 = vadd.f32 %v13217_v17, %v9923_v5 }
 0x34e   : > { %v2845_v16 = vadd.f32 %v2844_v20, %v2705_v15 }
 0x34f   : > { %v2222_v26 = vmax.f32 %v2190_v24, 0.0  ;;  %8451 = vmatmul.msk.bf16.gmra.mxu3 %vm2630_vm6, %v10317_v37  ;;  %v2444_v30 = vsel %vm495_vm0, 0.0, %v2370_v34  ;;  %v1909_v53 = vadd.f32 %v9928_v23, %v1785_v8 }
 0x350   : > { %v2565_v56 = vrot.slane %v2444_v30, 1 }
 0x351   : > { %v2254_v50 = vpack.c.bf16 %v2222_v26, %v2222_v26 }
 0x352   : > { %v3103_v14 = vpop.f32.mrf.mxu3  ;;  %v2112_v43 = vpop.f32.mrf.mxu0 }
 0x353   : > { %v2286_v25 = vunpack.c.l.bf16 %v2254_v50  ;;  %v10321_v11 = vadd.f32 %v3103_v14, %v2845_v16  ;;  %v2156_v45 = vadd.f32 %v2112_v43, %v9925_v21  ;;  %v2707_v1 = vpop.f32.mrf.mxu1  ;;  %v2033_v14 = vadd.f32 %v9932_v0, %v1909_v53 }
 0x355   : > { %v2371_v19 = vrot.slane %v2286_v25, 7  ;;  %v2191_v35 = vadd.f32 %v9988_v31, %v2156_v45  ;;  %v2846_v15 = vpop.f32.mrf.mxu2  ;;  %8460 = vmatmul.msk.bf16.gmra.mxu0 %vm2630_vm6, %v10109_v40  ;;  %v2964_v45 = vrot.slane %v2444_v30, 2 }
 0x356   : > { %v2847_v32 = vadd.f32 %v2846_v15, %v2707_v1 }
 0x357   : > { %v2460_v24 = vsel %vm495_vm0, %v2371_v19, 0.0  ;;  %v2223_v21 = vmax.f32 %v2191_v35, 0.0  ;;  %v2372_v20 = vsel %vm495_vm0, %v2370_v34, %v2371_v19 }
 0x358   : > { %v2568_v16 = vrot.slane %v2460_v24, 1  ;;  %v2967_v5 = vrot.slane %v2460_v24, 2  ;;  %v10333_v26 = vpack.c.bf16 %v2372_v20, %v2444_v30  ;;  %v2566_v50 = vrot.slane %v2372_v20, 1 }
 0x359   : > { %v2255_v43 = vpack.c.bf16 %v2223_v21, %v2223_v21  ;;  %v2965_v25 = vrot.slane %v2372_v20, 2 }
 0x35a   : > { %v3105_v17 = vpop.f32.mrf.mxu3  ;;  %v2114_v10 = vpop.f32.mrf.mxu0  ;;  %8436 = vmatmul.msk.bf16.gmra.mxu2 %vm2630_vm6, %v10333_v26  ;;  %v2567_v23 = vsel %vm678_vm2, %v2565_v56, %v2566_v50  ;;  %v2569_v1 = vsel %vm678_vm2, %v2566_v50, %v2568_v16 }
 0x35b   : > { %v10340_v34 = vadd.f32 %v3105_v17, %v2847_v32  ;;  %v2157_v8 = vadd.f32 %v2114_v10, %v2033_v14  ;;  %v2710_v19 = vpop.f32.mrf.mxu1  ;;  %v10342_v35 = vpack.c.bf16 %v2569_v1, %v2567_v23  ;;  %v2287_v15 = vunpack.c.l.bf16 %v2255_v43 }
 0x35c   : > { %v2966_v0 = vsel %vm1091_vm5, %v2964_v45, %v2965_v25  ;;  %v2968_v30 = vsel %vm1091_vm5, %v2965_v25, %v2967_v5  ;;  %v1787_v45 = vadd.f32 %v9934_v52, %v9937_v41 }
 0x35d   : > { %13218 = vst [vmem:[#allocation23_spill] sm:$0xff] %v10342_v35  ;;  %v2192_v53 = vadd.f32 %v9988_v31, %v2157_v8  ;;  %8420 = vmatmul.msk.bf16.gmra.mxu1 %vm2630_vm6, %v10342_v35  ;;  %v2849_v24 = vpop.f32.mrf.mxu2  ;;  %v10349_v56 = vpack.c.bf16 %v2968_v30, %v2966_v0  ;;  %v2373_v10 = vrot.slane %v2287_v15, 7 }
 0x35e   : > { %v2850_v21 = vadd.f32 %v2849_v24, %v2710_v19  ;;  %v13220_v19 = vld [vmem:[#allocation26_spill] sm:$0xff] }
 0x35f   : > { %13219 = vst [vmem:[#allocation24_spill] sm:$0xff] %v10349_v56  ;;  %v2224_v32 = vmax.f32 %v2192_v53, 0.0  ;;  %8452 = vmatmul.msk.bf16.gmra.mxu3 %vm2630_vm6, %v10349_v56  ;;  %v2445_v17 = vsel %vm495_vm0, 0.0, %v2373_v10  ;;  %v1911_v15 = vadd.f32 %v13220_v19, %v1787_v45 }
 0x360   : > { %v2570_v30 = vrot.slane %v2445_v17, 1 }
 0x361   : > { %v2256_v20 = vpack.c.bf16 %v2224_v32, %v2224_v32 }
 0x362   : > { %v3108_v16 = vpop.f32.mrf.mxu3  ;;  %v2117_v50 = vpop.f32.mrf.mxu0 }
 0x363   : > { %v2288_v14 = vunpack.c.l.bf16 %v2256_v20  ;;  %v10353_v43 = vadd.f32 %v3108_v16, %v2850_v21  ;;  %v2158_v5 = vadd.f32 %v2117_v50, %v9942_v7  ;;  %v2712_v25 = vpop.f32.mrf.mxu1  ;;  %v2969_v50 = vrot.slane %v2445_v17, 2 }
 0x365   : > { %v2374_v23 = vrot.slane %v2288_v14, 7  ;;  %v2193_v1 = vadd.f32 %v9988_v31, %v2158_v5  ;;  %v2851_v8 = vpop.f32.mrf.mxu2  ;;  %8461 = vmatmul.msk.bf16.gmra.mxu0 %vm2630_vm6, %v10143_v28  ;;  %v2035_v31 = vadd.f32 %v9956_v12, %v1911_v15  ;;  %v10381_v15 = vld [vmem:[%s12996_s2] ss:$0 sm:$0xff] }
 0x366   : > { %v2852_v0 = vadd.f32 %v2851_v8, %v2712_v25 }
 0x367   : > { %v2461_v53 = vsel %vm495_vm0, %v2374_v23, 0.0  ;;  %v2225_v7 = vmax.f32 %v2193_v1, 0.0  ;;  %v2375_v24 = vsel %vm495_vm0, %v2373_v10, %v2374_v23 }
 0x368   : > { %v2573_v21 = vrot.slane %v2461_v53, 1  ;;  %v2972_v52 = vrot.slane %v2461_v53, 2  ;;  %v10365_v41 = vpack.c.bf16 %v2375_v24, %v2445_v17  ;;  %v2571_v32 = vrot.slane %v2375_v24, 1 }
 0x369   : > { %v2257_v20 = vpack.c.bf16 %v2225_v7, %v2225_v7  ;;  %v2970_v16 = vrot.slane %v2375_v24, 2 }
 0x36a   : > { %v3110_v14 = vpop.f32.mrf.mxu3  ;;  %v2119_v5 = vpop.f32.mrf.mxu0  ;;  %8437 = vmatmul.msk.bf16.gmra.mxu2 %vm2630_vm6, %v10365_v41  ;;  %v2572_v25 = vsel %vm678_vm2, %v2570_v30, %v2571_v32  ;;  %v2574_v45 = vsel %vm678_vm2, %v2571_v32, %v2573_v21 }
 0x36b   : > { %v10372_v10 = vadd.f32 %v3110_v14, %v2852_v0  ;;  %v2159_v23 = vadd.f32 %v2119_v5, %v2035_v31  ;;  %v2715_v1 = vpop.f32.mrf.mxu1  ;;  %v10374_v8 = vpack.c.bf16 %v2574_v45, %v2572_v25  ;;  %v2289_v19 = vunpack.c.l.bf16 %v2257_v20  ;;  %v13223_v5 = vld [vmem:[#allocation27_spill] sm:$0xff] }
 0x36c   : > { %v2971_v12 = vsel %vm1091_vm5, %v2969_v50, %v2970_v16  ;;  %v2973_v17 = vsel %vm1091_vm5, %v2970_v16, %v2972_v52  ;;  %v1789_v25 = vadd.f32 %v13223_v5, %v9961_v49 }
 0x36d   : > { %13221 = vst [vmem:[#allocation25_spill] sm:$0xff] %v10374_v8  ;;  %v2194_v30 = vadd.f32 %v10381_v15, %v2159_v23  ;;  %8421 = vmatmul.msk.bf16.gmra.mxu1 %vm2630_vm6, %v10374_v8  ;;  %v2854_v0 = vpop.f32.mrf.mxu2  ;;  %v10386_v53 = vpack.c.bf16 %v2973_v17, %v2971_v12  ;;  %v2376_v21 = vrot.slane %v2289_v19, 7  ;;  %v13224_v19 = vld [vmem:[#allocation28_spill] sm:$0xff] }
 0x36e   : > { %v2855_v7 = vadd.f32 %v2854_v0, %v2715_v1  ;;  %v1913_v17 = vadd.f32 %v13224_v19, %v1789_v25 }
 0x36f   : > { %13222 = vst [vmem:[#allocation26_spill] sm:$0xff] %v10386_v53  ;;  %v2226_v24 = vmax.f32 %v2194_v30, 0.0  ;;  %8453 = vmatmul.msk.bf16.gmra.mxu3 %vm2630_vm6, %v10386_v53  ;;  %v2446_v45 = vsel %vm495_vm0, 0.0, %v2376_v21 }
 0x370   : > { %v2575_v0 = vrot.slane %v2446_v45, 1 }
 0x371   : > { %v2258_v52 = vpack.c.bf16 %v2226_v24, %v2226_v24 }
 0x372   : > { %v3113_v32 = vpop.f32.mrf.mxu3  ;;  %v2122_v31 = vpop.f32.mrf.mxu0 }
 0x373   : > { %v2290_v20 = vunpack.c.l.bf16 %v2258_v52  ;;  %v10390_v16 = vadd.f32 %v3113_v32, %v2855_v7  ;;  %v2160_v50 = vadd.f32 %v2122_v31, %v9963_v3  ;;  %v2717_v14 = vpop.f32.mrf.mxu1 }
 0x375   : > { %v2377_v23 = vrot.slane %v2290_v20, 7  ;;  %v2195_v1 = vadd.f32 %v10381_v15, %v2160_v50  ;;  %v2856_v12 = vpop.f32.mrf.mxu2  ;;  %8462 = vmatmul.msk.bf16.gmra.mxu0 %vm2630_vm6, %v10173_v47  ;;  %v2301_v20 = vld [vmem:[%s12997_s3 + $0xc] sm:$0x3]  ;;  %v13225_v50 = vld [vmem:[#allocation29_spill] sm:$0xff] }
 0x376   : > { %v2857_v30 = vadd.f32 %v2856_v12, %v2717_v14  ;;  %v2037_v5 = vadd.f32 %v13225_v50, %v1913_v17  ;;  %v3601_v14 = vsel %vm856_vm1, %v2301_v20, 0  ;;  %v2974_v12 = vrot.slane %v2446_v45, 2 }
 0x377   : > { %v2462_v7 = vsel %vm495_vm0, %v2377_v23, 0.0  ;;  %v2227_v3 = vmax.f32 %v2195_v1, 0.0  ;;  %v2378_v24 = vsel %vm495_vm0, %v2376_v21, %v2377_v23  ;;  %3610 = vmatpush.bf16.msrb.mxu3 %v3601_v14 }
 0x378   : > { %v2578_v52 = vrot.slane %v2462_v7, 1  ;;  %v2977_v49 = vrot.slane %v2462_v7, 2  ;;  %v10402_v32 = vpack.c.bf16 %v2378_v24, %v2446_v45  ;;  %v2576_v31 = vrot.slane %v2378_v24, 1  ;;  %v2302_v45 = vld [vmem:[%s12997_s3 + $0xe] sm:$0x3] }
 0x379   : > { %v2259_v8 = vpack.c.bf16 %v2227_v3, %v2227_v3  ;;  %v2975_v25 = vrot.slane %v2378_v24, 2 }
 0x37a   : > { %v3115_v19 = vpop.f32.mrf.mxu3  ;;  %v2124_v1 = vpop.f32.mrf.mxu0  ;;  %8438 = vmatmul.msk.bf16.gmra.mxu2 %vm2630_vm6, %v10402_v32  ;;  %v2577_v21 = vsel %vm678_vm2, %v2575_v0, %v2576_v31  ;;  %v2579_v23 = vsel %vm678_vm2, %v2576_v31, %v2578_v52  ;;  %v3725_v0 = vsel %vm856_vm1, %v2302_v45, 0  ;;  %v13229_v45 = vld [vmem:[#allocation30_spill] sm:$0xff] }
 0x37b   : > { %v10413_v7 = vadd.f32 %v3115_v19, %v2857_v30  ;;  %v2161_v53 = vadd.f32 %v2124_v1, %v2037_v5  ;;  %v2720_v35 = vpop.f32.mrf.mxu1  ;;  %v10415_v17 = vpack.c.bf16 %v2579_v23, %v2577_v21  ;;  %v2291_v3 = vunpack.c.l.bf16 %v2259_v8  ;;  %3734 = vmatpush.bf16.msra.mxu0 %v3725_v0  ;;  %v2303_v8 = vld [vmem:[%s12997_s3 + $0x10] sm:$0x3] }
 0x37c   : > { %v2976_v24 = vsel %vm1091_vm5, %v2974_v12, %v2975_v25  ;;  %v2978_v20 = vsel %vm1091_vm5, %v2975_v25, %v2977_v49  ;;  %v3849_v25 = vsel %vm856_vm1, %v2303_v8, 0  ;;  %v13228_v21 = vld [vmem:[#allocation31_spill] sm:$0xff] }
 0x37d   : > { %13226 = vst [vmem:[#allocation27_spill] sm:$0xff] %v10415_v17  ;;  %v2196_v52 = vadd.f32 %v10381_v15, %v2161_v53  ;;  %8422 = vmatmul.msk.bf16.gmra.mxu1 %vm2630_vm6, %v10415_v17  ;;  %v2859_v30 = vpop.f32.mrf.mxu2  ;;  %v10426_v31 = vpack.c.bf16 %v2978_v20, %v2976_v24  ;;  %v2379_v49 = vrot.slane %v2291_v3, 7  ;;  %v1791_v24 = vadd.f32 %v10135_v38, %v13229_v45 }
 0x37e   : > { %v2860_v50 = vadd.f32 %v2859_v30, %v2720_v35  ;;  %3858 = vmatpush.bf16.msra.mxu1 %v3849_v25 }
 0x37f   : > { %13227 = vst [vmem:[#allocation28_spill] sm:$0xff] %v10426_v31  ;;  %v2228_v5 = vmax.f32 %v2196_v52, 0.0  ;;  %8454 = vmatmul.msk.bf16.gmra.mxu3 %vm2630_vm6, %v10426_v31  ;;  %v2447_v20 = vsel %vm495_vm0, 0.0, %v2379_v49  ;;  %v1915_v30 = vadd.f32 %v10137_v22, %v1791_v24 }
 0x380   : > { %v2979_v17 = vrot.slane %v2447_v20, 2 }
 0x381   : > { %v2260_v53 = vpack.c.bf16 %v2228_v5, %v2228_v5 }
 0x382   : > { %v3118_v14 = vpop.f32.mrf.mxu3  ;;  %v2127_v12 = vpop.f32.mrf.mxu0 }
 0x383   : > { %v2292_v19 = vunpack.c.l.bf16 %v2260_v53  ;;  %v10434_v1 = vadd.f32 %v3118_v14, %v2860_v50  ;;  %v2162_v35 = vadd.f32 %v2127_v12, %v13228_v21  ;;  %v2722_v23 = vpop.f32.mrf.mxu1  ;;  %v2580_v50 = vrot.slane %v2447_v20, 1 }
 0x384   : > { %v2039_v21 = vadd.f32 %v10141_v44, %v1915_v30 }
 0x385   : > { %v2380_v0 = vrot.slane %v2292_v19, 7  ;;  %v2197_v3 = vadd.f32 %v10381_v15, %v2162_v35  ;;  %v2861_v52 = vpop.f32.mrf.mxu2  ;;  %8463 = vmatmul.msk.bf16.gmra.mxu0 %vm2630_vm6, %v10205_v48 }
 0x386   : > { %v2862_v5 = vadd.f32 %v2861_v52, %v2722_v23 }
 0x387   : > { %v2463_v8 = vsel %vm495_vm0, %v2380_v0, 0.0  ;;  %v2229_v25 = vmax.f32 %v2197_v3, 0.0  ;;  %v2381_v53 = vsel %vm495_vm0, %v2379_v49, %v2380_v0 }
 0x388   : > { %v2583_v14 = vrot.slane %v2463_v8, 1  ;;  %v2982_v38 = vrot.slane %v2463_v8, 2  ;;  %v10446_v12 = vpack.c.bf16 %v2381_v53, %v2447_v20  ;;  %v2581_v19 = vrot.slane %v2381_v53, 1 }
 0x389   : > { %v2261_v35 = vpack.c.bf16 %v2229_v25, %v2229_v25  ;;  %v2980_v45 = vrot.slane %v2381_v53, 2 }
 0x38a   : > { %v3120_v31 = vpop.f32.mrf.mxu3  ;;  %v2129_v56 = vpop.f32.mrf.mxu0  ;;  %8439 = vmatmul.msk.bf16.gmra.mxu2 %vm2630_vm6, %v10446_v12  ;;  %v2582_v22 = vsel %vm678_vm2, %v2580_v50, %v2581_v19  ;;  %v2584_v23 = vsel %vm678_vm2, %v2581_v19, %v2583_v14 }
 0x38b   : > { %v10453_v49 = vadd.f32 %v3120_v31, %v2862_v5  ;;  %v2163_v24 = vadd.f32 %v2129_v56, %v2039_v21  ;;  %v2725_v0 = vpop.f32.mrf.mxu1  ;;  %v10455_v3 = vpack.c.bf16 %v2584_v23, %v2582_v22  ;;  %v2293_v52 = vunpack.c.l.bf16 %v2261_v35 }
 0x38c   : > { %v2981_v44 = vsel %vm1091_vm5, %v2979_v17, %v2980_v45  ;;  %v2983_v20 = vsel %vm1091_vm5, %v2980_v45, %v2982_v38 }
 0x38d   : > { %v2198_v30 = vadd.f32 %v10381_v15, %v2163_v24  ;;  %8423 = vmatmul.msk.bf16.gmra.mxu1 %vm2630_vm6, %v10455_v3  ;;  %v2864_v8 = vpop.f32.mrf.mxu2  ;;  %v10462_v50 = vpack.c.bf16 %v2983_v20, %v2981_v44  ;;  %v2382_v56 = vrot.slane %v2293_v52, 7 }
 0x38e   : > { %v2865_v25 = vadd.f32 %v2864_v8, %v2725_v0 }
 0x38f   : > { %v2230_v31 = vmax.f32 %v2198_v30, 0.0  ;;  %8455 = vmatmul.msk.bf16.gmra.mxu3 %vm2630_vm6, %v10462_v50  ;;  %v2448_v21 = vsel %vm495_vm0, 0.0, %v2382_v56 }
 0x390   : > { %v3330_v23 = vrot.slane %v2448_v21, 1 }
 0x391   : > { %v2262_v5 = vpack.c.bf16 %v2230_v31, %v2230_v31 }
 0x392   : > { %v3123_v53 = vpop.f32.mrf.mxu3  ;;  %v3216_v14 = vpop.f32.mrf.mxu0 }
 0x393   : > { %v2294_v17 = vunpack.c.l.bf16 %v2262_v5  ;;  %v10466_v19 = vadd.f32 %v3123_v53, %v2865_v25  ;;  %v2727_v38 = vpop.f32.mrf.mxu1  ;;  %v10469_v15 = vadd.f32 %v3216_v14, %v10161_v6  ;;  %v3465_v6 = vrot.slane %v2448_v21, 2 }
 0x395   : > { %v2383_v35 = vrot.slane %v2294_v17, 7  ;;  %v2866_v45 = vpop.f32.mrf.mxu2  ;;  %8464 = vmatmul.msk.bf16.gmra.mxu0 %vm2630_vm6, %v10237_v46 }
 0x396   : > { %v2867_v22 = vadd.f32 %v2866_v45, %v2727_v38 }
 0x397   : > { %v2464_v24 = vsel %vm495_vm0, %v2383_v35, 0.0  ;;  %v2384_v0 = vsel %vm495_vm0, %v2382_v56, %v2383_v35 }
 0x398   : > { %v3333_v52 = vrot.slane %v2464_v24, 1  ;;  %v3468_v44 = vrot.slane %v2464_v24, 2  ;;  %v10476_v20 = vpack.c.bf16 %v2384_v0, %v2448_v21  ;;  %v3331_v30 = vrot.slane %v2384_v0, 1 }
 0x399   : > { %v3466_v8 = vrot.slane %v2384_v0, 2 }
 0x39a   : > { %v3125_v25 = vpop.f32.mrf.mxu3  ;;  %v10478_v31 = vpop.f32.mrf.mxu0  ;;  %8488 = vmatmul.msk.bf16.vlgmr.msrb.gmra.mxu2 %vm2630_vm6, %v10017_v54  ;;  %v3332_v5 = vsel %vm678_vm2, %v3330_v23, %v3331_v30  ;;  %v3334_v53 = vsel %vm678_vm2, %v3331_v30, %v3333_v52 }
 0x39b   : > { %v10484_v14 = vadd.f32 %v3125_v25, %v2867_v22  ;;  %v2730_v56 = vpop.f32.mrf.mxu1  ;;  %v3467_v17 = vsel %vm1091_vm5, %v3465_v6, %v3466_v8  ;;  %v3469_v38 = vsel %vm1091_vm5, %v3466_v8, %v3468_v44  ;;  %v10490_v21 = vpack.c.bf16 %v3334_v53, %v3332_v5 }
 0x39c   : > { %v10488_v35 = vpack.c.bf16 %v3469_v38, %v3467_v17 }
 0x39d   : > { %v2869_v45 = vpop.f32.mrf.mxu2  ;;  %8472 = vmatmul.msk.bf16.vlgmr.msrb.gmra.mxu1 %vm2630_vm6, %v10010_v57  ;;  %v13230_v57 = vld [vmem:[#allocation33_spill] sm:$0xff] }
 0x39e   : > { %v2870_v54 = vadd.f32 %v2869_v45, %v2730_v56  ;;  %v13231_v56 = vld [vmem:[#allocation32_spill] sm:$0xff] }
 0x39f   : > { %8504 = vmatmul.msk.bf16.vlgmr.msrb.gmra.mxu3 %vm2630_vm6, %v10028_v18 }
 0x3a2   : > { %v3128_v23 = vpop.f32.mrf.mxu3  ;;  %v3221_v22 = vpop.f32.mrf.mxu0 }
 0x3a3   : > { %v10496_v24 = vadd.f32 %v3128_v23, %v2870_v54  ;;  %v2732_v0 = vpop.f32.mrf.mxu1  ;;  %v10499_v52 = vadd.f32 %v3221_v22, %v10257_v42 }
 0x3a5   : > { %v2871_v44 = vpop.f32.mrf.mxu2  ;;  %8465 = vmatmul.msk.bf16.gmra.mxu0 %vm2630_vm6, %v10269_v59 }
 0x3a6   : > { %v2872_v30 = vadd.f32 %v2871_v44, %v2732_v0 }
 0x3aa   : > { %v3130_v6 = vpop.f32.mrf.mxu3  ;;  %v3223_v8 = vpop.f32.mrf.mxu0  ;;  %8489 = vmatmul.msk.bf16.gmra.mxu2 %vm2630_vm6, %v13230_v57  ;;  %v13238_v57 = vld [vmem:[#allocation17_spill] sm:$0xff] }
 0x3ab   : > { %v10505_v25 = vadd.f32 %v3130_v6, %v2872_v30  ;;  %v2735_v18 = vpop.f32.mrf.mxu1  ;;  %v10508_v5 = vadd.f32 %v3223_v8, %v10276_v39 }
 0x3ad   : > { %v2874_v53 = vpop.f32.mrf.mxu2  ;;  %8473 = vmatmul.msk.bf16.gmra.mxu1 %vm2630_vm6, %v13231_v56 }
 0x3ae   : > { %v2875_v42 = vadd.f32 %v2874_v53, %v2735_v18 }
 0x3af   : > { %8505 = vmatmul.msk.bf16.gmra.mxu3 %vm2630_vm6, %v10053_v51 }
 0x3b2   : > { %v3133_v17 = vpop.f32.mrf.mxu3  ;;  %v3226_v38 = vpop.f32.mrf.mxu0 }
 0x3b3   : > { %v10514_v45 = vadd.f32 %v3133_v17, %v2875_v42  ;;  %v2737_v54 = vpop.f32.mrf.mxu1  ;;  %v10517_v23 = vadd.f32 %v3226_v38, %v10289_v29 }
 0x3b5   : > { %v2876_v22 = vpop.f32.mrf.mxu2  ;;  %8466 = vmatmul.msk.bf16.gmra.mxu0 %vm2630_vm6, %v10301_v55 }
 0x3b6   : > { %v2877_v39 = vadd.f32 %v2876_v22, %v2737_v54 }
 0x3ba   : > { %v3135_v0 = vpop.f32.mrf.mxu3  ;;  %v3228_v44 = vpop.f32.mrf.mxu0  ;;  %8490 = vmatmul.msk.bf16.gmra.mxu2 %vm2630_vm6, %v10067_v62  ;;  %v13234_v62 = vld [vmem:[#allocation20_spill] sm:$0xff] }
 0x3bb   : > { %v10523_v30 = vadd.f32 %v3135_v0, %v2877_v39  ;;  %v2740_v51 = vpop.f32.mrf.mxu1  ;;  %v10526_v6 = vadd.f32 %v3228_v44, %v10308_v58 }
 0x3bd   : > { %v2879_v8 = vpop.f32.mrf.mxu2  ;;  %8474 = vmatmul.msk.bf16.gmra.mxu1 %vm2630_vm6, %v10060_v61 }
 0x3be   : > { %v2880_v29 = vadd.f32 %v2879_v8, %v2740_v51 }
 0x3bf   : > { %8506 = vmatmul.msk.bf16.gmra.mxu3 %vm2630_vm6, %v10081_v4 }
 0x3c2   : > { %v3138_v18 = vpop.f32.mrf.mxu3  ;;  %v3231_v53 = vpop.f32.mrf.mxu0 }
 0x3c3   : > { %v10532_v42 = vadd.f32 %v3138_v18, %v2880_v29  ;;  %v2742_v17 = vpop.f32.mrf.mxu1  ;;  %v10535_v38 = vadd.f32 %v3231_v53, %v10321_v11 }
 0x3c5   : > { %v2881_v54 = vpop.f32.mrf.mxu2  ;;  %8467 = vmatmul.msk.bf16.gmra.mxu0 %vm2630_vm6, %v10333_v26 }
 0x3c6   : > { %v2882_v58 = vadd.f32 %v2881_v54, %v2742_v17 }
 0x3ca   : > { %v3140_v22 = vpop.f32.mrf.mxu3  ;;  %v3233_v39 = vpop.f32.mrf.mxu0  ;;  %8491 = vmatmul.msk.bf16.gmra.mxu2 %vm2630_vm6, %v10095_v27 }
 0x3cb   : > { %v10541_v0 = vadd.f32 %v3140_v22, %v2882_v58  ;;  %v2745_v4 = vpop.f32.mrf.mxu1  ;;  %v10544_v44 = vadd.f32 %v3233_v39, %v10340_v34 }
 0x3cd   : > { %v2884_v51 = vpop.f32.mrf.mxu2  ;;  %8475 = vmatmul.msk.bf16.gmra.mxu1 %vm2630_vm6, %v10088_v9 }
 0x3ce   : > { %v2885_v11 = vadd.f32 %v2884_v51, %v2745_v4 }
 0x3cf   : > { %8507 = vmatmul.msk.bf16.gmra.mxu3 %vm2630_vm6, %v10109_v40 }
 0x3d2   : > { %v3143_v8 = vpop.f32.mrf.mxu3  ;;  %v3236_v29 = vpop.f32.mrf.mxu0 }
 0x3d3   : > { %v10550_v18 = vadd.f32 %v3143_v8, %v2885_v11  ;;  %v2747_v53 = vpop.f32.mrf.mxu1  ;;  %v10553_v17 = vadd.f32 %v3236_v29, %v10353_v43  ;;  %v13232_v11 = vld [vmem:[#allocation10_spill] sm:$0xff] }
 0x3d5   : > { %v2886_v54 = vpop.f32.mrf.mxu2  ;;  %8468 = vmatmul.msk.bf16.gmra.mxu0 %vm2630_vm6, %v10365_v41 }
 0x3d6   : > { %v2887_v34 = vadd.f32 %v2886_v54, %v2747_v53 }
 0x3da   : > { %v3145_v58 = vpop.f32.mrf.mxu3  ;;  %v3238_v22 = vpop.f32.mrf.mxu0  ;;  %8492 = vmatmul.msk.bf16.gmra.mxu2 %vm2630_vm6, %v10123_v36 }
 0x3db   : > { %v10559_v39 = vadd.f32 %v3145_v58, %v2887_v34  ;;  %v2750_v40 = vpop.f32.mrf.mxu1  ;;  %v10562_v4 = vadd.f32 %v3238_v22, %v10372_v10 }
 0x3dd   : > { %v2889_v51 = vpop.f32.mrf.mxu2  ;;  %8476 = vmatmul.msk.bf16.gmra.mxu1 %vm2630_vm6, %v13232_v11 }
 0x3de   : > { %v2890_v43 = vadd.f32 %v2889_v51, %v2750_v40 }
 0x3df   : > { %8508 = vmatmul.msk.bf16.gmra.mxu3 %vm2630_vm6, %v10143_v28 }
 0x3e2   : > { %v3148_v8 = vpop.f32.mrf.mxu3  ;;  %v3241_v29 = vpop.f32.mrf.mxu0 }
 0x3e3   : > { %v10568_v53 = vadd.f32 %v3148_v8, %v2890_v43  ;;  %v2752_v54 = vpop.f32.mrf.mxu1  ;;  %v10571_v34 = vadd.f32 %v3241_v29, %v10390_v16 }
 0x3e5   : > { %v2891_v58 = vpop.f32.mrf.mxu2  ;;  %8469 = vmatmul.msk.bf16.gmra.mxu0 %vm2630_vm6, %v10402_v32 }
 0x3e6   : > { %v2892_v10 = vadd.f32 %v2891_v58, %v2752_v54 }
 0x3ea   : > { %v3150_v22 = vpop.f32.mrf.mxu3  ;;  %v3243_v36 = vpop.f32.mrf.mxu0  ;;  %8493 = vmatmul.msk.bf16.gmra.mxu2 %vm2630_vm6, %v10157_v33 }
 0x3eb   : > { %v10577_v40 = vadd.f32 %v3150_v22, %v2892_v10  ;;  %v2755_v28 = vpop.f32.mrf.mxu1  ;;  %v10580_v51 = vadd.f32 %v3243_v36, %v10413_v7 }
 0x3ed   : > { %v2894_v43 = vpop.f32.mrf.mxu2  ;;  %8477 = vmatmul.msk.bf16.gmra.mxu1 %vm2630_vm6, %v10150_v2 }
 0x3ee   : > { %v2895_v16 = vadd.f32 %v2894_v43, %v2755_v28 }
 0x3ef   : > { %8509 = vmatmul.msk.bf16.gmra.mxu3 %vm2630_vm6, %v10173_v47 }
 0x3f2   : > { %v3153_v8 = vpop.f32.mrf.mxu3  ;;  %v3246_v29 = vpop.f32.mrf.mxu0 }
 0x3f3   : > { %v10586_v54 = vadd.f32 %v3153_v8, %v2895_v16  ;;  %v2757_v58 = vpop.f32.mrf.mxu1  ;;  %v10589_v10 = vadd.f32 %v3246_v29, %v10434_v1 }
 0x3f5   : > { %v2896_v22 = vpop.f32.mrf.mxu2  ;;  %8470 = vmatmul.msk.bf16.gmra.mxu0 %vm2630_vm6, %v10446_v12 }
 0x3f6   : > { %v2897_v36 = vadd.f32 %v2896_v22, %v2757_v58 }
 0x3fa   : > { %v3155_v7 = vpop.f32.mrf.mxu3  ;;  %v3248_v33 = vpop.f32.mrf.mxu0  ;;  %8494 = vmatmul.msk.bf16.gmra.mxu2 %vm2630_vm6, %v10187_v13 }
 0x3fb   : > { %v10595_v28 = vadd.f32 %v3155_v7, %v2897_v36  ;;  %v2760_v47 = vpop.f32.mrf.mxu1  ;;  %v10598_v43 = vadd.f32 %v3248_v33, %v10453_v49  ;;  %v4104_v49 = vld [vmem:[%s12999_s5 + $0x4] sm:$0xf] }
 0x3fd   : > { %v2899_v16 = vpop.f32.mrf.mxu2  ;;  %8478 = vmatmul.msk.bf16.gmra.mxu1 %vm2630_vm6, %v10180_v60 }
 0x3fe   : > { %v2900_v1 = vadd.f32 %v2899_v16, %v2760_v47 }
 0x3ff   : > { %8510 = vmatmul.msk.bf16.gmra.mxu3 %vm2630_vm6, %v10205_v48  ;;  %v4488_v48 = vsel %vm4486_vm7, %v4104_v49, 0 }
 0x400   : > { %4497 = vmatpush.bf16.msra.mxu2 %v4488_v48 }
 0x402   : > { %v3158_v8 = vpop.f32.mrf.mxu3  ;;  %v3251_v29 = vpop.f32.mrf.mxu0 }
 0x403   : > { %v10604_v58 = vadd.f32 %v3158_v8, %v2900_v1  ;;  %v2762_v22 = vpop.f32.mrf.mxu1  ;;  %v10607_v36 = vadd.f32 %v3251_v29, %v10466_v19 }
 0x405   : > { %v2901_v7 = vpop.f32.mrf.mxu2  ;;  %8471 = vmatmul.msk.bf16.gmra.mxu0 %vm2630_vm6, %v10476_v20 }
 0x406   : > { %v2902_v33 = vadd.f32 %v2901_v7, %v2762_v22  ;;  %v13233_v22 = vld [vmem:[#allocation13_spill] sm:$0xff] }
 0x40a   : > { %v3160_v47 = vpop.f32.mrf.mxu3  ;;  %v3253_v16 = vpop.f32.mrf.mxu0  ;;  %8495 = vmatmul.msk.bf16.gmra.mxu2 %vm2630_vm6, %v10219_v63 }
 0x40b   : > { %v10617_v19 = vadd.f32 %v3160_v47, %v2902_v33  ;;  %v2765_v1 = vpop.f32.mrf.mxu1  ;;  %v10620_v8 = vadd.f32 %v3253_v16, %v10484_v14 }
 0x40d   : > { %v2904_v29 = vpop.f32.mrf.mxu2  ;;  %8479 = vmatmul.msk.bf16.gmra.mxu1 %vm2630_vm6, %v13233_v22 }
 0x40e   : > { %v2905_v7 = vadd.f32 %v2904_v29, %v2765_v1 }
 0x40f   : > { %8511 = vmatmul.msk.bf16.gmra.mxu3 %vm2630_vm6, %v10237_v46 }
 0x412   : > { %v3163_v49 = vpop.f32.mrf.mxu3  ;;  %v3256_v48 = vpop.f32.mrf.mxu0 }
 0x413   : > { %v10626_v13 = vadd.f32 %v3163_v49, %v2905_v7  ;;  %v2767_v27 = vpop.f32.mrf.mxu1  ;;  %v10629_v33 = vadd.f32 %v3256_v48, %v10496_v24  ;;  %v13236_v7 = vld [vmem:[#allocation15_spill] sm:$0xff]  ;;  %v13237_v49 = vld [vmem:[#allocation14_spill] sm:$0xff] }
 0x414   : > { %v2832_v24 = vadd.f32 %v13237_v49, %v13236_v7 }
 0x415   : > { %v2906_v47 = vpop.f32.mrf.mxu2  ;;  %8520 = vmatmul.msk.bf16.vlgmr.msra.gmra.mxu0 %vm2630_vm6, %v13231_v56 }
 0x416   : > { %v2907_v14 = vadd.f32 %v2906_v47, %v2767_v27  ;;  %v13239_v47 = vld [vmem:[#allocation18_spill] sm:$0xff] }
 0x41a   : > { %v3165_v16 = vpop.f32.mrf.mxu3  ;;  %v3258_v63 = vpop.f32.mrf.mxu0  ;;  %8496 = vmatmul.msk.bf16.gmra.mxu2 %vm2630_vm6, %v13234_v62 }
 0x41b   : > { %v10635_v1 = vadd.f32 %v3165_v16, %v2907_v14  ;;  %v10638_v46 = vadd.f32 %v3258_v63, %v10505_v25  ;;  %v3353_v29 = vpop.f32.mrf.mxu1  ;;  %v3169_v14 = vadd.f32 %v13239_v47, %v2832_v24  ;;  %v13241_v47 = vld [vmem:[#allocation19_spill] sm:$0xff] }
 0x41c   : > { %v3433_v48 = vadd.f32 %v3353_v29, %v10469_v15 }
 0x41d   : > { %13235 = vst [vmem:[#allocation29_spill] sm:$0xff] %v10638_v46  ;;  %8480 = vmatmul.msk.bf16.gmra.mxu1 %vm2630_vm6, %v13238_v57  ;;  %v3488_v27 = vpop.f32.mrf.mxu2  ;;  %v3297_v16 = vadd.f32 %v10478_v31, %v3169_v14  ;;  %v13240_v46 = vld [vmem:[#allocation21_spill] sm:$0xff] }
 0x41e   : > { %v3568_v56 = vadd.f32 %v3488_v27, %v3433_v48 }
 0x41f   : > { %8512 = vmatmul.msk.bf16.gmra.mxu3 %vm2630_vm6, %v10269_v59 }
 0x422   : > { %v3612_v63 = vpop.f32.mrf.mxu3  ;;  %v3261_v25 = vpop.f32.mrf.mxu0 }
 0x423   : > { %v10649_v62 = vadd.f32 %v3612_v63, %v3568_v56  ;;  %v10652_v7 = vadd.f32 %v3261_v25, %v10514_v45  ;;  %v3355_v15 = vpop.f32.mrf.mxu1 }
 0x424   : > { %v3434_v29 = vadd.f32 %v3355_v15, %v3297_v16 }
 0x425   : > { %v3490_v49 = vpop.f32.mrf.mxu2  ;;  %8521 = vmatmul.msk.bf16.gmra.mxu0 %vm2630_vm6, %v10060_v61 }
 0x426   : > { %v3569_v48 = vadd.f32 %v3490_v49, %v3434_v29 }
 0x42a   : > { %v3614_v27 = vpop.f32.mrf.mxu3  ;;  %v3263_v59 = vpop.f32.mrf.mxu0  ;;  %8497 = vmatmul.msk.bf16.gmra.mxu2 %vm2630_vm6, %v13240_v46 }
 0x42b   : > { %v10658_v31 = vadd.f32 %v3614_v27, %v3569_v48  ;;  %v10661_v24 = vadd.f32 %v3263_v59, %v10523_v30  ;;  %v3358_v56 = vpop.f32.mrf.mxu1 }
 0x42c   : > { %v3435_v45 = vadd.f32 %v3358_v56, %v10499_v52 }
 0x42d   : > { %8481 = vmatmul.msk.bf16.gmra.mxu1 %vm2630_vm6, %v13241_v47  ;;  %v3493_v14 = vpop.f32.mrf.mxu2 }
 0x42e   : > { %v3570_v16 = vadd.f32 %v3493_v14, %v3435_v45  ;;  %v13242_v45 = vld [vmem:[#allocation22_spill] sm:$0xff] }
 0x42f   : > { %8513 = vmatmul.msk.bf16.gmra.mxu3 %vm2630_vm6, %v10301_v55 }
 0x432   : > { %v3617_v61 = vpop.f32.mrf.mxu3  ;;  %v3266_v63 = vpop.f32.mrf.mxu0 }
 0x433   : > { %v10668_v25 = vadd.f32 %v3617_v61, %v3570_v16  ;;  %v10671_v15 = vadd.f32 %v3266_v63, %v10532_v42  ;;  %v3360_v30 = vpop.f32.mrf.mxu1 }
 0x434   : > { %v3436_v29 = vadd.f32 %v3360_v30, %v10508_v5 }
 0x435   : > { %v3495_v49 = vpop.f32.mrf.mxu2  ;;  %8522 = vmatmul.msk.bf16.gmra.mxu0 %vm2630_vm6, %v10088_v9 }
 0x436   : > { %v3571_v52 = vadd.f32 %v3495_v49, %v3436_v29 }
 0x43a   : > { %v3619_v48 = vpop.f32.mrf.mxu3  ;;  %v3268_v27 = vpop.f32.mrf.mxu0  ;;  %8498 = vmatmul.msk.bf16.gmra.mxu2 %vm2630_vm6, %v10317_v37 }
 0x43b   : > { %v10678_v55 = vadd.f32 %v3619_v48, %v3571_v52  ;;  %v10681_v59 = vadd.f32 %v3268_v27, %v10541_v0  ;;  %v3363_v42 = vpop.f32.mrf.mxu1  ;;  %v13243_v48 = vld [vmem:[#allocation24_spill] sm:$0xff] }
 0x43c   : > { %v3437_v56 = vadd.f32 %v3363_v42, %v10517_v23 }
 0x43d   : > { %8482 = vmatmul.msk.bf16.gmra.mxu1 %vm2630_vm6, %v13242_v45  ;;  %v3498_v5 = vpop.f32.mrf.mxu2 }
 0x43e   : > { %v3572_v14 = vadd.f32 %v3498_v5, %v3437_v56  ;;  %v13244_v56 = vld [vmem:[#allocation23_spill] sm:$0xff] }
 0x43f   : > { %8514 = vmatmul.msk.bf16.gmra.mxu3 %vm2630_vm6, %v10333_v26 }
 0x442   : > { %v3622_v9 = vpop.f32.mrf.mxu3  ;;  %v3271_v16 = vpop.f32.mrf.mxu0 }
 0x443   : > { %v10688_v61 = vadd.f32 %v3622_v9, %v3572_v14  ;;  %v10691_v63 = vadd.f32 %v3271_v16, %v10550_v18  ;;  %v3365_v0 = vpop.f32.mrf.mxu1 }
 0x444   : > { %v3438_v30 = vadd.f32 %v3365_v0, %v10526_v6 }
 0x445   : > { %v3500_v29 = vpop.f32.mrf.mxu2  ;;  %8523 = vmatmul.msk.bf16.gmra.mxu0 %vm2630_vm6, %v13232_v11 }
 0x446   : > { %v3573_v23 = vadd.f32 %v3500_v29, %v3438_v30 }
 0x44a   : > { %v3624_v49 = vpop.f32.mrf.mxu3  ;;  %v3273_v52 = vpop.f32.mrf.mxu0  ;;  %8499 = vmatmul.msk.bf16.gmra.mxu2 %vm2630_vm6, %v13243_v48 }
 0x44b   : > { %v10698_v26 = vadd.f32 %v3624_v49, %v3573_v23  ;;  %v10701_v27 = vadd.f32 %v3273_v52, %v10559_v39  ;;  %v3368_v18 = vpop.f32.mrf.mxu1  ;;  %v13245_v49 = vld [vmem:[#allocation26_spill] sm:$0xff] }
 0x44c   : > { %v3439_v42 = vadd.f32 %v3368_v18, %v10535_v38 }
 0x44d   : > { %8483 = vmatmul.msk.bf16.gmra.mxu1 %vm2630_vm6, %v13244_v56  ;;  %v3503_v6 = vpop.f32.mrf.mxu2 }
 0x44e   : > { %v3574_v5 = vadd.f32 %v3503_v6, %v3439_v42  ;;  %v13246_v42 = vld [vmem:[#allocation25_spill] sm:$0xff] }
 0x44f   : > { %8515 = vmatmul.msk.bf16.gmra.mxu3 %vm2630_vm6, %v10365_v41 }
 0x452   : > { %v3627_v11 = vpop.f32.mrf.mxu3  ;;  %v3276_v14 = vpop.f32.mrf.mxu0 }
 0x453   : > { %v10708_v9 = vadd.f32 %v3627_v11, %v3574_v5  ;;  %v10711_v16 = vadd.f32 %v3276_v14, %v10568_v53  ;;  %v3370_v39 = vpop.f32.mrf.mxu1 }
 0x454   : > { %v3440_v0 = vadd.f32 %v3370_v39, %v10544_v44 }
 0x455   : > { %v3505_v30 = vpop.f32.mrf.mxu2  ;;  %8524 = vmatmul.msk.bf16.gmra.mxu0 %vm2630_vm6, %v10150_v2 }
 0x456   : > { %v3575_v38 = vadd.f32 %v3505_v30, %v3440_v0 }
 0x45a   : > { %v3629_v29 = vpop.f32.mrf.mxu3  ;;  %v3278_v23 = vpop.f32.mrf.mxu0  ;;  %8500 = vmatmul.msk.bf16.gmra.mxu2 %vm2630_vm6, %v13245_v49 }
 0x45b   : > { %v10718_v41 = vadd.f32 %v3629_v29, %v3575_v38  ;;  %v10721_v52 = vadd.f32 %v3278_v23, %v10577_v40  ;;  %v3373_v53 = vpop.f32.mrf.mxu1  ;;  %v13248_v23 = vld [vmem:[#allocation27_spill] sm:$0xff] }
 0x45c   : > { %v3441_v18 = vadd.f32 %v3373_v53, %v10553_v17 }
 0x45d   : > { %8484 = vmatmul.msk.bf16.gmra.mxu1 %vm2630_vm6, %v13246_v42  ;;  %v3508_v44 = vpop.f32.mrf.mxu2 }
 0x45e   : > { %v3576_v6 = vadd.f32 %v3508_v44, %v3441_v18 }
 0x45f   : > { %8516 = vmatmul.msk.bf16.gmra.mxu3 %vm2630_vm6, %v10402_v32  ;;  %v13247_v32 = vld [vmem:[#allocation28_spill] sm:$0xff] }
 0x462   : > { %v3632_v2 = vpop.f32.mrf.mxu3  ;;  %v3281_v5 = vpop.f32.mrf.mxu0 }
 0x463   : > { %v10728_v11 = vadd.f32 %v3632_v2, %v3576_v6  ;;  %v10731_v14 = vadd.f32 %v3281_v5, %v10586_v54  ;;  %v3375_v40 = vpop.f32.mrf.mxu1 }
 0x464   : > { %v10734_v39 = vadd.f32 %v3375_v40, %v10562_v4 }
 0x465   : > { %v10736_v17 = vpop.f32.mrf.mxu2  ;;  %8525 = vmatmul.msk.bf16.gmra.mxu0 %vm2630_vm6, %v10180_v60 }
 0x46a   : > { %v10740_v0 = vpop.f32.mrf.mxu3  ;;  %v3283_v30 = vpop.f32.mrf.mxu0  ;;  %8501 = vmatmul.msk.bf16.gmra.mxu2 %vm2630_vm6, %v13247_v32 }
 0x46b   : > { %v10745_v38 = vadd.f32 %v3283_v30, %v10595_v28  ;;  %v3378_v54 = vpop.f32.mrf.mxu1 }
 0x46c   : > { %v3443_v29 = vadd.f32 %v3378_v54, %v10571_v34 }
 0x46d   : > { %8485 = vmatmul.msk.bf16.gmra.mxu1 %vm2630_vm6, %v13248_v23  ;;  %v3513_v4 = vpop.f32.mrf.mxu2 }
 0x46e   : > { %v3578_v53 = vadd.f32 %v3513_v4, %v3443_v29 }
 0x46f   : > { %8517 = vmatmul.msk.bf16.gmra.mxu3 %vm2630_vm6, %v10446_v12 }
 0x472   : > { %v3637_v60 = vpop.f32.mrf.mxu3  ;;  %v3286_v18 = vpop.f32.mrf.mxu0 }
 0x473   : > { %v10752_v44 = vadd.f32 %v3637_v60, %v3578_v53  ;;  %v10755_v6 = vadd.f32 %v3286_v18, %v10604_v58  ;;  %v3380_v28 = vpop.f32.mrf.mxu1 }
 0x474   : > { %v10758_v2 = vadd.f32 %v3380_v28, %v10580_v51 }
 0x475   : > { %v10760_v34 = vpop.f32.mrf.mxu2  ;;  %8526 = vmatmul.msk.bf16.gmra.mxu0 %vm2630_vm6, %v13233_v22 }
 0x47a   : > { %v10764_v5 = vpop.f32.mrf.mxu3  ;;  %v3288_v40 = vpop.f32.mrf.mxu0  ;;  %8502 = vmatmul.msk.bf16.gmra.mxu2 %vm2630_vm6, %v10462_v50 }
 0x47b   : > { %v10769_v12 = vadd.f32 %v3288_v40, %v10617_v19  ;;  %v3383_v58 = vpop.f32.mrf.mxu1 }
 0x47c   : > { %v3445_v30 = vadd.f32 %v3383_v58, %v10589_v10 }
 0x47d   : > { %8486 = vmatmul.msk.bf16.gmra.mxu1 %vm2630_vm6, %v10455_v3  ;;  %v3518_v51 = vpop.f32.mrf.mxu2 }
 0x47e   : > { %v3580_v54 = vadd.f32 %v3518_v51, %v3445_v30  ;;  %v13249_v30 = vld [vmem:[#allocation5_spill] sm:$0xff] }
 0x47f   : > { %8518 = vmatmul.msk.bf16.gmra.mxu3 %vm2630_vm6, %v10476_v20 }
 0x482   : > { %v3642_v22 = vpop.f32.mrf.mxu3  ;;  %v3291_v29 = vpop.f32.mrf.mxu0 }
 0x483   : > { %v10776_v4 = vadd.f32 %v3642_v22, %v3580_v54  ;;  %v10779_v53 = vadd.f32 %v3291_v29, %v10626_v13  ;;  %v3385_v19 = vpop.f32.mrf.mxu1 }
 0x484   : > { %v10782_v60 = vadd.f32 %v3385_v19, %v10598_v43 }
 0x485   : > { %v10784_v10 = vpop.f32.mrf.mxu2  ;;  %8527 = vmatmul.msk.bf16.gmra.mxu0 %vm2630_vm6, %v13238_v57 }
 0x48a   : > { %v10788_v18 = vpop.f32.mrf.mxu3  ;;  %v3293_v28 = vpop.f32.mrf.mxu0  ;;  %8503 = vmatmul.msk.bf16.gmra.mxu2 %vm2630_vm6, %v10488_v35 }
 0x48b   : > { %v10793_v20 = vadd.f32 %v3293_v28, %v10635_v1  ;;  %v3388_v13 = vpop.f32.mrf.mxu1 }
 0x48c   : > { %v3447_v40 = vadd.f32 %v3388_v13, %v10607_v36 }
 0x48d   : > { %8487 = vmatmul.msk.bf16.gmra.mxu1 %vm2630_vm6, %v10490_v21  ;;  %v3523_v43 = vpop.f32.mrf.mxu2 }
 0x48e   : > { %v3582_v58 = vadd.f32 %v3523_v43, %v3447_v40 }
 0x48f   : > { %8519 = vmatmul.msk.bf16.gmra.mxu3 %vm2630_vm6, %v13249_v30 }
 0x492   : > { %v3647_v57 = vpop.f32.mrf.mxu3  ;;  %v3736_v51 = vpop.f32.mrf.mxu0 }
 0x493   : > { %v10800_v54 = vadd.f32 %v3647_v57, %v3582_v58  ;;  %v3390_v22 = vpop.f32.mrf.mxu1  ;;  %v10803_v29 = vadd.f32 %v3736_v51, %v10649_v62  ;;  %v13253_v62 = vld [vmem:[#allocation33_spill] sm:$0xff] }
 0x494   : > { %v10806_v1 = vadd.f32 %v3390_v22, %v10620_v8 }
 0x495   : > { %v10808_v36 = vpop.f32.mrf.mxu2  ;;  %8528 = vmatmul.msk.bf16.gmra.mxu0 %vm2630_vm6, %v13241_v47 }
 0x496   : > { %13250 = vst [vmem:[#allocation31_spill] sm:$0xff] %v10806_v1 }
 0x497   : > { %13251 = vst [vmem:[#allocation30_spill] sm:$0xff] %v10808_v36 }
 0x49a   : > { %v10812_v19 = vpop.f32.mrf.mxu3  ;;  %v3738_v28 = vpop.f32.mrf.mxu0 }
 0x49b   : > { %13252 = vst [vmem:[#allocation32_spill] sm:$0xff] %v10812_v19  ;;  %v3393_v13 = vpop.f32.mrf.mxu1  ;;  %v10815_v40 = vadd.f32 %v3738_v28, %v10658_v31  ;;  %v13254_v19 = vld [vmem:[#allocation29_spill] sm:$0xff] }
 0x49c   : > { %v3449_v43 = vadd.f32 %v3393_v13, %v10629_v33 }
 0x49d   : > { %v3528_v58 = vpop.f32.mrf.mxu2  ;;  %8536 = vmatmul.msk.bf16.vlgmr.msra.gmra.mxu1 %vm2630_vm6, %v13253_v62 }
 0x49e   : > { %v3584_v8 = vadd.f32 %v3528_v58, %v3449_v43 }
 0x4a2   : > { %v3652_v57 = vpop.f32.mrf.mxu3  ;;  %v3741_v51 = vpop.f32.mrf.mxu0 }
 0x4a3   : > { %v10820_v22 = vadd.f32 %v3652_v57, %v3584_v8  ;;  %v3395_v36 = vpop.f32.mrf.mxu1  ;;  %v10823_v47 = vadd.f32 %v3741_v51, %v10668_v25  ;;  %v13256_v25 = vld [vmem:[#allocation16_spill] sm:$0xff] }
 0x4a4   : > { %v10826_v1 = vadd.f32 %v3395_v36, %v13254_v19 }
 0x4a5   : > { %v10828_v31 = vpop.f32.mrf.mxu2  ;;  %8529 = vmatmul.msk.bf16.gmra.mxu0 %vm2630_vm6, %v13242_v45 }
 0x4aa   : > { %v10832_v33 = vpop.f32.mrf.mxu3  ;;  %v3743_v28 = vpop.f32.mrf.mxu0 }
 0x4ab   : > { %13255 = vst [vmem:[#allocation10_spill] sm:$0xff] %v10832_v33  ;;  %v3398_v13 = vpop.f32.mrf.mxu1  ;;  %v10835_v43 = vadd.f32 %v3743_v28, %v10678_v55 }
 0x4ac   : > { %v3451_v58 = vadd.f32 %v3398_v13, %v10652_v7 }
 0x4ad   : > { %v3533_v62 = vpop.f32.mrf.mxu2  ;;  %8537 = vmatmul.msk.bf16.gmra.mxu1 %vm2630_vm6, %v13256_v25 }
 0x4ae   : > { %v3586_v36 = vadd.f32 %v3533_v62, %v3451_v58 }
 0x4b2   : > { %v3657_v19 = vpop.f32.mrf.mxu3  ;;  %v3746_v8 = vpop.f32.mrf.mxu0 }
 0x4b3   : > { %v10840_v57 = vadd.f32 %v3657_v19, %v3586_v36  ;;  %v3400_v51 = vpop.f32.mrf.mxu1  ;;  %v10843_v45 = vadd.f32 %v3746_v8, %v10688_v61  ;;  %v13258_v61 = vld [vmem:[#allocation8_spill] sm:$0xff] }
 0x4b4   : > { %v10846_v33 = vadd.f32 %v3400_v51, %v10661_v24 }
 0x4b5   : > { %v10848_v55 = vpop.f32.mrf.mxu2  ;;  %8530 = vmatmul.msk.bf16.gmra.mxu0 %vm2630_vm6, %v13244_v56 }
 0x4ba   : > { %v10852_v7 = vpop.f32.mrf.mxu3  ;;  %v3748_v28 = vpop.f32.mrf.mxu0 }
 0x4bb   : > { %13257 = vst [vmem:[#allocation13_spill] sm:$0xff] %v10852_v7  ;;  %v3403_v13 = vpop.f32.mrf.mxu1  ;;  %v10855_v58 = vadd.f32 %v3748_v28, %v10698_v26 }
 0x4bc   : > { %v3453_v62 = vadd.f32 %v3403_v13, %v10671_v15 }
 0x4bd   : > { %v3538_v25 = vpop.f32.mrf.mxu2  ;;  %8538 = vmatmul.msk.bf16.gmra.mxu1 %vm2630_vm6, %v13258_v61 }
 0x4be   : > { %v3588_v24 = vadd.f32 %v3538_v25, %v3453_v62 }
 0x4c2   : > { %v3662_v36 = vpop.f32.mrf.mxu3  ;;  %v3751_v19 = vpop.f32.mrf.mxu0 }
 0x4c3   : > { %v10860_v8 = vadd.f32 %v3662_v36, %v3588_v24  ;;  %v3405_v51 = vpop.f32.mrf.mxu1  ;;  %v10863_v56 = vadd.f32 %v3751_v19, %v10708_v9  ;;  %v13260_v9 = vld [vmem:[#allocation34_spill] sm:$0xff] }
 0x4c4   : > { %v10866_v7 = vadd.f32 %v3405_v51, %v10681_v59 }
 0x4c5   : > { %v10868_v26 = vpop.f32.mrf.mxu2  ;;  %8531 = vmatmul.msk.bf16.gmra.mxu0 %vm2630_vm6, %v13246_v42 }
 0x4ca   : > { %v10872_v15 = vpop.f32.mrf.mxu3  ;;  %v3753_v28 = vpop.f32.mrf.mxu0 }
 0x4cb   : > { %13259 = vst [vmem:[#allocation15_spill] sm:$0xff] %v10872_v15  ;;  %v3408_v13 = vpop.f32.mrf.mxu1  ;;  %v10875_v62 = vadd.f32 %v3753_v28, %v10718_v41  ;;  %v3577_v41 = vadd.f32 %v10736_v17, %v10734_v39 }
 0x4cc   : > { %v3455_v25 = vadd.f32 %v3408_v13, %v10691_v63 }
 0x4cd   : > { %v3543_v61 = vpop.f32.mrf.mxu2  ;;  %8539 = vmatmul.msk.bf16.gmra.mxu1 %vm2630_vm6, %v13260_v9  ;;  %v3701_v28 = vadd.f32 %v10740_v0, %v3577_v41 }
 0x4ce   : > { %v3590_v59 = vadd.f32 %v3543_v61, %v3455_v25 }
 0x4d2   : > { %v3667_v24 = vpop.f32.mrf.mxu3  ;;  %v3756_v36 = vpop.f32.mrf.mxu0 }
 0x4d3   : > { %v10880_v19 = vadd.f32 %v3667_v24, %v3590_v59  ;;  %v3410_v51 = vpop.f32.mrf.mxu1  ;;  %v10883_v42 = vadd.f32 %v3756_v36, %v10728_v11  ;;  %v13261_v59 = vld [vmem:[#allocation11_spill] sm:$0xff] }
 0x4d4   : > { %v10886_v15 = vadd.f32 %v3410_v51, %v10701_v27 }
 0x4d5   : > { %v10890_v63 = vpop.f32.mrf.mxu2  ;;  %8532 = vmatmul.msk.bf16.gmra.mxu0 %vm2630_vm6, %v13248_v23 }
 0x4da   : > { %v10895_v13 = vpop.f32.mrf.mxu3  ;;  %v3758_v25 = vpop.f32.mrf.mxu0 }
 0x4db   : > { %v3413_v61 = vpop.f32.mrf.mxu1  ;;  %v10897_v9 = vadd.f32 %v3758_v25, %v3701_v28 }
 0x4dc   : > { %v3457_v11 = vadd.f32 %v3413_v61, %v10711_v16 }
 0x4dd   : > { %v3548_v27 = vpop.f32.mrf.mxu2  ;;  %8540 = vmatmul.msk.bf16.gmra.mxu1 %vm2630_vm6, %v13261_v59 }
 0x4de   : > { %v3592_v39 = vadd.f32 %v3548_v27, %v3457_v11  ;;  %v13265_v27 = vld [vmem:[#allocation9_spill] sm:$0xff] }
 0x4e2   : > { %v3672_v17 = vpop.f32.mrf.mxu3  ;;  %v3761_v24 = vpop.f32.mrf.mxu0 }
 0x4e3   : > { %v10902_v36 = vadd.f32 %v3672_v17, %v3592_v39  ;;  %v3415_v23 = vpop.f32.mrf.mxu1  ;;  %v10905_v0 = vadd.f32 %v3761_v24, %v10752_v44 }
 0x4e4   : > { %v10908_v51 = vadd.f32 %v3415_v23, %v10721_v52 }
 0x4e5   : > { %v10910_v41 = vpop.f32.mrf.mxu2  ;;  %8533 = vmatmul.msk.bf16.gmra.mxu0 %vm2630_vm6, %v10455_v3 }
 0x4e6   : > { %13262 = vst [vmem:[#allocation14_spill] sm:$0xff] %v10908_v51 }
 0x4e7   : > { %13263 = vst [vmem:[#allocation17_spill] sm:$0xff] %v10910_v41 }
 0x4ea   : > { %v10914_v16 = vpop.f32.mrf.mxu3  ;;  %v10916_v28 = vpop.f32.mrf.mxu0 }
 0x4eb   : > { %13264 = vst [vmem:[#allocation18_spill] sm:$0xff] %v10914_v16  ;;  %v3418_v25 = vpop.f32.mrf.mxu1 }
 0x4ec   : > { %v3459_v61 = vadd.f32 %v3418_v25, %v10731_v14 }
 0x4ed   : > { %v3553_v11 = vpop.f32.mrf.mxu2  ;;  %8541 = vmatmul.msk.bf16.gmra.mxu1 %vm2630_vm6, %v13265_v27 }
 0x4ee   : > { %v3594_v44 = vadd.f32 %v3553_v11, %v3459_v61 }
 0x4f2   : > { %v3677_v59 = vpop.f32.mrf.mxu3  ;;  %v3766_v52 = vpop.f32.mrf.mxu0 }
 0x4f3   : > { %v10921_v39 = vadd.f32 %v3677_v59, %v3594_v44  ;;  %v3420_v17 = vpop.f32.mrf.mxu1  ;;  %v10924_v24 = vadd.f32 %v3766_v52, %v10776_v4  ;;  %v4103_v4 = vld [vmem:[%s12999_s5] sm:$0xf]  ;;  %v13269_v44 = vld [vmem:[#allocation12_spill] sm:$0xff] }
 0x4f4   : > { %v10927_v3 = vadd.f32 %v3420_v17, %v10745_v38  ;;  %v4627_v38 = vsel %vm4486_vm7, %v4103_v4, 0 }
 0x4f5   : > { %v10929_v23 = vpop.f32.mrf.mxu2  ;;  %8534 = vmatmul.msk.bf16.gmra.mxu0 %vm2630_vm6, %v10490_v21  ;;  %4636 = vmatpush.bf16.msra.mxu3 %v4627_v38  ;;  %v13270_v21 = vld [vmem:[#allocation6_spill] sm:$0xff] }
 0x4f6   : > { %13266 = vst [vmem:[#allocation21_spill] sm:$0xff] %v10927_v3  ;;  %8552 = vmatmul.msk.bf16.vlgmr.msra.gmra.mxu2 %vm4438_vm8, %v13270_v21 }
 0x4f7   : > { %13267 = vst [vmem:[#allocation19_spill] sm:$0xff] %v10929_v23 }
 0x4f8   : > { %8568 = vmatmul.msk.bf16.vlgmr.msra.gmra.mxu3 %vm4438_vm8, %v13249_v30  ;;  %v4107_v30 = vld [vmem:[%s12999_s5 + $0x10] sm:$0xf] }
 0x4fa   : > { %v10933_v14 = vpop.f32.mrf.mxu3  ;;  %v10935_v25 = vpop.f32.mrf.mxu0 }
 0x4fb   : > { %13268 = vst [vmem:[#allocation22_spill] sm:$0xff] %v10933_v14  ;;  %v3423_v61 = vpop.f32.mrf.mxu1 }
 0x4fc   : > { %v3461_v11 = vadd.f32 %v3423_v61, %v10755_v6 }
 0x4fd   : > { %v3558_v27 = vpop.f32.mrf.mxu2  ;;  %8542 = vmatmul.msk.bf16.gmra.mxu1 %vm2630_vm6, %v13269_v44 }
 0x4fe   : > { %v3596_v59 = vadd.f32 %v3558_v27, %v3461_v11  ;;  %v4105_v11 = vld [vmem:[%s12999_s5 + $0x8] sm:$0xf] }
 0x4ff   : > { %v4886_v27 = vsel %vm4486_vm7, %v4105_v11, 0  ;;  %v4106_v11 = vld [vmem:[%s12999_s5 + $0xc] sm:$0xf] }
 0x500   : > { %4895 = vmatpush.bf16.msrb.mxu0 %v4886_v27 }
 0x502   : > { %v3682_v6 = vpop.f32.mrf.mxu3  ;;  %v3771_v52 = vpop.f32.mrf.mxu0 }
 0x503   : > { %v10948_v17 = vadd.f32 %v3682_v6, %v3596_v59  ;;  %v3425_v61 = vpop.f32.mrf.mxu1  ;;  %v10951_v14 = vadd.f32 %v3771_v52, %v10800_v54  ;;  %v13274_v52 = vld [vmem:[#allocation20_spill] sm:$0xff] }
 0x504   : > { %v10954_v44 = vadd.f32 %v3425_v61, %v10769_v12 }
 0x505   : > { %v10959_v4 = vpop.f32.mrf.mxu2  ;;  %8535 = vmatmul.msk.bf16.gmra.mxu0 %vm2630_vm6, %v13270_v21 }
 0x506   : > { %13271 = vst [vmem:[#allocation24_spill] sm:$0xff] %v10954_v44 }
 0x507   : > { %13272 = vst [vmem:[#allocation23_spill] sm:$0xff] %v10959_v4  ;;  %v5014_v4 = vsel %vm4486_vm7, %v4106_v11, 0 }
 0x508   : > { %5023 = vmatpush.bf16.msrb.mxu1 %v5014_v4 }
 0x50a   : > { %v10964_v38 = vpop.f32.mrf.mxu3  ;;  %v10966_v59 = vpop.f32.mrf.mxu0 }
 0x50b   : > { %13273 = vst [vmem:[#allocation26_spill] sm:$0xff] %v10964_v38  ;;  %v3428_v54 = vpop.f32.mrf.mxu1  ;;  %v5151_v38 = vsel %vm4486_vm7, %v4107_v30, 0  ;;  %v10994_v30 = vld [vmem:[%s12998_s4] ss:$0 sm:$0xff] }
 0x50c   : > { %v3463_v12 = vadd.f32 %v3428_v54, %v10779_v53  ;;  %5160 = vmatpush.bf16.msrb.mxu2 %v5151_v38 }
 0x50d   : > { %v3563_v6 = vpop.f32.mrf.mxu2  ;;  %8543 = vmatmul.msk.bf16.gmra.mxu1 %vm2630_vm6, %v13274_v52 }
 0x50e   : > { %v3598_v61 = vadd.f32 %v3563_v6, %v3463_v12  ;;  %v13276_v6 = vld [vmem:[#allocation7_spill] sm:$0xff] }
 0x512   : > { %v3687_v27 = vpop.f32.mrf.mxu3  ;;  %v3776_v21 = vpop.f32.mrf.mxu0 }
 0x513   : > { %v10979_v53 = vadd.f32 %v3687_v27, %v3598_v61  ;;  %v3430_v54 = vpop.f32.mrf.mxu1  ;;  %v10982_v52 = vadd.f32 %v3776_v21, %v10820_v22 }
 0x514   : > { %v10985_v12 = vadd.f32 %v3430_v54, %v10793_v20 }
 0x515   : > { %8584 = vmatmul.msk.bf16.vlgmr.msrb.gmra.mxu0 %vm4438_vm8, %v13276_v6 }
 0x516   : > { %13275 = vst [vmem:[#allocation25_spill] sm:$0xff] %v10985_v12 }
 0x51a   : > { %v10989_v44 = vpop.f32.mrf.mxu0 }
 0x51b   : > { %v3860_v61 = vpop.f32.mrf.mxu1 }
 0x51c   : > { %v3940_v11 = vadd.f32 %v3860_v61, %v10803_v29 }
 0x51d   : > { %8544 = vmatmul.msk.bf16.gmra.mxu1 %vm2630_vm6, %v13240_v46 }
 0x51e   : > { %v3975_v22 = vadd.f32 %v10994_v30, %v3940_v11 }
 0x520   : > { %v4007_v20 = vmax.f32 %v3975_v22, 0.0 }
 0x522   : > { %v4039_v21 = vpack.c.bf16 %v4007_v20, %v4007_v20  ;;  %v3781_v4 = vpop.f32.mrf.mxu0 }
 0x523   : > { %v11001_v38 = vadd.f32 %v3781_v4, %v10840_v57  ;;  %v3862_v27 = vpop.f32.mrf.mxu1 }
 0x524   : > { %v3941_v54 = vadd.f32 %v3862_v27, %v10815_v40  ;;  %v4071_v12 = vunpack.c.l.bf16 %v4039_v21 }
 0x526   : > { %v3976_v23 = vadd.f32 %v10994_v30, %v3941_v54  ;;  %v4145_v16 = vrot.slane %v4071_v12, 7 }
 0x528   : > { %v4008_v3 = vmax.f32 %v3976_v23, 0.0  ;;  %v4241_v22 = vsel %vm495_vm0, 0.0, %v4145_v16 }
 0x529   : > { %v4318_v20 = vrot.slane %v4241_v22, 1 }
 0x52a   : > { %v4040_v29 = vpack.c.bf16 %v4008_v3, %v4008_v3  ;;  %v11005_v61 = vpop.f32.mrf.mxu0 }
 0x52b   : > { %v3865_v46 = vpop.f32.mrf.mxu1 }
 0x52c   : > { %v4072_v41 = vunpack.c.l.bf16 %v4040_v29  ;;  %v3942_v11 = vadd.f32 %v3865_v46, %v10823_v47  ;;  %v4718_v47 = vrot.slane %v4241_v22, 2 }
 0x52d   : > { %8545 = vmatmul.msk.bf16.gmra.mxu1 %vm2630_vm6, %v10317_v37 }
 0x52e   : > { %v4146_v57 = vrot.slane %v4072_v41, 7  ;;  %v3977_v40 = vadd.f32 %v10994_v30, %v3942_v11 }
 0x530   : > { %v4257_v21 = vsel %vm495_vm0, %v4146_v57, 0.0  ;;  %v4009_v23 = vmax.f32 %v3977_v40, 0.0  ;;  %v4147_v3 = vsel %vm495_vm0, %v4145_v16, %v4146_v57 }
 0x531   : > { %v4321_v12 = vrot.slane %v4257_v21, 1  ;;  %v4721_v4 = vrot.slane %v4257_v21, 2  ;;  %v11014_v27 = vpack.c.bf16 %v4147_v3, %v4241_v22  ;;  %v4319_v54 = vrot.slane %v4147_v3, 1 }
 0x532   : > { %v4041_v29 = vpack.c.bf16 %v4009_v23, %v4009_v23  ;;  %v3786_v46 = vpop.f32.mrf.mxu0  ;;  %v4719_v51 = vrot.slane %v4147_v3, 2 }
 0x533   : > { %v11017_v37 = vadd.f32 %v3786_v46, %v10860_v8  ;;  %v3867_v41 = vpop.f32.mrf.mxu1  ;;  %8569 = vmatmul.msk.bf16.gmra.mxu3 %vm4438_vm8, %v11014_v27  ;;  %v4320_v11 = vsel %vm678_vm2, %v4318_v20, %v4319_v54  ;;  %v4322_v16 = vsel %vm678_vm2, %v4319_v54, %v4321_v12 }
 0x534   : > { %v3943_v57 = vadd.f32 %v3867_v41, %v10835_v43  ;;  %v11024_v40 = vpack.c.bf16 %v4322_v16, %v4320_v11  ;;  %v4720_v22 = vsel %vm1091_vm5, %v4718_v47, %v4719_v51  ;;  %v4073_v21 = vunpack.c.l.bf16 %v4041_v29 }
 0x535   : > { %v4722_v23 = vsel %vm1091_vm5, %v4719_v51, %v4721_v4 }
 0x536   : > { %13277 = vst [vmem:[#allocation28_spill] sm:$0xff] %v11024_v40  ;;  %v3978_v8 = vadd.f32 %v10994_v30, %v3943_v57  ;;  %8553 = vmatmul.msk.bf16.gmra.mxu2 %vm4438_vm8, %v11024_v40  ;;  %v11031_v3 = vpack.c.bf16 %v4722_v23, %v4720_v22  ;;  %v4148_v20 = vrot.slane %v4073_v21, 7 }
 0x538   : > { %v4010_v46 = vmax.f32 %v3978_v8, 0.0  ;;  %8585 = vmatmul.msk.bf16.gmra.mxu0 %vm4438_vm8, %v11031_v3  ;;  %v4242_v51 = vsel %vm495_vm0, 0.0, %v4148_v20 }
 0x539   : > { %v4323_v11 = vrot.slane %v4242_v51, 1 }
 0x53a   : > { %v4042_v43 = vpack.c.bf16 %v4010_v46, %v4010_v46  ;;  %v11035_v12 = vpop.f32.mrf.mxu0 }
 0x53b   : > { %v3870_v54 = vpop.f32.mrf.mxu1 }
 0x53c   : > { %v4074_v47 = vunpack.c.l.bf16 %v4042_v43  ;;  %v3944_v29 = vadd.f32 %v3870_v54, %v10843_v45  ;;  %v4723_v45 = vrot.slane %v4242_v51, 2 }
 0x53d   : > { %8546 = vmatmul.msk.bf16.gmra.mxu1 %vm2630_vm6, %v13243_v48 }
 0x53e   : > { %v4149_v4 = vrot.slane %v4074_v47, 7  ;;  %v3979_v41 = vadd.f32 %v10994_v30, %v3944_v29 }
 0x540   : > { %v4258_v16 = vsel %vm495_vm0, %v4149_v4, 0.0  ;;  %v4011_v57 = vmax.f32 %v3979_v41, 0.0  ;;  %v4150_v22 = vsel %vm495_vm0, %v4148_v20, %v4149_v4 }
 0x541   : > { %v4326_v21 = vrot.slane %v4258_v16, 1  ;;  %v4726_v23 = vrot.slane %v4258_v16, 2  ;;  %v11044_v8 = vpack.c.bf16 %v4150_v22, %v4242_v51  ;;  %v4324_v46 = vrot.slane %v4150_v22, 1 }
 0x542   : > { %v4043_v43 = vpack.c.bf16 %v4011_v57, %v4011_v57  ;;  %v3791_v54 = vpop.f32.mrf.mxu0  ;;  %v4724_v40 = vrot.slane %v4150_v22, 2 }
 0x543   : > { %v11047_v48 = vadd.f32 %v3791_v54, %v10880_v19  ;;  %v3872_v47 = vpop.f32.mrf.mxu1  ;;  %8570 = vmatmul.msk.bf16.gmra.mxu3 %vm4438_vm8, %v11044_v8  ;;  %v4325_v29 = vsel %vm678_vm2, %v4323_v11, %v4324_v46  ;;  %v4327_v20 = vsel %vm678_vm2, %v4324_v46, %v4326_v21 }
 0x544   : > { %v3945_v4 = vadd.f32 %v3872_v47, %v10855_v58  ;;  %v11054_v41 = vpack.c.bf16 %v4327_v20, %v4325_v29  ;;  %v4725_v51 = vsel %vm1091_vm5, %v4723_v45, %v4724_v40  ;;  %v4075_v16 = vunpack.c.l.bf16 %v4043_v43 }
 0x545   : > { %v4727_v57 = vsel %vm1091_vm5, %v4724_v40, %v4726_v23 }
 0x546   : > { %13278 = vst [vmem:[#allocation27_spill] sm:$0xff] %v11054_v41  ;;  %v3980_v19 = vadd.f32 %v10994_v30, %v3945_v4  ;;  %8554 = vmatmul.msk.bf16.gmra.mxu2 %vm4438_vm8, %v11054_v41  ;;  %v11061_v22 = vpack.c.bf16 %v4727_v57, %v4725_v51  ;;  %v4151_v11 = vrot.slane %v4075_v16, 7 }
 0x548   : > { %13279 = vst [vmem:[#allocation33_spill] sm:$0xff] %v11061_v22  ;;  %v4012_v54 = vmax.f32 %v3980_v19, 0.0  ;;  %8586 = vmatmul.msk.bf16.gmra.mxu0 %vm4438_vm8, %v11061_v22  ;;  %v4243_v40 = vsel %vm495_vm0, 0.0, %v4151_v11 }
 0x549   : > { %v4328_v29 = vrot.slane %v4243_v40, 1 }
 0x54a   : > { %v4044_v58 = vpack.c.bf16 %v4012_v54, %v4012_v54  ;;  %v11065_v21 = vpop.f32.mrf.mxu0 }
 0x54b   : > { %v3875_v46 = vpop.f32.mrf.mxu1 }
 0x54c   : > { %v4076_v45 = vunpack.c.l.bf16 %v4044_v58  ;;  %v3946_v43 = vadd.f32 %v3875_v46, %v10863_v56  ;;  %v4728_v56 = vrot.slane %v4243_v40, 2 }
 0x54d   : > { %8547 = vmatmul.msk.bf16.gmra.mxu1 %vm2630_vm6, %v13245_v49 }
 0x54e   : > { %v4152_v23 = vrot.slane %v4076_v45, 7  ;;  %v3981_v47 = vadd.f32 %v10994_v30, %v3946_v43 }
 0x550   : > { %v4259_v20 = vsel %vm495_vm0, %v4152_v23, 0.0  ;;  %v4013_v4 = vmax.f32 %v3981_v47, 0.0  ;;  %v4153_v51 = vsel %vm495_vm0, %v4151_v11, %v4152_v23 }
 0x551   : > { %v4331_v16 = vrot.slane %v4259_v20, 1  ;;  %v4731_v57 = vrot.slane %v4259_v20, 2  ;;  %v11074_v19 = vpack.c.bf16 %v4153_v51, %v4243_v40  ;;  %v4329_v54 = vrot.slane %v4153_v51, 1 }
 0x552   : > { %v4045_v58 = vpack.c.bf16 %v4013_v4, %v4013_v4  ;;  %v3796_v46 = vpop.f32.mrf.mxu0  ;;  %v4729_v41 = vrot.slane %v4153_v51, 2 }
 0x553   : > { %v11077_v49 = vadd.f32 %v3796_v46, %v10902_v36  ;;  %v3877_v45 = vpop.f32.mrf.mxu1  ;;  %8571 = vmatmul.msk.bf16.gmra.mxu3 %vm4438_vm8, %v11074_v19  ;;  %v4330_v43 = vsel %vm678_vm2, %v4328_v29, %v4329_v54  ;;  %v4332_v11 = vsel %vm678_vm2, %v4329_v54, %v4331_v16 }
 0x554   : > { %v3947_v23 = vadd.f32 %v3877_v45, %v10875_v62  ;;  %v11084_v47 = vpack.c.bf16 %v4332_v11, %v4330_v43  ;;  %v4730_v40 = vsel %vm1091_vm5, %v4728_v56, %v4729_v41  ;;  %v4077_v20 = vunpack.c.l.bf16 %v4045_v58 }
 0x555   : > { %v4732_v4 = vsel %vm1091_vm5, %v4729_v41, %v4731_v57 }
 0x556   : > { %13280 = vst [vmem:[#allocation29_spill] sm:$0xff] %v11084_v47  ;;  %v3982_v36 = vadd.f32 %v10994_v30, %v3947_v23  ;;  %8555 = vmatmul.msk.bf16.gmra.mxu2 %vm4438_vm8, %v11084_v47  ;;  %v11091_v51 = vpack.c.bf16 %v4732_v4, %v4730_v40  ;;  %v4154_v29 = vrot.slane %v4077_v20, 7 }
 0x558   : > { %13281 = vst [vmem:[#allocation16_spill] sm:$0xff] %v11091_v51  ;;  %v4014_v46 = vmax.f32 %v3982_v36, 0.0  ;;  %8587 = vmatmul.msk.bf16.gmra.mxu0 %vm4438_vm8, %v11091_v51  ;;  %v4244_v41 = vsel %vm495_vm0, 0.0, %v4154_v29 }
 0x559   : > { %v4333_v43 = vrot.slane %v4244_v41, 1 }
 0x55a   : > { %v4046_v62 = vpack.c.bf16 %v4014_v46, %v4014_v46  ;;  %v11095_v16 = vpop.f32.mrf.mxu0 }
 0x55b   : > { %v3880_v54 = vpop.f32.mrf.mxu1 }
 0x55c   : > { %v4078_v56 = vunpack.c.l.bf16 %v4046_v62  ;;  %v3948_v58 = vadd.f32 %v3880_v54, %v10883_v42  ;;  %v4733_v42 = vrot.slane %v4244_v41, 2 }
 0x55d   : > { %8548 = vmatmul.msk.bf16.gmra.mxu1 %vm2630_vm6, %v13247_v32 }
 0x55e   : > { %v4155_v57 = vrot.slane %v4078_v56, 7  ;;  %v3983_v45 = vadd.f32 %v10994_v30, %v3948_v58 }
 0x560   : > { %v4260_v11 = vsel %vm495_vm0, %v4155_v57, 0.0  ;;  %v4015_v23 = vmax.f32 %v3983_v45, 0.0  ;;  %v4156_v40 = vsel %vm495_vm0, %v4154_v29, %v4155_v57 }
 0x561   : > { %v4336_v20 = vrot.slane %v4260_v11, 1  ;;  %v4736_v4 = vrot.slane %v4260_v11, 2  ;;  %v11104_v36 = vpack.c.bf16 %v4156_v40, %v4244_v41  ;;  %v4334_v46 = vrot.slane %v4156_v40, 1 }
 0x562   : > { %v4047_v62 = vpack.c.bf16 %v4015_v23, %v4015_v23  ;;  %v3801_v54 = vpop.f32.mrf.mxu0  ;;  %v4734_v47 = vrot.slane %v4156_v40, 2 }
 0x563   : > { %v11107_v32 = vadd.f32 %v3801_v54, %v10921_v39  ;;  %v3882_v56 = vpop.f32.mrf.mxu1  ;;  %8572 = vmatmul.msk.bf16.gmra.mxu3 %vm4438_vm8, %v11104_v36  ;;  %v4335_v58 = vsel %vm678_vm2, %v4333_v43, %v4334_v46  ;;  %v4337_v29 = vsel %vm678_vm2, %v4334_v46, %v4336_v20  ;;  %v3579_v46 = vadd.f32 %v10760_v34, %v10758_v2 }
 0x564   : > { %v3949_v57 = vadd.f32 %v3882_v56, %v10897_v9  ;;  %v11114_v45 = vpack.c.bf16 %v4337_v29, %v4335_v58  ;;  %v4735_v41 = vsel %vm1091_vm5, %v4733_v42, %v4734_v47  ;;  %v4079_v11 = vunpack.c.l.bf16 %v4047_v62 }
 0x565   : > { %v4737_v23 = vsel %vm1091_vm5, %v4734_v47, %v4736_v4  ;;  %v3703_v29 = vadd.f32 %v10764_v5, %v3579_v46 }
 0x566   : > { %v3984_v39 = vadd.f32 %v10994_v30, %v3949_v57  ;;  %8556 = vmatmul.msk.bf16.gmra.mxu2 %vm4438_vm8, %v11114_v45  ;;  %v11121_v40 = vpack.c.bf16 %v4737_v23, %v4735_v41  ;;  %v4157_v43 = vrot.slane %v4079_v11, 7 }
 0x568   : > { %13282 = vst [vmem:[#allocation8_spill] sm:$0xff] %v11121_v40  ;;  %v4016_v54 = vmax.f32 %v3984_v39, 0.0  ;;  %8588 = vmatmul.msk.bf16.gmra.mxu0 %vm4438_vm8, %v11121_v40  ;;  %v4245_v62 = vsel %vm495_vm0, 0.0, %v4157_v43 }
 0x569   : > { %v4338_v57 = vrot.slane %v4245_v62, 1 }
 0x56a   : > { %v4048_v9 = vpack.c.bf16 %v4016_v54, %v4016_v54  ;;  %v11125_v20 = vpop.f32.mrf.mxu0  ;;  %v3827_v54 = vadd.f32 %v10916_v28, %v3703_v29 }
 0x56b   : > { %v3885_v42 = vpop.f32.mrf.mxu1 }
 0x56c   : > { %v4080_v47 = vunpack.c.l.bf16 %v4048_v9  ;;  %v3950_v4 = vadd.f32 %v3885_v42, %v10905_v0  ;;  %v4738_v9 = vrot.slane %v4245_v62, 2 }
 0x56d   : > { %8549 = vmatmul.msk.bf16.gmra.mxu1 %vm2630_vm6, %v10462_v50 }
 0x56e   : > { %v4158_v56 = vrot.slane %v4080_v47, 7  ;;  %v3985_v58 = vadd.f32 %v10994_v30, %v3950_v4 }
 0x570   : > { %v4261_v41 = vsel %vm495_vm0, %v4158_v56, 0.0  ;;  %v4017_v11 = vmax.f32 %v3985_v58, 0.0  ;;  %v4159_v2 = vsel %vm495_vm0, %v4157_v43, %v4158_v56 }
 0x571   : > { %v4341_v34 = vrot.slane %v4261_v41, 1  ;;  %v4741_v23 = vrot.slane %v4261_v41, 2  ;;  %v11137_v39 = vpack.c.bf16 %v4159_v2, %v4245_v62  ;;  %v4339_v0 = vrot.slane %v4159_v2, 1 }
 0x572   : > { %v4049_v50 = vpack.c.bf16 %v4017_v11, %v4017_v11  ;;  %v3806_v42 = vpop.f32.mrf.mxu0  ;;  %v4739_v47 = vrot.slane %v4159_v2, 2 }
 0x573   : > { %v11141_v4 = vadd.f32 %v3806_v42, %v10948_v17  ;;  %v3887_v5 = vpop.f32.mrf.mxu1  ;;  %8573 = vmatmul.msk.bf16.gmra.mxu3 %vm4438_vm8, %v11137_v39  ;;  %v4340_v43 = vsel %vm678_vm2, %v4338_v57, %v4339_v0  ;;  %v4342_v46 = vsel %vm678_vm2, %v4339_v0, %v4341_v34  ;;  %v3581_v0 = vadd.f32 %v10784_v10, %v10782_v60 }
 0x574   : > { %v3951_v56 = vadd.f32 %v3887_v5, %v3827_v54  ;;  %v11147_v58 = vpack.c.bf16 %v4342_v46, %v4340_v43  ;;  %v4740_v28 = vsel %vm1091_vm5, %v4738_v9, %v4739_v47  ;;  %v4081_v62 = vunpack.c.l.bf16 %v4049_v50  ;;  %v11168_v43 = vpop.f32.mrf.mxu2  ;;  %v11170_v46 = vpop.f32.mrf.mxu3 }
 0x575   : > { %v4742_v29 = vsel %vm1091_vm5, %v4739_v47, %v4741_v23  ;;  %v3705_v5 = vadd.f32 %v10788_v18, %v3581_v0 }
 0x576   : > { %v3986_v41 = vadd.f32 %v10994_v30, %v3951_v56  ;;  %8557 = vmatmul.msk.bf16.gmra.mxu2 %vm4438_vm8, %v11147_v58  ;;  %v11154_v17 = vpack.c.bf16 %v4742_v29, %v4740_v28  ;;  %v4160_v57 = vrot.slane %v4081_v62, 7 }
 0x578   : > { %13283 = vst [vmem:[#allocation34_spill] sm:$0xff] %v11154_v17  ;;  %v4018_v11 = vmax.f32 %v3986_v41, 0.0  ;;  %8589 = vmatmul.msk.bf16.gmra.mxu0 %vm4438_vm8, %v11154_v17  ;;  %v4246_v50 = vsel %vm495_vm0, 0.0, %v4160_v57  ;;  %v3829_v41 = vadd.f32 %v10935_v25, %v3705_v5 }
 0x579   : > { %v4343_v56 = vrot.slane %v4246_v50, 1 }
 0x57a   : > { %v4050_v2 = vpack.c.bf16 %v4018_v11, %v4018_v11  ;;  %v11158_v34 = vpop.f32.mrf.mxu0  ;;  %v4743_v11 = vrot.slane %v4246_v50, 2 }
 0x57b   : > { %v3890_v54 = vpop.f32.mrf.mxu1 }
 0x57c   : > { %v4082_v23 = vunpack.c.l.bf16 %v4050_v2  ;;  %v3952_v9 = vadd.f32 %v3890_v54, %v10924_v24 }
 0x57d   : > { %8550 = vmatmul.msk.bf16.gmra.mxu1 %vm2630_vm6, %v10488_v35 }
 0x57e   : > { %v4161_v42 = vrot.slane %v4082_v23, 7  ;;  %v3987_v47 = vadd.f32 %v10994_v30, %v3952_v9 }
 0x580   : > { %v4262_v60 = vsel %vm495_vm0, %v4161_v42, 0.0  ;;  %v4019_v10 = vmax.f32 %v3987_v47, 0.0  ;;  %v4162_v24 = vsel %vm495_vm0, %v4160_v57, %v4161_v42 }
 0x581   : > { %v4346_v28 = vrot.slane %v4262_v60, 1  ;;  %v4746_v62 = vrot.slane %v4262_v60, 2  ;;  %v11174_v29 = vpack.c.bf16 %v4162_v24, %v4246_v50  ;;  %v4344_v35 = vrot.slane %v4162_v24, 1 }
 0x582   : > { %v4051_v2 = vpack.c.bf16 %v4019_v10, %v4019_v10  ;;  %v3811_v18 = vpop.f32.mrf.mxu0  ;;  %v4744_v0 = vrot.slane %v4162_v24, 2  ;;  %v4638_v24 = vpop.f32.mrf.mxu3 }
 0x583   : > { %v11178_v54 = vadd.f32 %v3811_v18, %v10979_v53  ;;  %v3892_v23 = vpop.f32.mrf.mxu1  ;;  %8574 = vmatmul.msk.bf16.gmra.mxu3 %vm4438_vm8, %v11174_v29  ;;  %v4345_v57 = vsel %vm678_vm2, %v4343_v56, %v4344_v35  ;;  %v4347_v9 = vsel %vm678_vm2, %v4344_v35, %v4346_v28  ;;  %v4499_v56 = vpop.f32.mrf.mxu2 }
 0x584   : > { %v3953_v42 = vadd.f32 %v3892_v23, %v3829_v41  ;;  %v11184_v47 = vpack.c.bf16 %v4347_v9, %v4345_v57  ;;  %v4745_v25 = vsel %vm1091_vm5, %v4743_v11, %v4744_v0  ;;  %v4083_v50 = vunpack.c.l.bf16 %v4051_v2  ;;  %v13286_v2 = vld [vmem:[#allocation31_spill] sm:$0xff] }
 0x585   : > { %v4747_v5 = vsel %vm1091_vm5, %v4744_v0, %v4746_v62  ;;  %v4639_v35 = vadd.f32 %v4638_v24, %v4499_v56  ;;  %v13287_v62 = vld [vmem:[#allocation30_spill] sm:$0xff] }
 0x586   : > { %13284 = vst [vmem:[#allocation11_spill] sm:$0xff] %v11184_v47  ;;  %v3988_v60 = vadd.f32 %v10994_v30, %v3953_v42  ;;  %8558 = vmatmul.msk.bf16.gmra.mxu2 %vm4438_vm8, %v11184_v47  ;;  %v11191_v53 = vpack.c.bf16 %v4747_v5, %v4745_v25  ;;  %v4163_v28 = vrot.slane %v4083_v50, 7  ;;  %v3583_v18 = vadd.f32 %v13287_v62, %v13286_v2  ;;  %v13288_v50 = vld [vmem:[#allocation32_spill] sm:$0xff] }
 0x588   : > { %13285 = vst [vmem:[#allocation9_spill] sm:$0xff] %v11191_v53  ;;  %v4020_v10 = vmax.f32 %v3988_v60, 0.0  ;;  %8590 = vmatmul.msk.bf16.gmra.mxu0 %vm4438_vm8, %v11191_v53  ;;  %v4247_v9 = vsel %vm495_vm0, 0.0, %v4163_v28  ;;  %v3707_v5 = vadd.f32 %v13288_v50, %v3583_v18 }
 0x589   : > { %v4348_v60 = vrot.slane %v4247_v9, 1  ;;  %v4748_v47 = vrot.slane %v4247_v9, 2 }
 0x58a   : > { %v4052_v41 = vpack.c.bf16 %v4020_v10, %v4020_v10  ;;  %v11195_v11 = vpop.f32.mrf.mxu0 }
 0x58b   : > { %v3895_v0 = vpop.f32.mrf.mxu1 }
 0x58c   : > { %v4084_v23 = vunpack.c.l.bf16 %v4052_v41  ;;  %v3954_v57 = vadd.f32 %v3895_v0, %v10951_v14  ;;  %v3831_v0 = vadd.f32 %v10966_v59, %v3707_v5 }
 0x58d   : > { %8551 = vmatmul.msk.bf16.gmra.mxu1 %vm2630_vm6, %v13276_v6  ;;  %vm7847_vm6 = vcmask 1045508  }
 0x58e   : > { %v4164_v42 = vrot.slane %v4084_v23, 7  ;;  %v3989_v25 = vadd.f32 %v10994_v30, %v3954_v57 }
 0x590   : > { %v4263_v10 = vsel %vm495_vm0, %v4164_v42, 0.0  ;;  %v4021_v56 = vmax.f32 %v3989_v25, 0.0  ;;  %v4165_v24 = vsel %vm495_vm0, %v4163_v28, %v4164_v42 }
 0x591   : > { %v4351_v2 = vrot.slane %v4263_v10, 1  ;;  %v4751_v41 = vrot.slane %v4263_v10, 2  ;;  %v11207_v62 = vpack.c.bf16 %v4165_v24, %v4247_v9  ;;  %v4349_v14 = vrot.slane %v4165_v24, 1 }
 0x592   : > { %v4053_v6 = vpack.c.bf16 %v4021_v56, %v4021_v56  ;;  %v4749_v23 = vrot.slane %v4165_v24, 2  ;;  %v4897_v53 = vpop.f32.mrf.mxu0  ;;  %v3585_v24 = vadd.f32 %v10828_v31, %v10826_v1 }
 0x593   : > { %v3897_v57 = vpop.f32.mrf.mxu1  ;;  %8575 = vmatmul.msk.bf16.gmra.mxu3 %vm4438_vm8, %v11207_v62  ;;  %v4350_v18 = vsel %vm678_vm2, %v4348_v60, %v4349_v14  ;;  %v4352_v25 = vsel %vm678_vm2, %v4349_v14, %v4351_v2  ;;  %v11214_v28 = vadd.f32 %v4897_v53, %v4639_v35 }
 0x594   : > { %v3955_v42 = vadd.f32 %v3897_v57, %v3831_v0  ;;  %v11216_v50 = vpack.c.bf16 %v4352_v25, %v4350_v18  ;;  %v4750_v10 = vsel %vm1091_vm5, %v4748_v47, %v4749_v23  ;;  %v4085_v59 = vunpack.c.l.bf16 %v4053_v6 }
 0x595   : > { %v4752_v9 = vsel %vm1091_vm5, %v4749_v23, %v4751_v41  ;;  %v13290_v23 = vld [vmem:[#allocation10_spill] sm:$0xff] }
 0x596   : > { %v3990_v5 = vadd.f32 %v10994_v30, %v3955_v42  ;;  %8559 = vmatmul.msk.bf16.gmra.mxu2 %vm4438_vm8, %v11216_v50  ;;  %v11223_v56 = vpack.c.bf16 %v4752_v9, %v4750_v10  ;;  %v4166_v53 = vrot.slane %v4085_v59, 7  ;;  %v3709_v57 = vadd.f32 %v13290_v23, %v3585_v24 }
 0x598   : > { %13289 = vst [vmem:[#allocation12_spill] sm:$0xff] %v11223_v56  ;;  %v4022_v60 = vmax.f32 %v3990_v5, 0.0  ;;  %8591 = vmatmul.msk.bf16.gmra.mxu0 %vm4438_vm8, %v11223_v56  ;;  %v4248_v41 = vsel %vm495_vm0, 0.0, %v4166_v53  ;;  %v3833_v9 = vadd.f32 %v10989_v44, %v3709_v57 }
 0x599   : > { %v4353_v18 = vrot.slane %v4248_v41, 1  ;;  %v4753_v5 = vrot.slane %v4248_v41, 2 }
 0x59a   : > { %v4054_v35 = vpack.c.bf16 %v4022_v60, %v4022_v60 }
 0x59b   : > { %v3900_v47 = vpop.f32.mrf.mxu1 }
 0x59c   : > { %v4086_v6 = vunpack.c.l.bf16 %v4054_v35  ;;  %v3956_v2 = vadd.f32 %v3900_v47, %v10982_v52 }
 0x59d   : > { %8600 = vmatmul.msk.bf16.vlgmr.msrb.gmra.mxu1 %vm4438_vm8, %v11014_v27 }
 0x59e   : > { %v4167_v14 = vrot.slane %v4086_v6, 7  ;;  %v3991_v0 = vadd.f32 %v10994_v30, %v3956_v2 }
 0x5a0   : > { %v4264_v25 = vsel %vm495_vm0, %v4167_v14, 0.0  ;;  %v4023_v42 = vmax.f32 %v3991_v0, 0.0  ;;  %v4168_v1 = vsel %vm495_vm0, %v4166_v53, %v4167_v14 }
 0x5a1   : > { %v4356_v31 = vrot.slane %v4264_v25, 1  ;;  %v4756_v10 = vrot.slane %v4264_v25, 2  ;;  %v11237_v59 = vpack.c.bf16 %v4168_v1, %v4248_v41  ;;  %v4354_v52 = vrot.slane %v4168_v1, 1 }
 0x5a2   : > { %v4055_v27 = vpack.c.bf16 %v4023_v42, %v4023_v42  ;;  %v4754_v60 = vrot.slane %v4168_v1, 2  ;;  %v3587_v25 = vadd.f32 %v10848_v55, %v10846_v33  ;;  %v11257_v1 = vpop.f32.mrf.mxu0 }
 0x5a3   : > { %v3902_v35 = vpop.f32.mrf.mxu1  ;;  %8576 = vmatmul.msk.bf16.gmra.mxu3 %vm4438_vm8, %v11237_v59  ;;  %v4355_v24 = vsel %vm678_vm2, %v4353_v18, %v4354_v52  ;;  %v4357_v47 = vsel %vm678_vm2, %v4354_v52, %v4356_v31  ;;  %13292 = vst [vmem:[#allocation31_spill] sm:$0xff] %v11257_v1 }
 0x5a4   : > { %v3957_v6 = vadd.f32 %v3902_v35, %v3833_v9  ;;  %v11244_v53 = vpack.c.bf16 %v4357_v47, %v4355_v24  ;;  %v4755_v2 = vsel %vm1091_vm5, %v4753_v5, %v4754_v60  ;;  %v4087_v14 = vunpack.c.l.bf16 %v4055_v27  ;;  %v11263_v5 = vpop.f32.mrf.mxu3 }
 0x5a5   : > { %v4757_v0 = vsel %vm1091_vm5, %v4754_v60, %v4756_v10  ;;  %13293 = vst [vmem:[#allocation30_spill] sm:$0xff] %v11263_v5  ;;  %v13294_v60 = vld [vmem:[#allocation13_spill] sm:$0xff] }
 0x5a6   : > { %v3992_v44 = vadd.f32 %v10994_v30, %v3957_v6  ;;  %8560 = vmatmul.msk.bf16.gmra.mxu2 %vm4438_vm8, %v11244_v53  ;;  %v11251_v41 = vpack.c.bf16 %v4757_v0, %v4755_v2  ;;  %v4169_v57 = vrot.slane %v4087_v14, 7  ;;  %v3711_v35 = vadd.f32 %v13294_v60, %v3587_v25  ;;  %v11269_v2 = vpop.f32.mrf.mxu2 }
 0x5a7   : > { %13295 = vst [vmem:[#allocation32_spill] sm:$0xff] %v11269_v2 }
 0x5a8   : > { %13291 = vst [vmem:[#allocation20_spill] sm:$0xff] %v11251_v41  ;;  %v4024_v23 = vmax.f32 %v3992_v44, 0.0  ;;  %8592 = vmatmul.msk.bf16.gmra.mxu0 %vm4438_vm8, %v11251_v41  ;;  %v4249_v52 = vsel %vm495_vm0, 0.0, %v4169_v57  ;;  %v3835_v44 = vadd.f32 %v11005_v61, %v3711_v35 }
 0x5a9   : > { %v4358_v24 = vrot.slane %v4249_v52, 1 }
 0x5aa   : > { %v4056_v18 = vpack.c.bf16 %v4024_v23, %v4024_v23  ;;  %v4758_v23 = vrot.slane %v4249_v52, 2 }
 0x5ab   : > { %v3905_v42 = vpop.f32.mrf.mxu1 }
 0x5ac   : > { %v4088_v31 = vunpack.c.l.bf16 %v4056_v18  ;;  %v3958_v10 = vadd.f32 %v3905_v42, %v11001_v38 }
 0x5ad   : > { %8601 = vmatmul.msk.bf16.gmra.mxu1 %vm4438_vm8, %v11044_v8 }
 0x5ae   : > { %v4170_v9 = vrot.slane %v4088_v31, 7  ;;  %v3993_v27 = vadd.f32 %v10994_v30, %v3958_v10 }
 0x5b0   : > { %v4265_v33 = vsel %vm495_vm0, %v4170_v9, 0.0  ;;  %v4025_v55 = vmax.f32 %v3993_v27, 0.0  ;;  %v4171_v47 = vsel %vm495_vm0, %v4169_v57, %v4170_v9 }
 0x5b1   : > { %v4361_v6 = vrot.slane %v4265_v33, 1  ;;  %v4761_v38 = vrot.slane %v4265_v33, 2  ;;  %v11271_v14 = vpack.c.bf16 %v4171_v47, %v4249_v52  ;;  %v4359_v0 = vrot.slane %v4171_v47, 1 }
 0x5b2   : > { %v4057_v18 = vpack.c.bf16 %v4025_v55, %v4025_v55  ;;  %v4759_v42 = vrot.slane %v4171_v47, 2  ;;  %v3589_v47 = vadd.f32 %v10868_v26, %v10866_v7 }
 0x5b3   : > { %v3907_v31 = vpop.f32.mrf.mxu1  ;;  %8577 = vmatmul.msk.bf16.gmra.mxu3 %vm4438_vm8, %v11271_v14  ;;  %v4360_v25 = vsel %vm678_vm2, %v4358_v24, %v4359_v0  ;;  %v4362_v57 = vsel %vm678_vm2, %v4359_v0, %v4361_v6 }
 0x5b4   : > { %v3959_v10 = vadd.f32 %v3907_v31, %v3835_v44  ;;  %v11278_v9 = vpack.c.bf16 %v4362_v57, %v4360_v25  ;;  %v4760_v27 = vsel %vm1091_vm5, %v4758_v23, %v4759_v42  ;;  %v4089_v60 = vunpack.c.l.bf16 %v4057_v18  ;;  %v13297_v25 = vld [vmem:[#allocation15_spill] sm:$0xff] }
 0x5b5   : > { %v4902_v33 = vpop.f32.mrf.mxu0  ;;  %v4762_v61 = vsel %vm1091_vm5, %v4759_v42, %v4761_v38  ;;  %v3713_v57 = vadd.f32 %v13297_v25, %v3589_v47 }
 0x5b6   : > { %v3994_v52 = vadd.f32 %v10994_v30, %v3959_v10  ;;  %8561 = vmatmul.msk.bf16.gmra.mxu2 %vm4438_vm8, %v11278_v9  ;;  %v4643_v35 = vpop.f32.mrf.mxu3  ;;  %v11285_v55 = vpack.c.bf16 %v4762_v61, %v4760_v27  ;;  %v4172_v6 = vrot.slane %v4089_v60, 7 }
 0x5b7   : > { %v3837_v60 = vadd.f32 %v11035_v12, %v3713_v57 }
 0x5b8   : > { %13296 = vst [vmem:[#allocation10_spill] sm:$0xff] %v11285_v55  ;;  %v4026_v24 = vmax.f32 %v3994_v52, 0.0  ;;  %8593 = vmatmul.msk.bf16.gmra.mxu0 %vm4438_vm8, %v11285_v55  ;;  %v4250_v10 = vsel %vm495_vm0, 0.0, %v4172_v6 }
 0x5b9   : > { %v4504_v0 = vpop.f32.mrf.mxu2  ;;  %v4363_v52 = vrot.slane %v4250_v10, 1 }
 0x5ba   : > { %v4058_v44 = vpack.c.bf16 %v4026_v24, %v4026_v24  ;;  %v4644_v23 = vadd.f32 %v4643_v35, %v4504_v0 }
 0x5bb   : > { %v3910_v38 = vpop.f32.mrf.mxu1 }
 0x5bc   : > { %v4090_v18 = vunpack.c.l.bf16 %v4058_v44  ;;  %v3960_v42 = vadd.f32 %v3910_v38, %v11017_v37  ;;  %v11292_v31 = vadd.f32 %v4902_v33, %v4644_v23  ;;  %v4763_v38 = vrot.slane %v4250_v10, 2 }
 0x5bd   : > { %v4904_v27 = vpop.f32.mrf.mxu0  ;;  %8602 = vmatmul.msk.bf16.gmra.mxu1 %vm4438_vm8, %v11074_v19 }
 0x5be   : > { %v4173_v61 = vrot.slane %v4090_v18, 7  ;;  %v3995_v7 = vadd.f32 %v10994_v30, %v3960_v42  ;;  %v4645_v26 = vpop.f32.mrf.mxu3 }
 0x5c0   : > { %v4266_v35 = vsel %vm495_vm0, %v4173_v61, 0.0  ;;  %v4027_v37 = vmax.f32 %v3995_v7, 0.0  ;;  %v4174_v33 = vsel %vm495_vm0, %v4172_v6, %v4173_v61 }
 0x5c1   : > { %v4366_v24 = vrot.slane %v4266_v35, 1  ;;  %v4766_v47 = vrot.slane %v4266_v35, 2  ;;  %v4506_v0 = vpop.f32.mrf.mxu2  ;;  %v11302_v44 = vpack.c.bf16 %v4174_v33, %v4250_v10  ;;  %v4364_v23 = vrot.slane %v4174_v33, 1 }
 0x5c2   : > { %v4059_v25 = vpack.c.bf16 %v4027_v37, %v4027_v37  ;;  %v4646_v18 = vadd.f32 %v4645_v26, %v4506_v0  ;;  %v4764_v1 = vrot.slane %v4174_v33, 2 }
 0x5c3   : > { %v3912_v42 = vpop.f32.mrf.mxu1  ;;  %8578 = vmatmul.msk.bf16.gmra.mxu3 %vm4438_vm8, %v11302_v44  ;;  %v4365_v12 = vsel %vm678_vm2, %v4363_v52, %v4364_v23  ;;  %v4367_v57 = vsel %vm678_vm2, %v4364_v23, %v4366_v24 }
 0x5c4   : > { %v3961_v7 = vadd.f32 %v3912_v42, %v3837_v60  ;;  %v11308_v6 = vpack.c.bf16 %v4367_v57, %v4365_v12  ;;  %v4765_v61 = vsel %vm1091_vm5, %v4763_v38, %v4764_v1  ;;  %v4091_v35 = vunpack.c.l.bf16 %v4059_v25 }
 0x5c5   : > { %v4907_v5 = vpop.f32.mrf.mxu0  ;;  %v4767_v10 = vsel %vm1091_vm5, %v4764_v1, %v4766_v47  ;;  %v11312_v37 = vadd.f32 %v4904_v27, %v4646_v18  ;;  %v3591_v60 = vadd.f32 %v10890_v63, %v10886_v15 }
 0x5c6   : > { %13298 = vst [vmem:[#allocation13_spill] sm:$0xff] %v11308_v6  ;;  %v3996_v26 = vadd.f32 %v10994_v30, %v3961_v7  ;;  %8562 = vmatmul.msk.bf16.gmra.mxu2 %vm4438_vm8, %v11308_v6  ;;  %v4648_v33 = vpop.f32.mrf.mxu3  ;;  %v11317_v52 = vpack.c.bf16 %v4767_v10, %v4765_v61  ;;  %v4175_v0 = vrot.slane %v4091_v35, 7 }
 0x5c7   : > { %v3715_v42 = vadd.f32 %v10895_v13, %v3591_v60 }
 0x5c8   : > { %13299 = vst [vmem:[#allocation15_spill] sm:$0xff] %v11317_v52  ;;  %v4028_v24 = vmax.f32 %v3996_v26, 0.0  ;;  %8594 = vmatmul.msk.bf16.gmra.mxu0 %vm4438_vm8, %v11317_v52  ;;  %v4251_v12 = vsel %vm495_vm0, 0.0, %v4175_v0 }
 0x5c9   : > { %v4509_v23 = vpop.f32.mrf.mxu2  ;;  %v3839_v61 = vadd.f32 %v11065_v21, %v3715_v42  ;;  %v4368_v35 = vrot.slane %v4251_v12, 1 }
 0x5ca   : > { %v4060_v1 = vpack.c.bf16 %v4028_v24, %v4028_v24  ;;  %v4649_v27 = vadd.f32 %v4648_v33, %v4509_v23  ;;  %v4768_v23 = vrot.slane %v4251_v12, 2 }
 0x5cb   : > { %v3915_v47 = vpop.f32.mrf.mxu1 }
 0x5cc   : > { %v4092_v38 = vunpack.c.l.bf16 %v4060_v1  ;;  %v3962_v25 = vadd.f32 %v3915_v47, %v11047_v48  ;;  %v11324_v18 = vadd.f32 %v4907_v5, %v4649_v27 }
 0x5cd   : > { %v4909_v57 = vpop.f32.mrf.mxu0  ;;  %8603 = vmatmul.msk.bf16.gmra.mxu1 %vm4438_vm8, %v11104_v36 }
 0x5ce   : > { %v4176_v7 = vrot.slane %v4092_v38, 7  ;;  %v3997_v15 = vadd.f32 %v10994_v30, %v3962_v25  ;;  %v4650_v63 = vpop.f32.mrf.mxu3 }
 0x5d0   : > { %v4267_v10 = vsel %vm495_vm0, %v4176_v7, 0.0  ;;  %v4029_v48 = vmax.f32 %v3997_v15, 0.0  ;;  %v4177_v5 = vsel %vm495_vm0, %v4175_v0, %v4176_v7 }
 0x5d1   : > { %v4371_v26 = vrot.slane %v4267_v10, 1  ;;  %v4771_v13 = vrot.slane %v4267_v10, 2  ;;  %v4511_v33 = vpop.f32.mrf.mxu2  ;;  %v11334_v24 = vpack.c.bf16 %v4177_v5, %v4251_v12  ;;  %v4369_v60 = vrot.slane %v4177_v5, 1 }
 0x5d2   : > { %v4061_v1 = vpack.c.bf16 %v4029_v48, %v4029_v48  ;;  %v4651_v27 = vadd.f32 %v4650_v63, %v4511_v33  ;;  %v4769_v47 = vrot.slane %v4177_v5, 2  ;;  %v13303_v33 = vld [vmem:[#allocation17_spill] sm:$0xff] }
 0x5d3   : > { %v3917_v38 = vpop.f32.mrf.mxu1  ;;  %8579 = vmatmul.msk.bf16.gmra.mxu3 %vm4438_vm8, %v11334_v24  ;;  %v4370_v21 = vsel %vm678_vm2, %v4368_v35, %v4369_v60  ;;  %v4372_v25 = vsel %vm678_vm2, %v4369_v60, %v4371_v26 }
 0x5d4   : > { %v3963_v42 = vadd.f32 %v3917_v38, %v3839_v61  ;;  %v11340_v0 = vpack.c.bf16 %v4372_v25, %v4370_v21  ;;  %v4770_v7 = vsel %vm1091_vm5, %v4768_v23, %v4769_v47  ;;  %v4093_v15 = vunpack.c.l.bf16 %v4061_v1  ;;  %v13302_v61 = vld [vmem:[#allocation14_spill] sm:$0xff] }
 0x5d5   : > { %v4912_v10 = vpop.f32.mrf.mxu0  ;;  %v4772_v12 = vsel %vm1091_vm5, %v4769_v47, %v4771_v13  ;;  %v11344_v48 = vadd.f32 %v4909_v57, %v4651_v27  ;;  %v3593_v60 = vadd.f32 %v13303_v33, %v13302_v61  ;;  %v13304_v25 = vld [vmem:[#allocation18_spill] sm:$0xff] }
 0x5d6   : > { %13300 = vst [vmem:[#allocation35_spill] sm:$0xff] %v11340_v0  ;;  %v3998_v63 = vadd.f32 %v10994_v30, %v3963_v42  ;;  %8563 = vmatmul.msk.bf16.gmra.mxu2 %vm4438_vm8, %v11340_v0  ;;  %v4653_v5 = vpop.f32.mrf.mxu3  ;;  %v11349_v35 = vpack.c.bf16 %v4772_v12, %v4770_v7  ;;  %v4178_v23 = vrot.slane %v4093_v15, 7 }
 0x5d7   : > { %v3717_v42 = vadd.f32 %v13304_v25, %v3593_v60 }
 0x5d8   : > { %13301 = vst [vmem:[#allocation36_spill] sm:$0xff] %v11349_v35  ;;  %v4030_v26 = vmax.f32 %v3998_v63, 0.0  ;;  %8595 = vmatmul.msk.bf16.gmra.mxu0 %vm4438_vm8, %v11349_v35  ;;  %v4252_v7 = vsel %vm495_vm0, 0.0, %v4178_v23 }
 0x5d9   : > { %v4514_v1 = vpop.f32.mrf.mxu2  ;;  %v4773_v25 = vrot.slane %v4252_v7, 2 }
 0x5da   : > { %v4062_v13 = vpack.c.bf16 %v4030_v26, %v4030_v26  ;;  %v4654_v57 = vadd.f32 %v4653_v5, %v4514_v1  ;;  %v3841_v5 = vadd.f32 %v11095_v16, %v3717_v42  ;;  %v4373_v26 = vrot.slane %v4252_v7, 1 }
 0x5db   : > { %v3920_v27 = vpop.f32.mrf.mxu1 }
 0x5dc   : > { %v4094_v47 = vunpack.c.l.bf16 %v4062_v13  ;;  %v3964_v38 = vadd.f32 %v3920_v27, %v11077_v49  ;;  %v11356_v21 = vadd.f32 %v4912_v10, %v4654_v57 }
 0x5dd   : > { %v4914_v12 = vpop.f32.mrf.mxu0  ;;  %8604 = vmatmul.msk.bf16.gmra.mxu1 %vm4438_vm8, %v11137_v39 }
 0x5de   : > { %v4179_v63 = vrot.slane %v4094_v47, 7  ;;  %v3999_v15 = vadd.f32 %v10994_v30, %v3964_v38  ;;  %v4655_v61 = vpop.f32.mrf.mxu3 }
 0x5e0   : > { %v4268_v33 = vsel %vm495_vm0, %v4179_v63, 0.0  ;;  %v4031_v49 = vmax.f32 %v3999_v15, 0.0  ;;  %v4180_v10 = vsel %vm495_vm0, %v4178_v23, %v4179_v63 }
 0x5e1   : > { %v4376_v1 = vrot.slane %v4268_v33, 1  ;;  %v4776_v60 = vrot.slane %v4268_v33, 2  ;;  %v4516_v13 = vpop.f32.mrf.mxu2  ;;  %v11366_v57 = vpack.c.bf16 %v4180_v10, %v4252_v7  ;;  %v4374_v27 = vrot.slane %v4180_v10, 1 }
 0x5e2   : > { %v4063_v0 = vpack.c.bf16 %v4031_v49, %v4031_v49  ;;  %v4656_v47 = vadd.f32 %v4655_v61, %v4516_v13  ;;  %v4774_v35 = vrot.slane %v4180_v10, 2  ;;  %v13308_v13 = vld [vmem:[#allocation19_spill] sm:$0xff] }
 0x5e3   : > { %v3922_v38 = vpop.f32.mrf.mxu1  ;;  %8580 = vmatmul.msk.bf16.gmra.mxu3 %vm4438_vm8, %v11366_v57  ;;  %v4375_v16 = vsel %vm678_vm2, %v4373_v26, %v4374_v27  ;;  %v4377_v42 = vsel %vm678_vm2, %v4374_v27, %v4376_v1 }
 0x5e4   : > { %v3965_v15 = vadd.f32 %v3922_v38, %v3841_v5  ;;  %v11372_v23 = vpack.c.bf16 %v4377_v42, %v4375_v16  ;;  %v4775_v63 = vsel %vm1091_vm5, %v4773_v25, %v4774_v35  ;;  %v4095_v33 = vunpack.c.l.bf16 %v4063_v0  ;;  %v13307_v5 = vld [vmem:[#allocation21_spill] sm:$0xff]  ;;  %v13309_v16 = vld [vmem:[#allocation22_spill] sm:$0xff] }
 0x5e5   : > { %v4917_v6 = vpop.f32.mrf.mxu0  ;;  %v4777_v7 = vsel %vm1091_vm5, %v4774_v35, %v4776_v60  ;;  %v11376_v49 = vadd.f32 %v4914_v12, %v4656_v47  ;;  %v3595_v0 = vadd.f32 %v13308_v13, %v13307_v5 }
 0x5e6   : > { %13305 = vst [vmem:[#allocation14_spill] sm:$0xff] %v11372_v23  ;;  %v4000_v61 = vadd.f32 %v10994_v30, %v3965_v15  ;;  %8564 = vmatmul.msk.bf16.gmra.mxu2 %vm4438_vm8, %v11372_v23  ;;  %v4658_v10 = vpop.f32.mrf.mxu3  ;;  %v11381_v26 = vpack.c.bf16 %v4777_v7, %v4775_v63  ;;  %v4181_v27 = vrot.slane %v4095_v33, 7  ;;  %v11397_v33 = vld [vmem:[%s12998_s4] ss:$0 sm:$0xff] }
 0x5e7   : > { %v3719_v42 = vadd.f32 %v13309_v16, %v3595_v0 }
 0x5e8   : > { %13306 = vst [vmem:[#allocation17_spill] sm:$0xff] %v11381_v26  ;;  %v4032_v1 = vmax.f32 %v4000_v61, 0.0  ;;  %8596 = vmatmul.msk.bf16.gmra.mxu0 %vm4438_vm8, %v11381_v26  ;;  %v4253_v15 = vsel %vm495_vm0, 0.0, %v4181_v27 }
 0x5e9   : > { %v4519_v25 = vpop.f32.mrf.mxu2 }
 0x5ea   : > { %v4064_v35 = vpack.c.bf16 %v4032_v1, %v4032_v1  ;;  %v4659_v12 = vadd.f32 %v4658_v10, %v4519_v25 }
 0x5eb   : > { %v3925_v60 = vpop.f32.mrf.mxu1 }
 0x5ec   : > { %v4096_v47 = vunpack.c.l.bf16 %v4064_v35  ;;  %v3966_v30 = vadd.f32 %v3925_v60, %v11107_v32  ;;  %v11388_v38 = vadd.f32 %v4917_v6, %v4659_v12  ;;  %v3843_v32 = vadd.f32 %v11125_v20, %v3719_v42 }
 0x5ed   : > { %v4919_v63 = vpop.f32.mrf.mxu0  ;;  %8605 = vmatmul.msk.bf16.gmra.mxu1 %vm4438_vm8, %v11174_v29  ;;  %v4378_v6 = vrot.slane %v4253_v15, 1 }
 0x5ee   : > { %v4182_v7 = vrot.slane %v4096_v47, 7  ;;  %v4001_v61 = vadd.f32 %v11397_v33, %v3966_v30  ;;  %v4660_v10 = vpop.f32.mrf.mxu3  ;;  %v4778_v47 = vrot.slane %v4253_v15, 2 }
 0x5f0   : > { %v4269_v1 = vsel %vm495_vm0, %v4182_v7, 0.0  ;;  %v4033_v5 = vmax.f32 %v4001_v61, 0.0  ;;  %v4183_v13 = vsel %vm495_vm0, %v4181_v27, %v4182_v7 }
 0x5f1   : > { %v4381_v0 = vrot.slane %v4269_v1, 1  ;;  %v4781_v25 = vrot.slane %v4269_v1, 2  ;;  %v4521_v35 = vpop.f32.mrf.mxu2  ;;  %v11403_v12 = vpack.c.bf16 %v4183_v13, %v4253_v15  ;;  %v4379_v60 = vrot.slane %v4183_v13, 1 }
 0x5f2   : > { %v4065_v16 = vpack.c.bf16 %v4033_v5, %v4033_v5  ;;  %v4661_v23 = vadd.f32 %v4660_v10, %v4521_v35  ;;  %v4779_v26 = vrot.slane %v4183_v13, 2 }
 0x5f3   : > { %v3927_v30 = vpop.f32.mrf.mxu1  ;;  %8581 = vmatmul.msk.bf16.gmra.mxu3 %vm4438_vm8, %v11403_v12  ;;  %v4380_v20 = vsel %vm678_vm2, %v4378_v6, %v4379_v60  ;;  %v4382_v42 = vsel %vm678_vm2, %v4379_v60, %v4381_v0  ;;  %v13313_v60 = vld [vmem:[#allocation23_spill] sm:$0xff] }
 0x5f4   : > { %v4097_v61 = vunpack.c.l.bf16 %v4065_v16  ;;  %v3967_v27 = vadd.f32 %v3927_v30, %v3843_v32  ;;  %v11409_v7 = vpack.c.bf16 %v4382_v42, %v4380_v20  ;;  %v4780_v1 = vsel %vm1091_vm5, %v4778_v47, %v4779_v26  ;;  %v13312_v32 = vld [vmem:[#allocation24_spill] sm:$0xff] }
 0x5f5   : > { %v4922_v52 = vpop.f32.mrf.mxu0  ;;  %v4782_v15 = vsel %vm1091_vm5, %v4779_v26, %v4781_v25  ;;  %v11413_v5 = vadd.f32 %v4919_v63, %v4661_v23  ;;  %v3597_v47 = vadd.f32 %v13313_v60, %v13312_v32 }
 0x5f6   : > { %13310 = vst [vmem:[#allocation18_spill] sm:$0xff] %v11409_v7  ;;  %v4002_v10 = vadd.f32 %v11397_v33, %v3967_v27  ;;  %8565 = vmatmul.msk.bf16.gmra.mxu2 %vm4438_vm8, %v11409_v7  ;;  %v4663_v13 = vpop.f32.mrf.mxu3  ;;  %v11418_v6 = vpack.c.bf16 %v4782_v15, %v4780_v1  ;;  %v4184_v0 = vrot.slane %v4097_v61, 7  ;;  %v13314_v27 = vld [vmem:[#allocation26_spill] sm:$0xff] }
 0x5f7   : > { %v3721_v61 = vadd.f32 %v13314_v27, %v3597_v47 }
 0x5f8   : > { %13311 = vst [vmem:[#allocation21_spill] sm:$0xff] %v11418_v6  ;;  %v4034_v35 = vmax.f32 %v4002_v10, 0.0  ;;  %8597 = vmatmul.msk.bf16.gmra.mxu0 %vm4438_vm8, %v11418_v6  ;;  %v4254_v25 = vsel %vm495_vm0, 0.0, %v4184_v0 }
 0x5f9   : > { %v4524_v16 = vpop.f32.mrf.mxu2  ;;  %v4783_v60 = vrot.slane %v4254_v25, 2 }
 0x5fa   : > { %v4066_v26 = vpack.c.bf16 %v4034_v35, %v4034_v35  ;;  %v4664_v23 = vadd.f32 %v4663_v13, %v4524_v16  ;;  %v3845_v13 = vadd.f32 %v11158_v34, %v3721_v61  ;;  %v4383_v35 = vrot.slane %v4254_v25, 1 }
 0x5fb   : > { %v3930_v63 = vpop.f32.mrf.mxu1 }
 0x5fc   : > { %v4098_v30 = vunpack.c.l.bf16 %v4066_v26  ;;  %v3968_v20 = vadd.f32 %v3930_v63, %v11141_v4  ;;  %v11426_v42 = vadd.f32 %v4922_v52, %v4664_v23 }
 0x5fd   : > { %v4924_v1 = vpop.f32.mrf.mxu0  ;;  %8606 = vmatmul.msk.bf16.gmra.mxu1 %vm4438_vm8, %v11207_v62 }
 0x5fe   : > { %v4185_v15 = vrot.slane %v4098_v30, 7  ;;  %v4003_v10 = vadd.f32 %v11397_v33, %v3968_v20  ;;  %v4665_v32 = vpop.f32.mrf.mxu3  ;;  %v4108_v30 = vld [vmem:[%s12999_s5 + $0x14] sm:$0xf] }
 0x5ff   : > { %v5286_v61 = vsel %vm4486_vm7, %v4108_v30, 0 }
 0x600   : > { %v4270_v16 = vsel %vm495_vm0, %v4185_v15, 0.0  ;;  %v4035_v26 = vmax.f32 %v4003_v10, 0.0  ;;  %v4186_v4 = vsel %vm495_vm0, %v4184_v0, %v4185_v15  ;;  %5295 = vmatpush.bf16.msrb.mxu3 %v5286_v61 }
 0x601   : > { %v4386_v52 = vrot.slane %v4270_v16, 1  ;;  %v4786_v23 = vrot.slane %v4270_v16, 2  ;;  %v4526_v47 = vpop.f32.mrf.mxu2  ;;  %v11435_v63 = vpack.c.bf16 %v4186_v4, %v4254_v25  ;;  %v4384_v27 = vrot.slane %v4186_v4, 1 }
 0x602   : > { %v4067_v20 = vpack.c.bf16 %v4035_v26, %v4035_v26  ;;  %v4666_v7 = vadd.f32 %v4665_v32, %v4526_v47  ;;  %v4784_v34 = vrot.slane %v4186_v4, 2  ;;  %v4109_v32 = vld [vmem:[%s12999_s5 + $0x18] sm:$0xf] }
 0x603   : > { %v3932_v6 = vpop.f32.mrf.mxu1  ;;  %8582 = vmatmul.msk.bf16.gmra.mxu3 %vm4438_vm8, %v11435_v63  ;;  %v4385_v0 = vsel %vm678_vm2, %v4383_v35, %v4384_v27  ;;  %v4387_v15 = vsel %vm678_vm2, %v4384_v27, %v4386_v52  ;;  %v5410_v30 = vsel %vm4486_vm7, %v4109_v32, 0  ;;  %v4111_v52 = vld [vmem:[%s12999_s5 + $0x20] sm:$0xf] }
 0x604   : > { %v3969_v25 = vadd.f32 %v3932_v6, %v3845_v13  ;;  %v11445_v10 = vpack.c.bf16 %v4387_v15, %v4385_v0  ;;  %v4785_v16 = vsel %vm1091_vm5, %v4783_v60, %v4784_v34  ;;  %v4099_v26 = vunpack.c.l.bf16 %v4067_v20  ;;  %5419 = vmatpush.bf16.msra.mxu0 %v5410_v30  ;;  %v4110_v0 = vld [vmem:[%s12999_s5 + $0x1c] sm:$0xf] }
 0x605   : > { %v4927_v4 = vpop.f32.mrf.mxu0  ;;  %v4787_v47 = vsel %vm1091_vm5, %v4784_v34, %v4786_v23  ;;  %v11453_v2 = vadd.f32 %v4924_v1, %v4666_v7  ;;  %v13316_v23 = vld [vmem:[#allocation25_spill] sm:$0xff]  ;;  %v5658_v20 = vsel %vm4486_vm7, %v4111_v52, 0 }
 0x606   : > { %13315 = vst [vmem:[#allocation19_spill] sm:$0xff] %v11445_v10  ;;  %v4004_v35 = vadd.f32 %v11397_v33, %v3969_v25  ;;  %8566 = vmatmul.msk.bf16.gmra.mxu2 %vm4438_vm8, %v11445_v10  ;;  %v4668_v6 = vpop.f32.mrf.mxu3  ;;  %v11458_v13 = vpack.c.bf16 %v4787_v47, %v4785_v16  ;;  %v3599_v7 = vadd.f32 %v11168_v43, %v13316_v23  ;;  %v4187_v1 = vrot.slane %v4099_v26, 7 }
 0x607   : > { %5667 = vmatpush.bf16.msra.mxu2 %v5658_v20  ;;  %v5534_v25 = vsel %vm4486_vm7, %v4110_v0, 0 }
 0x608   : > { %v4036_v60 = vmax.f32 %v4004_v35, 0.0  ;;  %8598 = vmatmul.msk.bf16.gmra.mxu0 %vm4438_vm8, %v11458_v13  ;;  %5543 = vmatpush.bf16.msra.mxu1 %v5534_v25  ;;  %v3723_v43 = vadd.f32 %v11170_v46, %v3599_v7  ;;  %v4255_v26 = vsel %vm495_vm0, 0.0, %v4187_v1 }
 0x609   : > { %v4529_v27 = vpop.f32.mrf.mxu2  ;;  %v4388_v23 = vrot.slane %v4255_v26, 1  ;;  %v4788_v0 = vrot.slane %v4255_v26, 2 }
 0x60a   : > { %v4068_v34 = vpack.c.bf16 %v4036_v60, %v4036_v60  ;;  %v4669_v61 = vadd.f32 %v4668_v6, %v4529_v27  ;;  %v3847_v52 = vadd.f32 %v11195_v11, %v3723_v43 }
 0x60b   : > { %v3935_v15 = vpop.f32.mrf.mxu1 }
 0x60c   : > { %v4100_v16 = vunpack.c.l.bf16 %v4068_v34  ;;  %v3970_v32 = vadd.f32 %v3935_v15, %v11178_v54  ;;  %v11473_v47 = vadd.f32 %v4927_v4, %v4669_v61 }
 0x60d   : > { %v4929_v30 = vpop.f32.mrf.mxu0  ;;  %8607 = vmatmul.msk.bf16.gmra.mxu1 %vm4438_vm8, %v11237_v59 }
 0x60e   : > { %v4188_v35 = vrot.slane %v4100_v16, 7  ;;  %v4005_v6 = vadd.f32 %v11397_v33, %v3970_v32  ;;  %v4670_v60 = vpop.f32.mrf.mxu3 }
 0x610   : > { %v4271_v54 = vsel %vm495_vm0, %v4188_v35, 0.0  ;;  %v4037_v27 = vmax.f32 %v4005_v6, 0.0  ;;  %v4189_v4 = vsel %vm495_vm0, %v4187_v1, %v4188_v35 }
 0x611   : > { %v4391_v20 = vrot.slane %v4271_v54, 1  ;;  %v4791_v46 = vrot.slane %v4271_v54, 2  ;;  %v4531_v7 = vpop.f32.mrf.mxu2  ;;  %v11483_v34 = vpack.c.bf16 %v4189_v4, %v4255_v26  ;;  %v4389_v61 = vrot.slane %v4189_v4, 1 }
 0x612   : > { %v4069_v15 = vpack.c.bf16 %v4037_v27, %v4037_v27  ;;  %v4671_v25 = vadd.f32 %v4670_v60, %v4531_v7  ;;  %v4789_v16 = vrot.slane %v4189_v4, 2 }
 0x613   : > { %v3937_v32 = vpop.f32.mrf.mxu1  ;;  %8583 = vmatmul.msk.bf16.gmra.mxu3 %vm4438_vm8, %v11483_v34  ;;  %v4390_v11 = vsel %vm678_vm2, %v4388_v23, %v4389_v61  ;;  %v4392_v43 = vsel %vm678_vm2, %v4389_v61, %v4391_v20 }
 0x614   : > { %v3971_v6 = vadd.f32 %v3937_v32, %v3847_v52  ;;  %v11489_v1 = vpack.c.bf16 %v4392_v43, %v4390_v11  ;;  %v4790_v35 = vsel %vm1091_vm5, %v4788_v0, %v4789_v16  ;;  %v4101_v54 = vunpack.c.l.bf16 %v4069_v15 }
 0x615   : > { %v4932_v10 = vpop.f32.mrf.mxu0  ;;  %v4792_v26 = vsel %vm1091_vm5, %v4789_v16, %v4791_v46  ;;  %v11493_v27 = vadd.f32 %v4929_v30, %v4671_v25 }
 0x616   : > { %13317 = vst [vmem:[#allocation22_spill] sm:$0xff] %v11489_v1  ;;  %v4006_v60 = vadd.f32 %v11397_v33, %v3971_v6  ;;  %8567 = vmatmul.msk.bf16.gmra.mxu2 %vm4438_vm8, %v11489_v1  ;;  %v4673_v4 = vpop.f32.mrf.mxu3  ;;  %v11498_v23 = vpack.c.bf16 %v4792_v26, %v4790_v35  ;;  %v4190_v52 = vrot.slane %v4101_v54, 7 }
 0x618   : > { %v4038_v20 = vmax.f32 %v4006_v60, 0.0  ;;  %8599 = vmatmul.msk.bf16.gmra.mxu0 %vm4438_vm8, %v11498_v23  ;;  %v4256_v25 = vsel %vm495_vm0, 0.0, %v4190_v52 }
 0x619   : > { %v4534_v7 = vpop.f32.mrf.mxu2  ;;  %v5139_v43 = vrot.slane %v4256_v25, 1 }
 0x61a   : > { %v4070_v61 = vpack.c.bf16 %v4038_v20, %v4038_v20  ;;  %v4674_v0 = vadd.f32 %v4673_v4, %v4534_v7  ;;  %v5274_v4 = vrot.slane %v4256_v25, 2 }
 0x61b   : > { %v5025_v15 = vpop.f32.mrf.mxu1 }
 0x61c   : > { %v4102_v46 = vunpack.c.l.bf16 %v4070_v61  ;;  %v11503_v30 = vadd.f32 %v5025_v15, %v11214_v28  ;;  %v11505_v33 = vadd.f32 %v4932_v10, %v4674_v0 }
 0x61d   : > { %v4934_v16 = vpop.f32.mrf.mxu0  ;;  %8608 = vmatmul.msk.bf16.gmra.mxu1 %vm4438_vm8, %v11271_v14 }
 0x61e   : > { %v4191_v32 = vrot.slane %v4102_v46, 7  ;;  %v4675_v11 = vpop.f32.mrf.mxu3 }
 0x620   : > { %v4272_v6 = vsel %vm495_vm0, %v4191_v32, 0.0  ;;  %v4192_v35 = vsel %vm495_vm0, %v4190_v52, %v4191_v32 }
 0x621   : > { %v5142_v54 = vrot.slane %v4272_v6, 1  ;;  %v5277_v26 = vrot.slane %v4272_v6, 2  ;;  %v4536_v60 = vpop.f32.mrf.mxu2  ;;  %v11512_v28 = vpack.c.bf16 %v4192_v35, %v4256_v25  ;;  %v5140_v10 = vrot.slane %v4192_v35, 1 }
 0x622   : > { %v4676_v20 = vadd.f32 %v4675_v11, %v4536_v60  ;;  %v5275_v7 = vrot.slane %v4192_v35, 2  ;;  %v13318_v35 = vld [vmem:[#allocation28_spill] sm:$0xff] }
 0x623   : > { %v11514_v61 = vpop.f32.mrf.mxu1  ;;  %8632 = vmatmul.msk.bf16.vlgmr.msrb.gmra.mxu3 %vm4438_vm8, %v11031_v3  ;;  %v5141_v0 = vsel %vm678_vm2, %v5139_v43, %v5140_v10  ;;  %v5143_v15 = vsel %vm678_vm2, %v5140_v10, %v5142_v54 }
 0x624   : > { %v11520_v46 = vadd.f32 %v4934_v16, %v4676_v20  ;;  %v5276_v52 = vsel %vm1091_vm5, %v5274_v4, %v5275_v7  ;;  %v5278_v32 = vsel %vm1091_vm5, %v5275_v7, %v5277_v26  ;;  %v11526_v25 = vpack.c.bf16 %v5143_v15, %v5141_v0 }
 0x625   : > { %v4937_v6 = vpop.f32.mrf.mxu0  ;;  %v11524_v1 = vpack.c.bf16 %v5278_v32, %v5276_v52  ;;  %v13319_v52 = vld [vmem:[#allocation27_spill] sm:$0xff] }
 0x626   : > { %v4678_v11 = vpop.f32.mrf.mxu3  ;;  %8616 = vmatmul.msk.bf16.vlgmr.msrb.gmra.mxu2 %vm4438_vm8, %v13318_v35 }
 0x628   : > { %8648 = vmatmul.msk.bf16.vlgmr.msra.gmra.mxu0 %vm4438_vm8, %v11044_v8 }
 0x629   : > { %v4539_v3 = vpop.f32.mrf.mxu2 }
 0x62a   : > { %v4679_v43 = vadd.f32 %v4678_v11, %v4539_v3 }
 0x62b   : > { %v5030_v16 = vpop.f32.mrf.mxu1 }
 0x62c   : > { %v11533_v54 = vadd.f32 %v5030_v16, %v11292_v31  ;;  %v11535_v60 = vadd.f32 %v4937_v6, %v4679_v43 }
 0x62d   : > { %v4939_v26 = vpop.f32.mrf.mxu0  ;;  %8609 = vmatmul.msk.bf16.gmra.mxu1 %vm4438_vm8, %v11302_v44 }
 0x62e   : > { %v4680_v10 = vpop.f32.mrf.mxu3 }
 0x631   : > { %v4541_v4 = vpop.f32.mrf.mxu2 }
 0x632   : > { %v4681_v20 = vadd.f32 %v4680_v10, %v4541_v4 }
 0x633   : > { %v5032_v7 = vpop.f32.mrf.mxu1  ;;  %8633 = vmatmul.msk.bf16.gmra.mxu3 %vm4438_vm8, %v11061_v22 }
 0x634   : > { %v11542_v8 = vadd.f32 %v5032_v7, %v11312_v37  ;;  %v11544_v0 = vadd.f32 %v4939_v26, %v4681_v20  ;;  %v13320_v7 = vld [vmem:[#allocation29_spill] sm:$0xff] }
 0x635   : > { %v4942_v31 = vpop.f32.mrf.mxu0 }
 0x636   : > { %v4683_v15 = vpop.f32.mrf.mxu3  ;;  %8617 = vmatmul.msk.bf16.gmra.mxu2 %vm4438_vm8, %v13319_v52 }
 0x638   : > { %8649 = vmatmul.msk.bf16.gmra.mxu0 %vm4438_vm8, %v11074_v19 }
 0x639   : > { %v4544_v32 = vpop.f32.mrf.mxu2 }
 0x63a   : > { %v4684_v6 = vadd.f32 %v4683_v15, %v4544_v32 }
 0x63b   : > { %v5035_v11 = vpop.f32.mrf.mxu1 }
 0x63c   : > { %v11551_v35 = vadd.f32 %v5035_v11, %v11324_v18  ;;  %v11553_v3 = vadd.f32 %v4942_v31, %v4684_v6 }
 0x63d   : > { %v4944_v37 = vpop.f32.mrf.mxu0  ;;  %8610 = vmatmul.msk.bf16.gmra.mxu1 %vm4438_vm8, %v11334_v24 }
 0x63e   : > { %v4685_v43 = vpop.f32.mrf.mxu3 }
 0x641   : > { %v4546_v16 = vpop.f32.mrf.mxu2 }
 0x642   : > { %v4686_v26 = vadd.f32 %v4685_v43, %v4546_v16 }
 0x643   : > { %v5037_v10 = vpop.f32.mrf.mxu1  ;;  %8634 = vmatmul.msk.bf16.gmra.mxu3 %vm4438_vm8, %v11091_v51 }
 0x644   : > { %v11560_v19 = vadd.f32 %v5037_v10, %v11344_v48  ;;  %v11562_v4 = vadd.f32 %v4944_v37, %v4686_v26 }
 0x645   : > { %v4947_v18 = vpop.f32.mrf.mxu0 }
 0x646   : > { %v4688_v20 = vpop.f32.mrf.mxu3  ;;  %8618 = vmatmul.msk.bf16.gmra.mxu2 %vm4438_vm8, %v13320_v7 }
 0x648   : > { %8650 = vmatmul.msk.bf16.gmra.mxu0 %vm4438_vm8, %v11104_v36 }
 0x649   : > { %v4549_v31 = vpop.f32.mrf.mxu2 }
 0x64a   : > { %v4689_v15 = vadd.f32 %v4688_v20, %v4549_v31 }
 0x64b   : > { %v5040_v32 = vpop.f32.mrf.mxu1 }
 0x64c   : > { %v11569_v6 = vadd.f32 %v5040_v32, %v11356_v21  ;;  %v11571_v11 = vadd.f32 %v4947_v18, %v4689_v15 }
 0x64d   : > { %v4949_v48 = vpop.f32.mrf.mxu0  ;;  %8611 = vmatmul.msk.bf16.gmra.mxu1 %vm4438_vm8, %v11366_v57 }
 0x64e   : > { %v4690_v37 = vpop.f32.mrf.mxu3 }
 0x651   : > { %v4551_v43 = vpop.f32.mrf.mxu2 }
 0x652   : > { %v4691_v16 = vadd.f32 %v4690_v37, %v4551_v43 }
 0x653   : > { %v5042_v26 = vpop.f32.mrf.mxu1  ;;  %8635 = vmatmul.msk.bf16.gmra.mxu3 %vm4438_vm8, %v11121_v40  ;;  %v13321_v40 = vld [vmem:[#allocation9_spill] sm:$0xff] }
 0x654   : > { %v11578_v36 = vadd.f32 %v5042_v26, %v11376_v49  ;;  %v11580_v10 = vadd.f32 %v4949_v48, %v4691_v16 }
 0x655   : > { %v4952_v21 = vpop.f32.mrf.mxu0 }
 0x656   : > { %v4693_v20 = vpop.f32.mrf.mxu3  ;;  %8619 = vmatmul.msk.bf16.gmra.mxu2 %vm4438_vm8, %v11114_v45 }
 0x658   : > { %8651 = vmatmul.msk.bf16.gmra.mxu0 %vm4438_vm8, %v11137_v39 }
 0x659   : > { %v4554_v18 = vpop.f32.mrf.mxu2 }
 0x65a   : > { %v4694_v31 = vadd.f32 %v4693_v20, %v4554_v18 }
 0x65b   : > { %v5045_v15 = vpop.f32.mrf.mxu1 }
 0x65c   : > { %v11587_v32 = vadd.f32 %v5045_v15, %v11388_v38  ;;  %v11589_v37 = vadd.f32 %v4952_v21, %v4694_v31 }
 0x65d   : > { %v4954_v49 = vpop.f32.mrf.mxu0  ;;  %8612 = vmatmul.msk.bf16.gmra.mxu1 %vm4438_vm8, %v11403_v12 }
 0x65e   : > { %v4695_v48 = vpop.f32.mrf.mxu3 }
 0x661   : > { %v4556_v43 = vpop.f32.mrf.mxu2 }
 0x662   : > { %v4696_v16 = vadd.f32 %v4695_v48, %v4556_v43 }
 0x663   : > { %v5047_v26 = vpop.f32.mrf.mxu1  ;;  %8636 = vmatmul.msk.bf16.gmra.mxu3 %vm4438_vm8, %v11154_v17 }
 0x664   : > { %v11596_v39 = vadd.f32 %v5047_v26, %v11413_v5  ;;  %v11598_v20 = vadd.f32 %v4954_v49, %v4696_v16 }
 0x665   : > { %v4957_v38 = vpop.f32.mrf.mxu0 }
 0x666   : > { %v4698_v18 = vpop.f32.mrf.mxu3  ;;  %8620 = vmatmul.msk.bf16.gmra.mxu2 %vm4438_vm8, %v11147_v58 }
 0x668   : > { %8652 = vmatmul.msk.bf16.gmra.mxu0 %vm4438_vm8, %v11174_v29 }
 0x669   : > { %v4559_v21 = vpop.f32.mrf.mxu2 }
 0x66a   : > { %v4699_v31 = vadd.f32 %v4698_v18, %v4559_v21 }
 0x66b   : > { %v5050_v15 = vpop.f32.mrf.mxu1 }
 0x66c   : > { %v11605_v48 = vadd.f32 %v5050_v15, %v11426_v42  ;;  %v11607_v43 = vadd.f32 %v4957_v38, %v4699_v31  ;;  %v13322_v38 = vld [vmem:[#allocation11_spill] sm:$0xff] }
 0x66d   : > { %v4959_v5 = vpop.f32.mrf.mxu0  ;;  %8613 = vmatmul.msk.bf16.gmra.mxu1 %vm4438_vm8, %v11435_v63 }
 0x66e   : > { %v4700_v49 = vpop.f32.mrf.mxu3 }
 0x671   : > { %v4561_v16 = vpop.f32.mrf.mxu2 }
 0x672   : > { %v4701_v26 = vadd.f32 %v4700_v49, %v4561_v16 }
 0x673   : > { %v5052_v17 = vpop.f32.mrf.mxu1  ;;  %8637 = vmatmul.msk.bf16.gmra.mxu3 %vm4438_vm8, %v13321_v40 }
 0x674   : > { %v11614_v29 = vadd.f32 %v5052_v17, %v11453_v2  ;;  %v11616_v18 = vadd.f32 %v4959_v5, %v4701_v26 }
 0x675   : > { %v4962_v42 = vpop.f32.mrf.mxu0 }
 0x676   : > { %v4703_v21 = vpop.f32.mrf.mxu3  ;;  %8621 = vmatmul.msk.bf16.gmra.mxu2 %vm4438_vm8, %v13322_v38 }
 0x678   : > { %8653 = vmatmul.msk.bf16.gmra.mxu0 %vm4438_vm8, %v11207_v62 }
 0x679   : > { %v4564_v31 = vpop.f32.mrf.mxu2 }
 0x67a   : > { %v4704_v15 = vadd.f32 %v4703_v21, %v4564_v31 }
 0x67b   : > { %v5055_v49 = vpop.f32.mrf.mxu1 }
 0x67c   : > { %v11623_v16 = vadd.f32 %v5055_v49, %v11473_v47  ;;  %v11625_v40 = vadd.f32 %v4962_v42, %v4704_v15 }
 0x67d   : > { %v4964_v17 = vpop.f32.mrf.mxu0  ;;  %8614 = vmatmul.msk.bf16.gmra.mxu1 %vm4438_vm8, %v11483_v34 }
 0x67e   : > { %v4705_v2 = vpop.f32.mrf.mxu3 }
 0x681   : > { %v4566_v5 = vpop.f32.mrf.mxu2 }
 0x682   : > { %v4706_v26 = vadd.f32 %v4705_v2, %v4566_v5 }
 0x683   : > { %v5057_v51 = vpop.f32.mrf.mxu1  ;;  %8638 = vmatmul.msk.bf16.gmra.mxu3 %vm4438_vm8, %v11223_v56 }
 0x684   : > { %v11632_v62 = vadd.f32 %v5057_v51, %v11493_v27  ;;  %v11634_v21 = vadd.f32 %v4964_v17, %v4706_v26 }
 0x685   : > { %v4967_v47 = vpop.f32.mrf.mxu0 }
 0x686   : > { %v4708_v31 = vpop.f32.mrf.mxu3  ;;  %8622 = vmatmul.msk.bf16.gmra.mxu2 %vm4438_vm8, %v11216_v50 }
 0x688   : > { %8654 = vmatmul.msk.bf16.gmra.mxu0 %vm4438_vm8, %v11237_v59 }
 0x689   : > { %v4569_v42 = vpop.f32.mrf.mxu2 }
 0x68a   : > { %v4709_v15 = vadd.f32 %v4708_v31, %v4569_v42 }
 0x68b   : > { %v5060_v49 = vpop.f32.mrf.mxu1 }
 0x68c   : > { %v11641_v2 = vadd.f32 %v5060_v49, %v11505_v33  ;;  %v11643_v5 = vadd.f32 %v4967_v47, %v4709_v15 }
 0x68d   : > { %v4969_v51 = vpop.f32.mrf.mxu0  ;;  %8615 = vmatmul.msk.bf16.gmra.mxu1 %vm4438_vm8, %v11512_v28 }
 0x68e   : > { %v4710_v27 = vpop.f32.mrf.mxu3 }
 0x691   : > { %v4571_v17 = vpop.f32.mrf.mxu2 }
 0x692   : > { %v4711_v26 = vadd.f32 %v4710_v27, %v4571_v17 }
 0x693   : > { %v5062_v56 = vpop.f32.mrf.mxu1  ;;  %8639 = vmatmul.msk.bf16.gmra.mxu3 %vm4438_vm8, %v11251_v41 }
 0x694   : > { %v11650_v59 = vadd.f32 %v5062_v56, %v11520_v46  ;;  %v11652_v31 = vadd.f32 %v4969_v51, %v4711_v26 }
 0x695   : > { %v4972_v33 = vpop.f32.mrf.mxu0 }
 0x696   : > { %v4713_v42 = vpop.f32.mrf.mxu3  ;;  %8623 = vmatmul.msk.bf16.gmra.mxu2 %vm4438_vm8, %v11244_v53 }
 0x698   : > { %8655 = vmatmul.msk.bf16.gmra.mxu0 %vm4438_vm8, %v11271_v14 }
 0x699   : > { %v4574_v47 = vpop.f32.mrf.mxu2 }
 0x69a   : > { %v4714_v15 = vadd.f32 %v4713_v42, %v4574_v47  ;;  %v13325_v47 = vld [vmem:[#allocation32_spill] sm:$0xff] }
 0x69b   : > { %v5065_v49 = vpop.f32.mrf.mxu1 }
 0x69c   : > { %v11659_v27 = vadd.f32 %v5065_v49, %v11535_v60  ;;  %v11661_v17 = vadd.f32 %v4972_v33, %v4714_v15  ;;  %v13326_v15 = vld [vmem:[#allocation30_spill] sm:$0xff] }
 0x69d   : > { %v4974_v56 = vpop.f32.mrf.mxu0  ;;  %8664 = vmatmul.msk.bf16.vlgmr.msra.gmra.mxu1 %vm4438_vm8, %v13319_v52  ;;  %v4641_v49 = vadd.f32 %v13326_v15, %v13325_v47 }
 0x69e   : > { %13323 = vst [vmem:[#allocation24_spill] sm:$0xff] %v11659_v27  ;;  %v4715_v46 = vpop.f32.mrf.mxu3 }
 0x6a1   : > { %v4576_v51 = vpop.f32.mrf.mxu2 }
 0x6a2   : > { %v4716_v26 = vadd.f32 %v4715_v46, %v4576_v51 }
 0x6a3   : > { %v5067_v41 = vpop.f32.mrf.mxu1  ;;  %8640 = vmatmul.msk.bf16.gmra.mxu3 %vm4438_vm8, %v11285_v55 }
 0x6a4   : > { %v11668_v14 = vadd.f32 %v5067_v41, %v11544_v0  ;;  %v11670_v42 = vadd.f32 %v4974_v56, %v4716_v26  ;;  %v13327_v56 = vld [vmem:[#allocation31_spill] sm:$0xff] }
 0x6a5   : > { %v5421_v60 = vpop.f32.mrf.mxu0  ;;  %v4978_v26 = vadd.f32 %v13327_v56, %v4641_v49 }
 0x6a6   : > { %13324 = vst [vmem:[#allocation23_spill] sm:$0xff] %v11668_v14  ;;  %8624 = vmatmul.msk.bf16.gmra.mxu2 %vm4438_vm8, %v11278_v9  ;;  %v5297_v33 = vpop.f32.mrf.mxu3 }
 0x6a8   : > { %8656 = vmatmul.msk.bf16.gmra.mxu0 %vm4438_vm8, %v11302_v44  ;;  %v5106_v44 = vadd.f32 %v11514_v61, %v4978_v26 }
 0x6a9   : > { %v5162_v52 = vpop.f32.mrf.mxu2 }
 0x6aa   : > { %v5242_v46 = vadd.f32 %v5162_v52, %v11503_v30  ;;  %v13328_v30 = vld [vmem:[#allocation15_spill] sm:$0xff] }
 0x6ab   : > { %v5070_v51 = vpop.f32.mrf.mxu1 }
 0x6ac   : > { %v5377_v55 = vadd.f32 %v5297_v33, %v5242_v46  ;;  %v11680_v41 = vadd.f32 %v5070_v51, %v11553_v3  ;;  %v13329_v46 = vld [vmem:[#allocation13_spill] sm:$0xff] }
 0x6ad   : > { %v5423_v0 = vpop.f32.mrf.mxu0  ;;  %8665 = vmatmul.msk.bf16.gmra.mxu1 %vm4438_vm8, %v13320_v7 }
 0x6ae   : > { %v5299_v14 = vpop.f32.mrf.mxu3  ;;  %v11685_v27 = vadd.f32 %v5421_v60, %v5377_v55 }
 0x6b1   : > { %v5164_v22 = vpop.f32.mrf.mxu2 }
 0x6b2   : > { %v5243_v47 = vadd.f32 %v5164_v22, %v5106_v44 }
 0x6b3   : > { %v5072_v15 = vpop.f32.mrf.mxu1  ;;  %8641 = vmatmul.msk.bf16.gmra.mxu3 %vm4438_vm8, %v13328_v30 }
 0x6b4   : > { %v5378_v33 = vadd.f32 %v5299_v14, %v5243_v47  ;;  %v11691_v3 = vadd.f32 %v5072_v15, %v11562_v4 }
 0x6b5   : > { %v5426_v52 = vpop.f32.mrf.mxu0 }
 0x6b6   : > { %8625 = vmatmul.msk.bf16.gmra.mxu2 %vm4438_vm8, %v13329_v46  ;;  %v5302_v7 = vpop.f32.mrf.mxu3  ;;  %v11695_v49 = vadd.f32 %v5423_v0, %v5378_v33 }
 0x6b8   : > { %8657 = vmatmul.msk.bf16.gmra.mxu0 %vm4438_vm8, %v11334_v24  ;;  %v13330_v24 = vld [vmem:[#allocation36_spill] sm:$0xff] }
 0x6b9   : > { %v5167_v55 = vpop.f32.mrf.mxu2 }
 0x6ba   : > { %v5244_v22 = vadd.f32 %v5167_v55, %v11533_v54 }
 0x6bb   : > { %v5075_v61 = vpop.f32.mrf.mxu1 }
 0x6bc   : > { %v5379_v60 = vadd.f32 %v5302_v7, %v5244_v22  ;;  %v11701_v14 = vadd.f32 %v5075_v61, %v11571_v11  ;;  %v13331_v11 = vld [vmem:[#allocation35_spill] sm:$0xff] }
 0x6bd   : > { %v5428_v4 = vpop.f32.mrf.mxu0  ;;  %8666 = vmatmul.msk.bf16.gmra.mxu1 %vm4438_vm8, %v11114_v45 }
 0x6be   : > { %v5304_v51 = vpop.f32.mrf.mxu3  ;;  %v11705_v56 = vadd.f32 %v5426_v52, %v5379_v60 }
 0x6c1   : > { %v5169_v0 = vpop.f32.mrf.mxu2 }
 0x6c2   : > { %v5245_v26 = vadd.f32 %v5169_v0, %v11542_v8 }
 0x6c3   : > { %v5077_v44 = vpop.f32.mrf.mxu1  ;;  %8642 = vmatmul.msk.bf16.gmra.mxu3 %vm4438_vm8, %v13330_v24 }
 0x6c4   : > { %v5380_v54 = vadd.f32 %v5304_v51, %v5245_v26  ;;  %v11711_v47 = vadd.f32 %v5077_v44, %v11580_v10 }
 0x6c5   : > { %v5431_v45 = vpop.f32.mrf.mxu0 }
 0x6c6   : > { %8626 = vmatmul.msk.bf16.gmra.mxu2 %vm4438_vm8, %v13331_v11  ;;  %v5307_v15 = vpop.f32.mrf.mxu3  ;;  %v11715_v33 = vadd.f32 %v5428_v4, %v5380_v54 }
 0x6c8   : > { %8658 = vmatmul.msk.bf16.gmra.mxu0 %vm4438_vm8, %v11366_v57  ;;  %v13332_v57 = vld [vmem:[#allocation17_spill] sm:$0xff] }
 0x6c9   : > { %v5172_v52 = vpop.f32.mrf.mxu2 }
 0x6ca   : > { %v5246_v8 = vadd.f32 %v5172_v52, %v11551_v35 }
 0x6cb   : > { %v5080_v7 = vpop.f32.mrf.mxu1 }
 0x6cc   : > { %v5381_v55 = vadd.f32 %v5307_v15, %v5246_v8  ;;  %v11721_v22 = vadd.f32 %v5080_v7, %v11589_v37  ;;  %v13333_v37 = vld [vmem:[#allocation14_spill] sm:$0xff] }
 0x6cd   : > { %8667 = vmatmul.msk.bf16.gmra.mxu1 %vm4438_vm8, %v11147_v58  ;;  %v5433_v60 = vpop.f32.mrf.mxu0 }
 0x6ce   : > { %v11725_v10 = vadd.f32 %v5431_v45, %v5381_v55  ;;  %v5309_v61 = vpop.f32.mrf.mxu3 }
 0x6d1   : > { %v5174_v4 = vpop.f32.mrf.mxu2 }
 0x6d2   : > { %v5247_v51 = vadd.f32 %v5174_v4, %v11560_v19 }
 0x6d3   : > { %v5082_v0 = vpop.f32.mrf.mxu1  ;;  %8643 = vmatmul.msk.bf16.gmra.mxu3 %vm4438_vm8, %v13332_v57 }
 0x6d4   : > { %v5382_v35 = vadd.f32 %v5309_v61, %v5247_v51  ;;  %v11731_v26 = vadd.f32 %v5082_v0, %v11598_v20 }
 0x6d5   : > { %v5436_v15 = vpop.f32.mrf.mxu0 }
 0x6d6   : > { %8627 = vmatmul.msk.bf16.gmra.mxu2 %vm4438_vm8, %v13333_v37  ;;  %v11735_v44 = vadd.f32 %v5433_v60, %v5382_v35  ;;  %v5312_v58 = vpop.f32.mrf.mxu3  ;;  %v13334_v60 = vld [vmem:[#allocation21_spill] sm:$0xff] }
 0x6d8   : > { %8659 = vmatmul.msk.bf16.gmra.mxu0 %vm4438_vm8, %v11403_v12 }
 0x6d9   : > { %v5177_v54 = vpop.f32.mrf.mxu2 }
 0x6da   : > { %v5248_v19 = vadd.f32 %v5177_v54, %v11569_v6 }
 0x6db   : > { %v5085_v45 = vpop.f32.mrf.mxu1 }
 0x6dc   : > { %v5383_v52 = vadd.f32 %v5312_v58, %v5248_v19  ;;  %v11741_v8 = vadd.f32 %v5085_v45, %v11607_v43  ;;  %v13335_v43 = vld [vmem:[#allocation18_spill] sm:$0xff] }
 0x6dd   : > { %8668 = vmatmul.msk.bf16.gmra.mxu1 %vm4438_vm8, %v13322_v38  ;;  %v5438_v51 = vpop.f32.mrf.mxu0 }
 0x6de   : > { %v11745_v20 = vadd.f32 %v5436_v15, %v5383_v52  ;;  %v5314_v61 = vpop.f32.mrf.mxu3 }
 0x6e1   : > { %v5179_v7 = vpop.f32.mrf.mxu2 }
 0x6e2   : > { %v5249_v55 = vadd.f32 %v5179_v7, %v11578_v36 }
 0x6e3   : > { %v5087_v12 = vpop.f32.mrf.mxu1  ;;  %8644 = vmatmul.msk.bf16.gmra.mxu3 %vm4438_vm8, %v13334_v60 }
 0x6e4   : > { %v5384_v6 = vadd.f32 %v5314_v61, %v5249_v55  ;;  %v11751_v4 = vadd.f32 %v5087_v12, %v11616_v18 }
 0x6e6   : > { %8628 = vmatmul.msk.bf16.gmra.mxu2 %vm4438_vm8, %v13335_v43  ;;  %v11755_v0 = vadd.f32 %v5438_v51, %v5384_v6 }
 0x6e8   : > { %8660 = vmatmul.msk.bf16.gmra.mxu0 %vm4438_vm8, %v11435_v63 }
 0x6e9   : > { %v5182_v38 = vpop.f32.mrf.mxu2 }
 0x6ea   : > { %v11760_v36 = vadd.f32 %v5182_v38, %v11587_v32  ;;  %v13336_v32 = vld [vmem:[#allocation19_spill] sm:$0xff] }
 0x6eb   : > { %v5090_v35 = vpop.f32.mrf.mxu1 }
 0x6ec   : > { %v11763_v58 = vadd.f32 %v5090_v35, %v11625_v40  ;;  %v13340_v35 = vld [vmem:[#allocation33_spill] sm:$0xff] }
 0x6ed   : > { %8669 = vmatmul.msk.bf16.gmra.mxu1 %vm4438_vm8, %v11216_v50 }
 0x6f1   : > { %v5184_v18 = vpop.f32.mrf.mxu2 }
 0x6f2   : > { %v11768_v54 = vadd.f32 %v5184_v18, %v11596_v39  ;;  %v13341_v18 = vld [vmem:[#allocation24_spill] sm:$0xff] }
 0x6f3   : > { %v5092_v19 = vpop.f32.mrf.mxu1  ;;  %8645 = vmatmul.msk.bf16.gmra.mxu3 %vm4438_vm8, %v11458_v13 }
 0x6f4   : > { %v11773_v63 = vadd.f32 %v5092_v19, %v11634_v21 }
 0x6f6   : > { %8629 = vmatmul.msk.bf16.gmra.mxu2 %vm4438_vm8, %v13336_v32 }
 0x6f8   : > { %8661 = vmatmul.msk.bf16.gmra.mxu0 %vm4438_vm8, %v11483_v34 }
 0x6f9   : > { %v5187_v40 = vpop.f32.mrf.mxu2 }
 0x6fa   : > { %v11780_v50 = vadd.f32 %v5187_v40, %v11605_v48  ;;  %v13337_v48 = vld [vmem:[#allocation22_spill] sm:$0xff] }
 0x6fb   : > { %v5095_v15 = vpop.f32.mrf.mxu1 }
 0x6fc   : > { %v11783_v39 = vadd.f32 %v5095_v15, %v11643_v5 }
 0x6fd   : > { %8670 = vmatmul.msk.bf16.gmra.mxu1 %vm4438_vm8, %v11244_v53 }
 0x701   : > { %v5189_v45 = vpop.f32.mrf.mxu2 }
 0x702   : > { %v11788_v21 = vadd.f32 %v5189_v45, %v11614_v29 }
 0x703   : > { %v5097_v52 = vpop.f32.mrf.mxu1  ;;  %8646 = vmatmul.msk.bf16.gmra.mxu3 %vm4438_vm8, %v11498_v23 }
 0x704   : > { %v11793_v34 = vadd.f32 %v5097_v52, %v11652_v31  ;;  %v13345_v52 = vld [vmem:[#allocation16_spill] sm:$0xff] }
 0x706   : > { %8630 = vmatmul.msk.bf16.gmra.mxu2 %vm4438_vm8, %v13337_v48 }
 0x708   : > { %8662 = vmatmul.msk.bf16.gmra.mxu0 %vm4438_vm8, %v11512_v28 }
 0x709   : > { %v5192_v5 = vpop.f32.mrf.mxu2 }
 0x70a   : > { %v11800_v53 = vadd.f32 %v5192_v5, %v11623_v16  ;;  %v13338_v16 = vld [vmem:[#allocation5_spill] sm:$0xff] }
 0x70b   : > { %v5100_v7 = vpop.f32.mrf.mxu1 }
 0x70c   : > { %v11803_v29 = vadd.f32 %v5100_v7, %v11661_v17 }
 0x70d   : > { %8671 = vmatmul.msk.bf16.gmra.mxu1 %vm4438_vm8, %v11278_v9 }
 0x711   : > { %v5194_v55 = vpop.f32.mrf.mxu2 }
 0x712   : > { %v11808_v31 = vadd.f32 %v5194_v55, %v11632_v62 }
 0x713   : > { %v5102_v61 = vpop.f32.mrf.mxu1  ;;  %8647 = vmatmul.msk.bf16.gmra.mxu3 %vm4438_vm8, %v11524_v1 }
 0x714   : > { %v11813_v28 = vadd.f32 %v5102_v61, %v11670_v42 }
 0x716   : > { %8631 = vmatmul.msk.bf16.gmra.mxu2 %vm4438_vm8, %v11526_v25 }
 0x718   : > { %8663 = vmatmul.msk.bf16.gmra.mxu0 %vm4438_vm8, %v13338_v16 }
 0x719   : > { %v5197_v17 = vpop.f32.mrf.mxu2 }
 0x71a   : > { %v11820_v9 = vadd.f32 %v5197_v17, %v11641_v2  ;;  %v13348_v17 = vld [vmem:[#allocation8_spill] sm:$0xff] }
 0x71b   : > { %v5545_v12 = vpop.f32.mrf.mxu1 }
 0x71c   : > { %v11823_v62 = vadd.f32 %v5545_v12, %v11685_v27 }
 0x71d   : > { %8672 = vmatmul.msk.bf16.gmra.mxu1 %vm4438_vm8, %v13329_v46  ;;  %v13343_v46 = vld [vmem:[#allocation23_spill] sm:$0xff] }
 0x721   : > { %v5199_v6 = vpop.f32.mrf.mxu2 }
 0x722   : > { %v11828_v42 = vadd.f32 %v5199_v6, %v11650_v59 }
 0x723   : > { %v5547_v51 = vpop.f32.mrf.mxu1 }
 0x724   : > { %13339 = vst [vmem:[#allocation26_spill] sm:$0xff] %v11828_v42  ;;  %v11831_v38 = vadd.f32 %v5547_v51, %v11695_v49 }
 0x726   : > { %8680 = vmatmul.msk.bf16.vlgmr.msra.gmra.mxu2 %vm4438_vm8, %v13340_v35  ;;  %v13351_v35 = vld [vmem:[#allocation34_spill] sm:$0xff] }
 0x729   : > { %v5202_v2 = vpop.f32.mrf.mxu2 }
 0x72a   : > { %v11836_v19 = vadd.f32 %v5202_v2, %v13341_v18 }
 0x72b   : > { %v5550_v27 = vpop.f32.mrf.mxu1 }
 0x72c   : > { %13342 = vst [vmem:[#allocation25_spill] sm:$0xff] %v11836_v19  ;;  %v11839_v40 = vadd.f32 %v5550_v27, %v11705_v56 }
 0x72d   : > { %8673 = vmatmul.msk.bf16.gmra.mxu1 %vm4438_vm8, %v13331_v11 }
 0x731   : > { %v5204_v59 = vpop.f32.mrf.mxu2 }
 0x732   : > { %v11844_v15 = vadd.f32 %v5204_v59, %v13343_v46  ;;  %v13357_v59 = vld [vmem:[#allocation12_spill] sm:$0xff] }
 0x733   : > { %v5552_v49 = vpop.f32.mrf.mxu1 }
 0x734   : > { %13344 = vst [vmem:[#allocation28_spill] sm:$0xff] %v11844_v15  ;;  %v11847_v45 = vadd.f32 %v5552_v49, %v11715_v33 }
 0x736   : > { %8681 = vmatmul.msk.bf16.gmra.mxu2 %vm4438_vm8, %v13345_v52  ;;  %v13360_v52 = vld [vmem:[#allocation20_spill] sm:$0xff] }
 0x739   : > { %v5207_v5 = vpop.f32.mrf.mxu2 }
 0x73a   : > { %v11852_v7 = vadd.f32 %v5207_v5, %v11680_v41  ;;  %v13362_v5 = vld [vmem:[#allocation6_spill] sm:$0xff] }
 0x73b   : > { %v5555_v56 = vpop.f32.mrf.mxu1 }
 0x73c   : > { %13346 = vst [vmem:[#allocation27_spill] sm:$0xff] %v11852_v7  ;;  %v11855_v55 = vadd.f32 %v5555_v56, %v11725_v10 }
 0x73d   : > { %8674 = vmatmul.msk.bf16.gmra.mxu1 %vm4438_vm8, %v13333_v37 }
 0x741   : > { %v5209_v11 = vpop.f32.mrf.mxu2 }
 0x742   : > { %v11860_v61 = vadd.f32 %v5209_v11, %v11691_v3  ;;  %v13364_v11 = vld [vmem:[#allocation10_spill] sm:$0xff] }
 0x743   : > { %v5557_v33 = vpop.f32.mrf.mxu1 }
 0x744   : > { %13347 = vst [vmem:[#allocation29_spill] sm:$0xff] %v11860_v61  ;;  %v11863_v16 = vadd.f32 %v5557_v33, %v11735_v44 }
 0x746   : > { %8682 = vmatmul.msk.bf16.gmra.mxu2 %vm4438_vm8, %v13348_v17 }
 0x749   : > { %v5212_v41 = vpop.f32.mrf.mxu2 }
 0x74a   : > { %v11868_v12 = vadd.f32 %v5212_v41, %v11701_v14  ;;  %v11934_v41 = vpop.f32.mrf.mxu3 }
 0x74b   : > { %v5560_v10 = vpop.f32.mrf.mxu1 }
 0x74c   : > { %13349 = vst [vmem:[#allocation11_spill] sm:$0xff] %v11868_v12  ;;  %v11871_v6 = vadd.f32 %v5560_v10, %v11745_v20  ;;  %v8944_v20 = vld [vmem:[%s13001_s7 + $0x8] sm:$0xff]  ;;  %v11936_v10 = vpop.f32.mrf.mxu0 }
 0x74d   : > { %8675 = vmatmul.msk.bf16.gmra.mxu1 %vm4438_vm8, %v13335_v43  ;;  %6942 = vmatpush.bf16.msra.mxu3 %v8944_v20 }
 0x751   : > { %v5214_v3 = vpop.f32.mrf.mxu2 }
 0x752   : > { %v11876_v37 = vadd.f32 %v5214_v3, %v11711_v47 }
 0x753   : > { %v5562_v44 = vpop.f32.mrf.mxu1 }
 0x754   : > { %13350 = vst [vmem:[#allocation32_spill] sm:$0xff] %v11876_v37  ;;  %v11879_v51 = vadd.f32 %v5562_v44, %v11755_v0  ;;  %v13354_v0 = vld [vmem:[#allocation9_spill] sm:$0xff] }
 0x756   : > { %8683 = vmatmul.msk.bf16.gmra.mxu2 %vm4438_vm8, %v13351_v35 }
 0x759   : > { %v5217_v14 = vpop.f32.mrf.mxu2 }
 0x75a   : > { %v11884_v2 = vadd.f32 %v5217_v14, %v11721_v22  ;;  %v11951_v14 = vpop.f32.mrf.mxu0 }
 0x75b   : > { %v11944_v44 = vpop.f32.mrf.mxu1 }
 0x75c   : > { %13352 = vst [vmem:[#allocation30_spill] sm:$0xff] %v11884_v2 }
 0x75d   : > { %8676 = vmatmul.msk.bf16.gmra.mxu1 %vm4438_vm8, %v13336_v32 }
 0x761   : > { %v5219_v47 = vpop.f32.mrf.mxu2 }
 0x762   : > { %v11892_v43 = vadd.f32 %v5219_v47, %v11731_v26 }
 0x764   : > { %13353 = vst [vmem:[#allocation31_spill] sm:$0xff] %v11892_v43 }
 0x766   : > { %8684 = vmatmul.msk.bf16.gmra.mxu2 %vm4438_vm8, %v13354_v0 }
 0x769   : > { %v5222_v18 = vpop.f32.mrf.mxu2 }
 0x76a   : > { %v11897_v27 = vadd.f32 %v5222_v18, %v11741_v8 }
 0x76c   : > { %13355 = vst [vmem:[#allocation15_spill] sm:$0xff] %v11897_v27 }
 0x76d   : > { %8677 = vmatmul.msk.bf16.gmra.mxu1 %vm4438_vm8, %v13337_v48 }
 0x771   : > { %v5224_v22 = vpop.f32.mrf.mxu2 }
 0x772   : > { %v11902_v32 = vadd.f32 %v5224_v22, %v11751_v4 }
 0x774   : > { %13356 = vst [vmem:[#allocation13_spill] sm:$0xff] %v11902_v32 }
 0x776   : > { %8685 = vmatmul.msk.bf16.gmra.mxu2 %vm4438_vm8, %v13357_v59  ;;  %v11956_v59 = vpop.f32.mrf.mxu1 }
 0x779   : > { %v5227_v46 = vpop.f32.mrf.mxu2 }
 0x77a   : > { %v11907_v26 = vadd.f32 %v5227_v46, %v11763_v58 }
 0x77c   : > { %13358 = vst [vmem:[#allocation36_spill] sm:$0xff] %v11907_v26 }
 0x77d   : > { %8678 = vmatmul.msk.bf16.gmra.mxu1 %vm4438_vm8, %v11526_v25 }
 0x781   : > { %v5229_v49 = vpop.f32.mrf.mxu2 }
 0x782   : > { %v11912_v8 = vadd.f32 %v5229_v49, %v11773_v63 }
 0x784   : > { %13359 = vst [vmem:[#allocation35_spill] sm:$0xff] %v11912_v8 }
 0x786   : > { %8686 = vmatmul.msk.bf16.gmra.mxu2 %vm4438_vm8, %v13360_v52 }
 0x789   : > { %v5232_v48 = vpop.f32.mrf.mxu2 }
 0x78a   : > { %v11917_v4 = vadd.f32 %v5232_v48, %v11783_v39 }
 0x78c   : > { %13361 = vst [vmem:[#allocation17_spill] sm:$0xff] %v11917_v4 }
 0x78d   : > { %8679 = vmatmul.msk.bf16.gmra.mxu1 %vm4438_vm8, %v13362_v5 }
 0x791   : > { %v5234_v56 = vpop.f32.mrf.mxu2 }
 0x792   : > { %v11922_v58 = vadd.f32 %v5234_v56, %v11793_v34 }
 0x794   : > { %13363 = vst [vmem:[#allocation14_spill] sm:$0xff] %v11922_v58 }
 0x796   : > { %8687 = vmatmul.msk.bf16.gmra.mxu2 %vm4438_vm8, %v13364_v11 }
 0x799   : > { %v5237_v25 = vpop.f32.mrf.mxu2 }
 0x79a   : > { %v11927_v63 = vadd.f32 %v5237_v25, %v11803_v29  ;;  %v11942_v29 = vld [vmem:[%s13000_s6] ss:$0 sm:$0xff] }
 0x79c   : > { %13365 = vst [vmem:[#allocation21_spill] sm:$0xff] %v11927_v63 }
 0x7a1   : > { %v5239_v33 = vpop.f32.mrf.mxu2 }
 0x7a2   : > { %v11930_v17 = vadd.f32 %v5239_v33, %v11813_v28  ;;  %v11946_v28 = vpop.f32.mrf.mxu3 }
 0x7a4   : > { %13366 = vst [vmem:[#allocation18_spill] sm:$0xff] %v11930_v17 }
 0x7a6   : > { %8688 = vmatmul.msk.bf16.gmra.mxu2 %vm4438_vm8, %v13328_v30 }
 0x7a9   : > { %v5669_v39 = vpop.f32.mrf.mxu2 }
 0x7aa   : > { %v5749_v3 = vadd.f32 %v5669_v39, %v11823_v62  ;;  %v11959_v49 = vpop.f32.mrf.mxu3 }
 0x7ac   : > { %v5784_v35 = vadd.f32 %v11942_v29, %v5749_v3 }
 0x7ae   : > { %v5816_v20 = vmax.f32 %v5784_v35, 0.0 }
 0x7b0   : > { %v5848_v18 = vpack.c.bf16 %v5816_v20, %v5816_v20  ;;  %v11972_v20 = vpop.f32.mrf.mxu1 }
 0x7b1   : > { %v5671_v34 = vpop.f32.mrf.mxu2 }
 0x7b2   : > { %v5750_v47 = vadd.f32 %v5671_v34, %v11831_v38  ;;  %v5880_v48 = vunpack.c.l.bf16 %v5848_v18  ;;  %v11965_v38 = vpop.f32.mrf.mxu0 }
 0x7b4   : > { %v5785_v46 = vadd.f32 %v11942_v29, %v5750_v47 }
 0x7b6   : > { %8689 = vmatmul.msk.bf16.gmra.mxu2 %vm4438_vm8, %v13330_v24  ;;  %v5817_v56 = vmax.f32 %v5785_v46, 0.0 }
 0x7b8   : > { %v5849_v34 = vpack.c.bf16 %v5817_v56, %v5817_v56  ;;  %v11988_v32 = vpop.f32.mrf.mxu1 }
 0x7b9   : > { %v5674_v30 = vpop.f32.mrf.mxu2 }
 0x7ba   : > { %v5751_v62 = vadd.f32 %v5674_v30, %v11839_v40  ;;  %v5881_v46 = vunpack.c.l.bf16 %v5849_v34 }
 0x7bc   : > { %v5786_v0 = vadd.f32 %v11942_v29, %v5751_v62 }
 0x7be   : > { %v5818_v22 = vmax.f32 %v5786_v0, 0.0  ;;  %v11976_v0 = vpop.f32.mrf.mxu3 }
 0x7c0   : > { %v11961_v52 = vpack.c.bf16 %v5818_v22, %v5818_v22 }
 0x7c1   : > { %v5676_v24 = vpop.f32.mrf.mxu2 }
 0x7c2   : > { %v13115_v5 = vunpack.c.l.bf16 %v11961_v52  ;;  %v5752_v40 = vadd.f32 %v5676_v24, %v11847_v45 }
 0x7c4   : > { %v5912_v11 = vmax.f32 %v5880_v48, %v13115_v5  ;;  %v5787_v25 = vadd.f32 %v11942_v29, %v5752_v40  ;;  %v11983_v40 = vpop.f32.mrf.mxu0 }
 0x7c6   : > { %v5958_v33 = vrot.slane %v5912_v11, 2  ;;  %v5959_v39 = vrot.slane %v5912_v11, 4  ;;  %8690 = vmatmul.msk.bf16.gmra.mxu2 %vm4438_vm8, %v13332_v57  ;;  %v5819_v3 = vmax.f32 %v5787_v25, 0.0  ;;  %v6054_v35 = vperm.slane %v5912_v11, 1  ;;  %v11991_v12 = vpop.f32.mrf.mxu3 }
 0x7c7   : > { %v5960_v18 = vrot.slane %v5912_v11, 6  ;;  %v8696_v25 = vrot.slane %v5912_v11, 9 }
 0x7c8   : > { %v6055_v30 = vperm.slane %v5958_v33, 1  ;;  %v6056_v45 = vperm.slane %v5959_v39, 1  ;;  %v11974_v62 = vpack.c.bf16 %v5819_v3, %v5819_v3  ;;  %v8697_v3 = vrot.slane %v5958_v33, 9 }
 0x7c9   : > { %v5679_v47 = vpop.f32.mrf.mxu2  ;;  %v6057_v56 = vperm.slane %v5960_v18, 1  ;;  %v8698_v5 = vrot.slane %v5959_v39, 9  ;;  %v8699_v63 = vrot.slane %v5960_v18, 9  ;;  %v6372_v27 = vmax.f32 %v5912_v11, %v8696_v25 }
 0x7ca   : > { %v6111_v22 = vsel %vm6110_vm9, %v6055_v30, %v6054_v35  ;;  %v13116_v57 = vunpack.c.l.bf16 %v11974_v62 }
 0x7cb   : > { %v6113_v24 = vsel %vm6112_vm10, %v6056_v45, %v6111_v22  ;;  %v5753_v45 = vadd.f32 %v5679_v47, %v11855_v55  ;;  %v6375_v61 = vmax.f32 %v5960_v18, %v8699_v63 }
 0x7cc   : > { %v5913_v48 = vmax.f32 %v5881_v46, %v13116_v57  ;;  %v6115_v58 = vsel %vm6114_vm11, %v6057_v56, %v6113_v24  ;;  %v6373_v24 = vmax.f32 %v5958_v33, %v8697_v3  ;;  %v6374_v56 = vmax.f32 %v5959_v39, %v8698_v5  ;;  %v11999_v5 = vpop.f32.mrf.mxu0 }
 0x7cd   : > { %v5788_v7 = vadd.f32 %v11942_v29, %v5753_v45 }
 0x7ce   : > { %v5961_v35 = vrot.slane %v5913_v48, 2  ;;  %v5962_v30 = vrot.slane %v5913_v48, 4  ;;  %v5963_v34 = vrot.slane %v5913_v48, 6  ;;  %v6058_v17 = vperm.slane %v5913_v48, 1 }
 0x7cf   : > { %v8700_v4 = vrot.slane %v5913_v48, 9 }
 0x7d0   : > { %v6059_v22 = vperm.slane %v5961_v35, 1  ;;  %v6060_v46 = vperm.slane %v5962_v30, 1  ;;  %v6117_v57 = vsel %vm6116_vm12, %v6058_v17, %v6115_v58  ;;  %v8701_v8 = vrot.slane %v5961_v35, 9 }
 0x7d1   : > { %v5681_v26 = vpop.f32.mrf.mxu2  ;;  %v8702_v2 = vrot.slane %v5962_v30, 9  ;;  %v8703_v37 = vrot.slane %v5963_v34, 9  ;;  %v6376_v58 = vmax.f32 %v5913_v48, %v8700_v4 }
 0x7d2   : > { %v6119_v43 = vsel %vm6118_vm13, %v6059_v22, %v6117_v57  ;;  %v6377_v17 = vmax.f32 %v5961_v35, %v8701_v8  ;;  %v5754_v63 = vadd.f32 %v5681_v26, %v11863_v16  ;;  %v12002_v16 = vpop.f32.mrf.mxu1 }
 0x7d3   : > { %v6121_v55 = vsel %vm6120_vm14, %v6060_v46, %v6119_v43  ;;  %v6378_v57 = vmax.f32 %v5962_v30, %v8702_v2  ;;  %v6379_v22 = vmax.f32 %v5963_v34, %v8703_v37  ;;  %v5820_v34 = vmax.f32 %v5788_v7, 0.0 }
 0x7d4   : > { %v6172_v47 = vsel %vm495_vm0, -inf, %v6121_v55 }
 0x7d5   : > { %v6444_v15 = vrot.slane %v6172_v47, 2  ;;  %v6445_v19 = vrot.slane %v6172_v47, 4  ;;  %v6446_v11 = vrot.slane %v6172_v47, 6  ;;  %v6468_v25 = vrot.slane %v6172_v47, 1 }
 0x7d6   : > { %8691 = vmatmul.msk.bf16.gmra.mxu2 %vm4438_vm8, %v13334_v60  ;;  %v6564_v33 = vmax.f32 %v6372_v27, %v6172_v47 }
 0x7d7   : > { %v6469_v43 = vrot.slane %v6444_v15, 1  ;;  %v6470_v39 = vrot.slane %v6445_v19, 1  ;;  %v6471_v4 = vrot.slane %v6446_v11, 1  ;;  %v6565_v8 = vmax.f32 %v6373_v24, %v6468_v25 }
 0x7d8   : > { %v6566_v18 = vmax.f32 %v6374_v56, %v6444_v15  ;;  %v6568_v48 = vmax.f32 %v6376_v58, %v6445_v19  ;;  %v6570_v3 = vmax.f32 %v6378_v57, %v6446_v11  ;;  %v6711_v35 = vperm.slane %v6564_v33, 0  ;;  %v12006_v19 = vpop.f32.mrf.mxu3  ;;  %v12014_v33 = vpop.f32.mrf.mxu0 }
 0x7d9   : > { %v5684_v45 = vpop.f32.mrf.mxu2  ;;  %v6567_v46 = vmax.f32 %v6375_v61, %v6469_v43  ;;  %v6569_v55 = vmax.f32 %v6377_v17, %v6470_v39  ;;  %v6571_v42 = vmax.f32 %v6379_v22, %v6471_v4  ;;  %v6712_v60 = vperm.slane %v6565_v8, 0 }
 0x7da   : > { %v6713_v2 = vperm.slane %v6566_v18, 0  ;;  %v6715_v26 = vperm.slane %v6568_v48, 0  ;;  %v5755_v15 = vadd.f32 %v5684_v45, %v11871_v6  ;;  %v5789_v56 = vadd.f32 %v11942_v29, %v5754_v63  ;;  %v13367_v48 = vld [vmem:[#allocation3_spill] sm:$0xff] }
 0x7db   : > { %v6714_v37 = vperm.slane %v6567_v46, 0  ;;  %v6776_v27 = vsel %vm6775_vm15, %v6712_v60, %v6711_v35  ;;  %v6716_v24 = vperm.slane %v6569_v55, 0  ;;  %v6717_v47 = vperm.slane %v6570_v3, 0  ;;  %v13369_v35 = vld [vmem:[#allocation2_spill] sm:$0xff] }
 0x7dc   : > { %v6777_v30 = vsel %vm6110_vm9, %v6713_v2, %v6776_v27  ;;  %v5790_v17 = vadd.f32 %v11942_v29, %v5755_v15  ;;  %v6718_v11 = vperm.slane %v6571_v42, 0  ;;  %v5852_v57 = vpack.c.bf16 %v5820_v34, %v5820_v34 }
 0x7dd   : > { %v6778_v61 = vsel %vm6112_vm10, %v6714_v37, %v6777_v30  ;;  %v5821_v43 = vmax.f32 %v5789_v56, 0.0  ;;  %v5385_v42 = vadd.f32 %v11934_v41, %v11760_v36  ;;  %v13368_v3 = vrot.slane %v13367_v48, 1 }
 0x7de   : > { %v6779_v58 = vsel %vm6114_vm11, %v6715_v26, %v6778_v61  ;;  %v5822_v22 = vmax.f32 %v5790_v17, 0.0  ;;  %v13370_v45 = vrot.slane %v13369_v35, 1  ;;  %v5884_v55 = vunpack.c.l.bf16 %v5852_v57  ;;  %v12041_v26 = vpop.f32.mrf.mxu1 }
 0x7df   : > { %v6780_v25 = vsel %vm6116_vm12, %v6716_v24, %v6779_v58  ;;  %v5853_v37 = vpack.c.bf16 %v5821_v43, %v5821_v43  ;;  %v5509_v61 = vadd.f32 %v11936_v10, %v5385_v42  ;;  %v5386_v17 = vadd.f32 %v11946_v28, %v11768_v54  ;;  %v8948_v54 = vld [vmem:[%s13001_s7 + $0x28] sm:$0xff] }
 0x7e0   : > { %v6781_v6 = vsel %vm6118_vm13, %v6717_v47, %v6780_v25  ;;  %v12018_v4 = vpack.c.bf16 %v5822_v22, %v5822_v22  ;;  %v12028_v46 = vsel %vm678_vm2, %v13370_v45, %v13368_v3  ;;  %v12045_v34 = vpop.f32.mrf.mxu3  ;;  %v5387_v57 = vadd.f32 %v11959_v49, %v11780_v50  ;;  %v12070_v28 = vpop.f32.mrf.mxu0  ;;  %7257 = vmatpush.bf16.msrb.mxu1 %v8948_v54 }
 0x7e1   : > { %v5686_v7 = vpop.f32.mrf.mxu2  ;;  %v6782_v63 = vsel %vm6120_vm14, %v6718_v11, %v6781_v6  ;;  %13371 = vst [vmem:[#allocation19_spill] sm:$0xff] %v12028_v46  ;;  %v5885_v11 = vunpack.c.l.bf16 %v5853_v37  ;;  %v5633_v22 = vadd.f32 %v11944_v44, %v5509_v61  ;;  %v12078_v42 = vadd.f32 %v11976_v0, %v11788_v21 }
 0x7e2   : > { %v5756_v39 = vadd.f32 %v5686_v7, %v11879_v51  ;;  %v6832_v8 = vrot.slane %v6782_v63, 7  ;;  %v13118_v51 = vunpack.c.l.bf16 %v12018_v4  ;;  %v13373_v63 = vunpack.c.l.bf16 %v11974_v62 }
 0x7e3   : > { %v5511_v3 = vadd.f32 %v11965_v38, %v5387_v57 }
 0x7e4   : > { %v5791_v18 = vadd.f32 %v11942_v29, %v5756_v39  ;;  %v12032_v60 = vsel %vm495_vm0, 0.0, %v6832_v8  ;;  %v12035_v2 = vsel %vm495_vm0, %v6832_v8, 0.0  ;;  %v5914_v30 = vmax.f32 %v5884_v55, %v13118_v51 }
 0x7e5   : > { %v6883_v41 = vrot.slane %v12032_v60, 1  ;;  %v6884_v27 = vrot.slane %v12035_v2, 1 }
 0x7e6   : > { %v5823_v36 = vmax.f32 %v5791_v18, 0.0  ;;  %8692 = vmatmul.msk.bf16.gmra.mxu2 %vm4438_vm8, %v11458_v13  ;;  %v13372_v13 = vunpack.c.l.bf16 %v11961_v52  ;;  %v8947_v52 = vld [vmem:[%s13001_s7 + $0x20] sm:$0xff]  ;;  %v5510_v18 = vadd.f32 %v11951_v14, %v5386_v17 }
 0x7e7   : > { %v12050_v24 = vsel %vm678_vm2, %v6883_v41, %v6884_v27  ;;  %7194 = vmatpush.bf16.msrb.mxu0 %v8947_v52  ;;  %v12084_v27 = vpop.f32.mrf.mxu1 }
 0x7e8   : > { %v12047_v15 = vpack.c.bf16 %v5823_v36, %v5823_v36  ;;  %v5928_v56 = vmax.f32 %v5914_v30, %v13372_v13  ;;  %v6912_v58 = vpack.c.bf16 %v12050_v24, %v12028_v46  ;;  %v12087_v0 = vpop.f32.mrf.mxu3  ;;  %v5634_v17 = vadd.f32 %v11956_v59, %v5510_v18 }
 0x7e9   : > { %v5689_v47 = vpop.f32.mrf.mxu2 }
 0x7ea   : > { %v13117_v25 = vunpack.c.l.bf16 %v12047_v15  ;;  %v5964_v7 = vrot.slane %v5928_v56, 2  ;;  %v5965_v10 = vrot.slane %v5928_v56, 4  ;;  %8764 = vmatmul.msk.bf16.vlgmr.msra.gmra.mxu3 %vm6922_vm4, %v6912_v58  ;;  %v5966_v6 = vrot.slane %v5928_v56, 6 }
 0x7eb   : > { %v6061_v49 = vperm.slane %v5928_v56, 1  ;;  %v5757_v39 = vadd.f32 %v5689_v47, %v5633_v22  ;;  %v8704_v36 = vrot.slane %v5928_v56, 9 }
 0x7ec   : > { %v5915_v50 = vmax.f32 %v5885_v11, %v13117_v25  ;;  %v6062_v44 = vperm.slane %v5964_v7, 1  ;;  %v6063_v43 = vperm.slane %v5965_v10, 1  ;;  %v6064_v55 = vperm.slane %v5966_v6, 1 }
 0x7ed   : > { %v8705_v30 = vrot.slane %v5964_v7, 9  ;;  %v5792_v13 = vadd.f32 %v11942_v29, %v5757_v39  ;;  %v5635_v11 = vadd.f32 %v11972_v20, %v5511_v3  ;;  %v8706_v52 = vrot.slane %v5965_v10, 9 }
 0x7ee   : > { %v5929_v8 = vmax.f32 %v5915_v50, %v13373_v63  ;;  %v6122_v45 = vsel %vm6110_vm9, %v6062_v44, %v6061_v49  ;;  %v8707_v54 = vrot.slane %v5966_v6, 9  ;;  %v6380_v44 = vmax.f32 %v5928_v56, %v8704_v36 }
 0x7ef   : > { %v6123_v37 = vsel %vm6112_vm10, %v6063_v43, %v6122_v45  ;;  %v6381_v43 = vmax.f32 %v5964_v7, %v8705_v30  ;;  %v12095_v45 = vpop.f32.mrf.mxu0  ;;  %v5824_v20 = vmax.f32 %v5792_v13, 0.0 }
 0x7f0   : > { %v5967_v41 = vrot.slane %v5929_v8, 2  ;;  %v5968_v62 = vrot.slane %v5929_v8, 4  ;;  %v6065_v61 = vperm.slane %v5929_v8, 1  ;;  %v5969_v14 = vrot.slane %v5929_v8, 6 }
 0x7f1   : > { %v5691_v21 = vpop.f32.mrf.mxu2  ;;  %v6124_v38 = vsel %vm6114_vm11, %v6064_v55, %v6123_v37  ;;  %v8708_v58 = vrot.slane %v5929_v8, 9  ;;  %v6383_v56 = vmax.f32 %v5966_v6, %v8707_v54 }
 0x7f2   : > { %v6066_v47 = vperm.slane %v5967_v41, 1  ;;  %v6067_v57 = vperm.slane %v5968_v62, 1  ;;  %v6125_v22 = vsel %vm6116_vm12, %v6065_v61, %v6124_v38  ;;  %v8709_v49 = vrot.slane %v5967_v41, 9 }
 0x7f3   : > { %v8710_v63 = vrot.slane %v5968_v62, 9  ;;  %v8711_v59 = vrot.slane %v5969_v14, 9  ;;  %v6384_v18 = vmax.f32 %v5929_v8, %v8708_v58  ;;  %v6382_v38 = vmax.f32 %v5965_v10, %v8706_v52  ;;  %v12100_v58 = vpop.f32.mrf.mxu1 }
 0x7f4   : > { %v6126_v50 = vsel %vm6118_vm13, %v6066_v47, %v6125_v22  ;;  %v6385_v7 = vmax.f32 %v5967_v41, %v8709_v49  ;;  %v5758_v46 = vadd.f32 %v5691_v21, %v5634_v17  ;;  %v5856_v10 = vpack.c.bf16 %v5824_v20, %v5824_v20 }
 0x7f5   : > { %v6127_v39 = vsel %vm6120_vm14, %v6067_v57, %v6126_v50  ;;  %v6386_v30 = vmax.f32 %v5968_v62, %v8710_v63 }
 0x7f6   : > { %v6173_v55 = vsel %vm495_vm0, -inf, %v6127_v39  ;;  %8693 = vmatmul.msk.bf16.gmra.mxu2 %vm4438_vm8, %v11498_v23  ;;  %v6387_v39 = vmax.f32 %v5969_v14, %v8711_v59  ;;  %v5512_v14 = vadd.f32 %v11983_v40, %v12078_v42  ;;  %v5793_v63 = vadd.f32 %v11942_v29, %v5758_v46 }
 0x7f7   : > { %v6447_v3 = vrot.slane %v6173_v55, 2  ;;  %v6448_v37 = vrot.slane %v6173_v55, 4  ;;  %v6472_v61 = vrot.slane %v6173_v55, 1  ;;  %v6572_v47 = vmax.f32 %v6380_v44, %v6173_v55  ;;  %v12102_v44 = vpop.f32.mrf.mxu3 }
 0x7f8   : > { %v6449_v36 = vrot.slane %v6173_v55, 6  ;;  %v5636_v17 = vadd.f32 %v11988_v32, %v5512_v14 }
 0x7f9   : > { %v6474_v57 = vrot.slane %v6448_v37, 1  ;;  %v6576_v22 = vmax.f32 %v6384_v18, %v6448_v37  ;;  %v5694_v50 = vpop.f32.mrf.mxu2  ;;  %v6473_v25 = vrot.slane %v6447_v3, 1  ;;  %v6573_v13 = vmax.f32 %v6381_v43, %v6472_v61 }
 0x7fa   : > { %v5759_v51 = vadd.f32 %v5694_v50, %v5635_v11  ;;  %v6475_v8 = vrot.slane %v6449_v36, 1  ;;  %v6574_v48 = vmax.f32 %v6382_v38, %v6447_v3  ;;  %v6578_v41 = vmax.f32 %v6386_v30, %v6449_v36 }
 0x7fb   : > { %v6577_v23 = vmax.f32 %v6385_v7, %v6474_v57  ;;  %v6575_v35 = vmax.f32 %v6383_v56, %v6473_v25  ;;  %v6719_v62 = vperm.slane %v6572_v47, 0  ;;  %v6720_v54 = vperm.slane %v6573_v13, 0  ;;  %v12109_v25 = vpop.f32.mrf.mxu0  ;;  %v12127_v30 = vpop.f32.mrf.mxu1 }
 0x7fc   : > { %v5794_v6 = vadd.f32 %v11942_v29, %v5759_v51  ;;  %v6579_v52 = vmax.f32 %v6387_v39, %v6475_v8  ;;  %v6721_v49 = vperm.slane %v6574_v48, 0  ;;  %v6723_v55 = vperm.slane %v6576_v22, 0 }
 0x7fd   : > { %v6722_v43 = vperm.slane %v6575_v35, 0  ;;  %v6783_v21 = vsel %vm6775_vm15, %v6720_v54, %v6719_v62  ;;  %v6724_v18 = vperm.slane %v6577_v23, 0  ;;  %v5888_v48 = vunpack.c.l.bf16 %v5856_v10  ;;  %v13375_v23 = vld [vmem:[#allocation26_spill] sm:$0xff] }
 0x7fe   : > { %v5826_v11 = vmax.f32 %v5794_v6, 0.0  ;;  %v6784_v59 = vsel %vm6110_vm9, %v6721_v49, %v6783_v21  ;;  %v6725_v46 = vperm.slane %v6578_v41, 0  ;;  %v5825_v37 = vmax.f32 %v5793_v63, 0.0 }
 0x7ff   : > { %v6785_v40 = vsel %vm6112_vm10, %v6722_v43, %v6784_v59  ;;  %v6726_v61 = vperm.slane %v6579_v52, 0  ;;  %v5389_v7 = vadd.f32 %v11991_v12, %v11800_v53  ;;  %v5390_v36 = vadd.f32 %v12006_v19, %v11808_v31  ;;  %v12132_v50 = vpop.f32.mrf.mxu3 }
 0x800   : > { %v12112_v51 = vpack.c.bf16 %v5826_v11, %v5826_v11  ;;  %v6786_v3 = vsel %vm6114_vm11, %v6723_v55, %v6785_v40  ;;  %v5391_v22 = vadd.f32 %v12045_v34, %v11820_v9  ;;  %v13374_v39 = vunpack.c.l.bf16 %v12018_v4 }
 0x801   : > { %v5696_v20 = vpop.f32.mrf.mxu2  ;;  %v6787_v32 = vsel %vm6116_vm12, %v6724_v18, %v6786_v3  ;;  %v5857_v53 = vpack.c.bf16 %v5825_v37, %v5825_v37  ;;  %v5392_v31 = vadd.f32 %v12087_v0, %v13375_v23  ;;  %v5513_v9 = vadd.f32 %v11999_v5, %v5389_v7  ;;  %v8949_v37 = vld [vmem:[%s13001_s7 + $0x30] sm:$0xff] }
 0x802   : > { %v5890_v35 = vunpack.c.l.bf16 %v12112_v51  ;;  %v5760_v42 = vadd.f32 %v5696_v20, %v5636_v17  ;;  %v6788_v56 = vsel %vm6118_vm13, %v6725_v46, %v6787_v32  ;;  %v5514_v34 = vadd.f32 %v12014_v33, %v5390_v36  ;;  %7304 = vmatpush.bf16.msrb.mxu2 %v8949_v37 }
 0x803   : > { %v6789_v57 = vsel %vm6120_vm14, %v6726_v61, %v6788_v56  ;;  %v12148_v62 = vpop.f32.mrf.mxu0  ;;  %v5889_v49 = vunpack.c.l.bf16 %v5857_v53  ;;  %v5637_v11 = vadd.f32 %v12002_v16, %v5513_v9  ;;  %v12160_v43 = vadd.f32 %v12095_v45, %v5392_v31  ;;  %v12169_v40 = vpop.f32.mrf.mxu1 }
 0x804   : > { %v5916_v47 = vmax.f32 %v5888_v48, %v5890_v35  ;;  %v5795_v38 = vadd.f32 %v11942_v29, %v5760_v42  ;;  %v6833_v12 = vrot.slane %v6789_v57, 7  ;;  %v7012_v63 = vrot.slane %v12032_v60, 2 }
 0x805   : > { %v7013_v59 = vrot.slane %v12035_v2, 2  ;;  %v13376_v45 = vunpack.c.l.bf16 %v12047_v15 }
 0x806   : > { %v5930_v8 = vmax.f32 %v5916_v47, %v13374_v39  ;;  %v5827_v13 = vmax.f32 %v5795_v38, 0.0  ;;  %8694 = vmatmul.msk.bf16.gmra.mxu2 %vm4438_vm8, %v11524_v1  ;;  %v5515_v1 = vadd.f32 %v12070_v28, %v5391_v22  ;;  %v12155_v5 = vsel %vm495_vm0, 0.0, %v6833_v12 }
 0x807   : > { %v6857_v33 = vsel %vm495_vm0, %v6833_v12, 0.0  ;;  %v6886_v20 = vrot.slane %v12155_v5, 1  ;;  %v7015_v46 = vrot.slane %v12155_v5, 2  ;;  %v7100_v2 = vpack.c.bf16 %v12155_v5, %v12032_v60  ;;  %v12179_v61 = vpop.f32.mrf.mxu3 }
 0x808   : > { %v12140_v19 = vrot.slane %v5930_v8, 2  ;;  %v12142_v10 = vrot.slane %v5930_v8, 4  ;;  %v5972_v6 = vrot.slane %v5930_v8, 6  ;;  %v12146_v4 = vpack.c.bf16 %v5827_v13, %v5827_v13 }
 0x809   : > { %v5699_v41 = vpop.f32.mrf.mxu2  ;;  %v6068_v52 = vperm.slane %v5930_v8, 1  ;;  %v8712_v17 = vrot.slane %v5930_v8, 9  ;;  %v6887_v16 = vrot.slane %v6857_v33, 1  ;;  %v7016_v3 = vrot.slane %v6857_v33, 2 }
 0x80a   : > { %v6069_v54 = vperm.slane %v12140_v19, 1  ;;  %v6070_v0 = vperm.slane %v12142_v10, 1  ;;  %v5891_v14 = vunpack.c.l.bf16 %v12146_v4  ;;  %v6071_v21 = vperm.slane %v5972_v6, 1 }
 0x80b   : > { %v5761_v48 = vadd.f32 %v5699_v41, %v5637_v11  ;;  %v8713_v32 = vrot.slane %v12140_v19, 9  ;;  %v8714_v47 = vrot.slane %v12142_v10, 9  ;;  %v8715_v38 = vrot.slane %v5972_v6, 9 }
 0x80c   : > { %v6128_v28 = vsel %vm6110_vm9, %v6069_v54, %v6068_v52  ;;  %v5917_v55 = vmax.f32 %v5889_v49, %v5891_v14  ;;  %v12184_v15 = vsel %vm678_vm2, %v6886_v20, %v6887_v16  ;;  %v12191_v12 = vsel %vm1091_vm5, %v7015_v46, %v7016_v3  ;;  %v12194_v52 = vpop.f32.mrf.mxu0 }
 0x80d   : > { %v6129_v18 = vsel %vm6112_vm10, %v6070_v0, %v6128_v28  ;;  %v5796_v13 = vadd.f32 %v11942_v29, %v5761_v48  ;;  %v7165_v53 = vpack.c.bf16 %v12184_v15, %v12050_v24  ;;  %v5638_v54 = vadd.f32 %v12041_v26, %v5514_v34 }
 0x80e   : > { %v5931_v42 = vmax.f32 %v5917_v55, %v13376_v45  ;;  %v6130_v57 = vsel %vm6114_vm11, %v6071_v21, %v6129_v18  ;;  %v5639_v0 = vadd.f32 %v12084_v27, %v5515_v1  ;;  %v6388_v49 = vmax.f32 %v5930_v8, %v8712_v17  ;;  %v13377_v8 = vld [vmem:[#allocation7_spill] sm:$0xff] }
 0x80f   : > { %8796 = vmatmul.msk.bf16.vlgmr.msrb.gmra.mxu0 %vm6922_vm4, %v7165_v53  ;;  %v12200_v33 = vsel %vm1091_vm5, %v7012_v63, %v7013_v59  ;;  %v6389_v55 = vmax.f32 %v12140_v19, %v8713_v32  ;;  %v6390_v18 = vmax.f32 %v12142_v10, %v8714_v47  ;;  %v6391_v26 = vmax.f32 %v5972_v6, %v8715_v38  ;;  %v12212_v19 = vpop.f32.mrf.mxu1  ;;  %v12214_v37 = vpop.f32.mrf.mxu3 }
 0x810   : > { %v5973_v56 = vrot.slane %v5931_v42, 2  ;;  %v5974_v7 = vrot.slane %v5931_v42, 4  ;;  %v6072_v36 = vperm.slane %v5931_v42, 1  ;;  %v5975_v39 = vrot.slane %v5931_v42, 6 }
 0x811   : > { %v5701_v22 = vpop.f32.mrf.mxu2  ;;  %v8716_v41 = vrot.slane %v5931_v42, 9  ;;  %v7228_v21 = vpack.c.bf16 %v12191_v12, %v12200_v33  ;;  %v5828_v17 = vmax.f32 %v5796_v13, 0.0 }
 0x812   : > { %v6073_v23 = vperm.slane %v5973_v56, 1  ;;  %v6074_v31 = vperm.slane %v5974_v7, 1  ;;  %v6131_v9 = vsel %vm6116_vm12, %v6072_v36, %v6130_v57  ;;  %v8717_v11 = vrot.slane %v5973_v56, 9 }
 0x813   : > { %v8718_v28 = vrot.slane %v5974_v7, 9  ;;  %v8719_v1 = vrot.slane %v5975_v39, 9  ;;  %v6392_v63 = vmax.f32 %v5931_v42, %v8716_v41  ;;  %8804 = vmatmul.msk.bf16.vlgmr.msrb.gmra.mxu1 %vm6922_vm4, %v7228_v21  ;;  %v5762_v45 = vadd.f32 %v5701_v22, %v5638_v54 }
 0x814   : > { %v6132_v24 = vsel %vm6118_vm13, %v6073_v23, %v6131_v9  ;;  %v6393_v10 = vmax.f32 %v5973_v56, %v8717_v11  ;;  %v5860_v23 = vpack.c.bf16 %v5828_v17, %v5828_v17 }
 0x815   : > { %v6133_v27 = vsel %vm6120_vm14, %v6074_v31, %v6132_v24  ;;  %v6394_v6 = vmax.f32 %v5974_v7, %v8718_v28  ;;  %v6395_v36 = vmax.f32 %v5975_v39, %v8719_v1  ;;  %v5797_v56 = vadd.f32 %v11942_v29, %v5762_v45 }
 0x816   : > { %8695 = vmatmul.msk.bf16.gmra.mxu2 %vm4438_vm8, %v13377_v8  ;;  %v6174_v34 = vsel %vm495_vm0, -inf, %v6133_v27  ;;  %v5640_v39 = vadd.f32 %v12100_v58, %v12160_v43  ;;  %vm12797_vm8 = vmor %vm856_vm1, %vm7847_vm6  ;;  %vm7800_vm1 = vcmask 261120  }
 0x817   : > { %v6451_v59 = vrot.slane %v6174_v34, 4  ;;  %v6476_v48 = vrot.slane %v6174_v34, 1  ;;  %v6450_v20 = vrot.slane %v6174_v34, 2  ;;  %v6452_v16 = vrot.slane %v6174_v34, 6  ;;  %v12230_v58 = vpop.f32.mrf.mxu1 }
 0x818   : > { %v6580_v3 = vmax.f32 %v6388_v49, %v6174_v34  ;;  %v12218_v49 = vpop.f32.mrf.mxu0  ;;  %v5829_v27 = vmax.f32 %v5797_v56, 0.0 }
 0x819   : > { %v5704_v46 = vpop.f32.mrf.mxu2  ;;  %v6478_v32 = vrot.slane %v6451_v59, 1  ;;  %v6584_v47 = vmax.f32 %v6392_v63, %v6451_v59  ;;  %v6477_v42 = vrot.slane %v6450_v20, 1  ;;  %v6479_v57 = vrot.slane %v6452_v16, 1 }
 0x81a   : > { %v5763_v38 = vadd.f32 %v5704_v46, %v5639_v0  ;;  %v6581_v13 = vmax.f32 %v6389_v55, %v6476_v48  ;;  %v6582_v53 = vmax.f32 %v6390_v18, %v6450_v20  ;;  %v6586_v7 = vmax.f32 %v6394_v6, %v6452_v16  ;;  %v13378_v48 = vld [vmem:[#allocation25_spill] sm:$0xff] }
 0x81b   : > { %v6583_v9 = vmax.f32 %v6391_v26, %v6477_v42  ;;  %v6585_v41 = vmax.f32 %v6393_v10, %v6478_v32  ;;  %v6587_v22 = vmax.f32 %v6395_v36, %v6479_v57  ;;  %v6727_v54 = vperm.slane %v6580_v3, 0  ;;  %v12233_v10 = vpop.f32.mrf.mxu3  ;;  %v13379_v57 = vld [vmem:[#allocation28_spill] sm:$0xff] }
 0x81c   : > { %v5798_v31 = vadd.f32 %v11942_v29, %v5763_v38  ;;  %v6728_v11 = vperm.slane %v6581_v13, 0  ;;  %v6729_v0 = vperm.slane %v6582_v53, 0  ;;  %v6731_v18 = vperm.slane %v6584_v47, 0 }
 0x81d   : > { %v6730_v28 = vperm.slane %v6583_v9, 0  ;;  %v5892_v26 = vunpack.c.l.bf16 %v5860_v23  ;;  %v6732_v17 = vperm.slane %v6585_v41, 0  ;;  %v5393_v20 = vadd.f32 %v12102_v44, %v13378_v48  ;;  %v13380_v41 = vld [vmem:[#allocation27_spill] sm:$0xff] }
 0x81e   : > { %v5830_v24 = vmax.f32 %v5798_v31, 0.0  ;;  %v6790_v55 = vsel %vm6775_vm15, %v6728_v11, %v6727_v54  ;;  %v6733_v43 = vperm.slane %v6586_v7, 0  ;;  %v6734_v46 = vperm.slane %v6587_v22, 0 }
 0x81f   : > { %v6791_v34 = vsel %vm6110_vm9, %v6729_v0, %v6790_v55  ;;  %v5861_v47 = vpack.c.bf16 %v5829_v27, %v5829_v27  ;;  %v5394_v13 = vadd.f32 %v12132_v50, %v13379_v57  ;;  %v5517_v23 = vadd.f32 %v12109_v25, %v5393_v20 }
 0x820   : > { %v12222_v21 = vpack.c.bf16 %v5830_v24, %v5830_v24  ;;  %v6792_v59 = vsel %vm6112_vm10, %v6730_v28, %v6791_v34  ;;  %v12245_v53 = vpop.f32.mrf.mxu0  ;;  %v5395_v56 = vadd.f32 %v12179_v61, %v13380_v41 }
 0x821   : > { %v5706_v8 = vpop.f32.mrf.mxu2  ;;  %v6793_v16 = vsel %vm6114_vm11, %v6731_v18, %v6792_v59  ;;  %v5641_v22 = vadd.f32 %v12127_v30, %v5517_v23  ;;  %v5893_v54 = vunpack.c.l.bf16 %v5861_v47 }
 0x822   : > { %v5894_v1 = vunpack.c.l.bf16 %v12222_v21  ;;  %v5764_v63 = vadd.f32 %v5706_v8, %v5640_v39  ;;  %v6794_v3 = vsel %vm6116_vm12, %v6732_v17, %v6793_v16  ;;  %v5518_v39 = vadd.f32 %v12148_v62, %v5394_v13  ;;  %v12269_v8 = vpop.f32.mrf.mxu1 }
 0x823   : > { %v6795_v32 = vsel %vm6118_vm13, %v6733_v43, %v6794_v3  ;;  %v5519_v27 = vadd.f32 %v12194_v52, %v5395_v56 }
 0x824   : > { %v5918_v6 = vmax.f32 %v5892_v26, %v5894_v1  ;;  %v5799_v45 = vadd.f32 %v11942_v29, %v5764_v63  ;;  %v6796_v42 = vsel %vm6120_vm14, %v6734_v46, %v6795_v32  ;;  %v13381_v26 = vld [vmem:[#allocation29_spill] sm:$0xff]  ;;  %v12273_v63 = vpop.f32.mrf.mxu3  ;;  %v5642_v62 = vadd.f32 %v12169_v40, %v5518_v39 }
 0x825   : > { %v6834_v36 = vrot.slane %v6796_v42, 7  ;;  %v12266_v30 = vadd.f32 %v12214_v37, %v13381_v26 }
 0x826   : > { %v5932_v44 = vmax.f32 %v5918_v6, %v5890_v35  ;;  %v5831_v38 = vmax.f32 %v5799_v45, 0.0 }
 0x827   : > { %v12253_v35 = vsel %vm495_vm0, 0.0, %v6834_v36  ;;  %v6858_v28 = vsel %vm495_vm0, %v6834_v36, 0.0 }
 0x828   : > { %v5976_v31 = vrot.slane %v5932_v44, 2  ;;  %v5977_v9 = vrot.slane %v5932_v44, 4  ;;  %v12250_v7 = vpack.c.bf16 %v5831_v38, %v5831_v38  ;;  %v6075_v24 = vperm.slane %v5932_v44, 1  ;;  %v12287_v42 = vpop.f32.mrf.mxu0 }
 0x829   : > { %v5709_v51 = vpop.f32.mrf.mxu2  ;;  %v5978_v11 = vrot.slane %v5932_v44, 6  ;;  %v12262_v18 = vpack.c.bf16 %v12253_v35, %v12155_v5  ;;  %v8720_v17 = vrot.slane %v5932_v44, 9  ;;  %v6889_v59 = vrot.slane %v12253_v35, 1 }
 0x82a   : > { %v6076_v50 = vperm.slane %v5976_v31, 1  ;;  %v6077_v0 = vperm.slane %v5977_v9, 1  ;;  %v5895_v25 = vunpack.c.l.bf16 %v12250_v7  ;;  %v5765_v55 = vadd.f32 %v5709_v51, %v5641_v22 }
 0x82b   : > { %8812 = vmatmul.msk.bf16.vlgmr.msrb.gmra.mxu2 %vm6922_vm4, %v12262_v18  ;;  %v6890_v48 = vrot.slane %v6858_v28, 1  ;;  %v6078_v37 = vperm.slane %v5978_v11, 1  ;;  %v8721_v16 = vrot.slane %v5976_v31, 9  ;;  %v8722_v6 = vrot.slane %v5977_v9, 9 }
 0x82c   : > { %v6134_v61 = vsel %vm6110_vm9, %v6076_v50, %v6075_v24  ;;  %v5919_v34 = vmax.f32 %v5893_v54, %v5895_v25  ;;  %v5800_v43 = vadd.f32 %v11942_v29, %v5765_v55  ;;  %v7018_v40 = vrot.slane %v12253_v35, 2 }
 0x82d   : > { %v6135_v20 = vsel %vm6112_vm10, %v6077_v0, %v6134_v61  ;;  %v12284_v45 = vsel %vm678_vm2, %v6889_v59, %v6890_v48  ;;  %v7019_v38 = vrot.slane %v6858_v28, 2  ;;  %v8723_v36 = vrot.slane %v5978_v11, 9 }
 0x82e   : > { %v5933_v52 = vmax.f32 %v5919_v34, %v5891_v14  ;;  %v6136_v4 = vsel %vm6114_vm11, %v6078_v37, %v6135_v20  ;;  %v12292_v14 = vpack.c.bf16 %v12284_v45, %v12184_v15  ;;  %v5832_v56 = vmax.f32 %v5800_v43, 0.0  ;;  %v12303_v34 = vpop.f32.mrf.mxu1 }
 0x82f   : > { %v5643_v51 = vadd.f32 %v12212_v19, %v5519_v27  ;;  %v6396_v22 = vmax.f32 %v5932_v44, %v8720_v17  ;;  %v6397_v54 = vmax.f32 %v5976_v31, %v8721_v16  ;;  %v12300_v15 = vsel %vm1091_vm5, %v7018_v40, %v7019_v38  ;;  %v5352_v17 = vpop.f32.mrf.mxu3 }
 0x830   : > { %v5979_v46 = vrot.slane %v5933_v52, 2  ;;  %v5980_v3 = vrot.slane %v5933_v52, 4  ;;  %v6079_v32 = vperm.slane %v5933_v52, 1  ;;  %v5981_v57 = vrot.slane %v5933_v52, 6  ;;  %8765 = vmatmul.msk.bf16.gmra.mxu3 %vm6922_vm4, %v12292_v14 }
 0x831   : > { %v5711_v47 = vpop.f32.mrf.mxu2  ;;  %v8724_v24 = vrot.slane %v5933_v52, 9  ;;  %v6398_v39 = vmax.f32 %v5977_v9, %v8722_v6  ;;  %v6399_v61 = vmax.f32 %v5978_v11, %v8723_v36  ;;  %v5864_v19 = vpack.c.bf16 %v5832_v56, %v5832_v56 }
 0x832   : > { %v6080_v13 = vperm.slane %v5979_v46, 1  ;;  %v6081_v23 = vperm.slane %v5980_v3, 1  ;;  %v6137_v41 = vsel %vm6116_vm12, %v6079_v32, %v6136_v4  ;;  %v8725_v0 = vrot.slane %v5979_v46, 9 }
 0x833   : > { %v8726_v28 = vrot.slane %v5980_v3, 9  ;;  %v8727_v26 = vrot.slane %v5981_v57, 9  ;;  %v5766_v44 = vadd.f32 %v5711_v47, %v5642_v62  ;;  %v12308_v27 = vpack.c.bf16 %v12300_v15, %v12191_v12  ;;  %v5476_v12 = vpop.f32.mrf.mxu0 }
 0x834   : > { %v6138_v50 = vsel %vm6118_vm13, %v6080_v13, %v6137_v41  ;;  %v6400_v59 = vmax.f32 %v5933_v52, %v8724_v24  ;;  %v6401_v11 = vmax.f32 %v5979_v46, %v8725_v0 }
 0x835   : > { %v6139_v55 = vsel %vm6120_vm14, %v6081_v23, %v6138_v50  ;;  %v6402_v43 = vmax.f32 %v5980_v3, %v8726_v28  ;;  %v6403_v32 = vmax.f32 %v5981_v57, %v8727_v26  ;;  %v5801_v0 = vadd.f32 %v11942_v29, %v5766_v44 }
 0x836   : > { %v6175_v31 = vsel %vm495_vm0, -inf, %v6139_v55  ;;  %v12319_v26 = vpop.f32.mrf.mxu1 }
 0x837   : > { %v6453_v48 = vrot.slane %v6175_v31, 2  ;;  %v6454_v37 = vrot.slane %v6175_v31, 4  ;;  %v6455_v20 = vrot.slane %v6175_v31, 6  ;;  %v6480_v16 = vrot.slane %v6175_v31, 1 }
 0x838   : > { %v6588_v6 = vmax.f32 %v6396_v22, %v6175_v31  ;;  %v5896_v31 = vunpack.c.l.bf16 %v5864_v19 }
 0x839   : > { %v5714_v9 = vpop.f32.mrf.mxu2  ;;  %v6481_v38 = vrot.slane %v6453_v48, 1  ;;  %v6482_v62 = vrot.slane %v6454_v37, 1  ;;  %v6483_v47 = vrot.slane %v6455_v20, 1  ;;  %v6589_v36 = vmax.f32 %v6397_v54, %v6480_v16 }
 0x83a   : > { %v5767_v40 = vadd.f32 %v5714_v9, %v5643_v51  ;;  %v6590_v4 = vmax.f32 %v6398_v39, %v6453_v48  ;;  %v6592_v13 = vmax.f32 %v6400_v59, %v6454_v37  ;;  %v6594_v56 = vmax.f32 %v6402_v43, %v6455_v20  ;;  %v13382_v20 = vld [vmem:[#allocation11_spill] sm:$0xff] }
 0x83b   : > { %v6591_v52 = vmax.f32 %v6399_v61, %v6481_v38  ;;  %v6593_v41 = vmax.f32 %v6401_v11, %v6482_v62  ;;  %v6595_v24 = vmax.f32 %v6403_v32, %v6483_v47  ;;  %v6735_v50 = vperm.slane %v6588_v6, 0  ;;  %v12334_v6 = vld [vmem:[%s13000_s6] ss:$0 sm:$0xff]  ;;  %v12339_v62 = vpop.f32.mrf.mxu0 }
 0x83c   : > { %v5802_v23 = vadd.f32 %v11942_v29, %v5767_v40  ;;  %v6736_v46 = vperm.slane %v6589_v36, 0  ;;  %v6737_v3 = vperm.slane %v6590_v4, 0  ;;  %v5520_v51 = vadd.f32 %v12218_v49, %v12266_v30  ;;  %v12322_v30 = vpop.f32.mrf.mxu3  ;;  %v13383_v4 = vld [vmem:[#allocation32_spill] sm:$0xff] }
 0x83d   : > { %v6738_v22 = vperm.slane %v6591_v52, 0  ;;  %v6739_v61 = vperm.slane %v6592_v13, 0  ;;  %v6740_v48 = vperm.slane %v6593_v41, 0  ;;  %v6741_v37 = vperm.slane %v6594_v56, 0  ;;  %v13384_v41 = vld [vmem:[#allocation30_spill] sm:$0xff] }
 0x83e   : > { %v5834_v57 = vmax.f32 %v5802_v23, 0.0  ;;  %v6797_v54 = vsel %vm6775_vm15, %v6736_v46, %v6735_v50  ;;  %v5644_v28 = vadd.f32 %v12230_v58, %v5520_v51  ;;  %v5397_v9 = vadd.f32 %v12233_v10, %v13382_v20 }
 0x83f   : > { %v6798_v55 = vsel %vm6110_vm9, %v6737_v3, %v6797_v54  ;;  %v5833_v11 = vmax.f32 %v5801_v0, 0.0  ;;  %v6742_v43 = vperm.slane %v6595_v24, 0  ;;  %v5398_v13 = vadd.f32 %v12273_v63, %v13383_v4 }
 0x840   : > { %v12316_v39 = vpack.c.bf16 %v5834_v57, %v5834_v57  ;;  %v6799_v49 = vsel %vm6112_vm10, %v6738_v22, %v6798_v55  ;;  %v5521_v23 = vadd.f32 %v12245_v53, %v5397_v9  ;;  %v5399_v56 = vadd.f32 %v5352_v17, %v13384_v41  ;;  %v12361_v22 = vpop.f32.mrf.mxu1 }
 0x841   : > { %v5716_v59 = vpop.f32.mrf.mxu2  ;;  %v6800_v58 = vsel %vm6114_vm11, %v6739_v61, %v6799_v49  ;;  %v5865_v52 = vpack.c.bf16 %v5833_v11, %v5833_v11  ;;  %v5522_v17 = vadd.f32 %v12287_v42, %v5398_v13 }
 0x842   : > { %v5898_v29 = vunpack.c.l.bf16 %v12316_v39  ;;  %v5768_v44 = vadd.f32 %v5716_v59, %v5644_v28  ;;  %v6801_v16 = vsel %vm6116_vm12, %v6740_v48, %v6800_v58  ;;  %v5645_v46 = vadd.f32 %v12269_v8, %v5521_v23 }
 0x843   : > { %v6802_v32 = vsel %vm6118_vm13, %v6741_v37, %v6801_v16  ;;  %v5897_v0 = vunpack.c.l.bf16 %v5865_v52  ;;  %v5523_v61 = vadd.f32 %v5476_v12, %v5399_v56  ;;  %v5646_v48 = vadd.f32 %v12303_v34, %v5522_v17  ;;  %v12382_v16 = vpop.f32.mrf.mxu0 }
 0x844   : > { %v5920_v19 = vmax.f32 %v5896_v31, %v5898_v29  ;;  %v5803_v40 = vadd.f32 %v12334_v6, %v5768_v44  ;;  %v6803_v38 = vsel %vm6120_vm14, %v6742_v43, %v6802_v32  ;;  %v12364_v28 = vpop.f32.mrf.mxu3 }
 0x845   : > { %v6835_v36 = vrot.slane %v6803_v38, 7 }
 0x846   : > { %v12343_v10 = vmax.f32 %v5920_v19, %v5894_v1  ;;  %v5835_v47 = vmax.f32 %v5803_v40, 0.0 }
 0x847   : > { %v12355_v1 = vsel %vm495_vm0, 0.0, %v6835_v36  ;;  %v6859_v57 = vsel %vm495_vm0, %v6835_v36, 0.0 }
 0x848   : > { %v5982_v24 = vrot.slane %v12343_v10, 2  ;;  %v5983_v50 = vrot.slane %v12343_v10, 4  ;;  %v12352_v3 = vpack.c.bf16 %v5835_v47, %v5835_v47  ;;  %v5984_v51 = vrot.slane %v12343_v10, 6 }
 0x849   : > { %v5719_v21 = vpop.f32.mrf.mxu2  ;;  %v6082_v63 = vperm.slane %v12343_v10, 1  ;;  %v6892_v59 = vrot.slane %v12355_v1, 1  ;;  %v8728_v49 = vrot.slane %v12343_v10, 9  ;;  %v6893_v44 = vrot.slane %v6859_v57, 1 }
 0x84a   : > { %v6083_v53 = vperm.slane %v5982_v24, 1  ;;  %v6084_v54 = vperm.slane %v5983_v50, 1  ;;  %v5899_v8 = vunpack.c.l.bf16 %v12352_v3  ;;  %v5769_v31 = vadd.f32 %v5719_v21, %v5645_v46 }
 0x84b   : > { %v6085_v37 = vperm.slane %v5984_v51, 1  ;;  %v7021_v20 = vrot.slane %v12355_v1, 2  ;;  %v7022_v9 = vrot.slane %v6859_v57, 2  ;;  %v12378_v43 = vsel %vm678_vm2, %v6892_v59, %v6893_v44 }
 0x84c   : > { %v6140_v55 = vsel %vm6110_vm9, %v6083_v53, %v6082_v63  ;;  %v5921_v42 = vmax.f32 %v5897_v0, %v5899_v8  ;;  %v5804_v58 = vadd.f32 %v12334_v6, %v5769_v31  ;;  %v7101_v34 = vpack.c.bf16 %v12355_v1, %v12253_v35  ;;  %v13385_v63 = vld [vmem:[#allocation31_spill] sm:$0xff]  ;;  %v12398_v0 = vpop.f32.mrf.mxu1  ;;  %v12402_v59 = vpop.f32.mrf.mxu3 }
 0x84d   : > { %v6141_v12 = vsel %vm6112_vm10, %v6084_v54, %v6140_v55  ;;  %v8729_v19 = vrot.slane %v5982_v24, 9  ;;  %v8730_v40 = vrot.slane %v5983_v50, 9  ;;  %v7166_v32 = vpack.c.bf16 %v12378_v43, %v12284_v45 }
 0x84e   : > { %v5935_v11 = vmax.f32 %v5921_v42, %v5895_v25  ;;  %v12387_v38 = vsel %vm1091_vm5, %v7021_v20, %v7022_v9  ;;  %v8731_v47 = vrot.slane %v5984_v51, 9  ;;  %v6142_v13 = vsel %vm6114_vm11, %v6085_v37, %v6141_v12 }
 0x84f   : > { %v5836_v23 = vmax.f32 %v5804_v58, 0.0  ;;  %8797 = vmatmul.msk.bf16.gmra.mxu0 %vm6922_vm4, %v7166_v32  ;;  %v7229_v52 = vpack.c.bf16 %v12387_v38, %v12300_v15  ;;  %v5400_v53 = vadd.f32 %v12322_v30, %v13385_v63  ;;  %v5647_v57 = vadd.f32 %v12319_v26, %v5523_v61 }
 0x850   : > { %v5985_v36 = vrot.slane %v5935_v11, 2  ;;  %v5986_v7 = vrot.slane %v5935_v11, 4  ;;  %v6086_v25 = vperm.slane %v5935_v11, 1  ;;  %v5987_v41 = vrot.slane %v5935_v11, 6 }
 0x851   : > { %v5721_v4 = vpop.f32.mrf.mxu2  ;;  %v8732_v21 = vrot.slane %v5935_v11, 9  ;;  %8805 = vmatmul.msk.bf16.gmra.mxu1 %vm6922_vm4, %v7229_v52  ;;  %v6404_v54 = vmax.f32 %v12343_v10, %v8728_v49  ;;  %v6405_v42 = vmax.f32 %v5982_v24, %v8729_v19  ;;  %v6406_v44 = vmax.f32 %v5983_v50, %v8730_v40  ;;  %v12407_v24 = vpop.f32.mrf.mxu0 }
 0x852   : > { %v6087_v56 = vperm.slane %v5985_v36, 1  ;;  %v6088_v46 = vperm.slane %v5986_v7, 1  ;;  %v6143_v45 = vsel %vm6116_vm12, %v6086_v25, %v6142_v13  ;;  %v5770_v17 = vadd.f32 %v5721_v4, %v5646_v48 }
 0x853   : > { %v8733_v55 = vrot.slane %v5985_v36, 9  ;;  %v8734_v31 = vrot.slane %v5986_v7, 9  ;;  %v8735_v30 = vrot.slane %v5987_v41, 9  ;;  %v6408_v58 = vmax.f32 %v5935_v11, %v8732_v21 }
 0x854   : > { %v6144_v15 = vsel %vm6118_vm13, %v6087_v56, %v6143_v45  ;;  %v5868_v26 = vpack.c.bf16 %v5836_v23, %v5836_v23  ;;  %v6407_v48 = vmax.f32 %v5984_v51, %v8731_v47  ;;  %v5805_v20 = vadd.f32 %v12334_v6, %v5770_v17 }
 0x855   : > { %v6145_v37 = vsel %vm6120_vm14, %v6088_v46, %v6144_v15  ;;  %v6409_v32 = vmax.f32 %v5985_v36, %v8733_v55  ;;  %v6410_v25 = vmax.f32 %v5986_v7, %v8734_v31  ;;  %v6411_v19 = vmax.f32 %v5987_v41, %v8735_v30  ;;  %v5607_v41 = vpop.f32.mrf.mxu1  ;;  %v5362_v31 = vpop.f32.mrf.mxu3 }
 0x856   : > { %v6176_v61 = vsel %vm495_vm0, -inf, %v6145_v37 }
 0x857   : > { %v6456_v9 = vrot.slane %v6176_v61, 2  ;;  %v6457_v10 = vrot.slane %v6176_v61, 4  ;;  %v6458_v49 = vrot.slane %v6176_v61, 6  ;;  %v6484_v4 = vrot.slane %v6176_v61, 1 }
 0x858   : > { %v6596_v13 = vmax.f32 %v6404_v54, %v6176_v61  ;;  %v5524_v54 = vadd.f32 %v12339_v62, %v5400_v53  ;;  %v5837_v61 = vmax.f32 %v5805_v20, 0.0 }
 0x859   : > { %v5724_v12 = vpop.f32.mrf.mxu2  ;;  %v6485_v40 = vrot.slane %v6456_v9, 1  ;;  %v6486_v11 = vrot.slane %v6457_v10, 1  ;;  %v6487_v23 = vrot.slane %v6458_v49, 1  ;;  %v6597_v52 = vmax.f32 %v6405_v42, %v6484_v4 }
 0x85a   : > { %v5771_v50 = vadd.f32 %v5724_v12, %v5647_v57  ;;  %v6598_v56 = vmax.f32 %v6406_v44, %v6456_v9  ;;  %v6600_v51 = vmax.f32 %v6408_v58, %v6457_v10  ;;  %v6602_v21 = vmax.f32 %v6410_v25, %v6458_v49  ;;  %v13386_v25 = vld [vmem:[#allocation15_spill] sm:$0xff] }
 0x85b   : > { %v6599_v46 = vmax.f32 %v6407_v48, %v6485_v40  ;;  %v6601_v45 = vmax.f32 %v6409_v32, %v6486_v11  ;;  %v6603_v63 = vmax.f32 %v6411_v19, %v6487_v23  ;;  %v6743_v36 = vperm.slane %v6596_v13, 0  ;;  %v5486_v13 = vpop.f32.mrf.mxu0 }
 0x85c   : > { %v5806_v47 = vadd.f32 %v12334_v6, %v5771_v50  ;;  %v6744_v7 = vperm.slane %v6597_v52, 0  ;;  %v6745_v17 = vperm.slane %v6598_v56, 0  ;;  %v5648_v42 = vadd.f32 %v12361_v22, %v5524_v54  ;;  %v13387_v56 = vld [vmem:[#allocation13_spill] sm:$0xff] }
 0x85d   : > { %v6746_v57 = vperm.slane %v6599_v46, 0  ;;  %v6747_v37 = vperm.slane %v6600_v51, 0  ;;  %v5900_v58 = vunpack.c.l.bf16 %v5868_v26  ;;  %v6748_v9 = vperm.slane %v6601_v45, 0  ;;  %v13388_v45 = vld [vmem:[#allocation36_spill] sm:$0xff]  ;;  %v5364_v39 = vpop.f32.mrf.mxu3 }
 0x85e   : > { %v5838_v15 = vmax.f32 %v5806_v47, 0.0  ;;  %v6804_v55 = vsel %vm6775_vm15, %v6744_v7, %v6743_v36  ;;  %v6749_v49 = vperm.slane %v6602_v21, 0  ;;  %v6750_v32 = vperm.slane %v6603_v63, 0  ;;  %v5610_v63 = vpop.f32.mrf.mxu1 }
 0x85f   : > { %v6805_v30 = vsel %vm6110_vm9, %v6745_v17, %v6804_v55  ;;  %v5401_v4 = vadd.f32 %v12364_v28, %v13386_v25  ;;  %v5869_v40 = vpack.c.bf16 %v5837_v61, %v5837_v61  ;;  %v5402_v51 = vadd.f32 %v12402_v59, %v13387_v56 }
 0x860   : > { %v12413_v44 = vpack.c.bf16 %v5838_v15, %v5838_v15  ;;  %v6806_v10 = vsel %vm6112_vm10, %v6746_v57, %v6805_v30  ;;  %v5403_v21 = vadd.f32 %v5362_v31, %v13388_v45 }
 0x861   : > { %v5726_v48 = vpop.f32.mrf.mxu2  ;;  %v6807_v12 = vsel %vm6114_vm11, %v6747_v37, %v6806_v10  ;;  %v5525_v28 = vadd.f32 %v12382_v16, %v5401_v4  ;;  %v5901_v54 = vunpack.c.l.bf16 %v5869_v40  ;;  %v8943_v10 = vld [vmem:[%s13001_s7] sm:$0xff] }
 0x862   : > { %v5902_v62 = vunpack.c.l.bf16 %v12413_v44  ;;  %v5772_v53 = vadd.f32 %v5726_v48, %v5648_v42  ;;  %v6808_v22 = vsel %vm6116_vm12, %v6748_v9, %v6807_v12  ;;  %v5526_v42 = vadd.f32 %v12407_v24, %v5402_v51  ;;  %6989 = vmatpush.bf16.msrb.mxu3 %v8943_v10 }
 0x863   : > { %v6809_v50 = vsel %vm6118_vm13, %v6749_v49, %v6808_v22  ;;  %v5527_v48 = vadd.f32 %v5486_v13, %v5403_v21 }
 0x864   : > { %v5922_v26 = vmax.f32 %v5900_v58, %v5902_v62  ;;  %v5807_v20 = vadd.f32 %v12334_v6, %v5772_v53  ;;  %v6810_v19 = vsel %vm6120_vm14, %v6750_v32, %v6809_v50  ;;  %v12458_v53 = vpop.f32.mrf.mxu0  ;;  %v5650_v24 = vadd.f32 %v5607_v41, %v5526_v42 }
 0x865   : > { %v6836_v52 = vrot.slane %v6810_v19, 7 }
 0x866   : > { %v5936_v11 = vmax.f32 %v5922_v26, %v5898_v29  ;;  %v5839_v23 = vmax.f32 %v5807_v20, 0.0  ;;  %v5649_v29 = vadd.f32 %v12398_v0, %v5525_v28  ;;  %v13389_v0 = vld [vmem:[#allocation35_spill] sm:$0xff]  ;;  %v5612_v45 = vpop.f32.mrf.mxu1 }
 0x867   : > { %v12438_v17 = vsel %vm495_vm0, 0.0, %v6836_v52  ;;  %v6860_v31 = vsel %vm495_vm0, %v6836_v52, 0.0  ;;  %v12451_v61 = vadd.f32 %v5364_v39, %v13389_v0 }
 0x868   : > { %v5988_v47 = vrot.slane %v5936_v11, 2  ;;  %v12432_v46 = vrot.slane %v5936_v11, 4  ;;  %v12435_v36 = vpack.c.bf16 %v5839_v23, %v5839_v23  ;;  %v6089_v15 = vperm.slane %v5936_v11, 1 }
 0x869   : > { %v5729_v7 = vpop.f32.mrf.mxu2  ;;  %v5990_v57 = vrot.slane %v5936_v11, 6  ;;  %v12448_v58 = vpack.c.bf16 %v12438_v17, %v12355_v1  ;;  %v8736_v49 = vrot.slane %v5936_v11, 9  ;;  %v6895_v12 = vrot.slane %v12438_v17, 1 }
 0x86a   : > { %v6090_v59 = vperm.slane %v5988_v47, 1  ;;  %v6091_v16 = vperm.slane %v12432_v46, 1  ;;  %v5903_v55 = vunpack.c.l.bf16 %v12435_v36  ;;  %v5773_v30 = vadd.f32 %v5729_v7, %v5649_v29 }
 0x86b   : > { %8813 = vmatmul.msk.bf16.gmra.mxu2 %vm6922_vm4, %v12448_v58  ;;  %v6896_v32 = vrot.slane %v6860_v31, 1  ;;  %v6092_v22 = vperm.slane %v5990_v57, 1  ;;  %v8737_v26 = vrot.slane %v5988_v47, 9  ;;  %v8738_v20 = vrot.slane %v12432_v46, 9 }
 0x86c   : > { %v6146_v37 = vsel %vm6110_vm9, %v6090_v59, %v6089_v15  ;;  %v5923_v9 = vmax.f32 %v5901_v54, %v5903_v55  ;;  %v5808_v13 = vadd.f32 %v12334_v6, %v5773_v30  ;;  %v7024_v50 = vrot.slane %v12438_v17, 2  ;;  %v12478_v54 = vpop.f32.mrf.mxu3 }
 0x86d   : > { %v6147_v25 = vsel %vm6112_vm10, %v6091_v16, %v6146_v37  ;;  %v12469_v41 = vsel %vm678_vm2, %v6895_v12, %v6896_v32  ;;  %v7025_v56 = vrot.slane %v6860_v31, 2  ;;  %v8739_v51 = vrot.slane %v5990_v57, 9 }
 0x86e   : > { %v5937_v4 = vmax.f32 %v5923_v9, %v5899_v8  ;;  %v6148_v3 = vsel %vm6114_vm11, %v6092_v22, %v6147_v25  ;;  %v12475_v8 = vpack.c.bf16 %v12469_v41, %v12378_v43  ;;  %v5840_v29 = vmax.f32 %v5808_v13, 0.0 }
 0x86f   : > { %v5651_v15 = vadd.f32 %v5610_v63, %v5527_v48  ;;  %v6412_v59 = vmax.f32 %v5936_v11, %v8736_v49  ;;  %v6413_v16 = vmax.f32 %v5988_v47, %v8737_v26  ;;  %v12484_v30 = vsel %vm1091_vm5, %v7024_v50, %v7025_v56  ;;  %v5491_v49 = vpop.f32.mrf.mxu0 }
 0x870   : > { %v5991_v19 = vrot.slane %v5937_v4, 2  ;;  %v5992_v40 = vrot.slane %v5937_v4, 4  ;;  %v6093_v23 = vperm.slane %v5937_v4, 1  ;;  %v5993_v28 = vrot.slane %v5937_v4, 6  ;;  %8766 = vmatmul.msk.bf16.gmra.mxu3 %vm6922_vm4, %v12475_v8 }
 0x871   : > { %v5731_v52 = vpop.f32.mrf.mxu2  ;;  %v8740_v31 = vrot.slane %v5937_v4, 9  ;;  %v6414_v0 = vmax.f32 %v12432_v46, %v8738_v20  ;;  %v6415_v9 = vmax.f32 %v5990_v57, %v8739_v51  ;;  %v5872_v63 = vpack.c.bf16 %v5840_v29, %v5840_v29 }
 0x872   : > { %v6094_v21 = vperm.slane %v5991_v19, 1  ;;  %v6095_v7 = vperm.slane %v5992_v40, 1  ;;  %v6149_v39 = vsel %vm6116_vm12, %v6093_v23, %v6148_v3  ;;  %v8741_v43 = vrot.slane %v5991_v19, 9 }
 0x873   : > { %v8742_v37 = vrot.slane %v5992_v40, 9  ;;  %v8743_v12 = vrot.slane %v5993_v28, 9  ;;  %v5774_v11 = vadd.f32 %v5731_v52, %v5650_v24  ;;  %v12491_v48 = vpack.c.bf16 %v12484_v30, %v12387_v38 }
 0x874   : > { %v6150_v42 = vsel %vm6118_vm13, %v6094_v21, %v6149_v39  ;;  %v6416_v32 = vmax.f32 %v5937_v4, %v8740_v31  ;;  %v6417_v50 = vmax.f32 %v5991_v19, %v8741_v43  ;;  %v5615_v31 = vpop.f32.mrf.mxu1  ;;  %v5369_v43 = vpop.f32.mrf.mxu3 }
 0x875   : > { %v6151_v10 = vsel %vm6120_vm14, %v6095_v7, %v6150_v42  ;;  %v6418_v46 = vmax.f32 %v5992_v40, %v8742_v37  ;;  %v6419_v56 = vmax.f32 %v5993_v28, %v8743_v12  ;;  %v5528_v28 = vadd.f32 %v12458_v53, %v12451_v61 }
 0x876   : > { %v6177_v47 = vsel %vm495_vm0, -inf, %v6151_v10 }
 0x877   : > { %v6459_v22 = vrot.slane %v6177_v47, 2  ;;  %v6460_v25 = vrot.slane %v6177_v47, 4  ;;  %v6461_v13 = vrot.slane %v6177_v47, 6  ;;  %v6488_v57 = vrot.slane %v6177_v47, 1 }
 0x878   : > { %v6604_v20 = vmax.f32 %v6412_v59, %v6177_v47 }
 0x879   : > { %v5734_v26 = vpop.f32.mrf.mxu2  ;;  %v6489_v51 = vrot.slane %v6459_v22, 1  ;;  %v6490_v24 = vrot.slane %v6460_v25, 1  ;;  %v6491_v52 = vrot.slane %v6461_v13, 1  ;;  %v6605_v3 = vmax.f32 %v6413_v16, %v6488_v57 }
 0x87a   : > { %v5775_v23 = vadd.f32 %v5734_v26, %v5651_v15  ;;  %v6606_v21 = vmax.f32 %v6414_v0, %v6459_v22  ;;  %v6608_v7 = vmax.f32 %v6416_v32, %v6460_v25  ;;  %v6610_v29 = vmax.f32 %v6418_v46, %v6461_v13  ;;  %v5493_v26 = vpop.f32.mrf.mxu0  ;;  %v13390_v46 = vld [vmem:[#allocation17_spill] sm:$0xff] }
 0x87b   : > { %v6607_v39 = vmax.f32 %v6415_v9, %v6489_v51  ;;  %v6609_v4 = vmax.f32 %v6417_v50, %v6490_v24  ;;  %v6611_v42 = vmax.f32 %v6419_v56, %v6491_v52  ;;  %v6751_v10 = vperm.slane %v6604_v20, 0 }
 0x87c   : > { %v5810_v38 = vadd.f32 %v12334_v6, %v5775_v23  ;;  %v6752_v19 = vperm.slane %v6605_v3, 0  ;;  %v6753_v40 = vperm.slane %v6606_v21, 0  ;;  %v5809_v16 = vadd.f32 %v12334_v6, %v5774_v11 }
 0x87d   : > { %v6754_v59 = vperm.slane %v6607_v39, 0  ;;  %v5652_v0 = vadd.f32 %v5612_v45, %v5528_v28  ;;  %v6755_v9 = vperm.slane %v6608_v7, 0  ;;  %v5904_v32 = vunpack.c.l.bf16 %v5872_v63  ;;  %v5617_v7 = vpop.f32.mrf.mxu1  ;;  %v13391_v39 = vld [vmem:[#allocation14_spill] sm:$0xff] }
 0x87e   : > { %v5842_v15 = vmax.f32 %v5810_v38, 0.0  ;;  %v6811_v37 = vsel %vm6775_vm15, %v6752_v19, %v6751_v10  ;;  %v6756_v25 = vperm.slane %v6609_v4, 0  ;;  %v6757_v50 = vperm.slane %v6610_v29, 0  ;;  %v5372_v29 = vpop.f32.mrf.mxu3  ;;  %v13392_v19 = vld [vmem:[#allocation21_spill] sm:$0xff] }
 0x87f   : > { %v6812_v47 = vsel %vm6110_vm9, %v6753_v40, %v6811_v37  ;;  %v5405_v45 = vadd.f32 %v12478_v54, %v13390_v46  ;;  %v5841_v57 = vmax.f32 %v5809_v16, 0.0  ;;  %v6758_v20 = vperm.slane %v6611_v42, 0 }
 0x880   : > { %v12498_v12 = vpack.c.bf16 %v5842_v15, %v5842_v15  ;;  %v6813_v13 = vsel %vm6112_vm10, %v6754_v59, %v6812_v47  ;;  %v5406_v4 = vadd.f32 %v5369_v43, %v13391_v39  ;;  %v5407_v40 = vadd.f32 %v5372_v29, %v13392_v19 }
 0x881   : > { %v5736_v22 = vpop.f32.mrf.mxu2  ;;  %v6814_v11 = vsel %vm6114_vm11, %v6755_v9, %v6813_v13  ;;  %v5529_v54 = vadd.f32 %v5491_v49, %v5405_v45  ;;  %v5873_v38 = vpack.c.bf16 %v5841_v57, %v5841_v57 }
 0x882   : > { %v5906_v61 = vunpack.c.l.bf16 %v12498_v12  ;;  %v5776_v53 = vadd.f32 %v5736_v22, %v5652_v0  ;;  %v6815_v23 = vsel %vm6116_vm12, %v6756_v25, %v6814_v11  ;;  %v5496_v59 = vpop.f32.mrf.mxu0  ;;  %v5530_v13 = vadd.f32 %v5493_v26, %v5406_v4 }
 0x883   : > { %v6816_v51 = vsel %vm6118_vm13, %v6757_v50, %v6815_v23  ;;  %v5653_v28 = vadd.f32 %v5615_v31, %v5529_v54  ;;  %v5905_v0 = vunpack.c.l.bf16 %v5873_v38  ;;  %v5531_v25 = vadd.f32 %v5496_v59, %v5407_v40 }
 0x884   : > { %v5924_v63 = vmax.f32 %v5904_v32, %v5906_v61  ;;  %v5811_v56 = vadd.f32 %v12334_v6, %v5776_v53  ;;  %v6817_v24 = vsel %vm6120_vm14, %v6758_v20, %v6816_v51 }
 0x885   : > { %v6837_v21 = vrot.slane %v6817_v24, 7 }
 0x886   : > { %v12514_v52 = vmax.f32 %v5924_v63, %v5902_v62  ;;  %v5843_v3 = vmax.f32 %v5811_v56, 0.0 }
 0x887   : > { %v12523_v62 = vsel %vm495_vm0, 0.0, %v6837_v21  ;;  %v6861_v43 = vsel %vm495_vm0, %v6837_v21, 0.0  ;;  %v5620_v21 = vpop.f32.mrf.mxu1 }
 0x888   : > { %v5994_v42 = vrot.slane %v12514_v52, 2  ;;  %v5995_v10 = vrot.slane %v12514_v52, 4  ;;  %v12520_v15 = vpack.c.bf16 %v5843_v3, %v5843_v3  ;;  %v6096_v49 = vperm.slane %v12514_v52, 1 }
 0x889   : > { %v5739_v44 = vpop.f32.mrf.mxu2  ;;  %v5996_v47 = vrot.slane %v12514_v52, 6  ;;  %v6898_v22 = vrot.slane %v12523_v62, 1  ;;  %v6899_v50 = vrot.slane %v6861_v43, 1  ;;  %v8744_v46 = vrot.slane %v12514_v52, 9 }
 0x88a   : > { %v6097_v16 = vperm.slane %v5994_v42, 1  ;;  %v6098_v37 = vperm.slane %v5995_v10, 1  ;;  %v5907_v9 = vunpack.c.l.bf16 %v12520_v15  ;;  %v5777_v32 = vadd.f32 %v5739_v44, %v5653_v28  ;;  %v5374_v28 = vpop.f32.mrf.mxu3 }
 0x88b   : > { %v7027_v45 = vrot.slane %v12523_v62, 2  ;;  %v7028_v57 = vrot.slane %v6861_v43, 2  ;;  %v12540_v63 = vsel %vm678_vm2, %v6898_v22, %v6899_v50  ;;  %v7102_v26 = vpack.c.bf16 %v12523_v62, %v12438_v17 }
 0x88c   : > { %v6152_v31 = vsel %vm6110_vm9, %v6097_v16, %v6096_v49  ;;  %v5925_v53 = vmax.f32 %v5905_v0, %v5907_v9  ;;  %v5812_v23 = vadd.f32 %v12334_v6, %v5777_v32  ;;  %v6099_v56 = vperm.slane %v5996_v47, 1  ;;  %v13393_v16 = vld [vmem:[#allocation18_spill] sm:$0xff] }
 0x88d   : > { %v6153_v11 = vsel %vm6112_vm10, %v6098_v37, %v6152_v31  ;;  %v8745_v51 = vrot.slane %v5994_v42, 9  ;;  %v7167_v24 = vpack.c.bf16 %v12540_v63, %v12469_v41  ;;  %v12547_v3 = vsel %vm1091_vm5, %v7027_v45, %v7028_v57 }
 0x88e   : > { %v5939_v20 = vmax.f32 %v5925_v53, %v5903_v55  ;;  %v8746_v54 = vrot.slane %v5995_v10, 9  ;;  %v8747_v4 = vrot.slane %v5996_v47, 9  ;;  %v6154_v29 = vsel %vm6114_vm11, %v6099_v56, %v6153_v11 }
 0x88f   : > { %8798 = vmatmul.msk.bf16.gmra.mxu0 %vm6922_vm4, %v7167_v24  ;;  %v7230_v19 = vpack.c.bf16 %v12547_v3, %v12484_v30  ;;  %v5844_v49 = vmax.f32 %v5812_v23, 0.0  ;;  %v5408_v37 = vadd.f32 %v5374_v28, %v13393_v16  ;;  %v5654_v43 = vadd.f32 %v5617_v7, %v5530_v13 }
 0x890   : > { %v5997_v36 = vrot.slane %v5939_v20, 2  ;;  %v5998_v55 = vrot.slane %v5939_v20, 4  ;;  %v6100_v38 = vperm.slane %v5939_v20, 1  ;;  %v5999_v40 = vrot.slane %v5939_v20, 6 }
 0x891   : > { %v5741_v39 = vpop.f32.mrf.mxu2  ;;  %v5655_v0 = vadd.f32 %v5620_v21, %v5531_v25  ;;  %v8748_v31 = vrot.slane %v5939_v20, 9  ;;  %8806 = vmatmul.msk.bf16.gmra.mxu1 %vm6922_vm4, %v7230_v19  ;;  %v6420_v32 = vmax.f32 %v12514_v52, %v8744_v46  ;;  %v6421_v50 = vmax.f32 %v5994_v42, %v8745_v51 }
 0x892   : > { %v6101_v41 = vperm.slane %v5997_v36, 1  ;;  %v6102_v44 = vperm.slane %v5998_v55, 1  ;;  %v6155_v59 = vsel %vm6116_vm12, %v6100_v38, %v6154_v29  ;;  %v8749_v53 = vrot.slane %v5997_v36, 9 }
 0x893   : > { %v8750_v30 = vrot.slane %v5998_v55, 9  ;;  %v6422_v11 = vmax.f32 %v5995_v10, %v8746_v54  ;;  %v8751_v57 = vrot.slane %v5999_v40, 9  ;;  %v5876_v56 = vpack.c.bf16 %v5844_v49, %v5844_v49  ;;  %v5498_v54 = vpop.f32.mrf.mxu0 }
 0x894   : > { %v6156_v22 = vsel %vm6118_vm13, %v6101_v41, %v6155_v59  ;;  %v5778_v23 = vadd.f32 %v5741_v39, %v5654_v43  ;;  %v6423_v7 = vmax.f32 %v5996_v47, %v8747_v4  ;;  %v6424_v25 = vmax.f32 %v5939_v20, %v8748_v31  ;;  %v5622_v43 = vpop.f32.mrf.mxu1 }
 0x895   : > { %v6157_v45 = vsel %vm6120_vm14, %v6102_v44, %v6156_v22  ;;  %v6425_v52 = vmax.f32 %v5997_v36, %v8749_v53  ;;  %v6426_v46 = vmax.f32 %v5998_v55, %v8750_v30  ;;  %v6427_v42 = vmax.f32 %v5999_v40, %v8751_v57 }
 0x896   : > { %v6178_v24 = vsel %vm495_vm0, -inf, %v6157_v45  ;;  %v5813_v53 = vadd.f32 %v12334_v6, %v5778_v23  ;;  %v8945_v23 = vld [vmem:[%s13001_s7 + $0x10] sm:$0xff] }
 0x897   : > { %v6462_v13 = vrot.slane %v6178_v24, 2  ;;  %v6463_v21 = vrot.slane %v6178_v24, 4  ;;  %v6464_v38 = vrot.slane %v6178_v24, 6  ;;  %v6492_v19 = vrot.slane %v6178_v24, 1  ;;  %7070 = vmatpush.bf16.msra.mxu3 %v8945_v23 }
 0x898   : > { %v6612_v28 = vmax.f32 %v6420_v32, %v6178_v24  ;;  %v5532_v32 = vadd.f32 %v5498_v54, %v5408_v37  ;;  %v5908_v24 = vunpack.c.l.bf16 %v5876_v56 }
 0x899   : > { %v5744_v29 = vpop.f32.mrf.mxu2  ;;  %v6493_v10 = vrot.slane %v6462_v13, 1  ;;  %v6494_v51 = vrot.slane %v6463_v21, 1  ;;  %v6495_v44 = vrot.slane %v6464_v38, 1  ;;  %v6613_v59 = vmax.f32 %v6421_v50, %v6492_v19 }
 0x89a   : > { %v5779_v41 = vadd.f32 %v5744_v29, %v5655_v0  ;;  %v6614_v39 = vmax.f32 %v6422_v11, %v6462_v13  ;;  %v6616_v49 = vmax.f32 %v6424_v25, %v6463_v21  ;;  %v6618_v16 = vmax.f32 %v6426_v46, %v6464_v38 }
 0x89b   : > { %v6615_v20 = vmax.f32 %v6423_v7, %v6493_v10  ;;  %v6617_v4 = vmax.f32 %v6425_v52, %v6494_v51  ;;  %v6619_v31 = vmax.f32 %v6427_v42, %v6495_v44  ;;  %v6759_v36 = vperm.slane %v6612_v28, 0 }
 0x89c   : > { %v5814_v47 = vadd.f32 %v12334_v6, %v5779_v41  ;;  %v6760_v55 = vperm.slane %v6613_v59, 0  ;;  %v6761_v22 = vperm.slane %v6614_v39, 0  ;;  %v5656_v50 = vadd.f32 %v5622_v43, %v5532_v32 }
 0x89d   : > { %v6762_v40 = vperm.slane %v6615_v20, 0  ;;  %v6763_v45 = vperm.slane %v6616_v49, 0  ;;  %v6764_v25 = vperm.slane %v6617_v4, 0  ;;  %v6765_v29 = vperm.slane %v6618_v16, 0 }
 0x89e   : > { %v5846_v0 = vmax.f32 %v5814_v47, 0.0  ;;  %v6818_v30 = vsel %vm6775_vm15, %v6760_v55, %v6759_v36  ;;  %v5845_v52 = vmax.f32 %v5813_v53, 0.0  ;;  %v6766_v46 = vperm.slane %v6619_v31, 0 }
 0x89f   : > { %v6819_v57 = vsel %vm6110_vm9, %v6761_v22, %v6818_v30 }
 0x8a0   : > { %v5878_v11 = vpack.c.bf16 %v5846_v0, %v5846_v0  ;;  %v6820_v13 = vsel %vm6112_vm10, %v6762_v40, %v6819_v57  ;;  %v5877_v44 = vpack.c.bf16 %v5845_v52, %v5845_v52 }
 0x8a1   : > { %v5746_v7 = vpop.f32.mrf.mxu2  ;;  %v6821_v37 = vsel %vm6114_vm11, %v6763_v45, %v6820_v13 }
 0x8a2   : > { %v5910_v21 = vunpack.c.l.bf16 %v5878_v11  ;;  %v5780_v38 = vadd.f32 %v5746_v7, %v5656_v50  ;;  %v6822_v19 = vsel %vm6116_vm12, %v6764_v25, %v6821_v37  ;;  %v5909_v16 = vunpack.c.l.bf16 %v5877_v44 }
 0x8a3   : > { %v6823_v41 = vsel %vm6118_vm13, %v6765_v29, %v6822_v19 }
 0x8a4   : > { %v5926_v28 = vmax.f32 %v5908_v24, %v5910_v21  ;;  %v5815_v56 = vadd.f32 %v12334_v6, %v5780_v38  ;;  %v6824_v42 = vsel %vm6120_vm14, %v6766_v46, %v6823_v41 }
 0x8a5   : > { %v6838_v54 = vrot.slane %v6824_v42, 7 }
 0x8a6   : > { %v5940_v10 = vmax.f32 %v5926_v28, %v5906_v61  ;;  %v5847_v51 = vmax.f32 %v5815_v56, 0.0 }
 0x8a7   : > { %v12576_v47 = vsel %vm495_vm0, 0.0, %v6838_v54  ;;  %v6862_v6 = vsel %vm495_vm0, %v6838_v54, 0.0 }
 0x8a8   : > { %v6000_v59 = vrot.slane %v5940_v10, 2  ;;  %v6001_v39 = vrot.slane %v5940_v10, 4  ;;  %v5879_v49 = vpack.c.bf16 %v5847_v51, %v5847_v51  ;;  %v6103_v20 = vperm.slane %v5940_v10, 1 }
 0x8a9   : > { %v6002_v36 = vrot.slane %v5940_v10, 6  ;;  %v12582_v61 = vpack.c.bf16 %v12576_v47, %v12523_v62  ;;  %v6901_v55 = vrot.slane %v12576_v47, 1  ;;  %v6902_v32 = vrot.slane %v6862_v6, 1 }
 0x8aa   : > { %v6104_v4 = vperm.slane %v6000_v59, 1  ;;  %v6105_v43 = vperm.slane %v6001_v39, 1  ;;  %v5911_v31 = vunpack.c.l.bf16 %v5879_v49  ;;  %v7030_v0 = vrot.slane %v12576_v47, 2 }
 0x8ab   : > { %8814 = vmatmul.msk.bf16.gmra.mxu2 %vm6922_vm4, %v12582_v61  ;;  %v7031_v40 = vrot.slane %v6862_v6, 2  ;;  %v8752_v30 = vrot.slane %v5940_v10, 9  ;;  %v12592_v11 = vsel %vm678_vm2, %v6901_v55, %v6902_v32  ;;  %v6106_v45 = vperm.slane %v6002_v36, 1 }
 0x8ac   : > { %v6158_v12 = vsel %vm6110_vm9, %v6104_v4, %v6103_v20  ;;  %v5927_v22 = vmax.f32 %v5909_v16, %v5911_v31  ;;  %v8753_v57 = vrot.slane %v6000_v59, 9  ;;  %v12596_v24 = vpack.c.bf16 %v12592_v11, %v12540_v63 }
 0x8ad   : > { %v6159_v53 = vsel %vm6112_vm10, %v6105_v43, %v6158_v12  ;;  %v12599_v7 = vsel %vm1091_vm5, %v7030_v0, %v7031_v40  ;;  %v8754_v25 = vrot.slane %v6001_v39, 9  ;;  %v8755_v29 = vrot.slane %v6002_v36, 9 }
 0x8ae   : > { %v5941_v50 = vmax.f32 %v5927_v22, %v5907_v9  ;;  %v6160_v15 = vsel %vm6114_vm11, %v6106_v45, %v6159_v53  ;;  %8767 = vmatmul.msk.bf16.gmra.mxu3 %vm6922_vm4, %v12596_v24  ;;  %v12606_v37 = vpack.c.bf16 %v12599_v7, %v12547_v3  ;;  %v6428_v42 = vmax.f32 %v5940_v10, %v8752_v30  ;;  %v8951_v10 = vld [vmem:[%s13001_s7 + $0x40] sm:$0xff] }
 0x8af   : > { %v6429_v51 = vmax.f32 %v6000_v59, %v8753_v57  ;;  %v6430_v44 = vmax.f32 %v6001_v39, %v8754_v25  ;;  %v6431_v3 = vmax.f32 %v6002_v36, %v8755_v29  ;;  %7398 = vmatpush.bf16.msra.mxu0 %v8951_v10 }
 0x8b0   : > { %v6003_v13 = vrot.slane %v5941_v50, 2  ;;  %v6004_v21 = vrot.slane %v5941_v50, 4  ;;  %v6107_v38 = vperm.slane %v5941_v50, 1  ;;  %v6005_v9 = vrot.slane %v5941_v50, 6 }
 0x8b1   : > { %v8756_v46 = vrot.slane %v5941_v50, 9 }
 0x8b2   : > { %v6108_v63 = vperm.slane %v6003_v13, 1  ;;  %v6109_v23 = vperm.slane %v6004_v21, 1  ;;  %v6161_v52 = vsel %vm6116_vm12, %v6107_v38, %v6160_v15  ;;  %v8757_v28 = vrot.slane %v6003_v13, 9 }
 0x8b3   : > { %v8758_v56 = vrot.slane %v6004_v21, 9  ;;  %v8759_v41 = vrot.slane %v6005_v9, 9  ;;  %v6432_v49 = vmax.f32 %v5941_v50, %v8756_v46 }
 0x8b4   : > { %v6162_v19 = vsel %vm6118_vm13, %v6108_v63, %v6161_v52  ;;  %v6433_v31 = vmax.f32 %v6003_v13, %v8757_v28 }
 0x8b5   : > { %v6163_v54 = vsel %vm6120_vm14, %v6109_v23, %v6162_v19  ;;  %v6434_v12 = vmax.f32 %v6004_v21, %v8758_v56  ;;  %v6435_v55 = vmax.f32 %v6005_v9, %v8759_v41  ;;  %v13394_v9 = vld [vmem:[#allocation2_spill] sm:$0xff] }
 0x8b6   : > { %v6179_v20 = vsel %vm495_vm0, -inf, %v6163_v54  ;;  %v6864_v63 = vpack.c.bf16 %v12032_v60, %v13394_v9 }
 0x8b7   : > { %v6465_v4 = vrot.slane %v6179_v20, 2  ;;  %v6466_v6 = vrot.slane %v6179_v20, 4  ;;  %v6467_v16 = vrot.slane %v6179_v20, 6  ;;  %v6496_v43 = vrot.slane %v6179_v20, 1 }
 0x8b8   : > { %v6620_v22 = vmax.f32 %v6428_v42, %v6179_v20 }
 0x8b9   : > { %v6497_v59 = vrot.slane %v6465_v4, 1  ;;  %v6498_v32 = vrot.slane %v6466_v6, 1  ;;  %v6499_v0 = vrot.slane %v6467_v16, 1  ;;  %v6621_v39 = vmax.f32 %v6429_v51, %v6496_v43 }
 0x8ba   : > { %v6622_v40 = vmax.f32 %v6430_v44, %v6465_v4  ;;  %v6624_v53 = vmax.f32 %v6432_v49, %v6466_v6  ;;  %v6626_v30 = vmax.f32 %v6434_v12, %v6467_v16  ;;  %v6767_v36 = vperm.slane %v6620_v22, 0 }
 0x8bb   : > { %v6623_v50 = vmax.f32 %v6431_v3, %v6497_v59  ;;  %v6625_v45 = vmax.f32 %v6433_v31, %v6498_v32  ;;  %v6627_v57 = vmax.f32 %v6435_v55, %v6499_v0  ;;  %v6768_v25 = vperm.slane %v6621_v39, 0 }
 0x8bc   : > { %v6769_v13 = vperm.slane %v6622_v40, 0  ;;  %v6771_v29 = vperm.slane %v6624_v53, 0  ;;  %v6773_v46 = vperm.slane %v6626_v30, 0 }
 0x8bd   : > { %v6770_v21 = vperm.slane %v6623_v50, 0  ;;  %v6825_v38 = vsel %vm6775_vm15, %v6768_v25, %v6767_v36  ;;  %v6772_v23 = vperm.slane %v6625_v45, 0  ;;  %v6774_v28 = vperm.slane %v6627_v57, 0 }
 0x8be   : > { %v6826_v15 = vsel %vm6110_vm9, %v6769_v13, %v6825_v38  ;;  %8772 = vmatmul.msk.bf16.vlgmr.msrb.gmra.mxu3 %vm6922_vm4, %v6864_v63  ;;  %v13398_v63 = vld [vmem:[#allocation19_spill] sm:$0xff] }
 0x8bf   : > { %v6827_v52 = vsel %vm6112_vm10, %v6770_v21, %v6826_v15 }
 0x8c0   : > { %v6828_v19 = vsel %vm6114_vm11, %v6771_v29, %v6827_v52 }
 0x8c1   : > { %v6829_v56 = vsel %vm6116_vm12, %v6772_v23, %v6828_v19 }
 0x8c2   : > { %v6830_v41 = vsel %vm6118_vm13, %v6773_v46, %v6829_v56 }
 0x8c3   : > { %v6831_v42 = vsel %vm6120_vm14, %v6774_v28, %v6830_v41 }
 0x8c4   : > { %v6839_v51 = vrot.slane %v6831_v42, 7 }
 0x8c6   : > { %v6855_v54 = vsel %vm495_vm0, 0.0, %v6839_v51  ;;  %v6863_v44 = vsel %vm495_vm0, %v6839_v51, 0.0 }
 0x8c7   : > { %v7287_v49 = vpack.c.bf16 %v13394_v9, %v6855_v54  ;;  %v7161_v20 = vrot.slane %v6855_v54, 1  ;;  %v7162_v3 = vrot.slane %v6863_v44, 1  ;;  %v7224_v4 = vrot.slane %v6855_v54, 2 }
 0x8c8   : > { %v7225_v6 = vrot.slane %v6863_v44, 2  ;;  %v7103_v16 = vpack.c.bf16 %v6855_v54, %v12576_v47  ;;  %v8946_v47 = vld [vmem:[%s13001_s7 + $0x18] sm:$0xff] }
 0x8c9   : > { %8815 = vmatmul.msk.bf16.gmra.mxu2 %vm6922_vm4, %v7287_v49  ;;  %v12631_v43 = vsel %vm678_vm2, %v7161_v20, %v7162_v3  ;;  %7129 = vmatpush.bf16.msrb.mxu3 %v8946_v47  ;;  %vm7757_vm2 = vcmask 1042432  }
 0x8ca   : > { %v7168_v31 = vpack.c.bf16 %v12631_v43, %v12592_v11  ;;  %v7226_v12 = vsel %vm1091_vm5, %v7224_v4, %v7225_v6  ;;  %v13395_v11 = vld [vmem:[#allocation3_spill] sm:$0xff]  ;;  %v7334_v23 = vpack.c.bf16 %v13398_v63, %v12631_v43 }
 0x8cb   : > { %v7231_v55 = vpack.c.bf16 %v7226_v12, %v12599_v7  ;;  %v13396_v7 = vrot.slane %v13395_v11, 2  ;;  %v7259_v11 = vpop.f32.mrf.mxu1 }
 0x8cc   : > { %8799 = vmatmul.msk.bf16.gmra.mxu0 %vm6922_vm4, %v7168_v31 }
 0x8cd   : > { %8807 = vmatmul.msk.bf16.gmra.mxu1 %vm6922_vm4, %v7231_v55 }
 0x8ce   : > { %8773 = vmatmul.msk.bf16.gmra.mxu3 %vm6922_vm4, %v12262_v18  ;;  %v13397_v18 = vrot.slane %v13394_v9, 2 }
 0x8d0   : > { %v7011_v22 = vsel %vm1091_vm5, %v13397_v18, %v13396_v7  ;;  %vm7758_vm5 = vcmask 1046532  }
 0x8d1   : > { %v7041_v10 = vpack.c.bf16 %v12200_v33, %v7011_v22  ;;  %v7381_v32 = vpack.c.bf16 %v7011_v22, %v7226_v12  ;;  %v8950_v33 = vld [vmem:[%s13001_s7 + $0x38] sm:$0xff]  ;;  %vm12773_vm7 = vmor %vm7757_vm2, %vm7758_vm5 }
 0x8dc   : > { %8828 = vmatmul.msk.bf16.vlgmr.msra.gmra.mxu0 %vm6922_vm4, %v12308_v27 }
 0x8de   : > { %8774 = vmatmul.msk.bf16.gmra.mxu3 %vm6922_vm4, %v12448_v58  ;;  %v6944_v58 = vpop.f32.mrf.mxu3 }
 0x8e6   : > { %v12661_v59 = vpop.f32.mrf.mxu3 }
 0x8ec   : > { %8829 = vmatmul.msk.bf16.gmra.mxu0 %vm6922_vm4, %v12491_v48 }
 0x8ee   : > { %8775 = vmatmul.msk.bf16.gmra.mxu3 %vm6922_vm4, %v12582_v61  ;;  %v6949_v61 = vpop.f32.mrf.mxu3 }
 0x8f6   : > { %v12666_v0 = vpop.f32.mrf.mxu3 }
 0x8fc   : > { %8830 = vmatmul.msk.bf16.gmra.mxu0 %vm6922_vm4, %v12606_v37 }
 0x8fe   : > { %8780 = vmatmul.msk.bf16.vlgmr.msra.gmra.mxu3 %vm6922_vm4, %v7041_v10  ;;  %v6954_v39 = vpop.f32.mrf.mxu3 }
 0x8ff   : > { %7351 = vmatpush.bf16.msra.mxu3 %v8950_v33 }
 0x906   : > { %v6956_v40 = vpop.f32.mrf.mxu3 }
 0x90c   : > { %8831 = vmatmul.msk.bf16.gmra.mxu0 %vm6922_vm4, %v7381_v32  ;;  %v7261_v32 = vpop.f32.mrf.mxu1 }
 0x90e   : > { %8781 = vmatmul.msk.bf16.gmra.mxu3 %vm6922_vm4, %v12308_v27 }
 0x91e   : > { %8782 = vmatmul.msk.bf16.gmra.mxu3 %vm6922_vm4, %v12491_v48 }
 0x92e   : > { %8783 = vmatmul.msk.bf16.gmra.mxu3 %vm6922_vm4, %v12606_v37 }
 0x931   : > { %v6959_v53 = vpop.f32.mrf.mxu3 }
 0x939   : > { %v6961_v30 = vpop.f32.mrf.mxu3 }
 0x93e   : > { %8788 = vmatmul.msk.bf16.vlgmr.msrb.gmra.mxu3 %vm6922_vm4, %v7100_v2 }
 0x941   : > { %v6991_v27 = vpop.f32.mrf.mxu3 }
 0x942   : > { %v6992_v1 = vadd.f32 %v6991_v27, %v6944_v58  ;;  %v7306_v58 = vpop.f32.mrf.mxu2 }
 0x949   : > { %v6993_v36 = vpop.f32.mrf.mxu3 }
 0x94a   : > { %v6994_v10 = vadd.f32 %v6993_v36, %v12661_v59  ;;  %v7308_v27 = vpop.f32.mrf.mxu2 }
 0x94e   : > { %8789 = vmatmul.msk.bf16.gmra.mxu3 %vm6922_vm4, %v7101_v34 }
 0x951   : > { %v6996_v48 = vpop.f32.mrf.mxu3 }
 0x952   : > { %v6997_v17 = vadd.f32 %v6996_v48, %v6949_v61  ;;  %v7311_v36 = vpop.f32.mrf.mxu2 }
 0x959   : > { %v12683_v50 = vpop.f32.mrf.mxu3 }
 0x95e   : > { %8790 = vmatmul.msk.bf16.gmra.mxu3 %vm6922_vm4, %v7102_v26 }
 0x961   : > { %v7001_v37 = vpop.f32.mrf.mxu3 }
 0x962   : > { %v7002_v38 = vadd.f32 %v7001_v37, %v6954_v39 }
 0x969   : > { %v7003_v45 = vpop.f32.mrf.mxu3 }
 0x96a   : > { %v12689_v60 = vadd.f32 %v7003_v45, %v6956_v40  ;;  %v7264_v45 = vpop.f32.mrf.mxu1 }
 0x96e   : > { %8791 = vmatmul.msk.bf16.gmra.mxu3 %vm6922_vm4, %v7103_v16 }
 0x971   : > { %v7006_v5 = vpop.f32.mrf.mxu3 }
 0x972   : > { %v7007_v2 = vadd.f32 %v7006_v5, %v6959_v53 }
 0x979   : > { %v7008_v57 = vpop.f32.mrf.mxu3 }
 0x97a   : > { %v7009_v35 = vadd.f32 %v7008_v57, %v6961_v30 }
 0x97e   : > { %8820 = vmatmul.msk.bf16.vlgmr.msra.gmra.mxu3 %vm6922_vm4, %v12292_v14  ;;  %v7196_v14 = vpop.f32.mrf.mxu0 }
 0x981   : > { %v7072_v34 = vpop.f32.mrf.mxu3 }
 0x982   : > { %v7092_v25 = vadd.f32 %v7072_v34, %v6992_v1  ;;  %v6999_v1 = vadd.f32 %v12683_v50, %v12666_v0  ;;  %v7313_v0 = vpop.f32.mrf.mxu2 }
 0x986   : > { %v7198_v46 = vpop.f32.mrf.mxu0 }
 0x989   : > { %v7074_v13 = vpop.f32.mrf.mxu3 }
 0x98a   : > { %v7093_v33 = vadd.f32 %v7074_v13, %v6994_v10 }
 0x98e   : > { %8821 = vmatmul.msk.bf16.gmra.mxu3 %vm6922_vm4, %v12475_v8  ;;  %v7201_v56 = vpop.f32.mrf.mxu0 }
 0x991   : > { %v7077_v62 = vpop.f32.mrf.mxu3 }
 0x992   : > { %v7094_v26 = vadd.f32 %v7077_v62, %v6997_v17 }
 0x996   : > { %v7203_v51 = vpop.f32.mrf.mxu0 }
 0x999   : > { %v7079_v21 = vpop.f32.mrf.mxu3 }
 0x99a   : > { %v7095_v62 = vadd.f32 %v7079_v21, %v6999_v1 }
 0x99e   : > { %8822 = vmatmul.msk.bf16.gmra.mxu3 %vm6922_vm4, %v12596_v24  ;;  %v7206_v44 = vpop.f32.mrf.mxu0 }
 0x9a1   : > { %v7082_v29 = vpop.f32.mrf.mxu3 }
 0x9a2   : > { %v7096_v15 = vadd.f32 %v7082_v29, %v7002_v38  ;;  %v7266_v38 = vpop.f32.mrf.mxu1 }
 0x9a6   : > { %v12703_v4 = vpop.f32.mrf.mxu0 }
 0x9a9   : > { %v12698_v9 = vpop.f32.mrf.mxu3 }
 0x9ae   : > { %8823 = vmatmul.msk.bf16.gmra.mxu3 %vm6922_vm4, %v7334_v23  ;;  %v12705_v16 = vpop.f32.mrf.mxu0 }
 0x9b1   : > { %v7087_v52 = vpop.f32.mrf.mxu3 }
 0x9b2   : > { %v7098_v8 = vadd.f32 %v7087_v52, %v7007_v2 }
 0x9b6   : > { %v12711_v47 = vpop.f32.mrf.mxu0 }
 0x9b9   : > { %v7089_v19 = vpop.f32.mrf.mxu3 }
 0x9ba   : > { %v7099_v28 = vadd.f32 %v7089_v19, %v7009_v35  ;;  %v12721_v35 = vld [vmem:[%s13002_s8] ss:$0 sm:$0xff] }
 0x9be   : > { %v7400_v22 = vpop.f32.mrf.mxu0 }
 0x9c1   : > { %v7131_v41 = vpop.f32.mrf.mxu3 }
 0x9c2   : > { %v7151_v42 = vadd.f32 %v7131_v41, %v7092_v25  ;;  %v7269_v41 = vpop.f32.mrf.mxu1 }
 0x9c4   : > { %v7216_v24 = vadd.f32 %v7196_v14, %v7151_v42 }
 0x9c6   : > { %v7279_v53 = vadd.f32 %v7259_v11, %v7216_v24  ;;  %v7402_v30 = vpop.f32.mrf.mxu0 }
 0x9c8   : > { %v7326_v37 = vadd.f32 %v7306_v58, %v7279_v53 }
 0x9c9   : > { %v7133_v54 = vpop.f32.mrf.mxu3 }
 0x9ca   : > { %v7152_v40 = vadd.f32 %v7133_v54, %v7093_v33 }
 0x9cc   : > { %v7217_v48 = vadd.f32 %v7198_v46, %v7152_v40  ;;  %v7097_v40 = vadd.f32 %v12698_v9, %v12689_v60 }
 0x9ce   : > { %v7280_v59 = vadd.f32 %v7261_v32, %v7217_v48  ;;  %v7405_v13 = vpop.f32.mrf.mxu0 }
 0x9d0   : > { %v7327_v25 = vadd.f32 %v7308_v27, %v7280_v59  ;;  %v7271_v27 = vpop.f32.mrf.mxu1 }
 0x9d1   : > { %v7136_v49 = vpop.f32.mrf.mxu3 }
 0x9d2   : > { %v7153_v20 = vadd.f32 %v7136_v49, %v7094_v26 }
 0x9d4   : > { %v7218_v3 = vadd.f32 %v7201_v56, %v7153_v20 }
 0x9d6   : > { %v7281_v63 = vadd.f32 %v7264_v45, %v7218_v3  ;;  %v7407_v42 = vpop.f32.mrf.mxu0 }
 0x9d8   : > { %v7328_v19 = vadd.f32 %v7311_v36, %v7281_v63 }
 0x9d9   : > { %v7138_v6 = vpop.f32.mrf.mxu3 }
 0x9da   : > { %v7154_v29 = vadd.f32 %v7138_v6, %v7095_v62 }
 0x9dc   : > { %v7219_v52 = vadd.f32 %v7203_v51, %v7154_v29 }
 0x9de   : > { %v7282_v54 = vadd.f32 %v7266_v38, %v7219_v52  ;;  %v7410_v48 = vpop.f32.mrf.mxu0 }
 0x9e0   : > { %v7329_v3 = vadd.f32 %v7313_v0, %v7282_v54  ;;  %v7274_v0 = vpop.f32.mrf.mxu1 }
 0x9e1   : > { %v7141_v43 = vpop.f32.mrf.mxu3 }
 0x9e2   : > { %v7155_v31 = vadd.f32 %v7141_v43, %v7096_v15 }
 0x9e4   : > { %v12707_v12 = vadd.f32 %v7206_v44, %v7155_v31 }
 0x9e9   : > { %v12709_v55 = vpop.f32.mrf.mxu3 }
 0x9ea   : > { %v7156_v9 = vadd.f32 %v12709_v55, %v7097_v40 }
 0x9f1   : > { %v7146_v7 = vpop.f32.mrf.mxu3 }
 0x9f2   : > { %v12713_v18 = vadd.f32 %v7146_v7, %v7098_v8 }
 0x9f9   : > { %v7148_v61 = vpop.f32.mrf.mxu3 }
 0x9fa   : > { %v12716_v39 = vadd.f32 %v7148_v61, %v7099_v28  ;;  %v7316_v61 = vpop.f32.mrf.mxu2 }
 0xa01   : > { %v7353_v5 = vpop.f32.mrf.mxu3 }
 0xa02   : > { %v7373_v2 = vadd.f32 %v7353_v5, %v7326_v37 }
 0xa04   : > { %v7420_v57 = vadd.f32 %v7400_v22, %v7373_v2 }
 0xa06   : > { %v7431_v34 = vadd.f32 %v12721_v35, %v7420_v57 }
 0xa08   : > { %v7439_v15 = vmax.f32 %v7431_v34, 0.0 }
 0xa09   : > { %v7355_v17 = vpop.f32.mrf.mxu3 }
 0xa0a   : > { %v7374_v26 = vadd.f32 %v7355_v17, %v7327_v25  ;;  %v7447_v8 = vpack.c.bf16 %v7439_v15, %v7439_v15 }
 0xa0c   : > { %v7421_v14 = vadd.f32 %v7402_v30, %v7374_v26  ;;  %v7455_v21 = vunpack.c.l.bf16 %v7447_v8  ;;  %v7283_v30 = vadd.f32 %v7269_v41, %v12707_v12 }
 0xa0e   : > { %v7432_v23 = vadd.f32 %v12721_v35, %v7421_v14  ;;  %v7330_v14 = vadd.f32 %v7316_v61, %v7283_v30 }
 0xa10   : > { %v7440_v46 = vmax.f32 %v7432_v23, 0.0 }
 0xa11   : > { %v7358_v28 = vpop.f32.mrf.mxu3 }
 0xa12   : > { %v12727_v50 = vpack.c.bf16 %v7440_v46, %v7440_v46  ;;  %v7375_v56 = vadd.f32 %v7358_v28, %v7328_v19  ;;  %v7221_v46 = vadd.f32 %v12703_v4, %v7156_v9  ;;  %v7318_v28 = vpop.f32.mrf.mxu2 }
 0xa14   : > { %v7456_v24 = vunpack.c.l.bf16 %v12727_v50  ;;  %v7422_v44 = vadd.f32 %v7405_v13, %v7375_v56 }
 0xa16   : > { %v7463_v49 = vmax.f32 %v7455_v21, %v7456_v24  ;;  %v7433_v11 = vadd.f32 %v12721_v35, %v7422_v44  ;;  %v13399_v44 = vld [vmem:[#allocation4_spill] sm:$0xff] }
 0xa18   : > { %v7474_v20 = vrot.slane %v7463_v49, 2  ;;  %v7475_v51 = vrot.slane %v7463_v49, 4  ;;  %v7476_v6 = vrot.slane %v7463_v49, 6  ;;  %v7498_v43 = vperm.slane %v7463_v49, 1 }
 0xa19   : > { %v8832_v31 = vrot.slane %v7463_v49, 9  ;;  %v7360_v7 = vpop.f32.mrf.mxu3  ;;  %v7441_v1 = vmax.f32 %v7433_v11, 0.0 }
 0xa1a   : > { %v7499_v22 = vperm.slane %v7474_v20, 1  ;;  %v7500_v58 = vperm.slane %v7475_v51, 1  ;;  %v8833_v10 = vrot.slane %v7474_v20, 9  ;;  %v8834_v32 = vrot.slane %v7475_v51, 9 }
 0xa1b   : > { %v7376_v33 = vadd.f32 %v7360_v7, %v7329_v3  ;;  %v8835_v45 = vrot.slane %v7476_v6, 9  ;;  %v7574_v5 = vmax.f32 %v7463_v49, %v8832_v31  ;;  %v7449_v29 = vpack.c.bf16 %v7441_v1, %v7441_v1 }
 0xa1c   : > { %v7510_v53 = vsel %vm6110_vm9, %v7499_v22, %v7498_v43  ;;  %v7575_v59 = vmax.f32 %v7474_v20, %v8833_v10  ;;  %v7576_v36 = vmax.f32 %v7475_v51, %v8834_v32  ;;  %v7753_v49 = vrot.slane %v13399_v44, 4  ;;  %v7412_v20 = vpop.f32.mrf.mxu0 }
 0xa1d   : > { %v7511_v37 = vsel %vm6112_vm10, %v7500_v58, %v7510_v53  ;;  %v7423_v2 = vadd.f32 %v7407_v42, %v7376_v33  ;;  %v7577_v12 = vmax.f32 %v7476_v6, %v8835_v45  ;;  %v7457_v21 = vunpack.c.l.bf16 %v7449_v29 }
 0xa1e   : > { %v7522_v57 = vsel %vm495_vm0, -inf, %v7511_v37  ;;  %v7222_v51 = vadd.f32 %v12705_v16, %v12713_v18  ;;  %v7284_v43 = vadd.f32 %v7271_v27, %v7221_v46  ;;  %v8848_v7 = vrot.slane %v13399_v44, 9  ;;  %v7321_v27 = vpop.f32.mrf.mxu2 }
 0xa1f   : > { %v7594_v34 = vrot.slane %v7522_v57, 2  ;;  %v7598_v25 = vrot.slane %v7522_v57, 1  ;;  %v7622_v13 = vmax.f32 %v7574_v5, %v7522_v57  ;;  %v7434_v60 = vadd.f32 %v12721_v35, %v7423_v2 }
 0xa20   : > { %v8870_v22 = vrot.slane %v13399_v44, 10  ;;  %v7762_v18 = vrot.slane %v7753_v49, 5  ;;  %v12761_v10 = vrot.slane %v7753_v49, 6  ;;  %v7285_v61 = vadd.f32 %v7274_v0, %v7222_v51 }
 0xa21   : > { %v7599_v17 = vrot.slane %v7594_v34, 1  ;;  %v7623_v62 = vmax.f32 %v7575_v59, %v7598_v25  ;;  %v7624_v26 = vmax.f32 %v7576_v36, %v7594_v34  ;;  %v7363_v38 = vpop.f32.mrf.mxu3  ;;  %v7442_v15 = vmax.f32 %v7434_v60, 0.0  ;;  %v7276_v59 = vpop.f32.mrf.mxu1 }
 0xa22   : > { %v7691_v23 = vperm.slane %v7622_v13, 0  ;;  %v7377_v41 = vadd.f32 %v7363_v38, %v7330_v14  ;;  %v7223_v33 = vadd.f32 %v12711_v47, %v12716_v39  ;;  %v7331_v30 = vadd.f32 %v7318_v28, %v7284_v43 }
 0xa23   : > { %v7625_v63 = vmax.f32 %v7577_v12, %v7599_v17  ;;  %v7692_v52 = vperm.slane %v7623_v62, 0  ;;  %v7693_v8 = vperm.slane %v7624_v26, 0  ;;  %v12742_v19 = vpack.c.bf16 %v7442_v15, %v7442_v15 }
 0xa24   : > { %v7424_v31 = vadd.f32 %v7410_v48, %v7377_v41  ;;  %v12779_v57 = vsel %vm12773_vm7, %v8848_v7, %v7762_v18  ;;  %v7332_v34 = vadd.f32 %v7321_v27, %v7285_v61  ;;  %v7286_v9 = vadd.f32 %v7276_v59, %v7223_v33  ;;  %v7415_v12 = vpop.f32.mrf.mxu0  ;;  %v8953_v18 = vld [vmem:[%s13003_s9 + $0x8] sm:$0xff] }
 0xa25   : > { %v7694_v56 = vperm.slane %v7625_v63, 0  ;;  %v7707_v55 = vsel %vm6775_vm15, %v7692_v52, %v7691_v23  ;;  %v7458_v54 = vunpack.c.l.bf16 %v12742_v19  ;;  %v12811_v33 = vsel %vm12797_vm8, %v8870_v22, %v12761_v10  ;;  %7839 = vmatpush.bf16.msra.mxu2 %v8953_v18 }
 0xa26   : > { %v7708_v42 = vsel %vm6110_vm9, %v7693_v8, %v7707_v55  ;;  %v7435_v37 = vadd.f32 %v12721_v35, %v7424_v31 }
 0xa27   : > { %v12751_v4 = vsel %vm6112_vm10, %v7694_v56, %v7708_v42  ;;  %v7464_v6 = vmax.f32 %v7457_v21, %v7458_v54 }
 0xa28   : > { %v7719_v3 = vrot.slane %v12751_v4, 7  ;;  %v7443_v38 = vmax.f32 %v7435_v37, 0.0 }
 0xa29   : > { %v7365_v11 = vpop.f32.mrf.mxu3  ;;  %v7467_v16 = vmax.f32 %v7464_v6, %v7456_v24 }
 0xa2a   : > { %v7727_v58 = vsel %vm495_vm0, 0.0, %v7719_v3  ;;  %v7378_v2 = vadd.f32 %v7365_v11, %v7331_v30  ;;  %v7451_v3 = vpack.c.bf16 %v7443_v38, %v7443_v38  ;;  %v7323_v11 = vpop.f32.mrf.mxu2 }
 0xa2b   : > { %v12764_v32 = vsel %vm7731_vm3, %v7727_v58, 0.0  ;;  %v7477_v53 = vrot.slane %v7467_v16, 2  ;;  %v7478_v50 = vrot.slane %v7467_v16, 4  ;;  %v7479_v24 = vrot.slane %v7467_v16, 6 }
 0xa2c   : > { %7743 = vst [vmem:[#allocation1 + $0x1] ss:$2 sm:$0xff] %v12764_v32  ;;  %v7754_v40 = vrot.slane %v12764_v32, 4  ;;  %v8836_v48 = vrot.slane %v7467_v16, 9  ;;  %v7501_v5 = vperm.slane %v7467_v16, 1  ;;  %v8849_v17 = vrot.slane %v12764_v32, 9 }
 0xa2d   : > { %v7502_v47 = vperm.slane %v7477_v53, 1  ;;  %v8837_v39 = vrot.slane %v7477_v53, 9  ;;  %v7503_v36 = vperm.slane %v7478_v50, 1  ;;  %v8838_v1 = vrot.slane %v7478_v50, 9 }
 0xa2e   : > { %v7766_v25 = vrot.slane %v7754_v40, 5  ;;  %v8839_v60 = vrot.slane %v7479_v24, 9  ;;  %v7578_v26 = vmax.f32 %v7467_v16, %v8836_v48  ;;  %v7425_v63 = vadd.f32 %v7412_v20, %v7378_v2  ;;  %v7417_v2 = vpop.f32.mrf.mxu0 }
 0xa2f   : > { %v7512_v13 = vsel %vm6110_vm9, %v7502_v47, %v7501_v5  ;;  %v7579_v14 = vmax.f32 %v7477_v53, %v8837_v39  ;;  %v7580_v8 = vmax.f32 %v7478_v50, %v8838_v1  ;;  %v7333_v30 = vadd.f32 %v7323_v11, %v7286_v9 }
 0xa30   : > { %v7513_v62 = vsel %vm6112_vm10, %v7503_v36, %v7512_v13  ;;  %v12789_v56 = vsel %vm12773_vm7, %v8849_v17, %v7766_v25  ;;  %v7581_v55 = vmax.f32 %v7479_v24, %v8839_v60  ;;  %v7436_v41 = vadd.f32 %v12721_v35, %v7425_v63  ;;  %v8952_v25 = vld [vmem:[%s13003_s9] sm:$0xff]  ;;  %v8955_v63 = vld [vmem:[%s13003_s9 + $0x18] sm:$0xff] }
 0xa31   : > { %v7368_v29 = vpop.f32.mrf.mxu3  ;;  %v7523_v15 = vsel %vm495_vm0, -inf, %v7513_v62  ;;  %v7855_v27 = vrot.slane %v7754_v40, 6  ;;  %v7459_v5 = vunpack.c.l.bf16 %v7451_v3  ;;  %v8871_v22 = vrot.slane %v12764_v32, 10  ;;  %7840 = vmatpush.bf16.msra.mxu2 %v8952_v25  ;;  %7810 = vmatpush.bf16.msra.mxu1 %v8955_v63 }
 0xa32   : > { %v7379_v23 = vadd.f32 %v7368_v29, %v7332_v34  ;;  %v7595_v46 = vrot.slane %v7523_v15, 2  ;;  %v7600_v28 = vrot.slane %v7523_v15, 1  ;;  %v7626_v0 = vmax.f32 %v7578_v26, %v7523_v15 }
 0xa33   : > { %v12785_v52 = vld.sshfl [vmem:[#allocation1] sm:$0xff pattern:$0x75316420]  ;;  %v7444_v6 = vmax.f32 %v7436_v41, 0.0  ;;  %v12831_v13 = vsel %vm12797_vm8, %v8871_v22, %v7855_v27 }
 0xa34   : > { %7776 = vst [vmem:[#allocation1] ss:$2 sm:$0xff] %v12779_v57  ;;  %v7426_v42 = vadd.f32 %v7415_v12, %v7379_v23  ;;  %v7601_v21 = vrot.slane %v7595_v46, 1  ;;  %v7627_v49 = vmax.f32 %v7579_v14, %v7600_v28  ;;  %v7628_v20 = vmax.f32 %v7580_v8, %v7595_v46 }
 0xa35   : > { %7778 = vst [vmem:[#allocation1 + $0x1] ss:$2 sm:$0xff] %v12789_v56  ;;  %v7695_v51 = vperm.slane %v7626_v0, 0  ;;  %v12813_v53 = vpack.c.bf16 %v7444_v6, %v7444_v6  ;;  %v8954_v0 = vld [vmem:[%s13003_s9 + $0x10] sm:$0xff] }
 0xa36   : > { %v7437_v43 = vadd.f32 %v12721_v35, %v7426_v42  ;;  %v7629_v7 = vmax.f32 %v7581_v55, %v7601_v21  ;;  %v7696_v58 = vperm.slane %v7627_v49, 0  ;;  %v7697_v16 = vperm.slane %v7628_v20, 0  ;;  %7811 = vmatpush.bf16.msra.mxu1 %v8954_v0 }
 0xa37   : > { %v8183_v61 = vsel %vm6114_vm11, %v7695_v51, %v12751_v4  ;;  %v7460_v47 = vunpack.c.l.bf16 %v12813_v53  ;;  %v8959_v53 = vld [vmem:[%s13003_s9 + $0x38] sm:$0xff] }
 0xa38   : > { %v7698_v50 = vperm.slane %v7629_v7, 0  ;;  %v7710_v24 = vsel %vm6775_vm15, %v7696_v58, %v7695_v51  ;;  %v8184_v37 = vsel %vm6116_vm12, %v7696_v58, %v8183_v61  ;;  %v7445_v38 = vmax.f32 %v7437_v43, 0.0  ;;  %v8957_v58 = vld [vmem:[%s13003_s9 + $0x28] sm:$0xff] }
 0xa39   : > { %v7370_v48 = vpop.f32.mrf.mxu3  ;;  %v7711_v4 = vsel %vm6110_vm9, %v7697_v16, %v7710_v24  ;;  %v8185_v40 = vsel %vm6118_vm13, %v7697_v16, %v8184_v37  ;;  %v7465_v1 = vmax.f32 %v7459_v5, %v7460_v47  ;;  %7898 = vmatpush.bf16.msrb.mxu3 %v8957_v58 }
 0xa3a   : > { %v7380_v39 = vadd.f32 %v7370_v48, %v7333_v30  ;;  %v7712_v10 = vsel %vm6112_vm10, %v7698_v50, %v7711_v4  ;;  %v12835_v60 = vsel %vm6120_vm14, %v7698_v50, %v8185_v40  ;;  %v7453_v28 = vpack.c.bf16 %v7445_v38, %v7445_v38  ;;  %7942 = vmatpush.bf16.msrb.mxu1 %v8959_v53  ;;  %v8962_v53 = vld [vmem:[%s13003_s9 + $0x50] sm:$0xff] }
 0xa3b   : > { %v7720_v36 = vrot.slane %v7712_v10, 7  ;;  %v7468_v12 = vmax.f32 %v7465_v1, %v7458_v54 }
 0xa3c   : > { %v12822_v59 = vld.sshfl [vmem:[#allocation1] sm:$0xff pattern:$0x75316420]  ;;  %v7427_v34 = vadd.f32 %v7417_v2, %v7380_v39  ;;  %v7461_v50 = vunpack.c.l.bf16 %v7453_v28 }
 0xa3d   : > { %7865 = vst [vmem:[#allocation1] ss:$2 sm:$0xff] %v12811_v33  ;;  %v7728_v9 = vsel %vm495_vm0, 0.0, %v7720_v36  ;;  %v7480_v26 = vrot.slane %v7468_v12, 2  ;;  %v7481_v29 = vrot.slane %v7468_v12, 4  ;;  %v7482_v15 = vrot.slane %v7468_v12, 6 }
 0xa3e   : > { %7867 = vst [vmem:[#allocation1 + $0x1] ss:$2 sm:$0xff] %v12831_v13  ;;  %v7438_v17 = vadd.f32 %v12721_v35, %v7427_v34  ;;  %v12843_v62 = vsel %vm7731_vm3, %v7728_v9, 0.0  ;;  %v8840_v14 = vrot.slane %v7468_v12, 9  ;;  %v7504_v23 = vperm.slane %v7468_v12, 1  ;;  %v8956_v2 = vld [vmem:[%s13003_s9 + $0x20] sm:$0xff] }
 0xa3f   : > { %7745 = vst [vmem:[#allocation1 + $0x10] ss:$2 sm:$0xff] %v12843_v62  ;;  %v7505_v19 = vperm.slane %v7480_v26, 1  ;;  %v8841_v54 = vrot.slane %v7480_v26, 9  ;;  %v7506_v8 = vperm.slane %v7481_v29, 1  ;;  %v8842_v35 = vrot.slane %v7481_v29, 9  ;;  %7899 = vmatpush.bf16.msrb.mxu3 %v8956_v2 }
 0xa40   : > { %v8843_v42 = vrot.slane %v7482_v15, 9  ;;  %v7582_v21 = vmax.f32 %v7468_v12, %v8840_v14  ;;  %v7446_v49 = vmax.f32 %v7438_v17, 0.0  ;;  %v7755_v20 = vrot.slane %v12843_v62, 4 }
 0xa41   : > { %v7514_v46 = vsel %vm6110_vm9, %v7505_v19, %v7504_v23  ;;  %v7583_v3 = vmax.f32 %v7480_v26, %v8841_v54  ;;  %v7584_v6 = vmax.f32 %v7481_v29, %v8842_v35  ;;  %v8850_v22 = vrot.slane %v12843_v62, 9 }
 0xa42   : > { %v7515_v41 = vsel %vm6112_vm10, %v7506_v8, %v7514_v46  ;;  %v7454_v16 = vpack.c.bf16 %v7446_v49, %v7446_v49  ;;  %v7585_v18 = vmax.f32 %v7482_v15, %v8843_v42  ;;  %v7770_v27 = vrot.slane %v7755_v20, 5 }
 0xa43   : > { %v7524_v51 = vsel %vm495_vm0, -inf, %v7515_v41  ;;  %v7859_v8 = vrot.slane %v7755_v20, 6  ;;  %v8872_v42 = vrot.slane %v12843_v62, 10 }
 0xa44   : > { %v7596_v43 = vrot.slane %v7524_v51, 2  ;;  %v7602_v11 = vrot.slane %v7524_v51, 1  ;;  %v7630_v7 = vmax.f32 %v7582_v21, %v7524_v51  ;;  %v7462_v24 = vunpack.c.l.bf16 %v7454_v16 }
 0xa45   : > { %v12853_v55 = vld.sshfl [vmem:[#allocation1] sm:$0xff pattern:$0x75316420]  ;;  %v12875_v25 = vsel %vm12773_vm7, %v8850_v22, %v7770_v27 }
 0xa46   : > { %7909 = vst [vmem:[#allocation1] ss:$2 sm:$0xff] %v12764_v32  ;;  %v7603_v61 = vrot.slane %v7596_v43, 1  ;;  %v7631_v32 = vmax.f32 %v7583_v3, %v7602_v11  ;;  %v7632_v30 = vmax.f32 %v7584_v6, %v7596_v43  ;;  %v7699_v37 = vperm.slane %v7630_v7, 0 }
 0xa47   : > { %7911 = vst [vmem:[#allocation1 + $0x1] ss:$2 sm:$0xff] %v12843_v62  ;;  %v7466_v39 = vmax.f32 %v7461_v50, %v7462_v24  ;;  %v12898_v43 = vsel %vm12797_vm8, %v8872_v42, %v7859_v8 }
 0xa48   : > { %v7633_v48 = vmax.f32 %v7585_v18, %v7603_v61  ;;  %v7700_v4 = vperm.slane %v7631_v32, 0  ;;  %v7701_v5 = vperm.slane %v7632_v30, 0  ;;  %v8961_v30 = vld [vmem:[%s13003_s9 + $0x48] sm:$0xff] }
 0xa49   : > { %v7469_v1 = vmax.f32 %v7466_v39, %v7460_v47  ;;  %7990 = vmatpush.bf16.msrb.mxu2 %v8961_v30 }
 0xa4a   : > { %v7702_v10 = vperm.slane %v7633_v48, 0  ;;  %v7713_v40 = vsel %vm6775_vm15, %v7700_v4, %v7699_v37  ;;  %v8960_v4 = vld [vmem:[%s13003_s9 + $0x40] sm:$0xff] }
 0xa4b   : > { %v7714_v36 = vsel %vm6110_vm9, %v7701_v5, %v7713_v40  ;;  %v7483_v17 = vrot.slane %v7469_v1, 2  ;;  %v7484_v26 = vrot.slane %v7469_v1, 4  ;;  %v7485_v38 = vrot.slane %v7469_v1, 6 }
 0xa4c   : > { %v7715_v9 = vsel %vm6112_vm10, %v7702_v10, %v7714_v36  ;;  %v7507_v47 = vperm.slane %v7469_v1, 1  ;;  %v8844_v29 = vrot.slane %v7469_v1, 9 }
 0xa4d   : > { %v7721_v12 = vrot.slane %v7715_v9, 7  ;;  %v7508_v14 = vperm.slane %v7483_v17, 1  ;;  %v7509_v63 = vperm.slane %v7484_v26, 1  ;;  %v8845_v23 = vrot.slane %v7483_v17, 9  ;;  %7991 = vmatpush.bf16.msrb.mxu2 %v8960_v4 }
 0xa4e   : > { %v12871_v34 = vld.sshfl [vmem:[#allocation1] sm:$0xff pattern:$0x75316420]  ;;  %v8846_v54 = vrot.slane %v7484_v26, 9  ;;  %v8847_v28 = vrot.slane %v7485_v38, 9  ;;  %v7586_v41 = vmax.f32 %v7469_v1, %v8844_v29 }
 0xa4f   : > { %7957 = vst [vmem:[#allocation1] ss:$2 sm:$0xff] %v12789_v56  ;;  %v7729_v15 = vsel %vm495_vm0, 0.0, %v7721_v12  ;;  %v8958_v56 = vld [vmem:[%s13003_s9 + $0x30] sm:$0xff]  ;;  %v7516_v46 = vsel %vm6110_vm9, %v7508_v14, %v7507_v47  ;;  %v7587_v49 = vmax.f32 %v7483_v17, %v8845_v23  ;;  %v8963_v17 = vld [vmem:[%s13003_s9 + $0x58] sm:$0xff] }
 0xa50   : > { %7959 = vst [vmem:[#allocation1 + $0x1] ss:$2 sm:$0xff] %v12875_v25  ;;  %v12888_v19 = vsel %vm7731_vm3, %v7729_v15, 0.0  ;;  %v7517_v0 = vsel %vm6112_vm10, %v7509_v63, %v7516_v46  ;;  %7943 = vmatpush.bf16.msrb.mxu1 %v8958_v56  ;;  %v7588_v51 = vmax.f32 %v7484_v26, %v8846_v54  ;;  %v7589_v7 = vmax.f32 %v7485_v38, %v8847_v28  ;;  %v8965_v63 = vld [vmem:[%s13003_s9 + $0x68] sm:$0xff]  ;;  %v8967_v23 = vld [vmem:[%s13003_s9 + $0x78] sm:$0xff]  ;;  %v8964_v54 = vld [vmem:[%s13003_s9 + $0x60] sm:$0xff] }
 0xa51   : > { %7747 = vst [vmem:[#allocation1 + $0x11] ss:$2 sm:$0xff] %v12888_v19  ;;  %v7756_v35 = vrot.slane %v12888_v19, 4  ;;  %v7525_v21 = vsel %vm495_vm0, -inf, %v7517_v0  ;;  %v8851_v27 = vrot.slane %v12888_v19, 9  ;;  %v8873_v26 = vrot.slane %v12888_v19, 10  ;;  %8037 = vmatpush.bf16.msra.mxu3 %v8963_v17 }
 0xa52   : > { %v7597_v3 = vrot.slane %v7525_v21, 2  ;;  %v7604_v6 = vrot.slane %v7525_v21, 1  ;;  %v7634_v20 = vmax.f32 %v7586_v41, %v7525_v21  ;;  %v8969_v28 = vld [vmem:[%s13003_s9 + $0x88] sm:$0xff]  ;;  %v8966_v0 = vld [vmem:[%s13003_s9 + $0x70] sm:$0xff] }
 0xa53   : > { %v7774_v11 = vrot.slane %v7756_v35, 5 }
 0xa54   : > { %v7605_v16 = vrot.slane %v7597_v3, 1  ;;  %v7635_v18 = vmax.f32 %v7587_v49, %v7604_v6  ;;  %v7636_v61 = vmax.f32 %v7588_v51, %v7597_v3  ;;  %v7703_v32 = vperm.slane %v7634_v20, 0  ;;  %v8968_v49 = vld [vmem:[%s13003_s9 + $0x80] sm:$0xff] }
 0xa55   : > { %v7775_v39 = vsel %vm12773_vm7, %v8851_v27, %v7774_v11  ;;  %8038 = vmatpush.bf16.msra.mxu3 %v8962_v53 }
 0xa56   : > { %v7637_v24 = vmax.f32 %v7589_v7, %v7605_v16  ;;  %v7704_v48 = vperm.slane %v7635_v18, 0  ;;  %v7705_v37 = vperm.slane %v7636_v61, 0  ;;  %v8187_v5 = vsel %vm6114_vm11, %v7703_v32, %v7715_v9 }
 0xa57   : > { %v12900_v58 = vld.sshfl [vmem:[#allocation1] sm:$0xff pattern:$0x75316420]  ;;  %v7863_v9 = vrot.slane %v7756_v35, 6 }
 0xa58   : > { %8004 = vst [vmem:[#allocation1] ss:$2 sm:$0xff] %v12831_v13  ;;  %v7749_v50 = vld.sshfl [vmem:[#allocation1 + $0x10] sm:$0xff pattern:$0x75316420]  ;;  %v7706_v2 = vperm.slane %v7637_v24, 0  ;;  %v7716_v22 = vsel %vm6775_vm15, %v7704_v48, %v7703_v32  ;;  %v8188_v10 = vsel %vm6116_vm12, %v7704_v48, %v8187_v5 }
 0xa59   : > { %8006 = vst [vmem:[#allocation1 + $0x1] ss:$2 sm:$0xff] %v12898_v43  ;;  %v7752_v13 = vpack.c.bf16 %v7749_v50, %v12785_v52  ;;  %v8189_v40 = vsel %vm6118_vm13, %v7705_v37, %v8188_v10  ;;  %v7717_v36 = vsel %vm6110_vm9, %v7705_v37, %v7716_v22  ;;  %v7864_v47 = vsel %vm12797_vm8, %v8873_v26, %v7863_v9 }
 0xa5a   : > { %7780 = vst [vmem:[#allocation1 + $0x10] ss:$2 sm:$0xff] %v12875_v25  ;;  %v12922_v1 = vsel %vm6120_vm14, %v7706_v2, %v8189_v40  ;;  %v7718_v52 = vsel %vm6112_vm10, %v7706_v2, %v7717_v36 }
 0xa5b   : > { %7782 = vst [vmem:[#allocation1 + $0x11] ss:$2 sm:$0xff] %v7775_v39  ;;  %8869 = vmatmul.msk.bf16.vlgmr.msra.gmra.mxu2 %vm7800_vm1, %v7752_v13  ;;  %v7722_v29 = vrot.slane %v7718_v52, 7 }
 0xa5c   : > { %8123 = vmatpush.bf16.msra.mxu2 %v8967_v23 }
 0xa60   : > { %v12924_v12 = vld.sshfl [vmem:[#allocation1] sm:$0xff pattern:$0x75316420]  ;;  %8124 = vmatpush.bf16.msra.mxu2 %v8966_v0 }
 0xa61   : > { %8047 = vst [vmem:[#allocation1] ss:$2 sm:$0xff] %v12843_v62  ;;  %v7730_v62 = vsel %vm495_vm0, 0.0, %v7722_v29  ;;  %vm8197_vm0 = vcmask 257024  }
 0xa62   : > { %8049 = vst [vmem:[#allocation1 + $0x1] ss:$2 sm:$0xff] %v12888_v19  ;;  %v7784_v38 = vld.sshfl [vmem:[#allocation1 + $0x10] sm:$0xff pattern:$0x75316420]  ;;  %v7736_v56 = vsel %vm7731_vm3, %v7730_v62, 0.0 }
 0xa63   : > { %7869 = vst [vmem:[#allocation1 + $0x10] ss:$2 sm:$0xff] %v12898_v43  ;;  %v7787_v15 = vpack.c.bf16 %v7784_v38, %v12822_v59  ;;  %v7952_v35 = vrot.slane %v7736_v56, 4  ;;  %v8902_v51 = vrot.slane %v7736_v56, 10  ;;  %v9063_v38 = vld [vmem:[%s13004_s10] ss:$0 sm:$0xff] }
 0xa64   : > { %7871 = vst [vmem:[#allocation1 + $0x11] ss:$2 sm:$0xff] %v7864_v47 }
 0xa65   : > { %8860 = vmatmul.msk.bf16.vlgmr.msra.gmra.mxu1 %vm7800_vm1, %v7787_v15  ;;  %v8002_v21 = vrot.slane %v7952_v35, 6 }
 0xa66   : > { %8080 = vmatpush.bf16.msra.mxu1 %v8965_v63 }
 0xa67   : > { %v8003_v6 = vsel %vm12797_vm8, %v8902_v51, %v8002_v21 }
 0xa69   : > { %v8054_v14 = vld.sshfl [vmem:[#allocation1] sm:$0xff pattern:$0x75316420] }
 0xa6a   : > { %8090 = vst [vmem:[#allocation1] ss:$2 sm:$0xff] %v12875_v25  ;;  %8081 = vmatpush.bf16.msra.mxu1 %v8964_v54  ;;  %v7955_v25 = vrot.slane %v7952_v35, 5 }
 0xa6b   : > { %8092 = vst [vmem:[#allocation1 + $0x1] ss:$2 sm:$0xff] %v7775_v39  ;;  %v7873_v59 = vld.sshfl [vmem:[#allocation1 + $0x10] sm:$0xff pattern:$0x75316420] }
 0xa6c   : > { %7913 = vst [vmem:[#allocation1 + $0x10] ss:$2 sm:$0xff] %v12888_v19  ;;  %v7876_v8 = vpack.c.bf16 %v7873_v59, %v12853_v55  ;;  %v8892_v19 = vrot.slane %v7736_v56, 9 }
 0xa6d   : > { %7915 = vst [vmem:[#allocation1 + $0x11] ss:$2 sm:$0xff] %v7736_v56 }
 0xa6e   : > { %8882 = vmatmul.msk.bf16.vlgmr.msrb.gmra.mxu3 %vm7800_vm1, %v7876_v8  ;;  %v7956_v41 = vsel %vm12773_vm7, %v8892_v19, %v7955_v25 }
 0xa6f   : > { %8166 = vmatpush.bf16.msrb.mxu3 %v8969_v28 }
 0xa72   : > { %v8097_v46 = vld.sshfl [vmem:[#allocation1] sm:$0xff pattern:$0x75316420] }
 0xa73   : > { %8133 = vst [vmem:[#allocation1] ss:$2 sm:$0xff] %v12898_v43  ;;  %8167 = vmatpush.bf16.msrb.mxu3 %v8968_v49 }
 0xa74   : > { %8135 = vst [vmem:[#allocation1 + $0x1] ss:$2 sm:$0xff] %v7864_v47  ;;  %v7917_v55 = vld.sshfl [vmem:[#allocation1 + $0x10] sm:$0xff pattern:$0x75316420] }
 0xa75   : > { %v7920_v42 = vpack.c.bf16 %v7917_v55, %v12871_v34  ;;  %7961 = vst [vmem:[#allocation1 + $0x10] ss:$2 sm:$0xff] %v7775_v39 }
 0xa76   : > { %7963 = vst [vmem:[#allocation1 + $0x11] ss:$2 sm:$0xff] %v7956_v41 }
 0xa77   : > { %8891 = vmatmul.msk.bf16.vlgmr.msrb.gmra.mxu1 %vm7800_vm1, %v7920_v42 }
 0xa7d   : > { %v7965_v3 = vld.sshfl [vmem:[#allocation1 + $0x10] sm:$0xff pattern:$0x75316420] }
 0xa7e   : > { %v7968_v45 = vpack.c.bf16 %v7965_v3, %v12900_v58  ;;  %8008 = vst [vmem:[#allocation1 + $0x10] ss:$2 sm:$0xff] %v7864_v47  ;;  %v8140_v58 = vld.sshfl [vmem:[#allocation1] sm:$0xff pattern:$0x75316420] }
 0xa7f   : > { %8010 = vst [vmem:[#allocation1 + $0x11] ss:$2 sm:$0xff] %v8003_v6 }
 0xa80   : > { %8901 = vmatmul.msk.bf16.vlgmr.msrb.gmra.mxu2 %vm7800_vm1, %v7968_v45 }
 0xa86   : > { %v8012_v34 = vld.sshfl [vmem:[#allocation1 + $0x10] sm:$0xff pattern:$0x75316420] }
 0xa87   : > { %v8015_v20 = vpack.c.bf16 %v8012_v34, %v12924_v12  ;;  %8051 = vst [vmem:[#allocation1 + $0x10] ss:$2 sm:$0xff] %v7736_v56 }
 0xa88   : > { %8053 = vst [vmem:[#allocation1 + $0x11] ss:$2 sm:$0xff] %v13399_v44 }
 0xa89   : > { %8911 = vmatmul.msk.bf16.vlgmr.msra.gmra.mxu3 %vm7800_vm1, %v8015_v20 }
 0xa8f   : > { %v8055_v43 = vld.sshfl [vmem:[#allocation1 + $0x10] sm:$0xff pattern:$0x75316420] }
 0xa90   : > { %v8058_v11 = vpack.c.bf16 %v8055_v43, %v8054_v14  ;;  %8094 = vst [vmem:[#allocation1 + $0x10] ss:$2 sm:$0xff] %v7956_v41 }
 0xa91   : > { %8096 = vst [vmem:[#allocation1 + $0x11] ss:$2 sm:$0xff] %v12779_v57 }
 0xa92   : > { %8920 = vmatmul.msk.bf16.vlgmr.msra.gmra.mxu1 %vm7800_vm1, %v8058_v11 }
 0xa98   : > { %v8098_v31 = vld.sshfl [vmem:[#allocation1 + $0x10] sm:$0xff pattern:$0x75316420] }
 0xa99   : > { %v8101_v7 = vpack.c.bf16 %v8098_v31, %v8097_v46  ;;  %8137 = vst [vmem:[#allocation1 + $0x10] ss:$2 sm:$0xff] %v8003_v6 }
 0xa9a   : > { %8139 = vst [vmem:[#allocation1 + $0x11] ss:$2 sm:$0xff] %v12811_v33 }
 0xa9b   : > { %8929 = vmatmul.msk.bf16.vlgmr.msra.gmra.mxu2 %vm7800_vm1, %v8101_v7 }
 0xaa1   : > { %v8141_v16 = vld.sshfl [vmem:[#allocation1 + $0x10] sm:$0xff pattern:$0x75316420] }
 0xaa2   : > { %v8144_v18 = vpack.c.bf16 %v8141_v16, %v8140_v58 }
 0xaa4   : > { %8938 = vmatmul.msk.bf16.vlgmr.msrb.gmra.mxu3 %vm7800_vm1, %v8144_v18 }
 0xade   : > { %v7842_v61 = vpop.f32.mrf.mxu2 }
 0xae2   : > { %v7813_v44 = vpop.f32.mrf.mxu1 }
 0xae3   : > { %v7843_v37 = vadd.f32 %v7842_v61, %v7813_v44 }
 0xae6   : > { %v7844_v27 = vpop.f32.mrf.mxu2 }
 0xaea   : > { %v7815_v32 = vpop.f32.mrf.mxu1 }
 0xaeb   : > { %v7845_v13 = vadd.f32 %v7844_v27, %v7815_v32 }
 0xaf1   : > { %v7901_v30 = vpop.f32.mrf.mxu3 }
 0xaf2   : > { %v7906_v5 = vadd.f32 %v7901_v30, %v7843_v37 }
 0xaf4   : > { %v7945_v57 = vpop.f32.mrf.mxu1 }
 0xaf5   : > { %v7950_v39 = vadd.f32 %v7945_v57, %v7906_v5 }
 0xaf9   : > { %v7903_v50 = vpop.f32.mrf.mxu3 }
 0xafa   : > { %v7907_v40 = vadd.f32 %v7903_v50, %v7845_v13 }
 0xafc   : > { %v7947_v4 = vpop.f32.mrf.mxu1 }
 0xafd   : > { %v7951_v12 = vadd.f32 %v7947_v4, %v7907_v40 }
 0xb03   : > { %v7993_v24 = vpop.f32.mrf.mxu2 }
 0xb04   : > { %v7998_v2 = vadd.f32 %v7993_v24, %v7950_v39 }
 0xb0b   : > { %v7995_v33 = vpop.f32.mrf.mxu2 }
 0xb0c   : > { %v8040_v48 = vpop.f32.mrf.mxu3  ;;  %v7999_v17 = vadd.f32 %v7995_v33, %v7951_v12 }
 0xb0d   : > { %v8045_v36 = vadd.f32 %v8040_v48, %v7998_v2 }
 0xb0f   : > { %v8083_v22 = vpop.f32.mrf.mxu1 }
 0xb10   : > { %v8088_v52 = vadd.f32 %v8083_v22, %v8045_v36 }
 0xb14   : > { %v8042_v10 = vpop.f32.mrf.mxu3 }
 0xb15   : > { %v8046_v47 = vadd.f32 %v8042_v10, %v7999_v17 }
 0xb17   : > { %v8085_v15 = vpop.f32.mrf.mxu1 }
 0xb18   : > { %v8089_v63 = vadd.f32 %v8085_v15, %v8046_v47 }
 0xb1e   : > { %v8126_v9 = vpop.f32.mrf.mxu2 }
 0xb1f   : > { %v8131_v26 = vadd.f32 %v8126_v9, %v8088_v52 }
 0xb26   : > { %v8128_v14 = vpop.f32.mrf.mxu2 }
 0xb27   : > { %v8169_v53 = vpop.f32.mrf.mxu3  ;;  %v8132_v56 = vadd.f32 %v8128_v14, %v8089_v63 }
 0xb28   : > { %v8174_v29 = vadd.f32 %v8169_v53, %v8131_v26 }
 0xb2a   : > { %v8179_v62 = vadd.f32 %v9063_v38, %v8174_v29 }
 0xb2c   : > { %v8181_v23 = vmax.f32 %v8179_v62, 0.0 }
 0xb2e   : > { %v8193_v59 = vadd.f32 %v12835_v60, %v8181_v23 }
 0xb2f   : > { %v8171_v54 = vpop.f32.mrf.mxu3 }
 0xb30   : > { %v8195_v8 = vpack.c.bf16 %v8193_v59, %v8193_v59  ;;  %v8175_v35 = vadd.f32 %v8171_v54, %v8132_v56 }
 0xb32   : > { %8198 = vst.msk [vmem:[%s386_s12] sm:$0xf] %vm8197_vm0, %v8195_v8  ;;  %v8180_v25 = vadd.f32 %v9063_v38, %v8175_v35 }
 0xb34   : > { %v8182_v46 = vmax.f32 %v8180_v25, 0.0 }
 0xb36   : > { %v8194_v28 = vadd.f32 %v12922_v1, %v8182_v46 }
 0xb38   : > { %v8196_v0 = vpack.c.bf16 %v8194_v28, %v8194_v28 }
 0xb3a   : > { %8199 = vst.msk [vmem:[%s386_s12 + $0x4] sm:$0xf] %vm8197_vm0, %v8196_v0 }
 0xb3b PF: > { %s21_s17 = sadd.s32 1, %s9073_s17  }
 0xb3c   : > { %p18_p4 = scmp.ge.s32.totalorder %s21_s17, 4  }
 0xb3e   :  { %20 = sbr.rel (!%p18_p4) target bundleno = 1 (0x1), region = 121 }

</bundles_post_ra>
